<compile_context>
chip_gen: v5e
topology: v5e:2x2
jax: 0.10.0
libtpu: 0.0.40
codegen_flags: <defaults>
</compile_context>

<pallas_src>
import jax
import jax.numpy as jnp
from jax.experimental import pallas as pl
from jax.experimental.pallas import tpu as pltpu


def _round_up(x, m):
    return (x + m - 1) // m * m


# ----------------------------------------------------------------------------
# Fused kernel: (both LSTM layers + attention pooling + final FC) in one call.
# ----------------------------------------------------------------------------
def _make_fused_kernel(num_layers, T, Bp, Hp):
    def kernel(*refs):
        emb_ref = refs[0]
        pos = 1
        layer_refs = []
        for _ in range(num_layers):
            layer_refs.append(refs[pos:pos + 3])   # (wih, whh, fused bias)
            pos += 3
        wa_ref, ba_ref, wfc_ref, bfc_ref = refs[pos:pos + 4]
        pos += 4
        logits_ref = refs[pos]
        act_scr, gates_scr, h_scr, c_scr = refs[pos + 1:pos + 5]

        for layer_idx, (wih_ref, whh_ref, b_ref) in enumerate(layer_refs):
            wih = wih_ref[...]          # (Hp, 4*Hp)  pre-transposed
            whh = whh_ref[...]          # (Hp, 4*Hp)  pre-transposed
            b = b_ref[...]              # (1, 4*Hp)   bih + bhh fused

            # Layer input: embeddings for layer 0, previous layer's hidden states after.
            xin = emb_ref[...] if layer_idx == 0 else act_scr[...]     # (T, Bp, Hp)

            # Hoisted input-to-hidden GEMM for all T timesteps at once (MXU-friendly).
            xg = jnp.dot(xin.reshape(T * Bp, Hp), wih,
                         preferred_element_type=jnp.float32) + b       # (T*Bp, 4*Hp)
            gates_scr[...] = xg.reshape(T, Bp, 4 * Hp)

            h_scr[...] = jnp.zeros_like(h_scr)
            c_scr[...] = jnp.zeros_like(c_scr)

            def step(t, carry):
                h = h_scr[...]                                          # (Bp, Hp)
                c = c_scr[...]                                          # (Bp, Hp)
                g = gates_scr[t] + jnp.dot(h, whh,
                                           preferred_element_type=jnp.float32)
                # PyTorch gate order i, f, g, o; each gate is a full lane-aligned block.
                i_g = jax.nn.sigmoid(g[:, 0 * Hp:1 * Hp])
                f_g = jax.nn.sigmoid(g[:, 1 * Hp:2 * Hp])
                g_g = jnp.tanh(g[:, 2 * Hp:3 * Hp])
                o_g = jax.nn.sigmoid(g[:, 3 * Hp:4 * Hp])
                c_new = f_g * c + i_g * g_g
                h_new = o_g * jnp.tanh(c_new)
                c_scr[...] = c_new
                h_scr[...] = h_new
                act_scr[t] = h_new
                return carry

            jax.lax.fori_loop(0, T, step, 0, unroll=True)
            # TODO(synk): nn.LSTM inter-layer dropout is train-only; identity at inference.

        # Attention pooling over time + final projection (all operands still in VMEM).
        out = act_scr[...]                                              # (T, Bp, Hp)
        wa = wa_ref[...]                                                # (1, Hp)
        scores = (jnp.sum(out * wa[None, :, :], axis=-1, keepdims=True)
                  + ba_ref[...])                                        # (T, Bp, 1)
        m = jnp.max(scores, axis=0, keepdims=True)
        e = jnp.exp(scores - m)
        attn = e * pl.reciprocal(jnp.sum(e, axis=0, keepdims=True), approx=True)
        attended = jnp.sum(attn * out, axis=0)                          # (Bp, Hp)
        logits_ref[...] = (jnp.dot(attended, wfc_ref[...],
                                   preferred_element_type=jnp.float32)
                           + bfc_ref[...])                              # (Bp, Vp)

    return kernel


# ----------------------------------------------------------------------------
# Parameter packing: pre-transpose, fuse biases, zero-pad to (8, 128) tiles.
# ----------------------------------------------------------------------------
def pack_params(params, hidden_size, vocab_size):
    H, V = hidden_size, vocab_size
    Hp = _round_up(H, 128)
    Vp = _round_up(V, 128)

    def pad(a, shape):
        return jnp.pad(a, [(0, s - d) for d, s in zip(a.shape, shape)])

    packed = {
        "emb": pad(params["embedding"], (V, Hp)),                   # (V, Hp)
        "wa": pad(params["attn_w"], (1, Hp)),                       # (1, Hp)
        "ba": params["attn_b"].reshape(1, 1),                       # (1, 1)
        "wfc": pad(params["fc_w"].T, (Hp, Vp)),                     # (Hp, Vp)
        "bfc": pad(params["fc_b"].reshape(1, V), (1, Vp)),          # (1, Vp)
        "layers": [],
    }
    for lyr in params["lstm"]:
        Hin = lyr["wih"].shape[1]
        # (4H, Hin) -> (Hin, 4, H) -> zero-pad each gate block to Hp -> (Hp, 4*Hp)
        wih = pad(lyr["wih"].T.reshape(Hin, 4, H), (Hp, 4, Hp)).reshape(Hp, 4 * Hp)
        whh = pad(lyr["whh"].T.reshape(H, 4, H), (Hp, 4, Hp)).reshape(Hp, 4 * Hp)
        b = pad((lyr["bih"] + lyr["bhh"]).reshape(4, H), (4, Hp)).reshape(1, 4 * Hp)
        packed["layers"].append({"wih": wih, "whh": whh, "b": b})
    return packed, Hp, Vp


# ----------------------------------------------------------------------------
# Forward pass: embedding gather (plain JAX glue) + one fused Pallas kernel.
# ----------------------------------------------------------------------------
def poetry_model_forward(x_ids, packed, *, vocab_size):
    B, T = x_ids.shape
    Hp = packed["emb"].shape[1]
    Vp = packed["wfc"].shape[1]
    Bp = _round_up(max(B, 1), 8)
    V = vocab_size
    num_layers = len(packed["layers"])

    # Embedding lookup is a pure gather -> plain JAX glue (no clean Pallas equivalent).
    emb = jnp.take(packed["emb"], x_ids, axis=0)            # (B, T, Hp)
    emb = jnp.transpose(emb, (1, 0, 2))                     # (T, B, Hp) time-major
    emb = jnp.pad(emb, ((0, 0), (0, Bp - B), (0, 0)))       # pad batch to sublane multiple

    kernel = _make_fused_kernel(num_layers, T, Bp, Hp)

    in_arrays = [emb]
    in_specs = [pl.BlockSpec((T, Bp, Hp), lambda i: (0, 0, 0))]
    for lyr in packed["layers"]:
        in_arrays += [lyr["wih"], lyr["whh"], lyr["b"]]
        in_specs += [
            pl.BlockSpec((Hp, 4 * Hp), lambda i: (0, 0)),
            pl.BlockSpec((Hp, 4 * Hp), lambda i: (0, 0)),
            pl.BlockSpec((1, 4 * Hp), lambda i: (0, 0)),
        ]
    in_arrays += [packed["wa"], packed["ba"], packed["wfc"], packed["bfc"]]
    in_specs += [
        pl.BlockSpec((1, Hp), lambda i: (0, 0)),
        pl.BlockSpec((1, 1), lambda i: (0, 0)),
        pl.BlockSpec((Hp, Vp), lambda i: (0, 0)),
        pl.BlockSpec((1, Vp), lambda i: (0, 0)),
    ]

    logits_p = pl.pallas_call(
        kernel,
        out_shape=jax.ShapeDtypeStruct((Bp, Vp), jnp.float32),
        grid=(1,),
        in_specs=in_specs,
        out_specs=pl.BlockSpec((Bp, Vp), lambda i: (0, 0)),
        scratch_shapes=[
            pltpu.VMEM((T, Bp, Hp), jnp.float32),        # per-layer hidden activations
            pltpu.VMEM((T, Bp, 4 * Hp), jnp.float32),    # hoisted input-gate preactivations
            pltpu.VMEM((Bp, Hp), jnp.float32),           # h state
            pltpu.VMEM((Bp, Hp), jnp.float32),           # c state
        ],
        compiler_params=pltpu.CompilerParams(
            dimension_semantics=("arbitrary",)),
    )(*in_arrays)

    return logits_p[:B, :V]


# ----------------------------------------------------------------------------
# Parameter init (natural PyTorch-like shapes).
# ----------------------------------------------------------------------------
def init_params(key, input_size, hidden_size, num_layers):
    H, V = hidden_size, input_size
    scale = 1.0 / jnp.sqrt(jnp.float32(H))
    keys = jax.random.split(key, 4 + 4 * num_layers)
    params = {
        "embedding": jax.random.normal(keys[0], (V, H), jnp.float32) * 0.02,
        "attn_w": jax.random.normal(keys[1], (1, H), jnp.float32) * scale,
        "attn_b": jnp.zeros((1,), jnp.float32),
        "fc_w": jax.random.normal(keys[2], (V, H), jnp.float32) * scale,
        "fc_b": jnp.zeros((V,), jnp.float32),
        "lstm": [],
    }
    for l in range(num_layers):
        k = keys[4 + 4 * l: 4 + 4 * (l + 1)]
        params["lstm"].append({
            "wih": jax.random.normal(k[0], (4 * H, H), jnp.float32) * scale,
            "whh": jax.random.normal(k[1], (4 * H, H), jnp.float32) * scale,
            "bih": jax.random.normal(k[2], (4 * H,), jnp.float32) * scale,
            "bhh": jax.random.normal(k[3], (4 * H,), jnp.float32) * scale,
        })
    return params


if __name__ == "__main__":
    V = 64          # input_size (vocab)
    H = 32          # hidden_size
    NUM_LAYERS = 2
    B, T = 2, 8     # batch, sequence length

    key = jax.random.PRNGKey(0)
    pkey, xkey = jax.random.split(key)
    params = init_params(pkey, V, H, NUM_LAYERS)
    packed, Hp, Vp = pack_params(params, H, V)
    x_ids = jax.random.randint(xkey, (B, T), 0, V, dtype=jnp.int32)

    logits = poetry_model_forward(x_ids, packed, vocab_size=V)   # (B, V)
    jax.block_until_ready(logits)
    assert logits.shape == (B, V)
    assert bool(jnp.all(jnp.isfinite(logits)))
    print("KERNEL_OK")
</pallas_src>

<mosaic_0001>
module attributes {stable_mosaic.version = 11 : i64} {
  func.func @kernel(%arg0: i32, %arg1: memref<8x8x128xf32, #tpu.memory_space<vmem>>, %arg2: memref<128x512xf32, #tpu.memory_space<vmem>>, %arg3: memref<128x512xf32, #tpu.memory_space<vmem>>, %arg4: memref<1x512xf32, #tpu.memory_space<vmem>>, %arg5: memref<128x512xf32, #tpu.memory_space<vmem>>, %arg6: memref<128x512xf32, #tpu.memory_space<vmem>>, %arg7: memref<1x512xf32, #tpu.memory_space<vmem>>, %arg8: memref<1x128xf32, #tpu.memory_space<vmem>>, %arg9: memref<1x1xf32, #tpu.memory_space<vmem>>, %arg10: memref<128x128xf32, #tpu.memory_space<vmem>>, %arg11: memref<1x128xf32, #tpu.memory_space<vmem>>, %arg12: memref<8x128xf32, #tpu.memory_space<vmem>>, %arg13: memref<8x8x128xf32, #tpu.memory_space<vmem>>, %arg14: memref<8x8x512xf32, #tpu.memory_space<vmem>>, %arg15: memref<8x128xf32, #tpu.memory_space<vmem>>, %arg16: memref<8x128xf32, #tpu.memory_space<vmem>>) attributes {dimension_semantics = [#tpu.dimension_semantics<arbitrary>], iteration_bounds = array<i64: 1>, scalar_prefetch = 0 : i64, scratch_operands = 4 : i64, tpu.core_type = #tpu.core_type<tc>, window_params = [{pipeline_mode = #tpu.pipeline_mode<synchronous>, transform_indices = @transform_0, window_bounds = array<i64: 8, 8, 128>}, {pipeline_mode = #tpu.pipeline_mode<synchronous>, transform_indices = @transform_1, window_bounds = array<i64: 128, 512>}, {pipeline_mode = #tpu.pipeline_mode<synchronous>, transform_indices = @transform_2, window_bounds = array<i64: 128, 512>}, {pipeline_mode = #tpu.pipeline_mode<synchronous>, transform_indices = @transform_3, window_bounds = array<i64: 1, 512>}, {pipeline_mode = #tpu.pipeline_mode<synchronous>, transform_indices = @transform_4, window_bounds = array<i64: 128, 512>}, {pipeline_mode = #tpu.pipeline_mode<synchronous>, transform_indices = @transform_5, window_bounds = array<i64: 128, 512>}, {pipeline_mode = #tpu.pipeline_mode<synchronous>, transform_indices = @transform_6, window_bounds = array<i64: 1, 512>}, {pipeline_mode = #tpu.pipeline_mode<synchronous>, transform_indices = @transform_7, window_bounds = array<i64: 1, 128>}, {pipeline_mode = #tpu.pipeline_mode<synchronous>, transform_indices = @transform_8, window_bounds = array<i64: 1, 1>}, {pipeline_mode = #tpu.pipeline_mode<synchronous>, transform_indices = @transform_9, window_bounds = array<i64: 128, 128>}, {pipeline_mode = #tpu.pipeline_mode<synchronous>, transform_indices = @transform_10, window_bounds = array<i64: 1, 128>}, {pipeline_mode = #tpu.pipeline_mode<synchronous>, transform_indices = @transform_11, window_bounds = array<i64: 8, 128>}]} {
    %c0 = arith.constant 0 : index
    %c0_0 = arith.constant 0 : index
    %0 = vector.load %arg2[%c0, %c0_0] : memref<128x512xf32, #tpu.memory_space<vmem>>, vector<128x512xf32>
    %c0_1 = arith.constant 0 : index
    %c0_2 = arith.constant 0 : index
    %1 = vector.load %arg3[%c0_1, %c0_2] : memref<128x512xf32, #tpu.memory_space<vmem>>, vector<128x512xf32>
    %c0_3 = arith.constant 0 : index
    %c0_4 = arith.constant 0 : index
    %2 = vector.load %arg4[%c0_3, %c0_4] : memref<1x512xf32, #tpu.memory_space<vmem>>, vector<1x512xf32>
    %c0_5 = arith.constant 0 : index
    %c0_6 = arith.constant 0 : index
    %c0_7 = arith.constant 0 : index
    %3 = vector.load %arg1[%c0_5, %c0_6, %c0_7] : memref<8x8x128xf32, #tpu.memory_space<vmem>>, vector<8x8x128xf32>
    %4 = vector.shape_cast %3 : vector<8x8x128xf32> to vector<64x128xf32>
    %cst = arith.constant dense<0.000000e+00> : vector<64x512xf32>
    %5 = tpu.matmul %4, %0, %cst {dimension_numbers = #tpu.dot_dimension_numbers<[1], [0], [0], [1], [0, 0, 1, 1], [], []>} : vector<64x128xf32>, vector<128x512xf32>, vector<64x512xf32> -> vector<64x512xf32>
    %6 = vector.broadcast %2 : vector<1x512xf32> to vector<64x512xf32>
    %7 = arith.addf %5, %6 : vector<64x512xf32>
    %8 = vector.shape_cast %7 : vector<64x512xf32> to vector<8x8x512xf32>
    %c0_8 = arith.constant 0 : index
    %c0_9 = arith.constant 0 : index
    %c0_10 = arith.constant 0 : index
    %9 = vector.load %arg14[%c0_8, %c0_9, %c0_10] : memref<8x8x512xf32, #tpu.memory_space<vmem>>, vector<8x8x512xf32>
    tpu.vector_store %arg14[%c0_8, %c0_9, %c0_10], %8 {strides = array<i32>} : memref<8x8x512xf32, #tpu.memory_space<vmem>>, vector<8x8x512xf32>,
    %cst_11 = arith.constant 0.000000e+00 : f32
    %10 = vector.broadcast %cst_11 : f32 to vector<8x128xf32>
    %c0_12 = arith.constant 0 : index
    %c0_13 = arith.constant 0 : index
    %11 = vector.load %arg15[%c0_12, %c0_13] : memref<8x128xf32, #tpu.memory_space<vmem>>, vector<8x128xf32>
    tpu.vector_store %arg15[%c0_12, %c0_13], %10 {strides = array<i32>} : memref<8x128xf32, #tpu.memory_space<vmem>>, vector<8x128xf32>,
    %cst_14 = arith.constant 0.000000e+00 : f32
    %12 = vector.broadcast %cst_14 : f32 to vector<8x128xf32>
    %c0_15 = arith.constant 0 : index
    %c0_16 = arith.constant 0 : index
    %13 = vector.load %arg16[%c0_15, %c0_16] : memref<8x128xf32, #tpu.memory_space<vmem>>, vector<8x128xf32>
    tpu.vector_store %arg16[%c0_15, %c0_16], %12 {strides = array<i32>} : memref<8x128xf32, #tpu.memory_space<vmem>>, vector<8x128xf32>,
    %c0_i32 = arith.constant 0 : i32
    %c0_17 = arith.constant 0 : index
    %c0_18 = arith.constant 0 : index
    %14 = vector.load %arg15[%c0_17, %c0_18] : memref<8x128xf32, #tpu.memory_space<vmem>>, vector<8x128xf32>
    %c0_19 = arith.constant 0 : index
    %c0_20 = arith.constant 0 : index
    %15 = vector.load %arg16[%c0_19, %c0_20] : memref<8x128xf32, #tpu.memory_space<vmem>>, vector<8x128xf32>
    %16 = arith.index_cast %c0_i32 : i32 to index
    %c0_21 = arith.constant 0 : index
    %c0_22 = arith.constant 0 : index
    %17 = vector.load %arg14[%16, %c0_21, %c0_22] : memref<8x8x512xf32, #tpu.memory_space<vmem>>, vector<1x8x512xf32>
    %18 = vector.shape_cast %17 : vector<1x8x512xf32> to vector<8x512xf32>
    %cst_23 = arith.constant dense<0.000000e+00> : vector<8x512xf32>
    %19 = tpu.matmul %14, %1, %cst_23 {dimension_numbers = #tpu.dot_dimension_numbers<[1], [0], [0], [1], [0, 0, 1, 1], [], []>} : vector<8x128xf32>, vector<128x512xf32>, vector<8x512xf32> -> vector<8x512xf32>
    %20 = arith.addf %18, %19 : vector<8x512xf32>
    %21 = vector.extract_strided_slice %20 {offsets = [0, 0], sizes = [8, 128], strides = [1, 1]} : vector<8x512xf32> to vector<8x128xf32>
    %22 = arith.negf %21 : vector<8x128xf32>
    %23 = math.exp %22 : vector<8x128xf32>
    %cst_24 = arith.constant 1.000000e+00 : f32
    %24 = vector.broadcast %cst_24 : f32 to vector<8x128xf32>
    %25 = arith.addf %24, %23 : vector<8x128xf32>
    %26 = arith.divf %24, %25 : vector<8x128xf32>
    %27 = vector.extract_strided_slice %20 {offsets = [0, 128], sizes = [8, 128], strides = [1, 1]} : vector<8x512xf32> to vector<8x128xf32>
    %28 = arith.negf %27 : vector<8x128xf32>
    %29 = math.exp %28 : vector<8x128xf32>
    %cst_25 = arith.constant 1.000000e+00 : f32
    %30 = vector.broadcast %cst_25 : f32 to vector<8x128xf32>
    %31 = arith.addf %30, %29 : vector<8x128xf32>
    %32 = arith.divf %30, %31 : vector<8x128xf32>
    %33 = vector.extract_strided_slice %20 {offsets = [0, 256], sizes = [8, 128], strides = [1, 1]} : vector<8x512xf32> to vector<8x128xf32>
    %34 = math.tanh %33 : vector<8x128xf32>
    %35 = vector.extract_strided_slice %20 {offsets = [0, 384], sizes = [8, 128], strides = [1, 1]} : vector<8x512xf32> to vector<8x128xf32>
    %36 = arith.negf %35 : vector<8x128xf32>
    %37 = math.exp %36 : vector<8x128xf32>
    %cst_26 = arith.constant 1.000000e+00 : f32
    %38 = vector.broadcast %cst_26 : f32 to vector<8x128xf32>
    %39 = arith.addf %38, %37 : vector<8x128xf32>
    %40 = arith.divf %38, %39 : vector<8x128xf32>
    %41 = arith.mulf %32, %15 : vector<8x128xf32>
    %42 = arith.mulf %26, %34 : vector<8x128xf32>
    %43 = arith.addf %41, %42 : vector<8x128xf32>
    %44 = math.tanh %43 : vector<8x128xf32>
    %45 = arith.mulf %40, %44 : vector<8x128xf32>
    %c0_27 = arith.constant 0 : index
    %c0_28 = arith.constant 0 : index
    %46 = vector.load %arg16[%c0_27, %c0_28] : memref<8x128xf32, #tpu.memory_space<vmem>>, vector<8x128xf32>
    tpu.vector_store %arg16[%c0_27, %c0_28], %43 {strides = array<i32>} : memref<8x128xf32, #tpu.memory_space<vmem>>, vector<8x128xf32>,
    %c0_29 = arith.constant 0 : index
    %c0_30 = arith.constant 0 : index
    %47 = vector.load %arg15[%c0_29, %c0_30] : memref<8x128xf32, #tpu.memory_space<vmem>>, vector<8x128xf32>
    tpu.vector_store %arg15[%c0_29, %c0_30], %45 {strides = array<i32>} : memref<8x128xf32, #tpu.memory_space<vmem>>, vector<8x128xf32>,
    %48 = arith.index_cast %c0_i32 : i32 to index
    %c0_31 = arith.constant 0 : index
    %c0_32 = arith.constant 0 : index
    %49 = vector.load %arg13[%48, %c0_31, %c0_32] : memref<8x8x128xf32, #tpu.memory_space<vmem>>, vector<1x8x128xf32>
    %50 = vector.shape_cast %49 : vector<1x8x128xf32> to vector<8x128xf32>
    %51 = vector.shape_cast %45 : vector<8x128xf32> to vector<1x8x128xf32>
    tpu.vector_store %arg13[%48, %c0_31, %c0_32], %51 {strides = array<i32>} : memref<8x8x128xf32, #tpu.memory_space<vmem>>, vector<1x8x128xf32>,
    %c1_i32 = arith.constant 1 : i32
    %c0_33 = arith.constant 0 : index
    %c0_34 = arith.constant 0 : index
    %52 = vector.load %arg15[%c0_33, %c0_34] : memref<8x128xf32, #tpu.memory_space<vmem>>, vector<8x128xf32>
    %c0_35 = arith.constant 0 : index
    %c0_36 = arith.constant 0 : index
    %53 = vector.load %arg16[%c0_35, %c0_36] : memref<8x128xf32, #tpu.memory_space<vmem>>, vector<8x128xf32>
    %54 = arith.index_cast %c1_i32 : i32 to index
    %c0_37 = arith.constant 0 : index
    %c0_38 = arith.constant 0 : index
    %55 = vector.load %arg14[%54, %c0_37, %c0_38] : memref<8x8x512xf32, #tpu.memory_space<vmem>>, vector<1x8x512xf32>
    %56 = vector.shape_cast %55 : vector<1x8x512xf32> to vector<8x512xf32>
    %cst_39 = arith.constant dense<0.000000e+00> : vector<8x512xf32>
    %57 = tpu.matmul %52, %1, %cst_39 {dimension_numbers = #tpu.dot_dimension_numbers<[1], [0], [0], [1], [0, 0, 1, 1], [], []>} : vector<8x128xf32>, vector<128x512xf32>, vector<8x512xf32> -> vector<8x512xf32>
    %58 = arith.addf %56, %57 : vector<8x512xf32>
    %59 = vector.extract_strided_slice %58 {offsets = [0, 0], sizes = [8, 128], strides = [1, 1]} : vector<8x512xf32> to vector<8x128xf32>
    %60 = arith.negf %59 : vector<8x128xf32>
    %61 = math.exp %60 : vector<8x128xf32>
    %cst_40 = arith.constant 1.000000e+00 : f32
    %62 = vector.broadcast %cst_40 : f32 to vector<8x128xf32>
    %63 = arith.addf %62, %61 : vector<8x128xf32>
    %64 = arith.divf %62, %63 : vector<8x128xf32>
    %65 = vector.extract_strided_slice %58 {offsets = [0, 128], sizes = [8, 128], strides = [1, 1]} : vector<8x512xf32> to vector<8x128xf32>
    %66 = arith.negf %65 : vector<8x128xf32>
    %67 = math.exp %66 : vector<8x128xf32>
    %cst_41 = arith.constant 1.000000e+00 : f32
    %68 = vector.broadcast %cst_41 : f32 to vector<8x128xf32>
    %69 = arith.addf %68, %67 : vector<8x128xf32>
    %70 = arith.divf %68, %69 : vector<8x128xf32>
    %71 = vector.extract_strided_slice %58 {offsets = [0, 256], sizes = [8, 128], strides = [1, 1]} : vector<8x512xf32> to vector<8x128xf32>
    %72 = math.tanh %71 : vector<8x128xf32>
    %73 = vector.extract_strided_slice %58 {offsets = [0, 384], sizes = [8, 128], strides = [1, 1]} : vector<8x512xf32> to vector<8x128xf32>
    %74 = arith.negf %73 : vector<8x128xf32>
    %75 = math.exp %74 : vector<8x128xf32>
    %cst_42 = arith.constant 1.000000e+00 : f32
    %76 = vector.broadcast %cst_42 : f32 to vector<8x128xf32>
    %77 = arith.addf %76, %75 : vector<8x128xf32>
    %78 = arith.divf %76, %77 : vector<8x128xf32>
    %79 = arith.mulf %70, %53 : vector<8x128xf32>
    %80 = arith.mulf %64, %72 : vector<8x128xf32>
    %81 = arith.addf %79, %80 : vector<8x128xf32>
    %82 = math.tanh %81 : vector<8x128xf32>
    %83 = arith.mulf %78, %82 : vector<8x128xf32>
    %c0_43 = arith.constant 0 : index
    %c0_44 = arith.constant 0 : index
    %84 = vector.load %arg16[%c0_43, %c0_44] : memref<8x128xf32, #tpu.memory_space<vmem>>, vector<8x128xf32>
    tpu.vector_store %arg16[%c0_43, %c0_44], %81 {strides = array<i32>} : memref<8x128xf32, #tpu.memory_space<vmem>>, vector<8x128xf32>,
    %c0_45 = arith.constant 0 : index
    %c0_46 = arith.constant 0 : index
    %85 = vector.load %arg15[%c0_45, %c0_46] : memref<8x128xf32, #tpu.memory_space<vmem>>, vector<8x128xf32>
    tpu.vector_store %arg15[%c0_45, %c0_46], %83 {strides = array<i32>} : memref<8x128xf32, #tpu.memory_space<vmem>>, vector<8x128xf32>,
    %86 = arith.index_cast %c1_i32 : i32 to index
    %c0_47 = arith.constant 0 : index
    %c0_48 = arith.constant 0 : index
    %87 = vector.load %arg13[%86, %c0_47, %c0_48] : memref<8x8x128xf32, #tpu.memory_space<vmem>>, vector<1x8x128xf32>
    %88 = vector.shape_cast %87 : vector<1x8x128xf32> to vector<8x128xf32>
    %89 = vector.shape_cast %83 : vector<8x128xf32> to vector<1x8x128xf32>
    tpu.vector_store %arg13[%86, %c0_47, %c0_48], %89 {strides = array<i32>} : memref<8x8x128xf32, #tpu.memory_space<vmem>>, vector<1x8x128xf32>,
    %c2_i32 = arith.constant 2 : i32
    %c0_49 = arith.constant 0 : index
    %c0_50 = arith.constant 0 : index
    %90 = vector.load %arg15[%c0_49, %c0_50] : memref<8x128xf32, #tpu.memory_space<vmem>>, vector<8x128xf32>
    %c0_51 = arith.constant 0 : index
    %c0_52 = arith.constant 0 : index
    %91 = vector.load %arg16[%c0_51, %c0_52] : memref<8x128xf32, #tpu.memory_space<vmem>>, vector<8x128xf32>
    %92 = arith.index_cast %c2_i32 : i32 to index
    %c0_53 = arith.constant 0 : index
    %c0_54 = arith.constant 0 : index
    %93 = vector.load %arg14[%92, %c0_53, %c0_54] : memref<8x8x512xf32, #tpu.memory_space<vmem>>, vector<1x8x512xf32>
    %94 = vector.shape_cast %93 : vector<1x8x512xf32> to vector<8x512xf32>
    %cst_55 = arith.constant dense<0.000000e+00> : vector<8x512xf32>
    %95 = tpu.matmul %90, %1, %cst_55 {dimension_numbers = #tpu.dot_dimension_numbers<[1], [0], [0], [1], [0, 0, 1, 1], [], []>} : vector<8x128xf32>, vector<128x512xf32>, vector<8x512xf32> -> vector<8x512xf32>
    %96 = arith.addf %94, %95 : vector<8x512xf32>
    %97 = vector.extract_strided_slice %96 {offsets = [0, 0], sizes = [8, 128], strides = [1, 1]} : vector<8x512xf32> to vector<8x128xf32>
    %98 = arith.negf %97 : vector<8x128xf32>
    %99 = math.exp %98 : vector<8x128xf32>
    %cst_56 = arith.constant 1.000000e+00 : f32
    %100 = vector.broadcast %cst_56 : f32 to vector<8x128xf32>
    %101 = arith.addf %100, %99 : vector<8x128xf32>
    %102 = arith.divf %100, %101 : vector<8x128xf32>
    %103 = vector.extract_strided_slice %96 {offsets = [0, 128], sizes = [8, 128], strides = [1, 1]} : vector<8x512xf32> to vector<8x128xf32>
    %104 = arith.negf %103 : vector<8x128xf32>
    %105 = math.exp %104 : vector<8x128xf32>
    %cst_57 = arith.constant 1.000000e+00 : f32
    %106 = vector.broadcast %cst_57 : f32 to vector<8x128xf32>
    %107 = arith.addf %106, %105 : vector<8x128xf32>
    %108 = arith.divf %106, %107 : vector<8x128xf32>
    %109 = vector.extract_strided_slice %96 {offsets = [0, 256], sizes = [8, 128], strides = [1, 1]} : vector<8x512xf32> to vector<8x128xf32>
    %110 = math.tanh %109 : vector<8x128xf32>
    %111 = vector.extract_strided_slice %96 {offsets = [0, 384], sizes = [8, 128], strides = [1, 1]} : vector<8x512xf32> to vector<8x128xf32>
    %112 = arith.negf %111 : vector<8x128xf32>
    %113 = math.exp %112 : vector<8x128xf32>
    %cst_58 = arith.constant 1.000000e+00 : f32
    %114 = vector.broadcast %cst_58 : f32 to vector<8x128xf32>
    %115 = arith.addf %114, %113 : vector<8x128xf32>
    %116 = arith.divf %114, %115 : vector<8x128xf32>
    %117 = arith.mulf %108, %91 : vector<8x128xf32>
    %118 = arith.mulf %102, %110 : vector<8x128xf32>
    %119 = arith.addf %117, %118 : vector<8x128xf32>
    %120 = math.tanh %119 : vector<8x128xf32>
    %121 = arith.mulf %116, %120 : vector<8x128xf32>
    %c0_59 = arith.constant 0 : index
    %c0_60 = arith.constant 0 : index
    %122 = vector.load %arg16[%c0_59, %c0_60] : memref<8x128xf32, #tpu.memory_space<vmem>>, vector<8x128xf32>
    tpu.vector_store %arg16[%c0_59, %c0_60], %119 {strides = array<i32>} : memref<8x128xf32, #tpu.memory_space<vmem>>, vector<8x128xf32>,
    %c0_61 = arith.constant 0 : index
    %c0_62 = arith.constant 0 : index
    %123 = vector.load %arg15[%c0_61, %c0_62] : memref<8x128xf32, #tpu.memory_space<vmem>>, vector<8x128xf32>
    tpu.vector_store %arg15[%c0_61, %c0_62], %121 {strides = array<i32>} : memref<8x128xf32, #tpu.memory_space<vmem>>, vector<8x128xf32>,
    %124 = arith.index_cast %c2_i32 : i32 to index
    %c0_63 = arith.constant 0 : index
    %c0_64 = arith.constant 0 : index
    %125 = vector.load %arg13[%124, %c0_63, %c0_64] : memref<8x8x128xf32, #tpu.memory_space<vmem>>, vector<1x8x128xf32>
    %126 = vector.shape_cast %125 : vector<1x8x128xf32> to vector<8x128xf32>
    %127 = vector.shape_cast %121 : vector<8x128xf32> to vector<1x8x128xf32>
    tpu.vector_store %arg13[%124, %c0_63, %c0_64], %127 {strides = array<i32>} : memref<8x8x128xf32, #tpu.memory_space<vmem>>, vector<1x8x128xf32>,
    %c3_i32 = arith.constant 3 : i32
    %c0_65 = arith.constant 0 : index
    %c0_66 = arith.constant 0 : index
    %128 = vector.load %arg15[%c0_65, %c0_66] : memref<8x128xf32, #tpu.memory_space<vmem>>, vector<8x128xf32>
    %c0_67 = arith.constant 0 : index
    %c0_68 = arith.constant 0 : index
    %129 = vector.load %arg16[%c0_67, %c0_68] : memref<8x128xf32, #tpu.memory_space<vmem>>, vector<8x128xf32>
    %130 = arith.index_cast %c3_i32 : i32 to index
    %c0_69 = arith.constant 0 : index
    %c0_70 = arith.constant 0 : index
    %131 = vector.load %arg14[%130, %c0_69, %c0_70] : memref<8x8x512xf32, #tpu.memory_space<vmem>>, vector<1x8x512xf32>
    %132 = vector.shape_cast %131 : vector<1x8x512xf32> to vector<8x512xf32>
    %cst_71 = arith.constant dense<0.000000e+00> : vector<8x512xf32>
    %133 = tpu.matmul %128, %1, %cst_71 {dimension_numbers = #tpu.dot_dimension_numbers<[1], [0], [0], [1], [0, 0, 1, 1], [], []>} : vector<8x128xf32>, vector<128x512xf32>, vector<8x512xf32> -> vector<8x512xf32>
    %134 = arith.addf %132, %133 : vector<8x512xf32>
    %135 = vector.extract_strided_slice %134 {offsets = [0, 0], sizes = [8, 128], strides = [1, 1]} : vector<8x512xf32> to vector<8x128xf32>
    %136 = arith.negf %135 : vector<8x128xf32>
    %137 = math.exp %136 : vector<8x128xf32>
    %cst_72 = arith.constant 1.000000e+00 : f32
    %138 = vector.broadcast %cst_72 : f32 to vector<8x128xf32>
    %139 = arith.addf %138, %137 : vector<8x128xf32>
    %140 = arith.divf %138, %139 : vector<8x128xf32>
    %141 = vector.extract_strided_slice %134 {offsets = [0, 128], sizes = [8, 128], strides = [1, 1]} : vector<8x512xf32> to vector<8x128xf32>
    %142 = arith.negf %141 : vector<8x128xf32>
    %143 = math.exp %142 : vector<8x128xf32>
    %cst_73 = arith.constant 1.000000e+00 : f32
    %144 = vector.broadcast %cst_73 : f32 to vector<8x128xf32>
    %145 = arith.addf %144, %143 : vector<8x128xf32>
    %146 = arith.divf %144, %145 : vector<8x128xf32>
    %147 = vector.extract_strided_slice %134 {offsets = [0, 256], sizes = [8, 128], strides = [1, 1]} : vector<8x512xf32> to vector<8x128xf32>
    %148 = math.tanh %147 : vector<8x128xf32>
    %149 = vector.extract_strided_slice %134 {offsets = [0, 384], sizes = [8, 128], strides = [1, 1]} : vector<8x512xf32> to vector<8x128xf32>
    %150 = arith.negf %149 : vector<8x128xf32>
    %151 = math.exp %150 : vector<8x128xf32>
    %cst_74 = arith.constant 1.000000e+00 : f32
    %152 = vector.broadcast %cst_74 : f32 to vector<8x128xf32>
    %153 = arith.addf %152, %151 : vector<8x128xf32>
    %154 = arith.divf %152, %153 : vector<8x128xf32>
    %155 = arith.mulf %146, %129 : vector<8x128xf32>
    %156 = arith.mulf %140, %148 : vector<8x128xf32>
    %157 = arith.addf %155, %156 : vector<8x128xf32>
    %158 = math.tanh %157 : vector<8x128xf32>
    %159 = arith.mulf %154, %158 : vector<8x128xf32>
    %c0_75 = arith.constant 0 : index
    %c0_76 = arith.constant 0 : index
    %160 = vector.load %arg16[%c0_75, %c0_76] : memref<8x128xf32, #tpu.memory_space<vmem>>, vector<8x128xf32>
    tpu.vector_store %arg16[%c0_75, %c0_76], %157 {strides = array<i32>} : memref<8x128xf32, #tpu.memory_space<vmem>>, vector<8x128xf32>,
    %c0_77 = arith.constant 0 : index
    %c0_78 = arith.constant 0 : index
    %161 = vector.load %arg15[%c0_77, %c0_78] : memref<8x128xf32, #tpu.memory_space<vmem>>, vector<8x128xf32>
    tpu.vector_store %arg15[%c0_77, %c0_78], %159 {strides = array<i32>} : memref<8x128xf32, #tpu.memory_space<vmem>>, vector<8x128xf32>,
    %162 = arith.index_cast %c3_i32 : i32 to index
    %c0_79 = arith.constant 0 : index
    %c0_80 = arith.constant 0 : index
    %163 = vector.load %arg13[%162, %c0_79, %c0_80] : memref<8x8x128xf32, #tpu.memory_space<vmem>>, vector<1x8x128xf32>
    %164 = vector.shape_cast %163 : vector<1x8x128xf32> to vector<8x128xf32>
    %165 = vector.shape_cast %159 : vector<8x128xf32> to vector<1x8x128xf32>
    tpu.vector_store %arg13[%162, %c0_79, %c0_80], %165 {strides = array<i32>} : memref<8x8x128xf32, #tpu.memory_space<vmem>>, vector<1x8x128xf32>,
    %c4_i32 = arith.constant 4 : i32
    %c0_81 = arith.constant 0 : index
    %c0_82 = arith.constant 0 : index
    %166 = vector.load %arg15[%c0_81, %c0_82] : memref<8x128xf32, #tpu.memory_space<vmem>>, vector<8x128xf32>
    %c0_83 = arith.constant 0 : index
    %c0_84 = arith.constant 0 : index
    %167 = vector.load %arg16[%c0_83, %c0_84] : memref<8x128xf32, #tpu.memory_space<vmem>>, vector<8x128xf32>
    %168 = arith.index_cast %c4_i32 : i32 to index
    %c0_85 = arith.constant 0 : index
    %c0_86 = arith.constant 0 : index
    %169 = vector.load %arg14[%168, %c0_85, %c0_86] : memref<8x8x512xf32, #tpu.memory_space<vmem>>, vector<1x8x512xf32>
    %170 = vector.shape_cast %169 : vector<1x8x512xf32> to vector<8x512xf32>
    %cst_87 = arith.constant dense<0.000000e+00> : vector<8x512xf32>
    %171 = tpu.matmul %166, %1, %cst_87 {dimension_numbers = #tpu.dot_dimension_numbers<[1], [0], [0], [1], [0, 0, 1, 1], [], []>} : vector<8x128xf32>, vector<128x512xf32>, vector<8x512xf32> -> vector<8x512xf32>
    %172 = arith.addf %170, %171 : vector<8x512xf32>
    %173 = vector.extract_strided_slice %172 {offsets = [0, 0], sizes = [8, 128], strides = [1, 1]} : vector<8x512xf32> to vector<8x128xf32>
    %174 = arith.negf %173 : vector<8x128xf32>
    %175 = math.exp %174 : vector<8x128xf32>
    %cst_88 = arith.constant 1.000000e+00 : f32
    %176 = vector.broadcast %cst_88 : f32 to vector<8x128xf32>
    %177 = arith.addf %176, %175 : vector<8x128xf32>
    %178 = arith.divf %176, %177 : vector<8x128xf32>
    %179 = vector.extract_strided_slice %172 {offsets = [0, 128], sizes = [8, 128], strides = [1, 1]} : vector<8x512xf32> to vector<8x128xf32>
    %180 = arith.negf %179 : vector<8x128xf32>
    %181 = math.exp %180 : vector<8x128xf32>
    %cst_89 = arith.constant 1.000000e+00 : f32
    %182 = vector.broadcast %cst_89 : f32 to vector<8x128xf32>
    %183 = arith.addf %182, %181 : vector<8x128xf32>
    %184 = arith.divf %182, %183 : vector<8x128xf32>
    %185 = vector.extract_strided_slice %172 {offsets = [0, 256], sizes = [8, 128], strides = [1, 1]} : vector<8x512xf32> to vector<8x128xf32>
    %186 = math.tanh %185 : vector<8x128xf32>
    %187 = vector.extract_strided_slice %172 {offsets = [0, 384], sizes = [8, 128], strides = [1, 1]} : vector<8x512xf32> to vector<8x128xf32>
    %188 = arith.negf %187 : vector<8x128xf32>
    %189 = math.exp %188 : vector<8x128xf32>
    %cst_90 = arith.constant 1.000000e+00 : f32
    %190 = vector.broadcast %cst_90 : f32 to vector<8x128xf32>
    %191 = arith.addf %190, %189 : vector<8x128xf32>
    %192 = arith.divf %190, %191 : vector<8x128xf32>
    %193 = arith.mulf %184, %167 : vector<8x128xf32>
    %194 = arith.mulf %178, %186 : vector<8x128xf32>
    %195 = arith.addf %193, %194 : vector<8x128xf32>
    %196 = math.tanh %195 : vector<8x128xf32>
    %197 = arith.mulf %192, %196 : vector<8x128xf32>
    %c0_91 = arith.constant 0 : index
    %c0_92 = arith.constant 0 : index
    %198 = vector.load %arg16[%c0_91, %c0_92] : memref<8x128xf32, #tpu.memory_space<vmem>>, vector<8x128xf32>
    tpu.vector_store %arg16[%c0_91, %c0_92], %195 {strides = array<i32>} : memref<8x128xf32, #tpu.memory_space<vmem>>, vector<8x128xf32>,
    %c0_93 = arith.constant 0 : index
    %c0_94 = arith.constant 0 : index
    %199 = vector.load %arg15[%c0_93, %c0_94] : memref<8x128xf32, #tpu.memory_space<vmem>>, vector<8x128xf32>
    tpu.vector_store %arg15[%c0_93, %c0_94], %197 {strides = array<i32>} : memref<8x128xf32, #tpu.memory_space<vmem>>, vector<8x128xf32>,
    %200 = arith.index_cast %c4_i32 : i32 to index
    %c0_95 = arith.constant 0 : index
    %c0_96 = arith.constant 0 : index
    %201 = vector.load %arg13[%200, %c0_95, %c0_96] : memref<8x8x128xf32, #tpu.memory_space<vmem>>, vector<1x8x128xf32>
    %202 = vector.shape_cast %201 : vector<1x8x128xf32> to vector<8x128xf32>
    %203 = vector.shape_cast %197 : vector<8x128xf32> to vector<1x8x128xf32>
    tpu.vector_store %arg13[%200, %c0_95, %c0_96], %203 {strides = array<i32>} : memref<8x8x128xf32, #tpu.memory_space<vmem>>, vector<1x8x128xf32>,
    %c5_i32 = arith.constant 5 : i32
    %c0_97 = arith.constant 0 : index
    %c0_98 = arith.constant 0 : index
    %204 = vector.load %arg15[%c0_97, %c0_98] : memref<8x128xf32, #tpu.memory_space<vmem>>, vector<8x128xf32>
    %c0_99 = arith.constant 0 : index
    %c0_100 = arith.constant 0 : index
    %205 = vector.load %arg16[%c0_99, %c0_100] : memref<8x128xf32, #tpu.memory_space<vmem>>, vector<8x128xf32>
    %206 = arith.index_cast %c5_i32 : i32 to index
    %c0_101 = arith.constant 0 : index
    %c0_102 = arith.constant 0 : index
    %207 = vector.load %arg14[%206, %c0_101, %c0_102] : memref<8x8x512xf32, #tpu.memory_space<vmem>>, vector<1x8x512xf32>
    %208 = vector.shape_cast %207 : vector<1x8x512xf32> to vector<8x512xf32>
    %cst_103 = arith.constant dense<0.000000e+00> : vector<8x512xf32>
    %209 = tpu.matmul %204, %1, %cst_103 {dimension_numbers = #tpu.dot_dimension_numbers<[1], [0], [0], [1], [0, 0, 1, 1], [], []>} : vector<8x128xf32>, vector<128x512xf32>, vector<8x512xf32> -> vector<8x512xf32>
    %210 = arith.addf %208, %209 : vector<8x512xf32>
    %211 = vector.extract_strided_slice %210 {offsets = [0, 0], sizes = [8, 128], strides = [1, 1]} : vector<8x512xf32> to vector<8x128xf32>
    %212 = arith.negf %211 : vector<8x128xf32>
    %213 = math.exp %212 : vector<8x128xf32>
    %cst_104 = arith.constant 1.000000e+00 : f32
    %214 = vector.broadcast %cst_104 : f32 to vector<8x128xf32>
    %215 = arith.addf %214, %213 : vector<8x128xf32>
    %216 = arith.divf %214, %215 : vector<8x128xf32>
    %217 = vector.extract_strided_slice %210 {offsets = [0, 128], sizes = [8, 128], strides = [1, 1]} : vector<8x512xf32> to vector<8x128xf32>
    %218 = arith.negf %217 : vector<8x128xf32>
    %219 = math.exp %218 : vector<8x128xf32>
    %cst_105 = arith.constant 1.000000e+00 : f32
    %220 = vector.broadcast %cst_105 : f32 to vector<8x128xf32>
    %221 = arith.addf %220, %219 : vector<8x128xf32>
    %222 = arith.divf %220, %221 : vector<8x128xf32>
    %223 = vector.extract_strided_slice %210 {offsets = [0, 256], sizes = [8, 128], strides = [1, 1]} : vector<8x512xf32> to vector<8x128xf32>
    %224 = math.tanh %223 : vector<8x128xf32>
    %225 = vector.extract_strided_slice %210 {offsets = [0, 384], sizes = [8, 128], strides = [1, 1]} : vector<8x512xf32> to vector<8x128xf32>
    %226 = arith.negf %225 : vector<8x128xf32>
    %227 = math.exp %226 : vector<8x128xf32>
    %cst_106 = arith.constant 1.000000e+00 : f32
    %228 = vector.broadcast %cst_106 : f32 to vector<8x128xf32>
    %229 = arith.addf %228, %227 : vector<8x128xf32>
    %230 = arith.divf %228, %229 : vector<8x128xf32>
    %231 = arith.mulf %222, %205 : vector<8x128xf32>
    %232 = arith.mulf %216, %224 : vector<8x128xf32>
    %233 = arith.addf %231, %232 : vector<8x128xf32>
    %234 = math.tanh %233 : vector<8x128xf32>
    %235 = arith.mulf %230, %234 : vector<8x128xf32>
    %c0_107 = arith.constant 0 : index
    %c0_108 = arith.constant 0 : index
    %236 = vector.load %arg16[%c0_107, %c0_108] : memref<8x128xf32, #tpu.memory_space<vmem>>, vector<8x128xf32>
    tpu.vector_store %arg16[%c0_107, %c0_108], %233 {strides = array<i32>} : memref<8x128xf32, #tpu.memory_space<vmem>>, vector<8x128xf32>,
    %c0_109 = arith.constant 0 : index
    %c0_110 = arith.constant 0 : index
    %237 = vector.load %arg15[%c0_109, %c0_110] : memref<8x128xf32, #tpu.memory_space<vmem>>, vector<8x128xf32>
    tpu.vector_store %arg15[%c0_109, %c0_110], %235 {strides = array<i32>} : memref<8x128xf32, #tpu.memory_space<vmem>>, vector<8x128xf32>,
    %238 = arith.index_cast %c5_i32 : i32 to index
    %c0_111 = arith.constant 0 : index
    %c0_112 = arith.constant 0 : index
    %239 = vector.load %arg13[%238, %c0_111, %c0_112] : memref<8x8x128xf32, #tpu.memory_space<vmem>>, vector<1x8x128xf32>
    %240 = vector.shape_cast %239 : vector<1x8x128xf32> to vector<8x128xf32>
    %241 = vector.shape_cast %235 : vector<8x128xf32> to vector<1x8x128xf32>
    tpu.vector_store %arg13[%238, %c0_111, %c0_112], %241 {strides = array<i32>} : memref<8x8x128xf32, #tpu.memory_space<vmem>>, vector<1x8x128xf32>,
    %c6_i32 = arith.constant 6 : i32
    %c0_113 = arith.constant 0 : index
    %c0_114 = arith.constant 0 : index
    %242 = vector.load %arg15[%c0_113, %c0_114] : memref<8x128xf32, #tpu.memory_space<vmem>>, vector<8x128xf32>
    %c0_115 = arith.constant 0 : index
    %c0_116 = arith.constant 0 : index
    %243 = vector.load %arg16[%c0_115, %c0_116] : memref<8x128xf32, #tpu.memory_space<vmem>>, vector<8x128xf32>
    %244 = arith.index_cast %c6_i32 : i32 to index
    %c0_117 = arith.constant 0 : index
    %c0_118 = arith.constant 0 : index
    %245 = vector.load %arg14[%244, %c0_117, %c0_118] : memref<8x8x512xf32, #tpu.memory_space<vmem>>, vector<1x8x512xf32>
    %246 = vector.shape_cast %245 : vector<1x8x512xf32> to vector<8x512xf32>
    %cst_119 = arith.constant dense<0.000000e+00> : vector<8x512xf32>
    %247 = tpu.matmul %242, %1, %cst_119 {dimension_numbers = #tpu.dot_dimension_numbers<[1], [0], [0], [1], [0, 0, 1, 1], [], []>} : vector<8x128xf32>, vector<128x512xf32>, vector<8x512xf32> -> vector<8x512xf32>
    %248 = arith.addf %246, %247 : vector<8x512xf32>
    %249 = vector.extract_strided_slice %248 {offsets = [0, 0], sizes = [8, 128], strides = [1, 1]} : vector<8x512xf32> to vector<8x128xf32>
    %250 = arith.negf %249 : vector<8x128xf32>
    %251 = math.exp %250 : vector<8x128xf32>
    %cst_120 = arith.constant 1.000000e+00 : f32
    %252 = vector.broadcast %cst_120 : f32 to vector<8x128xf32>
    %253 = arith.addf %252, %251 : vector<8x128xf32>
    %254 = arith.divf %252, %253 : vector<8x128xf32>
    %255 = vector.extract_strided_slice %248 {offsets = [0, 128], sizes = [8, 128], strides = [1, 1]} : vector<8x512xf32> to vector<8x128xf32>
    %256 = arith.negf %255 : vector<8x128xf32>
    %257 = math.exp %256 : vector<8x128xf32>
    %cst_121 = arith.constant 1.000000e+00 : f32
    %258 = vector.broadcast %cst_121 : f32 to vector<8x128xf32>
    %259 = arith.addf %258, %257 : vector<8x128xf32>
    %260 = arith.divf %258, %259 : vector<8x128xf32>
    %261 = vector.extract_strided_slice %248 {offsets = [0, 256], sizes = [8, 128], strides = [1, 1]} : vector<8x512xf32> to vector<8x128xf32>
    %262 = math.tanh %261 : vector<8x128xf32>
    %263 = vector.extract_strided_slice %248 {offsets = [0, 384], sizes = [8, 128], strides = [1, 1]} : vector<8x512xf32> to vector<8x128xf32>
    %264 = arith.negf %263 : vector<8x128xf32>
    %265 = math.exp %264 : vector<8x128xf32>
    %cst_122 = arith.constant 1.000000e+00 : f32
    %266 = vector.broadcast %cst_122 : f32 to vector<8x128xf32>
    %267 = arith.addf %266, %265 : vector<8x128xf32>
    %268 = arith.divf %266, %267 : vector<8x128xf32>
    %269 = arith.mulf %260, %243 : vector<8x128xf32>
    %270 = arith.mulf %254, %262 : vector<8x128xf32>
    %271 = arith.addf %269, %270 : vector<8x128xf32>
    %272 = math.tanh %271 : vector<8x128xf32>
    %273 = arith.mulf %268, %272 : vector<8x128xf32>
    %c0_123 = arith.constant 0 : index
    %c0_124 = arith.constant 0 : index
    %274 = vector.load %arg16[%c0_123, %c0_124] : memref<8x128xf32, #tpu.memory_space<vmem>>, vector<8x128xf32>
    tpu.vector_store %arg16[%c0_123, %c0_124], %271 {strides = array<i32>} : memref<8x128xf32, #tpu.memory_space<vmem>>, vector<8x128xf32>,
    %c0_125 = arith.constant 0 : index
    %c0_126 = arith.constant 0 : index
    %275 = vector.load %arg15[%c0_125, %c0_126] : memref<8x128xf32, #tpu.memory_space<vmem>>, vector<8x128xf32>
    tpu.vector_store %arg15[%c0_125, %c0_126], %273 {strides = array<i32>} : memref<8x128xf32, #tpu.memory_space<vmem>>, vector<8x128xf32>,
    %276 = arith.index_cast %c6_i32 : i32 to index
    %c0_127 = arith.constant 0 : index
    %c0_128 = arith.constant 0 : index
    %277 = vector.load %arg13[%276, %c0_127, %c0_128] : memref<8x8x128xf32, #tpu.memory_space<vmem>>, vector<1x8x128xf32>
    %278 = vector.shape_cast %277 : vector<1x8x128xf32> to vector<8x128xf32>
    %279 = vector.shape_cast %273 : vector<8x128xf32> to vector<1x8x128xf32>
    tpu.vector_store %arg13[%276, %c0_127, %c0_128], %279 {strides = array<i32>} : memref<8x8x128xf32, #tpu.memory_space<vmem>>, vector<1x8x128xf32>,
    %c7_i32 = arith.constant 7 : i32
    %c0_129 = arith.constant 0 : index
    %c0_130 = arith.constant 0 : index
    %280 = vector.load %arg15[%c0_129, %c0_130] : memref<8x128xf32, #tpu.memory_space<vmem>>, vector<8x128xf32>
    %c0_131 = arith.constant 0 : index
    %c0_132 = arith.constant 0 : index
    %281 = vector.load %arg16[%c0_131, %c0_132] : memref<8x128xf32, #tpu.memory_space<vmem>>, vector<8x128xf32>
    %282 = arith.index_cast %c7_i32 : i32 to index
    %c0_133 = arith.constant 0 : index
    %c0_134 = arith.constant 0 : index
    %283 = vector.load %arg14[%282, %c0_133, %c0_134] : memref<8x8x512xf32, #tpu.memory_space<vmem>>, vector<1x8x512xf32>
    %284 = vector.shape_cast %283 : vector<1x8x512xf32> to vector<8x512xf32>
    %cst_135 = arith.constant dense<0.000000e+00> : vector<8x512xf32>
    %285 = tpu.matmul %280, %1, %cst_135 {dimension_numbers = #tpu.dot_dimension_numbers<[1], [0], [0], [1], [0, 0, 1, 1], [], []>} : vector<8x128xf32>, vector<128x512xf32>, vector<8x512xf32> -> vector<8x512xf32>
    %286 = arith.addf %284, %285 : vector<8x512xf32>
    %287 = vector.extract_strided_slice %286 {offsets = [0, 0], sizes = [8, 128], strides = [1, 1]} : vector<8x512xf32> to vector<8x128xf32>
    %288 = arith.negf %287 : vector<8x128xf32>
    %289 = math.exp %288 : vector<8x128xf32>
    %cst_136 = arith.constant 1.000000e+00 : f32
    %290 = vector.broadcast %cst_136 : f32 to vector<8x128xf32>
    %291 = arith.addf %290, %289 : vector<8x128xf32>
    %292 = arith.divf %290, %291 : vector<8x128xf32>
    %293 = vector.extract_strided_slice %286 {offsets = [0, 128], sizes = [8, 128], strides = [1, 1]} : vector<8x512xf32> to vector<8x128xf32>
    %294 = arith.negf %293 : vector<8x128xf32>
    %295 = math.exp %294 : vector<8x128xf32>
    %cst_137 = arith.constant 1.000000e+00 : f32
    %296 = vector.broadcast %cst_137 : f32 to vector<8x128xf32>
    %297 = arith.addf %296, %295 : vector<8x128xf32>
    %298 = arith.divf %296, %297 : vector<8x128xf32>
    %299 = vector.extract_strided_slice %286 {offsets = [0, 256], sizes = [8, 128], strides = [1, 1]} : vector<8x512xf32> to vector<8x128xf32>
    %300 = math.tanh %299 : vector<8x128xf32>
    %301 = vector.extract_strided_slice %286 {offsets = [0, 384], sizes = [8, 128], strides = [1, 1]} : vector<8x512xf32> to vector<8x128xf32>
    %302 = arith.negf %301 : vector<8x128xf32>
    %303 = math.exp %302 : vector<8x128xf32>
    %cst_138 = arith.constant 1.000000e+00 : f32
    %304 = vector.broadcast %cst_138 : f32 to vector<8x128xf32>
    %305 = arith.addf %304, %303 : vector<8x128xf32>
    %306 = arith.divf %304, %305 : vector<8x128xf32>
    %307 = arith.mulf %298, %281 : vector<8x128xf32>
    %308 = arith.mulf %292, %300 : vector<8x128xf32>
    %309 = arith.addf %307, %308 : vector<8x128xf32>
    %310 = math.tanh %309 : vector<8x128xf32>
    %311 = arith.mulf %306, %310 : vector<8x128xf32>
    %c0_139 = arith.constant 0 : index
    %c0_140 = arith.constant 0 : index
    %312 = vector.load %arg16[%c0_139, %c0_140] : memref<8x128xf32, #tpu.memory_space<vmem>>, vector<8x128xf32>
    tpu.vector_store %arg16[%c0_139, %c0_140], %309 {strides = array<i32>} : memref<8x128xf32, #tpu.memory_space<vmem>>, vector<8x128xf32>,
    %c0_141 = arith.constant 0 : index
    %c0_142 = arith.constant 0 : index
    %313 = vector.load %arg15[%c0_141, %c0_142] : memref<8x128xf32, #tpu.memory_space<vmem>>, vector<8x128xf32>
    tpu.vector_store %arg15[%c0_141, %c0_142], %311 {strides = array<i32>} : memref<8x128xf32, #tpu.memory_space<vmem>>, vector<8x128xf32>,
    %314 = arith.index_cast %c7_i32 : i32 to index
    %c0_143 = arith.constant 0 : index
    %c0_144 = arith.constant 0 : index
    %315 = vector.load %arg13[%314, %c0_143, %c0_144] : memref<8x8x128xf32, #tpu.memory_space<vmem>>, vector<1x8x128xf32>
    %316 = vector.shape_cast %315 : vector<1x8x128xf32> to vector<8x128xf32>
    %317 = vector.shape_cast %311 : vector<8x128xf32> to vector<1x8x128xf32>
    tpu.vector_store %arg13[%314, %c0_143, %c0_144], %317 {strides = array<i32>} : memref<8x8x128xf32, #tpu.memory_space<vmem>>, vector<1x8x128xf32>,
    %c8_i32 = arith.constant 8 : i32
    %c0_145 = arith.constant 0 : index
    %c0_146 = arith.constant 0 : index
    %318 = vector.load %arg5[%c0_145, %c0_146] : memref<128x512xf32, #tpu.memory_space<vmem>>, vector<128x512xf32>
    %c0_147 = arith.constant 0 : index
    %c0_148 = arith.constant 0 : index
    %319 = vector.load %arg6[%c0_147, %c0_148] : memref<128x512xf32, #tpu.memory_space<vmem>>, vector<128x512xf32>
    %c0_149 = arith.constant 0 : index
    %c0_150 = arith.constant 0 : index
    %320 = vector.load %arg7[%c0_149, %c0_150] : memref<1x512xf32, #tpu.memory_space<vmem>>, vector<1x512xf32>
    %c0_151 = arith.constant 0 : index
    %c0_152 = arith.constant 0 : index
    %c0_153 = arith.constant 0 : index
    %321 = vector.load %arg13[%c0_151, %c0_152, %c0_153] : memref<8x8x128xf32, #tpu.memory_space<vmem>>, vector<8x8x128xf32>
    %322 = vector.shape_cast %321 : vector<8x8x128xf32> to vector<64x128xf32>
    %cst_154 = arith.constant dense<0.000000e+00> : vector<64x512xf32>
    %323 = tpu.matmul %322, %318, %cst_154 {dimension_numbers = #tpu.dot_dimension_numbers<[1], [0], [0], [1], [0, 0, 1, 1], [], []>} : vector<64x128xf32>, vector<128x512xf32>, vector<64x512xf32> -> vector<64x512xf32>
    %324 = vector.broadcast %320 : vector<1x512xf32> to vector<64x512xf32>
    %325 = arith.addf %323, %324 : vector<64x512xf32>
    %326 = vector.shape_cast %325 : vector<64x512xf32> to vector<8x8x512xf32>
    %c0_155 = arith.constant 0 : index
    %c0_156 = arith.constant 0 : index
    %c0_157 = arith.constant 0 : index
    %327 = vector.load %arg14[%c0_155, %c0_156, %c0_157] : memref<8x8x512xf32, #tpu.memory_space<vmem>>, vector<8x8x512xf32>
    tpu.vector_store %arg14[%c0_155, %c0_156, %c0_157], %326 {strides = array<i32>} : memref<8x8x512xf32, #tpu.memory_space<vmem>>, vector<8x8x512xf32>,
    %cst_158 = arith.constant 0.000000e+00 : f32
    %328 = vector.broadcast %cst_158 : f32 to vector<8x128xf32>
    %c0_159 = arith.constant 0 : index
    %c0_160 = arith.constant 0 : index
    %329 = vector.load %arg15[%c0_159, %c0_160] : memref<8x128xf32, #tpu.memory_space<vmem>>, vector<8x128xf32>
    tpu.vector_store %arg15[%c0_159, %c0_160], %328 {strides = array<i32>} : memref<8x128xf32, #tpu.memory_space<vmem>>, vector<8x128xf32>,
    %cst_161 = arith.constant 0.000000e+00 : f32
    %330 = vector.broadcast %cst_161 : f32 to vector<8x128xf32>
    %c0_162 = arith.constant 0 : index
    %c0_163 = arith.constant 0 : index
    %331 = vector.load %arg16[%c0_162, %c0_163] : memref<8x128xf32, #tpu.memory_space<vmem>>, vector<8x128xf32>
    tpu.vector_store %arg16[%c0_162, %c0_163], %330 {strides = array<i32>} : memref<8x128xf32, #tpu.memory_space<vmem>>, vector<8x128xf32>,
    %c0_i32_164 = arith.constant 0 : i32
    %c0_165 = arith.constant 0 : index
    %c0_166 = arith.constant 0 : index
    %332 = vector.load %arg15[%c0_165, %c0_166] : memref<8x128xf32, #tpu.memory_space<vmem>>, vector<8x128xf32>
    %c0_167 = arith.constant 0 : index
    %c0_168 = arith.constant 0 : index
    %333 = vector.load %arg16[%c0_167, %c0_168] : memref<8x128xf32, #tpu.memory_space<vmem>>, vector<8x128xf32>
    %334 = arith.index_cast %c0_i32_164 : i32 to index
    %c0_169 = arith.constant 0 : index
    %c0_170 = arith.constant 0 : index
    %335 = vector.load %arg14[%334, %c0_169, %c0_170] : memref<8x8x512xf32, #tpu.memory_space<vmem>>, vector<1x8x512xf32>
    %336 = vector.shape_cast %335 : vector<1x8x512xf32> to vector<8x512xf32>
    %cst_171 = arith.constant dense<0.000000e+00> : vector<8x512xf32>
    %337 = tpu.matmul %332, %319, %cst_171 {dimension_numbers = #tpu.dot_dimension_numbers<[1], [0], [0], [1], [0, 0, 1, 1], [], []>} : vector<8x128xf32>, vector<128x512xf32>, vector<8x512xf32> -> vector<8x512xf32>
    %338 = arith.addf %336, %337 : vector<8x512xf32>
    %339 = vector.extract_strided_slice %338 {offsets = [0, 0], sizes = [8, 128], strides = [1, 1]} : vector<8x512xf32> to vector<8x128xf32>
    %340 = arith.negf %339 : vector<8x128xf32>
    %341 = math.exp %340 : vector<8x128xf32>
    %cst_172 = arith.constant 1.000000e+00 : f32
    %342 = vector.broadcast %cst_172 : f32 to vector<8x128xf32>
    %343 = arith.addf %342, %341 : vector<8x128xf32>
    %344 = arith.divf %342, %343 : vector<8x128xf32>
    %345 = vector.extract_strided_slice %338 {offsets = [0, 128], sizes = [8, 128], strides = [1, 1]} : vector<8x512xf32> to vector<8x128xf32>
    %346 = arith.negf %345 : vector<8x128xf32>
    %347 = math.exp %346 : vector<8x128xf32>
    %cst_173 = arith.constant 1.000000e+00 : f32
    %348 = vector.broadcast %cst_173 : f32 to vector<8x128xf32>
    %349 = arith.addf %348, %347 : vector<8x128xf32>
    %350 = arith.divf %348, %349 : vector<8x128xf32>
    %351 = vector.extract_strided_slice %338 {offsets = [0, 256], sizes = [8, 128], strides = [1, 1]} : vector<8x512xf32> to vector<8x128xf32>
    %352 = math.tanh %351 : vector<8x128xf32>
    %353 = vector.extract_strided_slice %338 {offsets = [0, 384], sizes = [8, 128], strides = [1, 1]} : vector<8x512xf32> to vector<8x128xf32>
    %354 = arith.negf %353 : vector<8x128xf32>
    %355 = math.exp %354 : vector<8x128xf32>
    %cst_174 = arith.constant 1.000000e+00 : f32
    %356 = vector.broadcast %cst_174 : f32 to vector<8x128xf32>
    %357 = arith.addf %356, %355 : vector<8x128xf32>
    %358 = arith.divf %356, %357 : vector<8x128xf32>
    %359 = arith.mulf %350, %333 : vector<8x128xf32>
    %360 = arith.mulf %344, %352 : vector<8x128xf32>
    %361 = arith.addf %359, %360 : vector<8x128xf32>
    %362 = math.tanh %361 : vector<8x128xf32>
    %363 = arith.mulf %358, %362 : vector<8x128xf32>
    %c0_175 = arith.constant 0 : index
    %c0_176 = arith.constant 0 : index
    %364 = vector.load %arg16[%c0_175, %c0_176] : memref<8x128xf32, #tpu.memory_space<vmem>>, vector<8x128xf32>
    tpu.vector_store %arg16[%c0_175, %c0_176], %361 {strides = array<i32>} : memref<8x128xf32, #tpu.memory_space<vmem>>, vector<8x128xf32>,
    %c0_177 = arith.constant 0 : index
    %c0_178 = arith.constant 0 : index
    %365 = vector.load %arg15[%c0_177, %c0_178] : memref<8x128xf32, #tpu.memory_space<vmem>>, vector<8x128xf32>
    tpu.vector_store %arg15[%c0_177, %c0_178], %363 {strides = array<i32>} : memref<8x128xf32, #tpu.memory_space<vmem>>, vector<8x128xf32>,
    %366 = arith.index_cast %c0_i32_164 : i32 to index
    %c0_179 = arith.constant 0 : index
    %c0_180 = arith.constant 0 : index
    %367 = vector.load %arg13[%366, %c0_179, %c0_180] : memref<8x8x128xf32, #tpu.memory_space<vmem>>, vector<1x8x128xf32>
    %368 = vector.shape_cast %367 : vector<1x8x128xf32> to vector<8x128xf32>
    %369 = vector.shape_cast %363 : vector<8x128xf32> to vector<1x8x128xf32>
    tpu.vector_store %arg13[%366, %c0_179, %c0_180], %369 {strides = array<i32>} : memref<8x8x128xf32, #tpu.memory_space<vmem>>, vector<1x8x128xf32>,
    %c1_i32_181 = arith.constant 1 : i32
    %c0_182 = arith.constant 0 : index
    %c0_183 = arith.constant 0 : index
    %370 = vector.load %arg15[%c0_182, %c0_183] : memref<8x128xf32, #tpu.memory_space<vmem>>, vector<8x128xf32>
    %c0_184 = arith.constant 0 : index
    %c0_185 = arith.constant 0 : index
    %371 = vector.load %arg16[%c0_184, %c0_185] : memref<8x128xf32, #tpu.memory_space<vmem>>, vector<8x128xf32>
    %372 = arith.index_cast %c1_i32_181 : i32 to index
    %c0_186 = arith.constant 0 : index
    %c0_187 = arith.constant 0 : index
    %373 = vector.load %arg14[%372, %c0_186, %c0_187] : memref<8x8x512xf32, #tpu.memory_space<vmem>>, vector<1x8x512xf32>
    %374 = vector.shape_cast %373 : vector<1x8x512xf32> to vector<8x512xf32>
    %cst_188 = arith.constant dense<0.000000e+00> : vector<8x512xf32>
    %375 = tpu.matmul %370, %319, %cst_188 {dimension_numbers = #tpu.dot_dimension_numbers<[1], [0], [0], [1], [0, 0, 1, 1], [], []>} : vector<8x128xf32>, vector<128x512xf32>, vector<8x512xf32> -> vector<8x512xf32>
    %376 = arith.addf %374, %375 : vector<8x512xf32>
    %377 = vector.extract_strided_slice %376 {offsets = [0, 0], sizes = [8, 128], strides = [1, 1]} : vector<8x512xf32> to vector<8x128xf32>
    %378 = arith.negf %377 : vector<8x128xf32>
    %379 = math.exp %378 : vector<8x128xf32>
    %cst_189 = arith.constant 1.000000e+00 : f32
    %380 = vector.broadcast %cst_189 : f32 to vector<8x128xf32>
    %381 = arith.addf %380, %379 : vector<8x128xf32>
    %382 = arith.divf %380, %381 : vector<8x128xf32>
    %383 = vector.extract_strided_slice %376 {offsets = [0, 128], sizes = [8, 128], strides = [1, 1]} : vector<8x512xf32> to vector<8x128xf32>
    %384 = arith.negf %383 : vector<8x128xf32>
    %385 = math.exp %384 : vector<8x128xf32>
    %cst_190 = arith.constant 1.000000e+00 : f32
    %386 = vector.broadcast %cst_190 : f32 to vector<8x128xf32>
    %387 = arith.addf %386, %385 : vector<8x128xf32>
    %388 = arith.divf %386, %387 : vector<8x128xf32>
    %389 = vector.extract_strided_slice %376 {offsets = [0, 256], sizes = [8, 128], strides = [1, 1]} : vector<8x512xf32> to vector<8x128xf32>
    %390 = math.tanh %389 : vector<8x128xf32>
    %391 = vector.extract_strided_slice %376 {offsets = [0, 384], sizes = [8, 128], strides = [1, 1]} : vector<8x512xf32> to vector<8x128xf32>
    %392 = arith.negf %391 : vector<8x128xf32>
    %393 = math.exp %392 : vector<8x128xf32>
    %cst_191 = arith.constant 1.000000e+00 : f32
    %394 = vector.broadcast %cst_191 : f32 to vector<8x128xf32>
    %395 = arith.addf %394, %393 : vector<8x128xf32>
    %396 = arith.divf %394, %395 : vector<8x128xf32>
    %397 = arith.mulf %388, %371 : vector<8x128xf32>
    %398 = arith.mulf %382, %390 : vector<8x128xf32>
    %399 = arith.addf %397, %398 : vector<8x128xf32>
    %400 = math.tanh %399 : vector<8x128xf32>
    %401 = arith.mulf %396, %400 : vector<8x128xf32>
    %c0_192 = arith.constant 0 : index
    %c0_193 = arith.constant 0 : index
    %402 = vector.load %arg16[%c0_192, %c0_193] : memref<8x128xf32, #tpu.memory_space<vmem>>, vector<8x128xf32>
    tpu.vector_store %arg16[%c0_192, %c0_193], %399 {strides = array<i32>} : memref<8x128xf32, #tpu.memory_space<vmem>>, vector<8x128xf32>,
    %c0_194 = arith.constant 0 : index
    %c0_195 = arith.constant 0 : index
    %403 = vector.load %arg15[%c0_194, %c0_195] : memref<8x128xf32, #tpu.memory_space<vmem>>, vector<8x128xf32>
    tpu.vector_store %arg15[%c0_194, %c0_195], %401 {strides = array<i32>} : memref<8x128xf32, #tpu.memory_space<vmem>>, vector<8x128xf32>,
    %404 = arith.index_cast %c1_i32_181 : i32 to index
    %c0_196 = arith.constant 0 : index
    %c0_197 = arith.constant 0 : index
    %405 = vector.load %arg13[%404, %c0_196, %c0_197] : memref<8x8x128xf32, #tpu.memory_space<vmem>>, vector<1x8x128xf32>
    %406 = vector.shape_cast %405 : vector<1x8x128xf32> to vector<8x128xf32>
    %407 = vector.shape_cast %401 : vector<8x128xf32> to vector<1x8x128xf32>
    tpu.vector_store %arg13[%404, %c0_196, %c0_197], %407 {strides = array<i32>} : memref<8x8x128xf32, #tpu.memory_space<vmem>>, vector<1x8x128xf32>,
    %c2_i32_198 = arith.constant 2 : i32
    %c0_199 = arith.constant 0 : index
    %c0_200 = arith.constant 0 : index
    %408 = vector.load %arg15[%c0_199, %c0_200] : memref<8x128xf32, #tpu.memory_space<vmem>>, vector<8x128xf32>
    %c0_201 = arith.constant 0 : index
    %c0_202 = arith.constant 0 : index
    %409 = vector.load %arg16[%c0_201, %c0_202] : memref<8x128xf32, #tpu.memory_space<vmem>>, vector<8x128xf32>
    %410 = arith.index_cast %c2_i32_198 : i32 to index
    %c0_203 = arith.constant 0 : index
    %c0_204 = arith.constant 0 : index
    %411 = vector.load %arg14[%410, %c0_203, %c0_204] : memref<8x8x512xf32, #tpu.memory_space<vmem>>, vector<1x8x512xf32>
    %412 = vector.shape_cast %411 : vector<1x8x512xf32> to vector<8x512xf32>
    %cst_205 = arith.constant dense<0.000000e+00> : vector<8x512xf32>
    %413 = tpu.matmul %408, %319, %cst_205 {dimension_numbers = #tpu.dot_dimension_numbers<[1], [0], [0], [1], [0, 0, 1, 1], [], []>} : vector<8x128xf32>, vector<128x512xf32>, vector<8x512xf32> -> vector<8x512xf32>
    %414 = arith.addf %412, %413 : vector<8x512xf32>
    %415 = vector.extract_strided_slice %414 {offsets = [0, 0], sizes = [8, 128], strides = [1, 1]} : vector<8x512xf32> to vector<8x128xf32>
    %416 = arith.negf %415 : vector<8x128xf32>
    %417 = math.exp %416 : vector<8x128xf32>
    %cst_206 = arith.constant 1.000000e+00 : f32
    %418 = vector.broadcast %cst_206 : f32 to vector<8x128xf32>
    %419 = arith.addf %418, %417 : vector<8x128xf32>
    %420 = arith.divf %418, %419 : vector<8x128xf32>
    %421 = vector.extract_strided_slice %414 {offsets = [0, 128], sizes = [8, 128], strides = [1, 1]} : vector<8x512xf32> to vector<8x128xf32>
    %422 = arith.negf %421 : vector<8x128xf32>
    %423 = math.exp %422 : vector<8x128xf32>
    %cst_207 = arith.constant 1.000000e+00 : f32
    %424 = vector.broadcast %cst_207 : f32 to vector<8x128xf32>
    %425 = arith.addf %424, %423 : vector<8x128xf32>
    %426 = arith.divf %424, %425 : vector<8x128xf32>
    %427 = vector.extract_strided_slice %414 {offsets = [0, 256], sizes = [8, 128], strides = [1, 1]} : vector<8x512xf32> to vector<8x128xf32>
    %428 = math.tanh %427 : vector<8x128xf32>
    %429 = vector.extract_strided_slice %414 {offsets = [0, 384], sizes = [8, 128], strides = [1, 1]} : vector<8x512xf32> to vector<8x128xf32>
    %430 = arith.negf %429 : vector<8x128xf32>
    %431 = math.exp %430 : vector<8x128xf32>
    %cst_208 = arith.constant 1.000000e+00 : f32
    %432 = vector.broadcast %cst_208 : f32 to vector<8x128xf32>
    %433 = arith.addf %432, %431 : vector<8x128xf32>
    %434 = arith.divf %432, %433 : vector<8x128xf32>
    %435 = arith.mulf %426, %409 : vector<8x128xf32>
    %436 = arith.mulf %420, %428 : vector<8x128xf32>
    %437 = arith.addf %435, %436 : vector<8x128xf32>
    %438 = math.tanh %437 : vector<8x128xf32>
    %439 = arith.mulf %434, %438 : vector<8x128xf32>
    %c0_209 = arith.constant 0 : index
    %c0_210 = arith.constant 0 : index
    %440 = vector.load %arg16[%c0_209, %c0_210] : memref<8x128xf32, #tpu.memory_space<vmem>>, vector<8x128xf32>
    tpu.vector_store %arg16[%c0_209, %c0_210], %437 {strides = array<i32>} : memref<8x128xf32, #tpu.memory_space<vmem>>, vector<8x128xf32>,
    %c0_211 = arith.constant 0 : index
    %c0_212 = arith.constant 0 : index
    %441 = vector.load %arg15[%c0_211, %c0_212] : memref<8x128xf32, #tpu.memory_space<vmem>>, vector<8x128xf32>
    tpu.vector_store %arg15[%c0_211, %c0_212], %439 {strides = array<i32>} : memref<8x128xf32, #tpu.memory_space<vmem>>, vector<8x128xf32>,
    %442 = arith.index_cast %c2_i32_198 : i32 to index
    %c0_213 = arith.constant 0 : index
    %c0_214 = arith.constant 0 : index
    %443 = vector.load %arg13[%442, %c0_213, %c0_214] : memref<8x8x128xf32, #tpu.memory_space<vmem>>, vector<1x8x128xf32>
    %444 = vector.shape_cast %443 : vector<1x8x128xf32> to vector<8x128xf32>
    %445 = vector.shape_cast %439 : vector<8x128xf32> to vector<1x8x128xf32>
    tpu.vector_store %arg13[%442, %c0_213, %c0_214], %445 {strides = array<i32>} : memref<8x8x128xf32, #tpu.memory_space<vmem>>, vector<1x8x128xf32>,
    %c3_i32_215 = arith.constant 3 : i32
    %c0_216 = arith.constant 0 : index
    %c0_217 = arith.constant 0 : index
    %446 = vector.load %arg15[%c0_216, %c0_217] : memref<8x128xf32, #tpu.memory_space<vmem>>, vector<8x128xf32>
    %c0_218 = arith.constant 0 : index
    %c0_219 = arith.constant 0 : index
    %447 = vector.load %arg16[%c0_218, %c0_219] : memref<8x128xf32, #tpu.memory_space<vmem>>, vector<8x128xf32>
    %448 = arith.index_cast %c3_i32_215 : i32 to index
    %c0_220 = arith.constant 0 : index
    %c0_221 = arith.constant 0 : index
    %449 = vector.load %arg14[%448, %c0_220, %c0_221] : memref<8x8x512xf32, #tpu.memory_space<vmem>>, vector<1x8x512xf32>
    %450 = vector.shape_cast %449 : vector<1x8x512xf32> to vector<8x512xf32>
    %cst_222 = arith.constant dense<0.000000e+00> : vector<8x512xf32>
    %451 = tpu.matmul %446, %319, %cst_222 {dimension_numbers = #tpu.dot_dimension_numbers<[1], [0], [0], [1], [0, 0, 1, 1], [], []>} : vector<8x128xf32>, vector<128x512xf32>, vector<8x512xf32> -> vector<8x512xf32>
    %452 = arith.addf %450, %451 : vector<8x512xf32>
    %453 = vector.extract_strided_slice %452 {offsets = [0, 0], sizes = [8, 128], strides = [1, 1]} : vector<8x512xf32> to vector<8x128xf32>
    %454 = arith.negf %453 : vector<8x128xf32>
    %455 = math.exp %454 : vector<8x128xf32>
    %cst_223 = arith.constant 1.000000e+00 : f32
    %456 = vector.broadcast %cst_223 : f32 to vector<8x128xf32>
    %457 = arith.addf %456, %455 : vector<8x128xf32>
    %458 = arith.divf %456, %457 : vector<8x128xf32>
    %459 = vector.extract_strided_slice %452 {offsets = [0, 128], sizes = [8, 128], strides = [1, 1]} : vector<8x512xf32> to vector<8x128xf32>
    %460 = arith.negf %459 : vector<8x128xf32>
    %461 = math.exp %460 : vector<8x128xf32>
    %cst_224 = arith.constant 1.000000e+00 : f32
    %462 = vector.broadcast %cst_224 : f32 to vector<8x128xf32>
    %463 = arith.addf %462, %461 : vector<8x128xf32>
    %464 = arith.divf %462, %463 : vector<8x128xf32>
    %465 = vector.extract_strided_slice %452 {offsets = [0, 256], sizes = [8, 128], strides = [1, 1]} : vector<8x512xf32> to vector<8x128xf32>
    %466 = math.tanh %465 : vector<8x128xf32>
    %467 = vector.extract_strided_slice %452 {offsets = [0, 384], sizes = [8, 128], strides = [1, 1]} : vector<8x512xf32> to vector<8x128xf32>
    %468 = arith.negf %467 : vector<8x128xf32>
    %469 = math.exp %468 : vector<8x128xf32>
    %cst_225 = arith.constant 1.000000e+00 : f32
    %470 = vector.broadcast %cst_225 : f32 to vector<8x128xf32>
    %471 = arith.addf %470, %469 : vector<8x128xf32>
    %472 = arith.divf %470, %471 : vector<8x128xf32>
    %473 = arith.mulf %464, %447 : vector<8x128xf32>
    %474 = arith.mulf %458, %466 : vector<8x128xf32>
    %475 = arith.addf %473, %474 : vector<8x128xf32>
    %476 = math.tanh %475 : vector<8x128xf32>
    %477 = arith.mulf %472, %476 : vector<8x128xf32>
    %c0_226 = arith.constant 0 : index
    %c0_227 = arith.constant 0 : index
    %478 = vector.load %arg16[%c0_226, %c0_227] : memref<8x128xf32, #tpu.memory_space<vmem>>, vector<8x128xf32>
    tpu.vector_store %arg16[%c0_226, %c0_227], %475 {strides = array<i32>} : memref<8x128xf32, #tpu.memory_space<vmem>>, vector<8x128xf32>,
    %c0_228 = arith.constant 0 : index
    %c0_229 = arith.constant 0 : index
    %479 = vector.load %arg15[%c0_228, %c0_229] : memref<8x128xf32, #tpu.memory_space<vmem>>, vector<8x128xf32>
    tpu.vector_store %arg15[%c0_228, %c0_229], %477 {strides = array<i32>} : memref<8x128xf32, #tpu.memory_space<vmem>>, vector<8x128xf32>,
    %480 = arith.index_cast %c3_i32_215 : i32 to index
    %c0_230 = arith.constant 0 : index
    %c0_231 = arith.constant 0 : index
    %481 = vector.load %arg13[%480, %c0_230, %c0_231] : memref<8x8x128xf32, #tpu.memory_space<vmem>>, vector<1x8x128xf32>
    %482 = vector.shape_cast %481 : vector<1x8x128xf32> to vector<8x128xf32>
    %483 = vector.shape_cast %477 : vector<8x128xf32> to vector<1x8x128xf32>
    tpu.vector_store %arg13[%480, %c0_230, %c0_231], %483 {strides = array<i32>} : memref<8x8x128xf32, #tpu.memory_space<vmem>>, vector<1x8x128xf32>,
    %c4_i32_232 = arith.constant 4 : i32
    %c0_233 = arith.constant 0 : index
    %c0_234 = arith.constant 0 : index
    %484 = vector.load %arg15[%c0_233, %c0_234] : memref<8x128xf32, #tpu.memory_space<vmem>>, vector<8x128xf32>
    %c0_235 = arith.constant 0 : index
    %c0_236 = arith.constant 0 : index
    %485 = vector.load %arg16[%c0_235, %c0_236] : memref<8x128xf32, #tpu.memory_space<vmem>>, vector<8x128xf32>
    %486 = arith.index_cast %c4_i32_232 : i32 to index
    %c0_237 = arith.constant 0 : index
    %c0_238 = arith.constant 0 : index
    %487 = vector.load %arg14[%486, %c0_237, %c0_238] : memref<8x8x512xf32, #tpu.memory_space<vmem>>, vector<1x8x512xf32>
    %488 = vector.shape_cast %487 : vector<1x8x512xf32> to vector<8x512xf32>
    %cst_239 = arith.constant dense<0.000000e+00> : vector<8x512xf32>
    %489 = tpu.matmul %484, %319, %cst_239 {dimension_numbers = #tpu.dot_dimension_numbers<[1], [0], [0], [1], [0, 0, 1, 1], [], []>} : vector<8x128xf32>, vector<128x512xf32>, vector<8x512xf32> -> vector<8x512xf32>
    %490 = arith.addf %488, %489 : vector<8x512xf32>
    %491 = vector.extract_strided_slice %490 {offsets = [0, 0], sizes = [8, 128], strides = [1, 1]} : vector<8x512xf32> to vector<8x128xf32>
    %492 = arith.negf %491 : vector<8x128xf32>
    %493 = math.exp %492 : vector<8x128xf32>
    %cst_240 = arith.constant 1.000000e+00 : f32
    %494 = vector.broadcast %cst_240 : f32 to vector<8x128xf32>
    %495 = arith.addf %494, %493 : vector<8x128xf32>
    %496 = arith.divf %494, %495 : vector<8x128xf32>
    %497 = vector.extract_strided_slice %490 {offsets = [0, 128], sizes = [8, 128], strides = [1, 1]} : vector<8x512xf32> to vector<8x128xf32>
    %498 = arith.negf %497 : vector<8x128xf32>
    %499 = math.exp %498 : vector<8x128xf32>
    %cst_241 = arith.constant 1.000000e+00 : f32
    %500 = vector.broadcast %cst_241 : f32 to vector<8x128xf32>
    %501 = arith.addf %500, %499 : vector<8x128xf32>
    %502 = arith.divf %500, %501 : vector<8x128xf32>
    %503 = vector.extract_strided_slice %490 {offsets = [0, 256], sizes = [8, 128], strides = [1, 1]} : vector<8x512xf32> to vector<8x128xf32>
    %504 = math.tanh %503 : vector<8x128xf32>
    %505 = vector.extract_strided_slice %490 {offsets = [0, 384], sizes = [8, 128], strides = [1, 1]} : vector<8x512xf32> to vector<8x128xf32>
    %506 = arith.negf %505 : vector<8x128xf32>
    %507 = math.exp %506 : vector<8x128xf32>
    %cst_242 = arith.constant 1.000000e+00 : f32
    %508 = vector.broadcast %cst_242 : f32 to vector<8x128xf32>
    %509 = arith.addf %508, %507 : vector<8x128xf32>
    %510 = arith.divf %508, %509 : vector<8x128xf32>
    %511 = arith.mulf %502, %485 : vector<8x128xf32>
    %512 = arith.mulf %496, %504 : vector<8x128xf32>
    %513 = arith.addf %511, %512 : vector<8x128xf32>
    %514 = math.tanh %513 : vector<8x128xf32>
    %515 = arith.mulf %510, %514 : vector<8x128xf32>
    %c0_243 = arith.constant 0 : index
    %c0_244 = arith.constant 0 : index
    %516 = vector.load %arg16[%c0_243, %c0_244] : memref<8x128xf32, #tpu.memory_space<vmem>>, vector<8x128xf32>
    tpu.vector_store %arg16[%c0_243, %c0_244], %513 {strides = array<i32>} : memref<8x128xf32, #tpu.memory_space<vmem>>, vector<8x128xf32>,
    %c0_245 = arith.constant 0 : index
    %c0_246 = arith.constant 0 : index
    %517 = vector.load %arg15[%c0_245, %c0_246] : memref<8x128xf32, #tpu.memory_space<vmem>>, vector<8x128xf32>
    tpu.vector_store %arg15[%c0_245, %c0_246], %515 {strides = array<i32>} : memref<8x128xf32, #tpu.memory_space<vmem>>, vector<8x128xf32>,
    %518 = arith.index_cast %c4_i32_232 : i32 to index
    %c0_247 = arith.constant 0 : index
    %c0_248 = arith.constant 0 : index
    %519 = vector.load %arg13[%518, %c0_247, %c0_248] : memref<8x8x128xf32, #tpu.memory_space<vmem>>, vector<1x8x128xf32>
    %520 = vector.shape_cast %519 : vector<1x8x128xf32> to vector<8x128xf32>
    %521 = vector.shape_cast %515 : vector<8x128xf32> to vector<1x8x128xf32>
    tpu.vector_store %arg13[%518, %c0_247, %c0_248], %521 {strides = array<i32>} : memref<8x8x128xf32, #tpu.memory_space<vmem>>, vector<1x8x128xf32>,
    %c5_i32_249 = arith.constant 5 : i32
    %c0_250 = arith.constant 0 : index
    %c0_251 = arith.constant 0 : index
    %522 = vector.load %arg15[%c0_250, %c0_251] : memref<8x128xf32, #tpu.memory_space<vmem>>, vector<8x128xf32>
    %c0_252 = arith.constant 0 : index
    %c0_253 = arith.constant 0 : index
    %523 = vector.load %arg16[%c0_252, %c0_253] : memref<8x128xf32, #tpu.memory_space<vmem>>, vector<8x128xf32>
    %524 = arith.index_cast %c5_i32_249 : i32 to index
    %c0_254 = arith.constant 0 : index
    %c0_255 = arith.constant 0 : index
    %525 = vector.load %arg14[%524, %c0_254, %c0_255] : memref<8x8x512xf32, #tpu.memory_space<vmem>>, vector<1x8x512xf32>
    %526 = vector.shape_cast %525 : vector<1x8x512xf32> to vector<8x512xf32>
    %cst_256 = arith.constant dense<0.000000e+00> : vector<8x512xf32>
    %527 = tpu.matmul %522, %319, %cst_256 {dimension_numbers = #tpu.dot_dimension_numbers<[1], [0], [0], [1], [0, 0, 1, 1], [], []>} : vector<8x128xf32>, vector<128x512xf32>, vector<8x512xf32> -> vector<8x512xf32>
    %528 = arith.addf %526, %527 : vector<8x512xf32>
    %529 = vector.extract_strided_slice %528 {offsets = [0, 0], sizes = [8, 128], strides = [1, 1]} : vector<8x512xf32> to vector<8x128xf32>
    %530 = arith.negf %529 : vector<8x128xf32>
    %531 = math.exp %530 : vector<8x128xf32>
    %cst_257 = arith.constant 1.000000e+00 : f32
    %532 = vector.broadcast %cst_257 : f32 to vector<8x128xf32>
    %533 = arith.addf %532, %531 : vector<8x128xf32>
    %534 = arith.divf %532, %533 : vector<8x128xf32>
    %535 = vector.extract_strided_slice %528 {offsets = [0, 128], sizes = [8, 128], strides = [1, 1]} : vector<8x512xf32> to vector<8x128xf32>
    %536 = arith.negf %535 : vector<8x128xf32>
    %537 = math.exp %536 : vector<8x128xf32>
    %cst_258 = arith.constant 1.000000e+00 : f32
    %538 = vector.broadcast %cst_258 : f32 to vector<8x128xf32>
    %539 = arith.addf %538, %537 : vector<8x128xf32>
    %540 = arith.divf %538, %539 : vector<8x128xf32>
    %541 = vector.extract_strided_slice %528 {offsets = [0, 256], sizes = [8, 128], strides = [1, 1]} : vector<8x512xf32> to vector<8x128xf32>
    %542 = math.tanh %541 : vector<8x128xf32>
    %543 = vector.extract_strided_slice %528 {offsets = [0, 384], sizes = [8, 128], strides = [1, 1]} : vector<8x512xf32> to vector<8x128xf32>
    %544 = arith.negf %543 : vector<8x128xf32>
    %545 = math.exp %544 : vector<8x128xf32>
    %cst_259 = arith.constant 1.000000e+00 : f32
    %546 = vector.broadcast %cst_259 : f32 to vector<8x128xf32>
    %547 = arith.addf %546, %545 : vector<8x128xf32>
    %548 = arith.divf %546, %547 : vector<8x128xf32>
    %549 = arith.mulf %540, %523 : vector<8x128xf32>
    %550 = arith.mulf %534, %542 : vector<8x128xf32>
    %551 = arith.addf %549, %550 : vector<8x128xf32>
    %552 = math.tanh %551 : vector<8x128xf32>
    %553 = arith.mulf %548, %552 : vector<8x128xf32>
    %c0_260 = arith.constant 0 : index
    %c0_261 = arith.constant 0 : index
    %554 = vector.load %arg16[%c0_260, %c0_261] : memref<8x128xf32, #tpu.memory_space<vmem>>, vector<8x128xf32>
    tpu.vector_store %arg16[%c0_260, %c0_261], %551 {strides = array<i32>} : memref<8x128xf32, #tpu.memory_space<vmem>>, vector<8x128xf32>,
    %c0_262 = arith.constant 0 : index
    %c0_263 = arith.constant 0 : index
    %555 = vector.load %arg15[%c0_262, %c0_263] : memref<8x128xf32, #tpu.memory_space<vmem>>, vector<8x128xf32>
    tpu.vector_store %arg15[%c0_262, %c0_263], %553 {strides = array<i32>} : memref<8x128xf32, #tpu.memory_space<vmem>>, vector<8x128xf32>,
    %556 = arith.index_cast %c5_i32_249 : i32 to index
    %c0_264 = arith.constant 0 : index
    %c0_265 = arith.constant 0 : index
    %557 = vector.load %arg13[%556, %c0_264, %c0_265] : memref<8x8x128xf32, #tpu.memory_space<vmem>>, vector<1x8x128xf32>
    %558 = vector.shape_cast %557 : vector<1x8x128xf32> to vector<8x128xf32>
    %559 = vector.shape_cast %553 : vector<8x128xf32> to vector<1x8x128xf32>
    tpu.vector_store %arg13[%556, %c0_264, %c0_265], %559 {strides = array<i32>} : memref<8x8x128xf32, #tpu.memory_space<vmem>>, vector<1x8x128xf32>,
    %c6_i32_266 = arith.constant 6 : i32
    %c0_267 = arith.constant 0 : index
    %c0_268 = arith.constant 0 : index
    %560 = vector.load %arg15[%c0_267, %c0_268] : memref<8x128xf32, #tpu.memory_space<vmem>>, vector<8x128xf32>
    %c0_269 = arith.constant 0 : index
    %c0_270 = arith.constant 0 : index
    %561 = vector.load %arg16[%c0_269, %c0_270] : memref<8x128xf32, #tpu.memory_space<vmem>>, vector<8x128xf32>
    %562 = arith.index_cast %c6_i32_266 : i32 to index
    %c0_271 = arith.constant 0 : index
    %c0_272 = arith.constant 0 : index
    %563 = vector.load %arg14[%562, %c0_271, %c0_272] : memref<8x8x512xf32, #tpu.memory_space<vmem>>, vector<1x8x512xf32>
    %564 = vector.shape_cast %563 : vector<1x8x512xf32> to vector<8x512xf32>
    %cst_273 = arith.constant dense<0.000000e+00> : vector<8x512xf32>
    %565 = tpu.matmul %560, %319, %cst_273 {dimension_numbers = #tpu.dot_dimension_numbers<[1], [0], [0], [1], [0, 0, 1, 1], [], []>} : vector<8x128xf32>, vector<128x512xf32>, vector<8x512xf32> -> vector<8x512xf32>
    %566 = arith.addf %564, %565 : vector<8x512xf32>
    %567 = vector.extract_strided_slice %566 {offsets = [0, 0], sizes = [8, 128], strides = [1, 1]} : vector<8x512xf32> to vector<8x128xf32>
    %568 = arith.negf %567 : vector<8x128xf32>
    %569 = math.exp %568 : vector<8x128xf32>
    %cst_274 = arith.constant 1.000000e+00 : f32
    %570 = vector.broadcast %cst_274 : f32 to vector<8x128xf32>
    %571 = arith.addf %570, %569 : vector<8x128xf32>
    %572 = arith.divf %570, %571 : vector<8x128xf32>
    %573 = vector.extract_strided_slice %566 {offsets = [0, 128], sizes = [8, 128], strides = [1, 1]} : vector<8x512xf32> to vector<8x128xf32>
    %574 = arith.negf %573 : vector<8x128xf32>
    %575 = math.exp %574 : vector<8x128xf32>
    %cst_275 = arith.constant 1.000000e+00 : f32
    %576 = vector.broadcast %cst_275 : f32 to vector<8x128xf32>
    %577 = arith.addf %576, %575 : vector<8x128xf32>
    %578 = arith.divf %576, %577 : vector<8x128xf32>
    %579 = vector.extract_strided_slice %566 {offsets = [0, 256], sizes = [8, 128], strides = [1, 1]} : vector<8x512xf32> to vector<8x128xf32>
    %580 = math.tanh %579 : vector<8x128xf32>
    %581 = vector.extract_strided_slice %566 {offsets = [0, 384], sizes = [8, 128], strides = [1, 1]} : vector<8x512xf32> to vector<8x128xf32>
    %582 = arith.negf %581 : vector<8x128xf32>
    %583 = math.exp %582 : vector<8x128xf32>
    %cst_276 = arith.constant 1.000000e+00 : f32
    %584 = vector.broadcast %cst_276 : f32 to vector<8x128xf32>
    %585 = arith.addf %584, %583 : vector<8x128xf32>
    %586 = arith.divf %584, %585 : vector<8x128xf32>
    %587 = arith.mulf %578, %561 : vector<8x128xf32>
    %588 = arith.mulf %572, %580 : vector<8x128xf32>
    %589 = arith.addf %587, %588 : vector<8x128xf32>
    %590 = math.tanh %589 : vector<8x128xf32>
    %591 = arith.mulf %586, %590 : vector<8x128xf32>
    %c0_277 = arith.constant 0 : index
    %c0_278 = arith.constant 0 : index
    %592 = vector.load %arg16[%c0_277, %c0_278] : memref<8x128xf32, #tpu.memory_space<vmem>>, vector<8x128xf32>
    tpu.vector_store %arg16[%c0_277, %c0_278], %589 {strides = array<i32>} : memref<8x128xf32, #tpu.memory_space<vmem>>, vector<8x128xf32>,
    %c0_279 = arith.constant 0 : index
    %c0_280 = arith.constant 0 : index
    %593 = vector.load %arg15[%c0_279, %c0_280] : memref<8x128xf32, #tpu.memory_space<vmem>>, vector<8x128xf32>
    tpu.vector_store %arg15[%c0_279, %c0_280], %591 {strides = array<i32>} : memref<8x128xf32, #tpu.memory_space<vmem>>, vector<8x128xf32>,
    %594 = arith.index_cast %c6_i32_266 : i32 to index
    %c0_281 = arith.constant 0 : index
    %c0_282 = arith.constant 0 : index
    %595 = vector.load %arg13[%594, %c0_281, %c0_282] : memref<8x8x128xf32, #tpu.memory_space<vmem>>, vector<1x8x128xf32>
    %596 = vector.shape_cast %595 : vector<1x8x128xf32> to vector<8x128xf32>
    %597 = vector.shape_cast %591 : vector<8x128xf32> to vector<1x8x128xf32>
    tpu.vector_store %arg13[%594, %c0_281, %c0_282], %597 {strides = array<i32>} : memref<8x8x128xf32, #tpu.memory_space<vmem>>, vector<1x8x128xf32>,
    %c7_i32_283 = arith.constant 7 : i32
    %c0_284 = arith.constant 0 : index
    %c0_285 = arith.constant 0 : index
    %598 = vector.load %arg15[%c0_284, %c0_285] : memref<8x128xf32, #tpu.memory_space<vmem>>, vector<8x128xf32>
    %c0_286 = arith.constant 0 : index
    %c0_287 = arith.constant 0 : index
    %599 = vector.load %arg16[%c0_286, %c0_287] : memref<8x128xf32, #tpu.memory_space<vmem>>, vector<8x128xf32>
    %600 = arith.index_cast %c7_i32_283 : i32 to index
    %c0_288 = arith.constant 0 : index
    %c0_289 = arith.constant 0 : index
    %601 = vector.load %arg14[%600, %c0_288, %c0_289] : memref<8x8x512xf32, #tpu.memory_space<vmem>>, vector<1x8x512xf32>
    %602 = vector.shape_cast %601 : vector<1x8x512xf32> to vector<8x512xf32>
    %cst_290 = arith.constant dense<0.000000e+00> : vector<8x512xf32>
    %603 = tpu.matmul %598, %319, %cst_290 {dimension_numbers = #tpu.dot_dimension_numbers<[1], [0], [0], [1], [0, 0, 1, 1], [], []>} : vector<8x128xf32>, vector<128x512xf32>, vector<8x512xf32> -> vector<8x512xf32>
    %604 = arith.addf %602, %603 : vector<8x512xf32>
    %605 = vector.extract_strided_slice %604 {offsets = [0, 0], sizes = [8, 128], strides = [1, 1]} : vector<8x512xf32> to vector<8x128xf32>
    %606 = arith.negf %605 : vector<8x128xf32>
    %607 = math.exp %606 : vector<8x128xf32>
    %cst_291 = arith.constant 1.000000e+00 : f32
    %608 = vector.broadcast %cst_291 : f32 to vector<8x128xf32>
    %609 = arith.addf %608, %607 : vector<8x128xf32>
    %610 = arith.divf %608, %609 : vector<8x128xf32>
    %611 = vector.extract_strided_slice %604 {offsets = [0, 128], sizes = [8, 128], strides = [1, 1]} : vector<8x512xf32> to vector<8x128xf32>
    %612 = arith.negf %611 : vector<8x128xf32>
    %613 = math.exp %612 : vector<8x128xf32>
    %cst_292 = arith.constant 1.000000e+00 : f32
    %614 = vector.broadcast %cst_292 : f32 to vector<8x128xf32>
    %615 = arith.addf %614, %613 : vector<8x128xf32>
    %616 = arith.divf %614, %615 : vector<8x128xf32>
    %617 = vector.extract_strided_slice %604 {offsets = [0, 256], sizes = [8, 128], strides = [1, 1]} : vector<8x512xf32> to vector<8x128xf32>
    %618 = math.tanh %617 : vector<8x128xf32>
    %619 = vector.extract_strided_slice %604 {offsets = [0, 384], sizes = [8, 128], strides = [1, 1]} : vector<8x512xf32> to vector<8x128xf32>
    %620 = arith.negf %619 : vector<8x128xf32>
    %621 = math.exp %620 : vector<8x128xf32>
    %cst_293 = arith.constant 1.000000e+00 : f32
    %622 = vector.broadcast %cst_293 : f32 to vector<8x128xf32>
    %623 = arith.addf %622, %621 : vector<8x128xf32>
    %624 = arith.divf %622, %623 : vector<8x128xf32>
    %625 = arith.mulf %616, %599 : vector<8x128xf32>
    %626 = arith.mulf %610, %618 : vector<8x128xf32>
    %627 = arith.addf %625, %626 : vector<8x128xf32>
    %628 = math.tanh %627 : vector<8x128xf32>
    %629 = arith.mulf %624, %628 : vector<8x128xf32>
    %c0_294 = arith.constant 0 : index
    %c0_295 = arith.constant 0 : index
    %630 = vector.load %arg16[%c0_294, %c0_295] : memref<8x128xf32, #tpu.memory_space<vmem>>, vector<8x128xf32>
    tpu.vector_store %arg16[%c0_294, %c0_295], %627 {strides = array<i32>} : memref<8x128xf32, #tpu.memory_space<vmem>>, vector<8x128xf32>,
    %c0_296 = arith.constant 0 : index
    %c0_297 = arith.constant 0 : index
    %631 = vector.load %arg15[%c0_296, %c0_297] : memref<8x128xf32, #tpu.memory_space<vmem>>, vector<8x128xf32>
    tpu.vector_store %arg15[%c0_296, %c0_297], %629 {strides = array<i32>} : memref<8x128xf32, #tpu.memory_space<vmem>>, vector<8x128xf32>,
    %632 = arith.index_cast %c7_i32_283 : i32 to index
    %c0_298 = arith.constant 0 : index
    %c0_299 = arith.constant 0 : index
    %633 = vector.load %arg13[%632, %c0_298, %c0_299] : memref<8x8x128xf32, #tpu.memory_space<vmem>>, vector<1x8x128xf32>
    %634 = vector.shape_cast %633 : vector<1x8x128xf32> to vector<8x128xf32>
    %635 = vector.shape_cast %629 : vector<8x128xf32> to vector<1x8x128xf32>
    tpu.vector_store %arg13[%632, %c0_298, %c0_299], %635 {strides = array<i32>} : memref<8x8x128xf32, #tpu.memory_space<vmem>>, vector<1x8x128xf32>,
    %c8_i32_300 = arith.constant 8 : i32
    %c0_301 = arith.constant 0 : index
    %c0_302 = arith.constant 0 : index
    %c0_303 = arith.constant 0 : index
    %636 = vector.load %arg13[%c0_301, %c0_302, %c0_303] : memref<8x8x128xf32, #tpu.memory_space<vmem>>, vector<8x8x128xf32>
    %c0_304 = arith.constant 0 : index
    %c0_305 = arith.constant 0 : index
    %637 = vector.load %arg8[%c0_304, %c0_305] : memref<1x128xf32, #tpu.memory_space<vmem>>, vector<1x128xf32>
    %638 = vector.shape_cast %637 : vector<1x128xf32> to vector<1x1x128xf32>
    %639 = vector.broadcast %638 : vector<1x1x128xf32> to vector<8x8x128xf32>
    %640 = arith.mulf %636, %639 : vector<8x8x128xf32>
    %cst_306 = arith.constant dense<0.000000e+00> : vector<8x8xf32>
    %641 = vector.multi_reduction <add>, %640, %cst_306 [2] : vector<8x8x128xf32> to vector<8x8xf32>
    %642 = vector.shape_cast %641 : vector<8x8xf32> to vector<8x8x1xf32>
    %c0_307 = arith.constant 0 : index
    %c0_308 = arith.constant 0 : index
    %643 = vector.load %arg9[%c0_307, %c0_308] : memref<1x1xf32, #tpu.memory_space<vmem>>, vector<1x1xf32>
    %644 = vector.shape_cast %643 : vector<1x1xf32> to vector<1x1x1xf32>
    %645 = vector.broadcast %644 : vector<1x1x1xf32> to vector<8x8x1xf32>
    %646 = arith.addf %642, %645 : vector<8x8x1xf32>
    %cst_309 = arith.constant dense<0xFF800000> : vector<8x1xf32>
    %647 = vector.multi_reduction <maximumf>, %646, %cst_309 [0] : vector<8x8x1xf32> to vector<8x1xf32>
    %648 = vector.shape_cast %647 : vector<8x1xf32> to vector<1x8x1xf32>
    %649 = vector.broadcast %648 : vector<1x8x1xf32> to vector<8x8x1xf32>
    %650 = arith.subf %646, %649 : vector<8x8x1xf32>
    %651 = math.exp %650 : vector<8x8x1xf32>
    %cst_310 = arith.constant dense<0.000000e+00> : vector<8x1xf32>
    %652 = vector.multi_reduction <add>, %651, %cst_310 [0] : vector<8x8x1xf32> to vector<8x1xf32>
    %653 = vector.shape_cast %652 : vector<8x1xf32> to vector<1x8x1xf32>
    %654 = tpu.reciprocal %653 {approx = true} : vector<1x8x1xf32> -> vector<1x8x1xf32>
    %655 = vector.broadcast %654 : vector<1x8x1xf32> to vector<8x8x1xf32>
    %656 = arith.mulf %651, %655 : vector<8x8x1xf32>
    %657 = vector.broadcast %656 : vector<8x8x1xf32> to vector<8x8x128xf32>
    %658 = arith.mulf %657, %636 : vector<8x8x128xf32>
    %cst_311 = arith.constant dense<0.000000e+00> : vector<8x128xf32>
    %659 = vector.multi_reduction <add>, %658, %cst_311 [0] : vector<8x8x128xf32> to vector<8x128xf32>
    %c0_312 = arith.constant 0 : index
    %c0_313 = arith.constant 0 : index
    %660 = vector.load %arg10[%c0_312, %c0_313] : memref<128x128xf32, #tpu.memory_space<vmem>>, vector<128x128xf32>
    %cst_314 = arith.constant dense<0.000000e+00> : vector<8x128xf32>
    %661 = tpu.matmul %659, %660, %cst_314 {dimension_numbers = #tpu.dot_dimension_numbers<[1], [0], [0], [1], [0, 0, 1, 1], [], []>} : vector<8x128xf32>, vector<128x128xf32>, vector<8x128xf32> -> vector<8x128xf32>
    %c0_315 = arith.constant 0 : index
    %c0_316 = arith.constant 0 : index
    %662 = vector.load %arg11[%c0_315, %c0_316] : memref<1x128xf32, #tpu.memory_space<vmem>>, vector<1x128xf32>
    %663 = vector.broadcast %662 : vector<1x128xf32> to vector<8x128xf32>
    %664 = arith.addf %661, %663 : vector<8x128xf32>
    %c0_317 = arith.constant 0 : index
    %c0_318 = arith.constant 0 : index
    %665 = vector.load %arg12[%c0_317, %c0_318] : memref<8x128xf32, #tpu.memory_space<vmem>>, vector<8x128xf32>
    tpu.vector_store %arg12[%c0_317, %c0_318], %664 {strides = array<i32>} : memref<8x128xf32, #tpu.memory_space<vmem>>, vector<8x128xf32>,
    return
  }
  func.func @transform_0(%arg0: i32) -> (i32, i32, i32) {
    %c0_i32 = arith.constant 0 : i32
    %c0_i32_0 = arith.constant 0 : i32
    %c0_i32_1 = arith.constant 0 : i32
    %c0_i32_2 = arith.constant 0 : i32
    return %c0_i32, %c0_i32_0, %c0_i32_1 : i32, i32, i32
  }
  func.func @transform_1(%arg0: i32) -> (i32, i32) {
    %c0_i32 = arith.constant 0 : i32
    %c0_i32_0 = arith.constant 0 : i32
    %c0_i32_1 = arith.constant 0 : i32
    return %c0_i32, %c0_i32_0 : i32, i32
  }
  func.func @transform_2(%arg0: i32) -> (i32, i32) {
    %c0_i32 = arith.constant 0 : i32
    %c0_i32_0 = arith.constant 0 : i32
    %c0_i32_1 = arith.constant 0 : i32
    return %c0_i32, %c0_i32_0 : i32, i32
  }
  func.func @transform_3(%arg0: i32) -> (i32, i32) {
    %c0_i32 = arith.constant 0 : i32
    %c0_i32_0 = arith.constant 0 : i32
    %c0_i32_1 = arith.constant 0 : i32
    return %c0_i32, %c0_i32_0 : i32, i32
  }
  func.func @transform_4(%arg0: i32) -> (i32, i32) {
    %c0_i32 = arith.constant 0 : i32
    %c0_i32_0 = arith.constant 0 : i32
    %c0_i32_1 = arith.constant 0 : i32
    return %c0_i32, %c0_i32_0 : i32, i32
  }
  func.func @transform_5(%arg0: i32) -> (i32, i32) {
    %c0_i32 = arith.constant 0 : i32
    %c0_i32_0 = arith.constant 0 : i32
    %c0_i32_1 = arith.constant 0 : i32
    return %c0_i32, %c0_i32_0 : i32, i32
  }
  func.func @transform_6(%arg0: i32) -> (i32, i32) {
    %c0_i32 = arith.constant 0 : i32
    %c0_i32_0 = arith.constant 0 : i32
    %c0_i32_1 = arith.constant 0 : i32
    return %c0_i32, %c0_i32_0 : i32, i32
  }
  func.func @transform_7(%arg0: i32) -> (i32, i32) {
    %c0_i32 = arith.constant 0 : i32
    %c0_i32_0 = arith.constant 0 : i32
    %c0_i32_1 = arith.constant 0 : i32
    return %c0_i32, %c0_i32_0 : i32, i32
  }
  func.func @transform_8(%arg0: i32) -> (i32, i32) {
    %c0_i32 = arith.constant 0 : i32
    %c0_i32_0 = arith.constant 0 : i32
    %c0_i32_1 = arith.constant 0 : i32
    return %c0_i32, %c0_i32_0 : i32, i32
  }
  func.func @transform_9(%arg0: i32) -> (i32, i32) {
    %c0_i32 = arith.constant 0 : i32
    %c0_i32_0 = arith.constant 0 : i32
    %c0_i32_1 = arith.constant 0 : i32
    return %c0_i32, %c0_i32_0 : i32, i32
  }
  func.func @transform_10(%arg0: i32) -> (i32, i32) {
    %c0_i32 = arith.constant 0 : i32
    %c0_i32_0 = arith.constant 0 : i32
    %c0_i32_1 = arith.constant 0 : i32
    return %c0_i32, %c0_i32_0 : i32, i32
  }
  func.func @transform_11(%arg0: i32) -> (i32, i32) {
    %c0_i32 = arith.constant 0 : i32
    %c0_i32_0 = arith.constant 0 : i32
    %c0_i32_1 = arith.constant 0 : i32
    return %c0_i32, %c0_i32_0 : i32, i32
  }
}

</mosaic_0001>

<bundles_post_ra>
// kernel: tpu_custom_call.1
= control target key start
LH: loop header
LB: loop body
LE: loop exit
PB: predicated region body
PF: predicated region fallthrough
CT: control target
= control target key end

     0   :  { %s6412_s0 = inlined_call_operand.hbm [shape: f32[8,8,128], index: 0, kind: input, shape index: {}]   ;;  %s6413_s1 = inlined_call_operand.hbm [shape: f32[128,512], index: 1, kind: input, shape index: {}]   ;;  %s6414_s2 = inlined_call_operand.hbm [shape: f32[128,512], index: 2, kind: input, shape index: {}]   ;;  %s6415_s3 = inlined_call_operand.vmem [shape: f32[1,512], index: 3, kind: input, shape index: {}]   ;;  %s6416_s4 = inlined_call_operand.hbm [shape: f32[128,512], index: 4, kind: input, shape index: {}]   ;;  %s6417_s5 = inlined_call_operand.hbm [shape: f32[128,512], index: 5, kind: input, shape index: {}]   ;;  %s6418_s6 = inlined_call_operand.hbm [shape: f32[1,512], index: 6, kind: input, shape index: {}]   ;;  %s6419_s7 = inlined_call_operand.vmem [shape: f32[1,128], index: 7, kind: input, shape index: {}]   ;;  %s6420_s8 = inlined_call_operand.<no memory space> [shape: f32[1,1], index: 8, kind: input, shape index: {}]   ;;  %s6421_s9 = inlined_call_operand.hbm [shape: f32[128,128], index: 9, kind: input, shape index: {}]   ;;  %s6422_s10 = inlined_call_operand.vmem [shape: f32[1,128], index: 10, kind: input, shape index: {}]   ;;  %s6423_s11 = inlined_call_operand.hbm [shape: f32[8,128], index: 11, kind: output, shape index: {}]  }
   0x1   :  { %v16_v0 = vstv %s6420_s8 }
   0x2   :  { %17 = vst [vmem:[#allocation6] sm:$0x1] %v16_v0 }
   0x3   :  { %18 = vsyncpa [#allocation8], 0 }
   0x4   :  { %19 = vsyncpa [#allocation11], 0 }
   0x5   :  { %20 = vsyncpa [#allocation14], 0 }
   0x6   :  { %21 = vsyncpa [#allocation17], 0  ;;  %s40_s21 = sshll.u32 %s6413_s1, 4  ;;  %s41_s21 = int_to_ptr.hbm [resolvable:$true] %s40_s21 }
   0x7   :  { %22 = vsyncpa [#allocation9], 0  ;;  %s4247_s22 = smov [#allocation10]   ;;  %s68_s26 = sshll.u32 %s6416_s4, 4  ;;  %s69_s26 = int_to_ptr.hbm [resolvable:$true] %s68_s26 }
   0x8   :  { %s42_s23 = sshll.u32 %s4247_s22, 4  ;;  %s4248_s27 = smov 512   ;;  %s43_s23 = int_to_ptr.vmem [resolvable:$true] %s42_s23 }
   0x9   :  { %s4249_s8 = smov 32   ;;  %s4250_s28 = smov [#allocation13]  }
   0xa   :  { %48 = dma.hbm_to_vmem [thread:$0]  %s41_s21, 8192, %s43_s23, [#allocation11], %s4248_s27, %s4248_s27, %s4249_s8  }
   0xb   :  { %s70_s29 = sshll.u32 %s4250_s28, 4  ;;  %s95_s12 = sshll.u32 %s6418_s6, 4  ;;  %s71_s29 = int_to_ptr.vmem [resolvable:$true] %s70_s29  ;;  %s96_s12 = int_to_ptr.hbm [resolvable:$true] %s95_s12 }
   0xc   :  { %76 = dma.hbm_to_vmem [thread:$0]  %s69_s26, 8192, %s71_s29, [#allocation14], %s4248_s27, %s4248_s27, %s4249_s8  }
   0xd   :  { %s27_s14 = sshll.u32 %s6412_s0, 4  ;;  %s4251_s15 = smov [#allocation16]   ;;  %s28_s14 = int_to_ptr.hbm [resolvable:$true] %s27_s14 }
   0xe   :  { %s97_s16 = sshll.u32 %s4251_s15, 4  ;;  %s4252_s17 = smov [#allocation7]   ;;  %s98_s16 = int_to_ptr.vmem [resolvable:$true] %s97_s16 }
   0xf   :  { %100 = dma.hbm_to_vmem [thread:$0]  %s96_s12, 64, %s98_s16, [#allocation17]  }
  0x10   :  { %s29_s18 = sshll.u32 %s4252_s17, 4  ;;  %s4253_s19 = smov 128   ;;  %s30_s18 = int_to_ptr.vmem [resolvable:$true] %s29_s18 }
  0x11   :  { %s4254_s6 = smov 8   ;;  %s53_s22 = sshll.u32 %s6414_s2, 4  ;;  %s54_s22 = int_to_ptr.hbm [resolvable:$true] %s53_s22 }
  0x12   :  { %35 = dma.hbm_to_vmem [thread:$0]  %s28_s14, 1024, %s30_s18, [#allocation8], %s4253_s19, %s4253_s19, %s4254_s6  }
  0x13   :  { %s4255_s23 = smov [#allocation12]   ;;  %s81_s26 = sshll.u32 %s6417_s5, 4  ;;  %s82_s26 = int_to_ptr.hbm [resolvable:$true] %s81_s26 }
  0x14   :  { %s55_s24 = sshll.u32 %s4255_s23, 4  ;;  %s4256_s28 = smov [#allocation15]   ;;  %s56_s24 = int_to_ptr.vmem [resolvable:$true] %s55_s24 }
  0x15   :  { %61 = dma.hbm_to_vmem [thread:$0]  %s54_s22, 8192, %s56_s24, [#allocation11], %s4248_s27, %s4248_s27, %s4249_s8  }
  0x16   :  { %s83_s29 = sshll.u32 %s4256_s28, 4  ;;  %s109_s12 = sshll.u32 %s6421_s9, 4  ;;  %s84_s29 = int_to_ptr.vmem [resolvable:$true] %s83_s29  ;;  %s110_s12 = int_to_ptr.hbm [resolvable:$true] %s109_s12 }
  0x17   :  { %89 = dma.hbm_to_vmem [thread:$0]  %s82_s26, 8192, %s84_s29, [#allocation14], %s4248_s27, %s4248_s27, %s4249_s8  }
  0x18   :  { %s4257_s2 = smov [#allocation18]  }
  0x19   :  { %s111_s4 = sshll.u32 %s4257_s2, 4  ;;  %s112_s4 = int_to_ptr.vmem [resolvable:$true] %s111_s4 }
  0x1a   :  { %117 = dma.hbm_to_vmem [thread:$0]  %s110_s12, 2048, %s112_s4, [#allocation17], %s4253_s19, %s4253_s19, %s4254_s6  }
  0x1b   :  { %4237 = dma.done.wait [#allocation8], 1024  }
  0x1c   :  { %4238 = vsyncadd [#allocation8], 4294966272 }
  0x1d   :  { %4239 = dma.done.wait [#allocation11], 16384  }
  0x1e   :  { %4240 = vsyncadd [#allocation11], 4294950912 }
  0x1f   :  { %4241 = dma.done.wait [#allocation14], 16384  }
  0x20   :  { %4242 = vsyncadd [#allocation14], 4294950912 }
  0x21   :  { %4243 = dma.done.wait [#allocation17], 2112  }
  0x22   :  { %4244 = vsyncadd [#allocation17], 4294965184  ;;  %v208_v1 = vld [vmem:[#allocation10 + $0x1e0] sm:$0xff]  ;;  %v209_v2 = vld [vmem:[#allocation10 + $0x1e8] sm:$0xff]  ;;  %s4260_s15 = smov [#allocation19]   ;;  %s3561_s19 = sshll.u32 %s6423_s11, 4  ;;  %s3562_s19 = int_to_ptr.hbm [resolvable:$true] %s3561_s19 }
  0x23   :  { %v210_v3 = vld [vmem:[#allocation10 + $0x1f0] sm:$0xff]  ;;  %294 = vmatpush.msra.mxu0 %v208_v1  ;;  %335 = vmatpush.msra.mxu1 %v209_v2  ;;  %v211_v4 = vld [vmem:[#allocation10 + $0x1f8] sm:$0xff]  ;;  %v204_v5 = vld [vmem:[#allocation10 + $0x1c0] sm:$0xff]  ;;  %s3559_s16 = sshll.u32 %s4260_s15, 4  ;;  %s3560_s16 = int_to_ptr.vmem [resolvable:$true] %s3559_s16 }
  0x24   :  { %v205_v6 = vld [vmem:[#allocation10 + $0x1c8] sm:$0xff]  ;;  %376 = vmatpush.msra.mxu2 %v210_v3  ;;  %417 = vmatpush.msra.mxu3 %v211_v4  ;;  %v206_v7 = vld [vmem:[#allocation10 + $0x1d0] sm:$0xff]  ;;  %v207_v8 = vld [vmem:[#allocation10 + $0x1d8] sm:$0xff] }
  0x25   :  { %v200_v9 = vld [vmem:[#allocation10 + $0x1a0] sm:$0xff]  ;;  %295 = vmatpush.msra.mxu0 %v204_v5  ;;  %336 = vmatpush.msra.mxu1 %v205_v6  ;;  %v201_v10 = vld [vmem:[#allocation10 + $0x1a8] sm:$0xff]  ;;  %v202_v11 = vld [vmem:[#allocation10 + $0x1b0] sm:$0xff] }
  0x26   :  { %v203_v12 = vld [vmem:[#allocation10 + $0x1b8] sm:$0xff]  ;;  %377 = vmatpush.msra.mxu2 %v206_v7  ;;  %418 = vmatpush.msra.mxu3 %v207_v8  ;;  %v196_v13 = vld [vmem:[#allocation10 + $0x180] sm:$0xff]  ;;  %v197_v14 = vld [vmem:[#allocation10 + $0x188] sm:$0xff] }
  0x27   :  { %296 = vmatpush.msra.mxu0 %v200_v9  ;;  %337 = vmatpush.msra.mxu1 %v201_v10  ;;  %v198_v15 = vld [vmem:[#allocation10 + $0x190] sm:$0xff]  ;;  %v199_v16 = vld [vmem:[#allocation10 + $0x198] sm:$0xff]  ;;  %v192_v17 = vld [vmem:[#allocation10 + $0x160] sm:$0xff] }
  0x28   :  { %378 = vmatpush.msra.mxu2 %v202_v11  ;;  %419 = vmatpush.msra.mxu3 %v203_v12  ;;  %v193_v18 = vld [vmem:[#allocation10 + $0x168] sm:$0xff]  ;;  %v194_v19 = vld [vmem:[#allocation10 + $0x170] sm:$0xff]  ;;  %v195_v20 = vld [vmem:[#allocation10 + $0x178] sm:$0xff] }
  0x29   :  { %297 = vmatpush.msra.mxu0 %v196_v13  ;;  %338 = vmatpush.msra.mxu1 %v197_v14  ;;  %v188_v21 = vld [vmem:[#allocation10 + $0x140] sm:$0xff]  ;;  %v189_v22 = vld [vmem:[#allocation10 + $0x148] sm:$0xff]  ;;  %v190_v23 = vld [vmem:[#allocation10 + $0x150] sm:$0xff] }
  0x2a   :  { %379 = vmatpush.msra.mxu2 %v198_v15  ;;  %420 = vmatpush.msra.mxu3 %v199_v16  ;;  %v191_v24 = vld [vmem:[#allocation10 + $0x158] sm:$0xff]  ;;  %v184_v25 = vld [vmem:[#allocation10 + $0x120] sm:$0xff]  ;;  %v185_v26 = vld [vmem:[#allocation10 + $0x128] sm:$0xff] }
  0x2b   :  { %298 = vmatpush.msra.mxu0 %v192_v17  ;;  %339 = vmatpush.msra.mxu1 %v193_v18  ;;  %v186_v27 = vld [vmem:[#allocation10 + $0x130] sm:$0xff]  ;;  %v187_v28 = vld [vmem:[#allocation10 + $0x138] sm:$0xff]  ;;  %v180_v29 = vld [vmem:[#allocation10 + $0x100] sm:$0xff] }
  0x2c   :  { %380 = vmatpush.msra.mxu2 %v194_v19  ;;  %421 = vmatpush.msra.mxu3 %v195_v20  ;;  %v181_v30 = vld [vmem:[#allocation10 + $0x108] sm:$0xff]  ;;  %v182_v31 = vld [vmem:[#allocation10 + $0x110] sm:$0xff]  ;;  %v183_v32 = vld [vmem:[#allocation10 + $0x118] sm:$0xff] }
  0x2d   :  { %299 = vmatpush.msra.mxu0 %v188_v21  ;;  %340 = vmatpush.msra.mxu1 %v189_v22  ;;  %v176_v33 = vld [vmem:[#allocation10 + $0xe0] sm:$0xff]  ;;  %v177_v34 = vld [vmem:[#allocation10 + $0xe8] sm:$0xff]  ;;  %v178_v35 = vld [vmem:[#allocation10 + $0xf0] sm:$0xff] }
  0x2e   :  { %381 = vmatpush.msra.mxu2 %v190_v23  ;;  %422 = vmatpush.msra.mxu3 %v191_v24  ;;  %v179_v36 = vld [vmem:[#allocation10 + $0xf8] sm:$0xff]  ;;  %v172_v37 = vld [vmem:[#allocation10 + $0xc0] sm:$0xff]  ;;  %v173_v38 = vld [vmem:[#allocation10 + $0xc8] sm:$0xff] }
  0x2f   :  { %300 = vmatpush.msra.mxu0 %v184_v25  ;;  %341 = vmatpush.msra.mxu1 %v185_v26  ;;  %v174_v39 = vld [vmem:[#allocation10 + $0xd0] sm:$0xff]  ;;  %v175_v40 = vld [vmem:[#allocation10 + $0xd8] sm:$0xff]  ;;  %v168_v41 = vld [vmem:[#allocation10 + $0xa0] sm:$0xff] }
  0x30   :  { %382 = vmatpush.msra.mxu2 %v186_v27  ;;  %423 = vmatpush.msra.mxu3 %v187_v28  ;;  %v169_v42 = vld [vmem:[#allocation10 + $0xa8] sm:$0xff]  ;;  %v170_v43 = vld [vmem:[#allocation10 + $0xb0] sm:$0xff]  ;;  %v171_v44 = vld [vmem:[#allocation10 + $0xb8] sm:$0xff] }
  0x31   :  { %301 = vmatpush.msra.mxu0 %v180_v29  ;;  %342 = vmatpush.msra.mxu1 %v181_v30  ;;  %v164_v45 = vld [vmem:[#allocation10 + $0x80] sm:$0xff]  ;;  %v165_v46 = vld [vmem:[#allocation10 + $0x88] sm:$0xff]  ;;  %v166_v47 = vld [vmem:[#allocation10 + $0x90] sm:$0xff] }
  0x32   :  { %383 = vmatpush.msra.mxu2 %v182_v31  ;;  %424 = vmatpush.msra.mxu3 %v183_v32  ;;  %v167_v48 = vld [vmem:[#allocation10 + $0x98] sm:$0xff]  ;;  %v160_v49 = vld [vmem:[#allocation10 + $0x60] sm:$0xff]  ;;  %v161_v50 = vld [vmem:[#allocation10 + $0x68] sm:$0xff] }
  0x33   :  { %302 = vmatpush.msra.mxu0 %v176_v33  ;;  %343 = vmatpush.msra.mxu1 %v177_v34  ;;  %v162_v51 = vld [vmem:[#allocation10 + $0x70] sm:$0xff]  ;;  %v163_v52 = vld [vmem:[#allocation10 + $0x78] sm:$0xff]  ;;  %v156_v53 = vld [vmem:[#allocation10 + $0x40] sm:$0xff] }
  0x34   :  { %384 = vmatpush.msra.mxu2 %v178_v35  ;;  %425 = vmatpush.msra.mxu3 %v179_v36  ;;  %v157_v54 = vld [vmem:[#allocation10 + $0x48] sm:$0xff]  ;;  %v158_v55 = vld [vmem:[#allocation10 + $0x50] sm:$0xff]  ;;  %v159_v56 = vld [vmem:[#allocation10 + $0x58] sm:$0xff] }
  0x35   :  { %303 = vmatpush.msra.mxu0 %v172_v37  ;;  %344 = vmatpush.msra.mxu1 %v173_v38  ;;  %v152_v57 = vld [vmem:[#allocation10 + $0x20] sm:$0xff]  ;;  %v153_v58 = vld [vmem:[#allocation10 + $0x28] sm:$0xff]  ;;  %v154_v59 = vld [vmem:[#allocation10 + $0x30] sm:$0xff] }
  0x36   :  { %385 = vmatpush.msra.mxu2 %v174_v39  ;;  %426 = vmatpush.msra.mxu3 %v175_v40  ;;  %v155_v60 = vld [vmem:[#allocation10 + $0x38] sm:$0xff]  ;;  %v148_v61 = vld [vmem:[#allocation10] sm:$0xff]  ;;  %v149_v62 = vld [vmem:[#allocation10 + $0x8] sm:$0xff] }
  0x37   :  { %304 = vmatpush.msra.mxu0 %v168_v41  ;;  %345 = vmatpush.msra.mxu1 %v169_v42  ;;  %v150_v63 = vld [vmem:[#allocation10 + $0x10] sm:$0xff]  ;;  %v151_v0 = vld [vmem:[#allocation10 + $0x18] sm:$0xff]  ;;  %v277_v1 = vld [vmem:[#allocation7] sm:$0xff] }
  0x38   :  { %386 = vmatpush.msra.mxu2 %v170_v43  ;;  %427 = vmatpush.msra.mxu3 %v171_v44  ;;  %v4357_v2 = vld [vmem:[#allocation12 + $0x1e0] sm:$0xff]  ;;  %v4359_v3 = vld [vmem:[#allocation12 + $0x1e8] sm:$0xff]  ;;  %v4361_v4 = vld [vmem:[#allocation12 + $0x1f8] sm:$0xff] }
  0x39   :  { %305 = vmatpush.msra.mxu0 %v164_v45  ;;  %346 = vmatpush.msra.mxu1 %v165_v46  ;;  %v4363_v5 = vld [vmem:[#allocation12 + $0x1f0] sm:$0xff]  ;;  %v4365_v6 = vld [vmem:[#allocation12 + $0x1c0] sm:$0xff]  ;;  %v4367_v7 = vld [vmem:[#allocation12 + $0x1c8] sm:$0xff] }
  0x3a   :  { %387 = vmatpush.msra.mxu2 %v166_v47  ;;  %428 = vmatpush.msra.mxu3 %v167_v48  ;;  %v4371_v8 = vld [vmem:[#allocation12 + $0x1d8] sm:$0xff]  ;;  %v4373_v9 = vld [vmem:[#allocation12 + $0x1d0] sm:$0xff]  ;;  %v4376_v10 = vld [vmem:[#allocation12 + $0x1a0] sm:$0xff] }
  0x3b   :  { %306 = vmatpush.msra.mxu0 %v160_v49  ;;  %347 = vmatpush.msra.mxu1 %v161_v50  ;;  %v4378_v11 = vld [vmem:[#allocation12 + $0x1a8] sm:$0xff]  ;;  %v4383_v12 = vld [vmem:[#allocation12 + $0x1b8] sm:$0xff]  ;;  %v4385_v13 = vld [vmem:[#allocation12 + $0x1b0] sm:$0xff] }
  0x3c   :  { %388 = vmatpush.msra.mxu2 %v162_v51  ;;  %429 = vmatpush.msra.mxu3 %v163_v52  ;;  %v278_v14 = vld [vmem:[#allocation7 + $0x8] sm:$0xff]  ;;  %v4391_v15 = vld [vmem:[#allocation12 + $0x180] sm:$0xff]  ;;  %v4397_v17 = vld [vmem:[#allocation12 + $0x198] sm:$0xff] }
  0x3d   :  { %307 = vmatpush.msra.mxu0 %v156_v53  ;;  %348 = vmatpush.msra.mxu1 %v157_v54  ;;  %v4393_v16 = vld [vmem:[#allocation12 + $0x188] sm:$0xff]  ;;  %v4399_v18 = vld [vmem:[#allocation12 + $0x190] sm:$0xff]  ;;  %v4401_v19 = vld [vmem:[#allocation12 + $0x160] sm:$0xff] }
  0x3e   :  { %389 = vmatpush.msra.mxu2 %v158_v55  ;;  %430 = vmatpush.msra.mxu3 %v159_v56  ;;  %v4403_v20 = vld [vmem:[#allocation12 + $0x168] sm:$0xff]  ;;  %v4407_v21 = vld [vmem:[#allocation12 + $0x178] sm:$0xff]  ;;  %v4409_v22 = vld [vmem:[#allocation12 + $0x170] sm:$0xff] }
  0x3f   :  { %308 = vmatpush.msra.mxu0 %v152_v57  ;;  %349 = vmatpush.msra.mxu1 %v153_v58  ;;  %v4412_v23 = vld [vmem:[#allocation12 + $0x140] sm:$0xff]  ;;  %v4414_v24 = vld [vmem:[#allocation12 + $0x148] sm:$0xff]  ;;  %v4419_v25 = vld [vmem:[#allocation12 + $0x158] sm:$0xff] }
  0x40   :  { %390 = vmatpush.msra.mxu2 %v154_v59  ;;  %431 = vmatpush.msra.mxu3 %v155_v60  ;;  %v4421_v26 = vld [vmem:[#allocation12 + $0x150] sm:$0xff]  ;;  %v4427_v28 = vld [vmem:[#allocation12 + $0x120] sm:$0xff]  ;;  %v4429_v29 = vld [vmem:[#allocation12 + $0x128] sm:$0xff] }
  0x41   :  { %309 = vmatpush.msra.mxu0 %v148_v61  ;;  %350 = vmatpush.msra.mxu1 %v149_v62  ;;  %v279_v27 = vld [vmem:[#allocation7 + $0x10] sm:$0xff]  ;;  %v4433_v30 = vld [vmem:[#allocation12 + $0x138] sm:$0xff]  ;;  %v4437_v32 = vld [vmem:[#allocation12 + $0x100] sm:$0xff] }
  0x42   :  { %391 = vmatpush.msra.mxu2 %v150_v63  ;;  %432 = vmatpush.msra.mxu3 %v151_v0  ;;  %v4435_v31 = vld [vmem:[#allocation12 + $0x130] sm:$0xff]  ;;  %v4439_v33 = vld [vmem:[#allocation12 + $0x108] sm:$0xff]  ;;  %v4443_v34 = vld [vmem:[#allocation12 + $0x118] sm:$0xff] }
  0x43   :  { %310 = vmatmul.f32.vlgmr.msra.gmra.mxu0 %v277_v1  ;;  %351 = vmatmul.f32.vlgmr.msra.gmra.mxu1 %v277_v1  ;;  %v4445_v35 = vld [vmem:[#allocation12 + $0x110] sm:$0xff]  ;;  %v4448_v36 = vld [vmem:[#allocation12 + $0xe0] sm:$0xff]  ;;  %v4450_v37 = vld [vmem:[#allocation12 + $0xe8] sm:$0xff] }
  0x44   :  { %392 = vmatmul.f32.vlgmr.msra.gmra.mxu2 %v277_v1  ;;  %433 = vmatmul.f32.vlgmr.msra.gmra.mxu3 %v277_v1  ;;  %v4455_v38 = vld [vmem:[#allocation12 + $0xf8] sm:$0xff]  ;;  %v4457_v39 = vld [vmem:[#allocation12 + $0xf0] sm:$0xff]  ;;  %v4463_v41 = vld [vmem:[#allocation12 + $0xc0] sm:$0xff] }
  0x45   :  { %498 = vmatpush.msrb.mxu0 %v4357_v2  ;;  %518 = vmatpush.msrb.mxu1 %v4359_v3  ;;  %v280_v40 = vld [vmem:[#allocation7 + $0x18] sm:$0xff]  ;;  %v4465_v42 = vld [vmem:[#allocation12 + $0xc8] sm:$0xff]  ;;  %v4471_v44 = vld [vmem:[#allocation12 + $0xd0] sm:$0xff] }
  0x46   :  { %558 = vmatpush.msrb.mxu3 %v4361_v4  ;;  %538 = vmatpush.msrb.mxu2 %v4363_v5  ;;  %v4469_v43 = vld [vmem:[#allocation12 + $0xd8] sm:$0xff]  ;;  %6699 = vst [vmem:[#allocation26_spill] sm:$0xff] %v4471_v44  ;;  %v4473_v45 = vld [vmem:[#allocation12 + $0xa0] sm:$0xff]  ;;  %v4475_v46 = vld [vmem:[#allocation12 + $0xa8] sm:$0xff] }
  0x47   :  { %499 = vmatpush.msrb.mxu0 %v4365_v6  ;;  %519 = vmatpush.msrb.mxu1 %v4367_v7  ;;  %6698 = vst [vmem:[#allocation25_spill] sm:$0xff] %v4469_v43  ;;  %v4479_v47 = vld [vmem:[#allocation12 + $0xb8] sm:$0xff]  ;;  %v4481_v48 = vld [vmem:[#allocation12 + $0xb0] sm:$0xff]  ;;  %v4484_v49 = vld [vmem:[#allocation12 + $0x80] sm:$0xff] }
  0x48   :  { %559 = vmatpush.msrb.mxu3 %v4371_v8  ;;  %539 = vmatpush.msrb.mxu2 %v4373_v9  ;;  %6700 = vst [vmem:[#allocation27_spill] sm:$0xff] %v4473_v45  ;;  %v4486_v50 = vld [vmem:[#allocation12 + $0x88] sm:$0xff]  ;;  %v4491_v51 = vld [vmem:[#allocation12 + $0x98] sm:$0xff]  ;;  %v4493_v52 = vld [vmem:[#allocation12 + $0x90] sm:$0xff] }
  0x49   :  { %500 = vmatpush.msrb.mxu0 %v4376_v10  ;;  %520 = vmatpush.msrb.mxu1 %v4378_v11  ;;  %6701 = vst [vmem:[#allocation28_spill] sm:$0xff] %v4475_v46  ;;  %v281_v53 = vld [vmem:[#allocation7 + $0x20] sm:$0xff]  ;;  %v4501_v55 = vld [vmem:[#allocation12 + $0x68] sm:$0xff]  ;;  %v4505_v56 = vld [vmem:[#allocation12 + $0x78] sm:$0xff] }
  0x4a   :  { %560 = vmatpush.msrb.mxu3 %v4383_v12  ;;  %540 = vmatpush.msrb.mxu2 %v4385_v13  ;;  %6702 = vst [vmem:[#allocation29_spill] sm:$0xff] %v4479_v47  ;;  %v4499_v54 = vld [vmem:[#allocation12 + $0x60] sm:$0xff]  ;;  %v4507_v57 = vld [vmem:[#allocation12 + $0x70] sm:$0xff]  ;;  %v4511_v59 = vld [vmem:[#allocation12 + $0x48] sm:$0xff] }
  0x4b   :  { %313 = vmatmul.f32.gmra.mxu0 %v278_v14  ;;  %354 = vmatmul.f32.gmra.mxu1 %v278_v14  ;;  %6703 = vst [vmem:[#allocation30_spill] sm:$0xff] %v4481_v48  ;;  %v4509_v58 = vld [vmem:[#allocation12 + $0x40] sm:$0xff]  ;;  %v4515_v60 = vld [vmem:[#allocation12 + $0x58] sm:$0xff]  ;;  %v4517_v61 = vld [vmem:[#allocation12 + $0x50] sm:$0xff] }
  0x4c   :  { %395 = vmatmul.f32.gmra.mxu2 %v278_v14  ;;  %436 = vmatmul.f32.gmra.mxu3 %v278_v14  ;;  %6704 = vst [vmem:[#allocation31_spill] sm:$0xff] %v4484_v49  ;;  %v4520_v62 = vld [vmem:[#allocation12 + $0x20] sm:$0xff]  ;;  %v4522_v63 = vld [vmem:[#allocation12 + $0x28] sm:$0xff]  ;;  %v4527_v0 = vld [vmem:[#allocation12 + $0x30] sm:$0xff] }
  0x4d   :  { %501 = vmatpush.msrb.mxu0 %v4391_v15  ;;  %521 = vmatpush.msrb.mxu1 %v4393_v16  ;;  %6705 = vst [vmem:[#allocation32_spill] sm:$0xff] %v4486_v50  ;;  %v4529_v1 = vld [vmem:[#allocation12 + $0x38] sm:$0xff]  ;;  %v282_v14 = vld [vmem:[#allocation7 + $0x28] sm:$0xff] }
  0x4e   :  { %561 = vmatpush.msrb.mxu3 %v4397_v17  ;;  %541 = vmatpush.msrb.mxu2 %v4399_v18  ;;  %6706 = vst [vmem:[#allocation33_spill] sm:$0xff] %v4491_v51 }
  0x4f   :  { %502 = vmatpush.msrb.mxu0 %v4401_v19  ;;  %522 = vmatpush.msrb.mxu1 %v4403_v20  ;;  %6707 = vst [vmem:[#allocation34_spill] sm:$0xff] %v4493_v52 }
  0x50   :  { %562 = vmatpush.msrb.mxu3 %v4407_v21  ;;  %542 = vmatpush.msrb.mxu2 %v4409_v22  ;;  %6708 = vst [vmem:[#allocation35_spill] sm:$0xff] %v4499_v54 }
  0x51   :  { %503 = vmatpush.msrb.mxu0 %v4412_v23  ;;  %523 = vmatpush.msrb.mxu1 %v4414_v24  ;;  %6709 = vst [vmem:[#allocation36_spill] sm:$0xff] %v4501_v55 }
  0x52   :  { %563 = vmatpush.msrb.mxu3 %v4419_v25  ;;  %543 = vmatpush.msrb.mxu2 %v4421_v26  ;;  %6710 = vst [vmem:[#allocation37_spill] sm:$0xff] %v4505_v56 }
  0x53   :  { %316 = vmatmul.f32.gmra.mxu0 %v279_v27  ;;  %357 = vmatmul.f32.gmra.mxu1 %v279_v27  ;;  %6711 = vst [vmem:[#allocation38_spill] sm:$0xff] %v4507_v57 }
  0x54   :  { %398 = vmatmul.f32.gmra.mxu2 %v279_v27  ;;  %439 = vmatmul.f32.gmra.mxu3 %v279_v27  ;;  %6712 = vst [vmem:[#allocation39_spill] sm:$0xff] %v4509_v58  ;;  %v4535_v27 = vld [vmem:[#allocation12] sm:$0xff] }
  0x55   :  { %504 = vmatpush.msrb.mxu0 %v4427_v28  ;;  %524 = vmatpush.msrb.mxu1 %v4429_v29  ;;  %6713 = vst [vmem:[#allocation40_spill] sm:$0xff] %v4511_v59 }
  0x56   :  { %564 = vmatpush.msrb.mxu3 %v4433_v30  ;;  %544 = vmatpush.msrb.mxu2 %v4435_v31  ;;  %6714 = vst [vmem:[#allocation41_spill] sm:$0xff] %v4515_v60 }
  0x57   :  { %505 = vmatpush.msrb.mxu0 %v4437_v32  ;;  %525 = vmatpush.msrb.mxu1 %v4439_v33  ;;  %6715 = vst [vmem:[#allocation42_spill] sm:$0xff] %v4517_v61 }
  0x58   :  { %565 = vmatpush.msrb.mxu3 %v4443_v34  ;;  %545 = vmatpush.msrb.mxu2 %v4445_v35  ;;  %6716 = vst [vmem:[#allocation43_spill] sm:$0xff] %v4520_v62 }
  0x59   :  { %506 = vmatpush.msrb.mxu0 %v4448_v36  ;;  %526 = vmatpush.msrb.mxu1 %v4450_v37  ;;  %6717 = vst [vmem:[#allocation44_spill] sm:$0xff] %v4522_v63 }
  0x5a   :  { %566 = vmatpush.msrb.mxu3 %v4455_v38  ;;  %546 = vmatpush.msrb.mxu2 %v4457_v39  ;;  %6718 = vst [vmem:[#allocation45_spill] sm:$0xff] %v4527_v0 }
  0x5b   :  { %319 = vmatmul.f32.gmra.mxu0 %v280_v40  ;;  %360 = vmatmul.f32.gmra.mxu1 %v280_v40  ;;  %6719 = vst [vmem:[#allocation46_spill] sm:$0xff] %v4529_v1 }
  0x5c   :  { %401 = vmatmul.f32.gmra.mxu2 %v280_v40  ;;  %442 = vmatmul.f32.gmra.mxu3 %v280_v40  ;;  %6720 = vst [vmem:[#allocation47_spill] sm:$0xff] %v4535_v27  ;;  %v4537_v40 = vld [vmem:[#allocation12 + $0x8] sm:$0xff] }
  0x5d   :  { %507 = vmatpush.msrb.mxu0 %v4463_v41  ;;  %527 = vmatpush.msrb.mxu1 %v4465_v42  ;;  %6721 = vst [vmem:[#allocation48_spill] sm:$0xff] %v4537_v40 }
  0x5e   :  { %567 = vmatpush.msrb.mxu3 %v4469_v43  ;;  %547 = vmatpush.msrb.mxu2 %v4471_v44 }
  0x5f   :  { %508 = vmatpush.msrb.mxu0 %v4473_v45  ;;  %528 = vmatpush.msrb.mxu1 %v4475_v46 }
  0x60   :  { %568 = vmatpush.msrb.mxu3 %v4479_v47  ;;  %548 = vmatpush.msrb.mxu2 %v4481_v48 }
  0x61   :  { %509 = vmatpush.msrb.mxu0 %v4484_v49  ;;  %529 = vmatpush.msrb.mxu1 %v4486_v50 }
  0x62   :  { %569 = vmatpush.msrb.mxu3 %v4491_v51  ;;  %549 = vmatpush.msrb.mxu2 %v4493_v52 }
  0x63   :  { %322 = vmatmul.f32.gmra.mxu0 %v281_v53  ;;  %363 = vmatmul.f32.gmra.mxu1 %v281_v53 }
  0x64   :  { %404 = vmatmul.f32.gmra.mxu2 %v281_v53  ;;  %445 = vmatmul.f32.gmra.mxu3 %v281_v53  ;;  %v4541_v53 = vld [vmem:[#allocation12 + $0x10] sm:$0xff] }
  0x65   :  { %510 = vmatpush.msrb.mxu0 %v4499_v54  ;;  %530 = vmatpush.msrb.mxu1 %v4501_v55  ;;  %6722 = vst [vmem:[#allocation49_spill] sm:$0xff] %v4541_v53 }
  0x66   :  { %570 = vmatpush.msrb.mxu3 %v4505_v56  ;;  %550 = vmatpush.msrb.mxu2 %v4507_v57 }
  0x67   :  { %511 = vmatpush.msrb.mxu0 %v4509_v58  ;;  %531 = vmatpush.msrb.mxu1 %v4511_v59  ;;  %v4543_v59 = vld [vmem:[#allocation12 + $0x18] sm:$0xff] }
  0x68   :  { %571 = vmatpush.msrb.mxu3 %v4515_v60  ;;  %551 = vmatpush.msrb.mxu2 %v4517_v61  ;;  %6723 = vst [vmem:[#allocation50_spill] sm:$0xff] %v4543_v59 }
  0x69   :  { %512 = vmatpush.msrb.mxu0 %v4520_v62  ;;  %532 = vmatpush.msrb.mxu1 %v4522_v63 }
  0x6a   :  { %552 = vmatpush.msrb.mxu2 %v4527_v0  ;;  %572 = vmatpush.msrb.mxu3 %v4529_v1  ;;  %v283_v1 = vld [vmem:[#allocation7 + $0x30] sm:$0xff] }
  0x6b   :  { %325 = vmatmul.f32.gmra.mxu0 %v282_v14  ;;  %366 = vmatmul.f32.gmra.mxu1 %v282_v14 }
  0x6c   :  { %407 = vmatmul.f32.gmra.mxu2 %v282_v14  ;;  %448 = vmatmul.f32.gmra.mxu3 %v282_v14  ;;  %v284_v14 = vld [vmem:[#allocation7 + $0x38] sm:$0xff] }
  0x6d   :  { %513 = vmatpush.msrb.mxu0 %v4535_v27  ;;  %533 = vmatpush.msrb.mxu1 %v4537_v40 }
  0x6e   :  { %553 = vmatpush.msrb.mxu2 %v4541_v53  ;;  %573 = vmatpush.msrb.mxu3 %v4543_v59 }
  0x6f   :  { %655 = vmatpush.msra.mxu0 %v4357_v2  ;;  %675 = vmatpush.msra.mxu1 %v4359_v3 }
  0x70   :  { %695 = vmatpush.msra.mxu2 %v4363_v5  ;;  %715 = vmatpush.msra.mxu3 %v4361_v4 }
  0x71   :  { %656 = vmatpush.msra.mxu0 %v4365_v6  ;;  %676 = vmatpush.msra.mxu1 %v4367_v7 }
  0x72   :  { %696 = vmatpush.msra.mxu2 %v4373_v9  ;;  %716 = vmatpush.msra.mxu3 %v4371_v8 }
  0x73   :  { %328 = vmatmul.f32.gmra.mxu0 %v283_v1  ;;  %369 = vmatmul.f32.gmra.mxu1 %v283_v1 }
  0x74   :  { %410 = vmatmul.f32.gmra.mxu2 %v283_v1  ;;  %451 = vmatmul.f32.gmra.mxu3 %v283_v1  ;;  %v6428_v1 = vmov 0.0  }
  0x75   :  { %657 = vmatpush.msra.mxu0 %v4376_v10  ;;  %677 = vmatpush.msra.mxu1 %v4378_v11 }
  0x76   :  { %697 = vmatpush.msra.mxu2 %v4385_v13  ;;  %717 = vmatpush.msra.mxu3 %v4383_v12 }
  0x77   :  { %658 = vmatpush.msra.mxu0 %v4391_v15  ;;  %678 = vmatpush.msra.mxu1 %v4393_v16 }
  0x78   :  { %698 = vmatpush.msra.mxu2 %v4399_v18  ;;  %718 = vmatpush.msra.mxu3 %v4397_v17 }
  0x79   :  { %659 = vmatpush.msra.mxu0 %v4401_v19  ;;  %679 = vmatpush.msra.mxu1 %v4403_v20 }
  0x7a   :  { %699 = vmatpush.msra.mxu2 %v4409_v22  ;;  %719 = vmatpush.msra.mxu3 %v4407_v21 }
  0x7b   :  { %331 = vmatmul.f32.gmra.mxu0 %v284_v14  ;;  %372 = vmatmul.f32.gmra.mxu1 %v284_v14 }
  0x7c   :  { %413 = vmatmul.f32.gmra.mxu2 %v284_v14  ;;  %454 = vmatmul.f32.gmra.mxu3 %v284_v14  ;;  %v6724_v14 = vld [vmem:[#allocation40_spill] sm:$0xff] }
  0x7d   :  { %660 = vmatpush.msra.mxu0 %v4412_v23  ;;  %680 = vmatpush.msra.mxu1 %v4414_v24 }
  0x7e   :  { %700 = vmatpush.msra.mxu2 %v4421_v26  ;;  %720 = vmatpush.msra.mxu3 %v4419_v25 }
  0x7f   :  { %661 = vmatpush.msra.mxu0 %v4427_v28  ;;  %681 = vmatpush.msra.mxu1 %v4429_v29 }
  0x80   :  { %701 = vmatpush.msra.mxu2 %v4435_v31  ;;  %721 = vmatpush.msra.mxu3 %v4433_v30 }
  0x81   :  { %662 = vmatpush.msra.mxu0 %v4437_v32  ;;  %682 = vmatpush.msra.mxu1 %v4439_v33 }
  0x82   :  { %702 = vmatpush.msra.mxu2 %v4445_v35  ;;  %722 = vmatpush.msra.mxu3 %v4443_v34 }
  0x83   :  { %514 = vmatmul.f32.vlgmr.msrb.gmra.mxu0 %v6428_v1  ;;  %534 = vmatmul.f32.vlgmr.msrb.gmra.mxu1 %v6428_v1 }
  0x84   :  { %554 = vmatmul.f32.vlgmr.msrb.gmra.mxu2 %v6428_v1  ;;  %574 = vmatmul.f32.vlgmr.msrb.gmra.mxu3 %v6428_v1  ;;  %v6725_v1 = vld [vmem:[#allocation46_spill] sm:$0xff] }
  0x85   :  { %663 = vmatpush.msra.mxu0 %v4448_v36  ;;  %683 = vmatpush.msra.mxu1 %v4450_v37 }
  0x86   :  { %703 = vmatpush.msra.mxu2 %v4457_v39  ;;  %723 = vmatpush.msra.mxu3 %v4455_v38 }
  0x87   :  { %664 = vmatpush.msra.mxu0 %v4463_v41  ;;  %684 = vmatpush.msra.mxu1 %v4465_v42 }
  0x88   :  { %704 = vmatpush.msra.mxu2 %v4471_v44  ;;  %724 = vmatpush.msra.mxu3 %v4469_v43 }
  0x89   :  { %665 = vmatpush.msra.mxu0 %v4473_v45  ;;  %685 = vmatpush.msra.mxu1 %v4475_v46 }
  0x8a   :  { %705 = vmatpush.msra.mxu2 %v4481_v48  ;;  %725 = vmatpush.msra.mxu3 %v4479_v47 }
  0x8b   :  { %666 = vmatpush.msra.mxu0 %v4484_v49  ;;  %686 = vmatpush.msra.mxu1 %v4486_v50 }
  0x8c   :  { %706 = vmatpush.msra.mxu2 %v4493_v52  ;;  %726 = vmatpush.msra.mxu3 %v4491_v51 }
  0x8d   :  { %667 = vmatpush.msra.mxu0 %v4499_v54  ;;  %687 = vmatpush.msra.mxu1 %v4501_v55 }
  0x8e   :  { %707 = vmatpush.msra.mxu2 %v4507_v57  ;;  %727 = vmatpush.msra.mxu3 %v4505_v56 }
  0x8f   :  { %668 = vmatpush.msra.mxu0 %v4509_v58  ;;  %688 = vmatpush.msra.mxu1 %v6724_v14 }
  0x90   :  { %708 = vmatpush.msra.mxu2 %v4517_v61  ;;  %728 = vmatpush.msra.mxu3 %v4515_v60 }
  0x91   :  { %669 = vmatpush.msra.mxu0 %v4520_v62  ;;  %689 = vmatpush.msra.mxu1 %v4522_v63 }
  0x92   :  { %709 = vmatpush.msra.mxu2 %v4527_v0  ;;  %729 = vmatpush.msra.mxu3 %v6725_v1 }
  0x93   :  { %670 = vmatpush.msra.mxu0 %v4535_v27  ;;  %690 = vmatpush.msra.mxu1 %v4537_v40 }
  0x94   :  { %710 = vmatpush.msra.mxu2 %v4541_v53  ;;  %730 = vmatpush.msra.mxu3 %v4543_v59 }
  0x95   :  { %813 = vmatpush.msrb.mxu0 %v4357_v2  ;;  %833 = vmatpush.msrb.mxu1 %v4359_v3 }
  0x96   :  { %853 = vmatpush.msrb.mxu2 %v4363_v5  ;;  %873 = vmatpush.msrb.mxu3 %v4361_v4 }
  0x97   :  { %814 = vmatpush.msrb.mxu0 %v4365_v6  ;;  %834 = vmatpush.msrb.mxu1 %v4367_v7 }
  0x98   :  { %854 = vmatpush.msrb.mxu2 %v4373_v9  ;;  %874 = vmatpush.msrb.mxu3 %v4371_v8 }
  0x99   :  { %815 = vmatpush.msrb.mxu0 %v4376_v10  ;;  %835 = vmatpush.msrb.mxu1 %v4378_v11 }
  0x9a   :  { %855 = vmatpush.msrb.mxu2 %v4385_v13  ;;  %875 = vmatpush.msrb.mxu3 %v4383_v12 }
  0x9b   :  { %816 = vmatpush.msrb.mxu0 %v4391_v15  ;;  %836 = vmatpush.msrb.mxu1 %v4393_v16 }
  0x9c   :  { %856 = vmatpush.msrb.mxu2 %v4399_v18  ;;  %876 = vmatpush.msrb.mxu3 %v4397_v17 }
  0x9d   :  { %817 = vmatpush.msrb.mxu0 %v4401_v19  ;;  %837 = vmatpush.msrb.mxu1 %v4403_v20 }
  0x9e   :  { %857 = vmatpush.msrb.mxu2 %v4409_v22  ;;  %877 = vmatpush.msrb.mxu3 %v4407_v21 }
  0x9f   :  { %818 = vmatpush.msrb.mxu0 %v4412_v23  ;;  %838 = vmatpush.msrb.mxu1 %v4414_v24 }
  0xa0   :  { %858 = vmatpush.msrb.mxu2 %v4421_v26  ;;  %878 = vmatpush.msrb.mxu3 %v4419_v25 }
  0xa1   :  { %819 = vmatpush.msrb.mxu0 %v4427_v28  ;;  %839 = vmatpush.msrb.mxu1 %v4429_v29 }
  0xa2   :  { %859 = vmatpush.msrb.mxu2 %v4435_v31  ;;  %879 = vmatpush.msrb.mxu3 %v4433_v30 }
  0xa3   :  { %820 = vmatpush.msrb.mxu0 %v4437_v32  ;;  %840 = vmatpush.msrb.mxu1 %v4439_v33 }
  0xa4   :  { %860 = vmatpush.msrb.mxu2 %v4445_v35  ;;  %880 = vmatpush.msrb.mxu3 %v4443_v34 }
  0xa5   :  { %821 = vmatpush.msrb.mxu0 %v4448_v36  ;;  %841 = vmatpush.msrb.mxu1 %v4450_v37 }
  0xa6   :  { %861 = vmatpush.msrb.mxu2 %v4457_v39  ;;  %881 = vmatpush.msrb.mxu3 %v4455_v38 }
  0xa7   :  { %822 = vmatpush.msrb.mxu0 %v4463_v41  ;;  %842 = vmatpush.msrb.mxu1 %v4465_v42 }
  0xa8   :  { %862 = vmatpush.msrb.mxu2 %v4471_v44  ;;  %882 = vmatpush.msrb.mxu3 %v4469_v43 }
  0xa9   :  { %823 = vmatpush.msrb.mxu0 %v4473_v45  ;;  %843 = vmatpush.msrb.mxu1 %v4475_v46 }
  0xaa   :  { %863 = vmatpush.msrb.mxu2 %v4481_v48  ;;  %883 = vmatpush.msrb.mxu3 %v4479_v47 }
  0xab   :  { %824 = vmatpush.msrb.mxu0 %v4484_v49  ;;  %844 = vmatpush.msrb.mxu1 %v4486_v50 }
  0xac   :  { %864 = vmatpush.msrb.mxu2 %v4493_v52  ;;  %884 = vmatpush.msrb.mxu3 %v4491_v51 }
  0xad   :  { %825 = vmatpush.msrb.mxu0 %v4499_v54  ;;  %845 = vmatpush.msrb.mxu1 %v4501_v55 }
  0xae   :  { %865 = vmatpush.msrb.mxu2 %v4507_v57  ;;  %885 = vmatpush.msrb.mxu3 %v4505_v56 }
  0xaf   :  { %826 = vmatpush.msrb.mxu0 %v4509_v58  ;;  %846 = vmatpush.msrb.mxu1 %v6724_v14 }
  0xb0   :  { %866 = vmatpush.msrb.mxu2 %v4517_v61  ;;  %886 = vmatpush.msrb.mxu3 %v4515_v60 }
  0xb1   :  { %827 = vmatpush.msrb.mxu0 %v4520_v62  ;;  %847 = vmatpush.msrb.mxu1 %v4522_v63 }
  0xb2   :  { %867 = vmatpush.msrb.mxu2 %v4527_v0  ;;  %887 = vmatpush.msrb.mxu3 %v6725_v1 }
  0xb3   :  { %828 = vmatpush.msrb.mxu0 %v4535_v27  ;;  %848 = vmatpush.msrb.mxu1 %v4537_v40 }
  0xb4   :  { %868 = vmatpush.msrb.mxu2 %v4541_v53  ;;  %888 = vmatpush.msrb.mxu3 %v4543_v59 }
  0xc0   :  { %v311_v14 = vpop.f32.mrf.mxu0  ;;  %v352_v61 = vpop.f32.mrf.mxu1 }
  0xc7   :  { %v393_v58 = vpop.f32.mrf.mxu2  ;;  %v434_v60 = vpop.f32.mrf.mxu3 }
  0xc8   :  { %v4681_v56 = vpop.f32.mrf.mxu0  ;;  %v4683_v62 = vpop.f32.mrf.mxu1 }
  0xc9   :  { %6726 = vst [vmem:[#allocation51_spill] sm:$0xff] %v4681_v56 }
  0xca   :  { %6727 = vst [vmem:[#allocation52_spill] sm:$0xff] %v4683_v62 }
  0xcf   :  { %v4685_v63 = vpop.f32.mrf.mxu2  ;;  %v4687_v0 = vpop.f32.mrf.mxu3 }
  0xd0   :  { %6728 = vst [vmem:[#allocation53_spill] sm:$0xff] %v4685_v63  ;;  %v4689_v1 = vpop.f32.mrf.mxu0  ;;  %v4691_v27 = vpop.f32.mrf.mxu1 }
  0xd1   :  { %6729 = vst [vmem:[#allocation54_spill] sm:$0xff] %v4687_v0 }
  0xd2   :  { %6730 = vst [vmem:[#allocation55_spill] sm:$0xff] %v4689_v1 }
  0xd3   :  { %6731 = vst [vmem:[#allocation56_spill] sm:$0xff] %v4691_v27 }
  0xd7   :  { %v4693_v40 = vpop.f32.mrf.mxu2  ;;  %v4695_v53 = vpop.f32.mrf.mxu3 }
  0xd8   :  { %6732 = vst [vmem:[#allocation57_spill] sm:$0xff] %v4693_v40  ;;  %v4697_v59 = vpop.f32.mrf.mxu0  ;;  %v4699_v57 = vpop.f32.mrf.mxu1 }
  0xd9   :  { %6733 = vst [vmem:[#allocation58_spill] sm:$0xff] %v4695_v53 }
  0xda   :  { %6734 = vst [vmem:[#allocation59_spill] sm:$0xff] %v4697_v59 }
  0xdb   :  { %6735 = vst [vmem:[#allocation60_spill] sm:$0xff] %v4699_v57 }
  0xdf   :  { %v4701_v55 = vpop.f32.mrf.mxu2  ;;  %v4703_v56 = vpop.f32.mrf.mxu3 }
  0xe0   :  { %6736 = vst [vmem:[#allocation61_spill] sm:$0xff] %v4701_v55  ;;  %v4705_v62 = vpop.f32.mrf.mxu0  ;;  %v4707_v63 = vpop.f32.mrf.mxu1 }
  0xe1   :  { %6737 = vst [vmem:[#allocation62_spill] sm:$0xff] %v4703_v56 }
  0xe2   :  { %6738 = vst [vmem:[#allocation63_spill] sm:$0xff] %v4705_v62 }
  0xe3   :  { %6739 = vst [vmem:[#allocation64_spill] sm:$0xff] %v4707_v63 }
  0xe7   :  { %v4709_v0 = vpop.f32.mrf.mxu3  ;;  %v4715_v40 = vpop.f32.mrf.mxu2 }
  0xe8   :  { %6740 = vst [vmem:[#allocation65_spill] sm:$0xff] %v4709_v0  ;;  %v4711_v1 = vpop.f32.mrf.mxu0  ;;  %v4713_v27 = vpop.f32.mrf.mxu1  ;;  %v276_v0 = vld [vmem:[%s6415_s3] sm:$0xf] }
  0xe9   :  { %6741 = vst [vmem:[#allocation66_spill] sm:$0xff] %v4711_v1  ;;  %v4744_v52 = vperm.slane %v276_v0, 3 }
  0xea   :  { %6742 = vst [vmem:[#allocation67_spill] sm:$0xff] %v4713_v27  ;;  %v4734_v27 = vperm.slane %v276_v0, 0 }
  0xeb   :  { %6743 = vst [vmem:[#allocation68_spill] sm:$0xff] %v4715_v40  ;;  %v4736_v40 = vperm.slane %v276_v0, 1  ;;  %v435_v50 = vadd.f32 %v434_v60, %v4744_v52 }
  0xec   :  { %6751 = vst [vmem:[#allocation76_spill] sm:$0xff] %v4734_v27 }
  0xed   :  { %6752 = vst [vmem:[#allocation77_spill] sm:$0xff] %v4736_v40 }
  0xee   :  { %6755 = vst [vmem:[#allocation80_spill] sm:$0xff] %v4744_v52 }
  0xef   :  { %v4717_v53 = vpop.f32.mrf.mxu3  ;;  %v4723_v55 = vpop.f32.mrf.mxu2 }
  0xf0   :  { %6744 = vst [vmem:[#allocation69_spill] sm:$0xff] %v4717_v53  ;;  %v4719_v59 = vpop.f32.mrf.mxu0  ;;  %v4721_v57 = vpop.f32.mrf.mxu1 }
  0xf1   :  { %6745 = vst [vmem:[#allocation70_spill] sm:$0xff] %v4719_v59  ;;  %v353_v59 = vadd.f32 %v352_v61, %v4736_v40 }
  0xf2   :  { %6746 = vst [vmem:[#allocation71_spill] sm:$0xff] %v4721_v57  ;;  %v312_v57 = vadd.f32 %v311_v14, %v4734_v27 }
  0xf3   :  { %6747 = vst [vmem:[#allocation72_spill] sm:$0xff] %v4723_v55 }
  0xf7   :  { %v4725_v56 = vpop.f32.mrf.mxu3  ;;  %v4738_v53 = vpop.f32.mrf.mxu2 }
  0xf8   :  { %6748 = vst [vmem:[#allocation73_spill] sm:$0xff] %v4725_v56  ;;  %v4730_v63 = vpop.f32.mrf.mxu0  ;;  %v4732_v1 = vpop.f32.mrf.mxu1 }
  0xf9   :  { %6749 = vst [vmem:[#allocation74_spill] sm:$0xff] %v4730_v63 }
  0xfa   :  { %6750 = vst [vmem:[#allocation75_spill] sm:$0xff] %v4732_v1 }
  0xfb   :  { %6753 = vst [vmem:[#allocation78_spill] sm:$0xff] %v4738_v53 }
  0xff   :  { %v4742_v55 = vpop.f32.mrf.mxu3  ;;  %v4747_v49 = vpop.f32.mrf.mxu2 }
 0x100   :  { %6754 = vst [vmem:[#allocation79_spill] sm:$0xff] %v4742_v55  ;;  %v515_v56 = vpop.f32.mrf.mxu0  ;;  %v535_v62 = vpop.f32.mrf.mxu1 }
 0x101   :  { %v578_v54 = vadd.f32 %v515_v56, %v312_v57  ;;  %v579_v51 = vadd.f32 %v535_v62, %v353_v59  ;;  %6756 = vst [vmem:[#allocation81_spill] sm:$0xff] %v4747_v49  ;;  %v4749_v56 = vperm.slane %v276_v0, 2 }
 0x103   :  { %v3574_v63 = vmul.f32 -1.442695, %v578_v54  ;;  %v3575_v1 = vmul.f32 -1.442695, %v579_v51  ;;  %6757 = vst [vmem:[#allocation82_spill] sm:$0xff] %v4749_v56  ;;  %v394_v57 = vadd.f32 %v393_v58, %v4749_v56 }
 0x105   :  { %3642 = vpow2.f32 %v3574_v63 }
 0x106   :  { %3644 = vpow2.f32 %v3575_v1 }
 0x107   :  { %v575_v53 = vpop.f32.mrf.mxu3  ;;  %v555_v54 = vpop.f32.mrf.mxu2 }
 0x108   :  { %v581_v14 = vadd.f32 %v575_v53, %v435_v50  ;;  %v580_v62 = vadd.f32 %v555_v54, %v394_v57 }
 0x10a   :  { %v3576_v27 = vmul.f32 -1.442695, %v581_v14 }
 0x10b   :  { %v3643_v61 = vpop.eup %3642 }
 0x10c   :  { %v3645_v40 = vpop.eup %3644  ;;  %v585_v55 = vadd.f32 1.0, %v3643_v61  ;;  %3646 = vpow2.f32 %v3576_v27 }
 0x10d   :  { %v604_v47 = vadd.f32 1.0, %v3645_v40 }
 0x10e   :  { %3648 = vrcp.f32 %v585_v55  ;;  %v597_v61 = vand.u32 2147483648, %v585_v55  ;;  %v595_v40 = vand.u32 2147483647, %v585_v55  ;;  %vm591_vm2 = vweird.f32 %v585_v55 }
 0x10f   :  { %3650 = vrcp.f32 %v604_v47  ;;  %v616_v27 = vand.u32 2147483648, %v604_v47  ;;  %v614_v52 = vand.u32 2147483647, %v604_v47  ;;  %vm610_vm3 = vweird.f32 %v604_v47 }
 0x110   :  { %v598_v54 = vor.u32 1.1754944e-38, %v597_v61  ;;  %vm596_vm5 = vcmp.eq.f32.partialorder %v595_v40, 8.507059e+37 }
 0x111   :  { %v617_v56 = vor.u32 1.1754944e-38, %v616_v27  ;;  %vm615_vm7 = vcmp.eq.f32.partialorder %v614_v52, 8.507059e+37 }
 0x112   :  { %v3647_v51 = vpop.eup %3646 }
 0x113   :  { %v624_v59 = vadd.f32 1.0, %v3647_v51 }
 0x114   :  { %v3649_v60 = vpop.eup %3648 }
 0x115   :  { %v3651_v63 = vpop.eup %3650  ;;  %v587_v1 = vmul.f32 %v3649_v60, %v585_v55  ;;  %3652 = vrcp.f32 %v624_v59  ;;  %vm592_vm0 = vweird.f32 %v3649_v60  ;;  %vm630_vm9 = vweird.f32 %v624_v59 }
 0x116   :  { %v606_v50 = vmul.f32 %v3651_v63, %v604_v47  ;;  %3654 = vtanh.f32 %v580_v62  ;;  %vm611_vm1 = vweird.f32 %v3651_v63  ;;  %vm593_vm4 = vmor %vm591_vm2, %vm592_vm0  ;;  %v634_v55 = vand.u32 2147483647, %v624_v59 }
 0x117   :  { %v588_v53 = vsub.f32 1.0, %v587_v1  ;;  %vm612_vm6 = vmor %vm610_vm3, %vm611_vm1 }
 0x118   :  { %v607_v14 = vsub.f32 1.0, %v606_v50  ;;  %vm635_vm11 = vcmp.eq.f32.partialorder %v634_v55, 8.507059e+37 }
 0x119   :  { %v589_v0 = vmul.f32 %v3649_v60, %v588_v53 }
 0x11a   :  { %v608_v49 = vmul.f32 %v3651_v63, %v607_v14 }
 0x11b   :  { %v3653_v48 = vpop.eup %3652  ;;  %v590_v58 = vadd.f32 %v3649_v60, %v589_v0 }
 0x11c   :  { %v609_v51 = vadd.f32 %v3651_v63, %v608_v49  ;;  %v626_v57 = vmul.f32 %v3653_v48, %v624_v59  ;;  %v3655_v62 = vpop.eup %3654  ;;  %vm631_vm8 = vweird.f32 %v3653_v48  ;;  %v636_v49 = vand.u32 2147483648, %v624_v59 }
 0x11d   :  { %v594_v1 = vsel %vm593_vm4, %v3649_v60, %v590_v58  ;;  %vm632_vm10 = vmor %vm630_vm9, %vm631_vm8 }
 0x11e   :  { %v599_v50 = vsel %vm596_vm5, %v598_v54, %v594_v1  ;;  %v613_v53 = vsel %vm612_vm6, %v3651_v63, %v609_v51  ;;  %v627_v46 = vsub.f32 1.0, %v626_v57  ;;  %v637_v61 = vor.u32 1.1754944e-38, %v636_v49  ;;  %v6791_v1 = vld [vmem:[#allocation82_spill] sm:$0xff] }
 0x11f   :  { %v618_v14 = vsel %vm615_vm7, %v617_v56, %v613_v53  ;;  %v641_v45 = vmul.f32 %v3655_v62, %v599_v50  ;;  %v6792_v62 = vld [vmem:[#allocation53_spill] sm:$0xff] }
 0x120   :  { %v640_v43 = vmul.f32 0.0, %v618_v14  ;;  %v628_v44 = vmul.f32 %v3653_v48, %v627_v46  ;;  %v397_v50 = vadd.f32 %v6792_v62, %v6791_v1 }
 0x122   :  { %v4752_v0 = vadd.f32 %v641_v45, %v640_v43  ;;  %v629_v47 = vadd.f32 %v3653_v48, %v628_v44  ;;  %v6789_v43 = vld [vmem:[#allocation80_spill] sm:$0xff]  ;;  %v6790_v44 = vld [vmem:[#allocation54_spill] sm:$0xff] }
 0x123   :  { %v438_v45 = vadd.f32 %v6790_v44, %v6789_v43 }
 0x124   :  { %3656 = vtanh.f32 %v4752_v0  ;;  %v633_v60 = vsel %vm632_vm10, %v3653_v48, %v629_v47 }
 0x125   :  { %v638_v52 = vsel %vm635_vm11, %v637_v61, %v633_v60 }
 0x12a   :  { %v3657_v63 = vpop.eup %3656 }
 0x12b   :  { %v4755_v27 = vmul.f32 %v3657_v63, %v638_v52 }
 0x12d   :  { %6758 = vst [vmem:[#allocation83_spill] sm:$0xff] %v4755_v27  ;;  %671 = vmatmul.f32.vlgmr.msra.gmra.mxu0 %v4755_v27  ;;  %691 = vmatmul.f32.vlgmr.msra.gmra.mxu1 %v4755_v27 }
 0x12e   :  { %711 = vmatmul.f32.vlgmr.msra.gmra.mxu2 %v4755_v27  ;;  %731 = vmatmul.f32.vlgmr.msra.gmra.mxu3 %v4755_v27  ;;  %v4939_v27 = vld [vmem:[#allocation12 + $0xe0] sm:$0xff] }
 0x12f   :  { %971 = vmatpush.msra.mxu0 %v4357_v2  ;;  %991 = vmatpush.msra.mxu1 %v4359_v3  ;;  %v6759_v2 = vld [vmem:[#allocation26_spill] sm:$0xff]  ;;  %v6760_v3 = vld [vmem:[#allocation25_spill] sm:$0xff] }
 0x130   :  { %1011 = vmatpush.msra.mxu2 %v4363_v5  ;;  %1031 = vmatpush.msra.mxu3 %v4361_v4  ;;  %v6761_v4 = vld [vmem:[#allocation27_spill] sm:$0xff]  ;;  %v6762_v5 = vld [vmem:[#allocation28_spill] sm:$0xff] }
 0x131   :  { %972 = vmatpush.msra.mxu0 %v4365_v6  ;;  %992 = vmatpush.msra.mxu1 %v4367_v7  ;;  %v6763_v6 = vld [vmem:[#allocation30_spill] sm:$0xff]  ;;  %v6764_v7 = vld [vmem:[#allocation29_spill] sm:$0xff] }
 0x132   :  { %1012 = vmatpush.msra.mxu2 %v4373_v9  ;;  %1032 = vmatpush.msra.mxu3 %v4371_v8  ;;  %v6765_v8 = vld [vmem:[#allocation31_spill] sm:$0xff]  ;;  %v6766_v9 = vld [vmem:[#allocation32_spill] sm:$0xff] }
 0x133   :  { %973 = vmatpush.msra.mxu0 %v4376_v10  ;;  %993 = vmatpush.msra.mxu1 %v4378_v11  ;;  %v6767_v10 = vld [vmem:[#allocation34_spill] sm:$0xff]  ;;  %v6768_v11 = vld [vmem:[#allocation33_spill] sm:$0xff] }
 0x134   :  { %1013 = vmatpush.msra.mxu2 %v4385_v13  ;;  %1033 = vmatpush.msra.mxu3 %v4383_v12  ;;  %v6769_v12 = vld [vmem:[#allocation35_spill] sm:$0xff]  ;;  %v6770_v13 = vld [vmem:[#allocation36_spill] sm:$0xff] }
 0x135   :  { %974 = vmatpush.msra.mxu0 %v4391_v15  ;;  %994 = vmatpush.msra.mxu1 %v4393_v16  ;;  %v6771_v15 = vld [vmem:[#allocation38_spill] sm:$0xff]  ;;  %v6772_v16 = vld [vmem:[#allocation37_spill] sm:$0xff] }
 0x136   :  { %1014 = vmatpush.msra.mxu2 %v4399_v18  ;;  %1034 = vmatpush.msra.mxu3 %v4397_v17  ;;  %v6773_v17 = vld [vmem:[#allocation39_spill] sm:$0xff]  ;;  %v6774_v18 = vld [vmem:[#allocation40_spill] sm:$0xff] }
 0x137   :  { %975 = vmatpush.msra.mxu0 %v4401_v19  ;;  %995 = vmatpush.msra.mxu1 %v4403_v20  ;;  %v6775_v19 = vld [vmem:[#allocation42_spill] sm:$0xff]  ;;  %v6776_v20 = vld [vmem:[#allocation41_spill] sm:$0xff] }
 0x138   :  { %1015 = vmatpush.msra.mxu2 %v4409_v22  ;;  %1035 = vmatpush.msra.mxu3 %v4407_v21  ;;  %v6777_v21 = vld [vmem:[#allocation43_spill] sm:$0xff]  ;;  %v6778_v22 = vld [vmem:[#allocation44_spill] sm:$0xff] }
 0x139   :  { %976 = vmatpush.msra.mxu0 %v4412_v23  ;;  %996 = vmatpush.msra.mxu1 %v4414_v24  ;;  %v6779_v23 = vld [vmem:[#allocation45_spill] sm:$0xff]  ;;  %v6780_v24 = vld [vmem:[#allocation46_spill] sm:$0xff] }
 0x13a   :  { %1016 = vmatpush.msra.mxu2 %v4421_v26  ;;  %1036 = vmatpush.msra.mxu3 %v4419_v25  ;;  %v6781_v25 = vld [vmem:[#allocation47_spill] sm:$0xff]  ;;  %v6782_v26 = vld [vmem:[#allocation48_spill] sm:$0xff] }
 0x13b   :  { %977 = vmatpush.msra.mxu0 %v4427_v28  ;;  %997 = vmatpush.msra.mxu1 %v4429_v29  ;;  %v6783_v28 = vld [vmem:[#allocation49_spill] sm:$0xff]  ;;  %v6784_v29 = vld [vmem:[#allocation50_spill] sm:$0xff] }
 0x13c   :  { %1017 = vmatpush.msra.mxu2 %v4435_v31  ;;  %1037 = vmatpush.msra.mxu3 %v4433_v30  ;;  %v6785_v30 = vld [vmem:[#allocation76_spill] sm:$0xff]  ;;  %v6786_v31 = vld [vmem:[#allocation51_spill] sm:$0xff] }
 0x13d   :  { %978 = vmatpush.msra.mxu0 %v4437_v32  ;;  %998 = vmatpush.msra.mxu1 %v4439_v33  ;;  %v315_v32 = vadd.f32 %v6786_v31, %v6785_v30  ;;  %v6787_v33 = vld [vmem:[#allocation77_spill] sm:$0xff] }
 0x13e   :  { %1018 = vmatpush.msra.mxu2 %v4445_v35  ;;  %1038 = vmatpush.msra.mxu3 %v4443_v34  ;;  %v6788_v34 = vld [vmem:[#allocation52_spill] sm:$0xff] }
 0x13f   :  { %979 = vmatpush.msra.mxu0 %v4448_v36  ;;  %999 = vmatpush.msra.mxu1 %v4450_v37  ;;  %v356_v35 = vadd.f32 %v6788_v34, %v6787_v33 }
 0x140   :  { %1019 = vmatpush.msra.mxu2 %v4457_v39  ;;  %1039 = vmatpush.msra.mxu3 %v4455_v38 }
 0x141   :  { %980 = vmatpush.msra.mxu0 %v4463_v41  ;;  %1000 = vmatpush.msra.mxu1 %v4465_v42 }
 0x142   :  { %1020 = vmatpush.msra.mxu2 %v6759_v2  ;;  %1040 = vmatpush.msra.mxu3 %v6760_v3 }
 0x143   :  { %981 = vmatpush.msra.mxu0 %v6761_v4  ;;  %1001 = vmatpush.msra.mxu1 %v6762_v5 }
 0x144   :  { %1021 = vmatpush.msra.mxu2 %v6763_v6  ;;  %1041 = vmatpush.msra.mxu3 %v6764_v7 }
 0x145   :  { %982 = vmatpush.msra.mxu0 %v6765_v8  ;;  %1002 = vmatpush.msra.mxu1 %v6766_v9 }
 0x146   :  { %1022 = vmatpush.msra.mxu2 %v6767_v10  ;;  %1042 = vmatpush.msra.mxu3 %v6768_v11 }
 0x147   :  { %983 = vmatpush.msra.mxu0 %v6769_v12  ;;  %1003 = vmatpush.msra.mxu1 %v6770_v13 }
 0x148   :  { %1023 = vmatpush.msra.mxu2 %v6771_v15  ;;  %1043 = vmatpush.msra.mxu3 %v6772_v16 }
 0x149   :  { %984 = vmatpush.msra.mxu0 %v6773_v17  ;;  %1004 = vmatpush.msra.mxu1 %v6774_v18 }
 0x14a   :  { %1024 = vmatpush.msra.mxu2 %v6775_v19  ;;  %1044 = vmatpush.msra.mxu3 %v6776_v20 }
 0x14b   :  { %985 = vmatpush.msra.mxu0 %v6777_v21  ;;  %1005 = vmatpush.msra.mxu1 %v6778_v22 }
 0x14c   :  { %1025 = vmatpush.msra.mxu2 %v6779_v23  ;;  %1045 = vmatpush.msra.mxu3 %v6780_v24 }
 0x14d   :  { %986 = vmatpush.msra.mxu0 %v6781_v25  ;;  %1006 = vmatpush.msra.mxu1 %v6782_v26 }
 0x14e   :  { %1026 = vmatpush.msra.mxu2 %v6783_v28  ;;  %1046 = vmatpush.msra.mxu3 %v6784_v29 }
 0x1aa   :  { %v672_v36 = vpop.f32.mrf.mxu0  ;;  %v692_v37 = vpop.f32.mrf.mxu1 }
 0x1ab   :  { %v735_v38 = vadd.f32 %v672_v36, %v315_v32  ;;  %v736_v39 = vadd.f32 %v692_v37, %v356_v35 }
 0x1ad   :  { %v3577_v41 = vmul.f32 -1.442695, %v735_v38  ;;  %v3578_v42 = vmul.f32 -1.442695, %v736_v39 }
 0x1af   :  { %3658 = vpow2.f32 %v3577_v41 }
 0x1b0   :  { %3660 = vpow2.f32 %v3578_v42 }
 0x1b1   :  { %v732_v46 = vpop.f32.mrf.mxu3  ;;  %v712_v51 = vpop.f32.mrf.mxu2 }
 0x1b2   :  { %v738_v48 = vadd.f32 %v732_v46, %v438_v45  ;;  %v737_v47 = vadd.f32 %v712_v51, %v397_v50 }
 0x1b4   :  { %v3579_v56 = vmul.f32 -1.442695, %v738_v48 }
 0x1b5   :  { %v3659_v59 = vpop.eup %3658 }
 0x1b6   :  { %v3661_v40 = vpop.eup %3660  ;;  %v742_v58 = vadd.f32 1.0, %v3659_v59  ;;  %3662 = vpow2.f32 %v3579_v56 }
 0x1b7   :  { %v761_v54 = vadd.f32 1.0, %v3661_v40 }
 0x1b8   :  { %3664 = vrcp.f32 %v742_v58  ;;  %v754_v52 = vand.u32 2147483648, %v742_v58  ;;  %v752_v34 = vand.u32 2147483647, %v742_v58  ;;  %vm748_vm14 = vweird.f32 %v742_v58 }
 0x1b9   :  { %3666 = vrcp.f32 %v761_v54  ;;  %v773_v31 = vand.u32 2147483648, %v761_v54  ;;  %v771_v36 = vand.u32 2147483647, %v761_v54  ;;  %vm767_vm15 = vweird.f32 %v761_v54 }
 0x1ba   :  { %v755_v39 = vor.u32 1.1754944e-38, %v754_v52  ;;  %vm753_vm2 = vcmp.eq.f32.partialorder %v752_v34, 8.507059e+37  ;;  %v4852_v52 = vld [vmem:[#allocation12 + $0x1f8] sm:$0xff]  ;;  %v4861_v34 = vld [vmem:[#allocation12 + $0x1d0] sm:$0xff] }
 0x1bb   :  { %v774_v44 = vor.u32 1.1754944e-38, %v773_v31  ;;  %vm772_vm3 = vcmp.eq.f32.partialorder %v771_v36, 8.507059e+37  ;;  %v4855_v31 = vld [vmem:[#allocation12 + $0x1c0] sm:$0xff] }
 0x1bc   :  { %v3663_v57 = vpop.eup %3662  ;;  %v4867_v36 = vld [vmem:[#allocation12 + $0x1a0] sm:$0xff] }
 0x1bd   :  { %v781_v53 = vadd.f32 1.0, %v3663_v57 }
 0x1be   :  { %v3665_v14 = vpop.eup %3664 }
 0x1bf   :  { %v3667_v49 = vpop.eup %3666  ;;  %v744_v55 = vmul.f32 %v3665_v14, %v742_v58  ;;  %3668 = vrcp.f32 %v781_v53  ;;  %vm749_vm12 = vweird.f32 %v3665_v14  ;;  %v793_v50 = vand.u32 2147483648, %v781_v53 }
 0x1c0   :  { %v763_v60 = vmul.f32 %v3667_v49, %v761_v54  ;;  %3670 = vtanh.f32 %v737_v47  ;;  %vm768_vm13 = vweird.f32 %v3667_v49  ;;  %vm750_vm0 = vmor %vm748_vm14, %vm749_vm12  ;;  %vm787_vm5 = vweird.f32 %v781_v53 }
 0x1c1   :  { %v745_v61 = vsub.f32 1.0, %v744_v55  ;;  %vm769_vm1 = vmor %vm767_vm15, %vm768_vm13  ;;  %v794_v55 = vor.u32 1.1754944e-38, %v793_v50  ;;  %v4918_v50 = vld [vmem:[#allocation12 + $0x128] sm:$0xff] }
 0x1c2   :  { %v764_v63 = vsub.f32 1.0, %v763_v60 }
 0x1c3   :  { %v746_v32 = vmul.f32 %v3665_v14, %v745_v61 }
 0x1c4   :  { %v765_v35 = vmul.f32 %v3667_v49, %v764_v63  ;;  %v4849_v63 = vld [vmem:[#allocation12 + $0x1f0] sm:$0xff] }
 0x1c5   :  { %v3669_v37 = vpop.eup %3668  ;;  %v747_v38 = vadd.f32 %v3665_v14, %v746_v32  ;;  %v4858_v32 = vld [vmem:[#allocation12 + $0x1c8] sm:$0xff] }
 0x1c6   :  { %v766_v41 = vadd.f32 %v3667_v49, %v765_v35  ;;  %v783_v42 = vmul.f32 %v3669_v37, %v781_v53  ;;  %v3671_v46 = vpop.eup %3670  ;;  %vm788_vm4 = vweird.f32 %v3669_v37  ;;  %v4864_v35 = vld [vmem:[#allocation12 + $0x1d8] sm:$0xff] }
 0x1c7   :  { %v751_v45 = vsel %vm750_vm0, %v3665_v14, %v747_v38  ;;  %v791_v14 = vand.u32 2147483647, %v781_v53  ;;  %vm789_vm6 = vmor %vm787_vm5, %vm788_vm4  ;;  %v4846_v53 = vld [vmem:[#allocation12 + $0x1e8] sm:$0xff]  ;;  %v4873_v38 = vld [vmem:[#allocation12 + $0x1b0] sm:$0xff] }
 0x1c8   :  { %v756_v48 = vsel %vm753_vm2, %v755_v39, %v751_v45  ;;  %v770_v56 = vsel %vm769_vm1, %v3667_v49, %v766_v41  ;;  %v784_v59 = vsub.f32 1.0, %v783_v42  ;;  %v4876_v39 = vld [vmem:[#allocation12 + $0x1b8] sm:$0xff]  ;;  %v4879_v41 = vld [vmem:[#allocation12 + $0x180] sm:$0xff]  ;;  %v4882_v42 = vld [vmem:[#allocation12 + $0x188] sm:$0xff] }
 0x1c9   :  { %v775_v40 = vsel %vm772_vm3, %v774_v44, %v770_v56  ;;  %v798_v51 = vmul.f32 %v3671_v46, %v756_v48  ;;  %vm792_vm7 = vcmp.eq.f32.partialorder %v791_v14, 8.507059e+37  ;;  %v4885_v44 = vld [vmem:[#allocation12 + $0x190] sm:$0xff]  ;;  %v4888_v45 = vld [vmem:[#allocation12 + $0x198] sm:$0xff]  ;;  %v4891_v46 = vld [vmem:[#allocation12 + $0x160] sm:$0xff] }
 0x1ca   :  { %v797_v57 = vmul.f32 %v775_v40, %v4752_v0  ;;  %v785_v62 = vmul.f32 %v3669_v37, %v784_v59  ;;  %v4843_v0 = vld [vmem:[#allocation12 + $0x1e0] sm:$0xff]  ;;  %v4894_v48 = vld [vmem:[#allocation12 + $0x168] sm:$0xff]  ;;  %v4897_v56 = vld [vmem:[#allocation12 + $0x170] sm:$0xff] }
 0x1cb   :  { %v4900_v59 = vld [vmem:[#allocation12 + $0x178] sm:$0xff]  ;;  %v4903_v40 = vld [vmem:[#allocation12 + $0x140] sm:$0xff]  ;;  %v4921_v14 = vld [vmem:[#allocation12 + $0x130] sm:$0xff] }
 0x1cc   :  { %v4834_v58 = vadd.f32 %v798_v51, %v797_v57  ;;  %v786_v54 = vadd.f32 %v3669_v37, %v785_v62  ;;  %v4906_v51 = vld [vmem:[#allocation12 + $0x148] sm:$0xff]  ;;  %v4909_v57 = vld [vmem:[#allocation12 + $0x150] sm:$0xff]  ;;  %v4912_v62 = vld [vmem:[#allocation12 + $0x158] sm:$0xff] }
 0x1ce   :  { %3672 = vtanh.f32 %v4834_v58  ;;  %v790_v47 = vsel %vm789_vm6, %v3669_v37, %v786_v54  ;;  %v4870_v37 = vld [vmem:[#allocation12 + $0x1a8] sm:$0xff]  ;;  %v4915_v54 = vld [vmem:[#allocation12 + $0x120] sm:$0xff] }
 0x1cf   :  { %v795_v60 = vsel %vm792_vm7, %v794_v55, %v790_v47  ;;  %v4924_v47 = vld [vmem:[#allocation12 + $0x138] sm:$0xff]  ;;  %v4927_v55 = vld [vmem:[#allocation12 + $0x100] sm:$0xff] }
 0x1d0   :  { %6794 = vst [vmem:[#allocation25_spill] sm:$0xff] %v4924_v47 }
 0x1d1   :  { %6795 = vst [vmem:[#allocation27_spill] sm:$0xff] %v4927_v55 }
 0x1d4   :  { %v3673_v49 = vpop.eup %3672 }
 0x1d5   :  { %v4837_v61 = vmul.f32 %v3673_v49, %v795_v60  ;;  %v4930_v49 = vld [vmem:[#allocation12 + $0x108] sm:$0xff]  ;;  %v4933_v60 = vld [vmem:[#allocation12 + $0x110] sm:$0xff] }
 0x1d6   :  { %6796 = vst [vmem:[#allocation28_spill] sm:$0xff] %v4930_v49 }
 0x1d7   :  { %6793 = vst [vmem:[#allocation26_spill] sm:$0xff] %v4837_v61  ;;  %829 = vmatmul.f32.vlgmr.msrb.gmra.mxu0 %v4837_v61  ;;  %849 = vmatmul.f32.vlgmr.msrb.gmra.mxu1 %v4837_v61 }
 0x1d8   :  { %869 = vmatmul.f32.vlgmr.msrb.gmra.mxu2 %v4837_v61  ;;  %889 = vmatmul.f32.vlgmr.msrb.gmra.mxu3 %v4837_v61  ;;  %6797 = vst [vmem:[#allocation30_spill] sm:$0xff] %v4933_v60  ;;  %v4936_v61 = vld [vmem:[#allocation12 + $0x118] sm:$0xff] }
 0x1d9   :  { %1129 = vmatpush.msrb.mxu0 %v4843_v0  ;;  %1149 = vmatpush.msrb.mxu1 %v4846_v53  ;;  %6798 = vst [vmem:[#allocation29_spill] sm:$0xff] %v4936_v61 }
 0x1da   :  { %1169 = vmatpush.msrb.mxu2 %v4849_v63  ;;  %1189 = vmatpush.msrb.mxu3 %v4852_v52 }
 0x1db   :  { %1130 = vmatpush.msrb.mxu0 %v4855_v31  ;;  %1150 = vmatpush.msrb.mxu1 %v4858_v32 }
 0x1dc   :  { %1170 = vmatpush.msrb.mxu2 %v4861_v34  ;;  %1190 = vmatpush.msrb.mxu3 %v4864_v35 }
 0x1dd   :  { %1131 = vmatpush.msrb.mxu0 %v4867_v36  ;;  %1151 = vmatpush.msrb.mxu1 %v4870_v37 }
 0x1de   :  { %1171 = vmatpush.msrb.mxu2 %v4873_v38  ;;  %1191 = vmatpush.msrb.mxu3 %v4876_v39 }
 0x1df   :  { %1132 = vmatpush.msrb.mxu0 %v4879_v41  ;;  %1152 = vmatpush.msrb.mxu1 %v4882_v42 }
 0x1e0   :  { %1172 = vmatpush.msrb.mxu2 %v4885_v44  ;;  %1192 = vmatpush.msrb.mxu3 %v4888_v45 }
 0x1e1   :  { %1133 = vmatpush.msrb.mxu0 %v4891_v46  ;;  %1153 = vmatpush.msrb.mxu1 %v4894_v48 }
 0x1e2   :  { %1173 = vmatpush.msrb.mxu2 %v4897_v56  ;;  %1193 = vmatpush.msrb.mxu3 %v4900_v59 }
 0x1e3   :  { %1134 = vmatpush.msrb.mxu0 %v4903_v40  ;;  %1154 = vmatpush.msrb.mxu1 %v4906_v51 }
 0x1e4   :  { %1174 = vmatpush.msrb.mxu2 %v4909_v57  ;;  %1194 = vmatpush.msrb.mxu3 %v4912_v62 }
 0x1e5   :  { %1135 = vmatpush.msrb.mxu0 %v4915_v54  ;;  %1155 = vmatpush.msrb.mxu1 %v4918_v50 }
 0x1e6   :  { %1175 = vmatpush.msrb.mxu2 %v4921_v14  ;;  %1195 = vmatpush.msrb.mxu3 %v4924_v47  ;;  %v4942_v47 = vld [vmem:[#allocation12 + $0xe8] sm:$0xff] }
 0x1e7   :  { %1136 = vmatpush.msrb.mxu0 %v4927_v55  ;;  %1156 = vmatpush.msrb.mxu1 %v4930_v49  ;;  %v4945_v55 = vld [vmem:[#allocation12 + $0xf0] sm:$0xff]  ;;  %v4948_v49 = vld [vmem:[#allocation12 + $0xf8] sm:$0xff] }
 0x1e8   :  { %1176 = vmatpush.msrb.mxu2 %v4933_v60  ;;  %1196 = vmatpush.msrb.mxu3 %v4936_v61  ;;  %v4951_v60 = vld [vmem:[#allocation12 + $0xc0] sm:$0xff]  ;;  %v4954_v61 = vld [vmem:[#allocation12 + $0xc8] sm:$0xff] }
 0x1e9   :  { %1137 = vmatpush.msrb.mxu0 %v4939_v27  ;;  %1157 = vmatpush.msrb.mxu1 %v4942_v47 }
 0x1ea   :  { %1177 = vmatpush.msrb.mxu2 %v4945_v55  ;;  %1197 = vmatpush.msrb.mxu3 %v4948_v49 }
 0x1eb   :  { %1138 = vmatpush.msrb.mxu0 %v4951_v60  ;;  %1158 = vmatpush.msrb.mxu1 %v4954_v61 }
 0x1ec   :  { %1178 = vmatpush.msrb.mxu2 %v6759_v2  ;;  %1198 = vmatpush.msrb.mxu3 %v6760_v3  ;;  %v6799_v2 = vld [vmem:[#allocation55_spill] sm:$0xff] }
 0x1ed   :  { %1139 = vmatpush.msrb.mxu0 %v6761_v4  ;;  %1159 = vmatpush.msrb.mxu1 %v6762_v5  ;;  %v318_v3 = vadd.f32 %v6799_v2, %v6785_v30  ;;  %v6800_v4 = vld [vmem:[#allocation56_spill] sm:$0xff] }
 0x1ee   :  { %1179 = vmatpush.msrb.mxu2 %v6763_v6  ;;  %1199 = vmatpush.msrb.mxu3 %v6764_v7  ;;  %v359_v5 = vadd.f32 %v6800_v4, %v6787_v33 }
 0x1ef   :  { %1140 = vmatpush.msrb.mxu0 %v6765_v8  ;;  %1160 = vmatpush.msrb.mxu1 %v6766_v9 }
 0x1f0   :  { %1180 = vmatpush.msrb.mxu2 %v6767_v10  ;;  %1200 = vmatpush.msrb.mxu3 %v6768_v11 }
 0x1f1   :  { %1141 = vmatpush.msrb.mxu0 %v6769_v12  ;;  %1161 = vmatpush.msrb.mxu1 %v6770_v13  ;;  %v6801_v12 = vld [vmem:[#allocation58_spill] sm:$0xff] }
 0x1f2   :  { %1181 = vmatpush.msrb.mxu2 %v6771_v15  ;;  %1201 = vmatpush.msrb.mxu3 %v6772_v16  ;;  %v441_v13 = vadd.f32 %v6801_v12, %v6789_v43 }
 0x1f3   :  { %1142 = vmatpush.msrb.mxu0 %v6773_v17  ;;  %1162 = vmatpush.msrb.mxu1 %v6774_v18 }
 0x1f4   :  { %1182 = vmatpush.msrb.mxu2 %v6775_v19  ;;  %1202 = vmatpush.msrb.mxu3 %v6776_v20 }
 0x1f5   :  { %1143 = vmatpush.msrb.mxu0 %v6777_v21  ;;  %1163 = vmatpush.msrb.mxu1 %v6778_v22 }
 0x1f6   :  { %1183 = vmatpush.msrb.mxu2 %v6779_v23  ;;  %1203 = vmatpush.msrb.mxu3 %v6780_v24  ;;  %v6802_v24 = vld [vmem:[#allocation57_spill] sm:$0xff] }
 0x1f7   :  { %1144 = vmatpush.msrb.mxu0 %v6781_v25  ;;  %1164 = vmatpush.msrb.mxu1 %v6782_v26  ;;  %v400_v25 = vadd.f32 %v6802_v24, %v6791_v1 }
 0x1f8   :  { %1184 = vmatpush.msrb.mxu2 %v6783_v28  ;;  %1204 = vmatpush.msrb.mxu3 %v6784_v29 }
 0x254   :  { %v830_v6 = vpop.f32.mrf.mxu0  ;;  %v850_v7 = vpop.f32.mrf.mxu1 }
 0x255   :  { %v893_v8 = vadd.f32 %v830_v6, %v318_v3  ;;  %v894_v9 = vadd.f32 %v850_v7, %v359_v5 }
 0x257   :  { %v3580_v10 = vmul.f32 -1.442695, %v893_v8  ;;  %v3581_v11 = vmul.f32 -1.442695, %v894_v9 }
 0x259   :  { %3674 = vpow2.f32 %v3580_v10 }
 0x25a   :  { %3676 = vpow2.f32 %v3581_v11 }
 0x25b   :  { %v890_v15 = vpop.f32.mrf.mxu3  ;;  %v870_v22 = vpop.f32.mrf.mxu2 }
 0x25c   :  { %v896_v16 = vadd.f32 %v890_v15, %v441_v13  ;;  %v895_v29 = vadd.f32 %v870_v22, %v400_v25 }
 0x25e   :  { %v3582_v17 = vmul.f32 -1.442695, %v896_v16 }
 0x25f   :  { %v3675_v18 = vpop.eup %3674 }
 0x260   :  { %v3677_v19 = vpop.eup %3676  ;;  %v900_v20 = vadd.f32 1.0, %v3675_v18  ;;  %3678 = vpow2.f32 %v3582_v17 }
 0x261   :  { %v919_v21 = vadd.f32 1.0, %v3677_v19 }
 0x262   :  { %3680 = vrcp.f32 %v900_v20  ;;  %v912_v7 = vand.u32 2147483648, %v900_v20  ;;  %v910_v10 = vand.u32 2147483647, %v900_v20  ;;  %vm906_vm10 = vweird.f32 %v900_v20 }
 0x263   :  { %3682 = vrcp.f32 %v919_v21  ;;  %v931_v8 = vand.u32 2147483648, %v919_v21  ;;  %v929_v12 = vand.u32 2147483647, %v919_v21  ;;  %vm925_vm11 = vweird.f32 %v919_v21 }
 0x264   :  { %v913_v16 = vor.u32 1.1754944e-38, %v912_v7  ;;  %vm911_vm14 = vcmp.eq.f32.partialorder %v910_v10, 8.507059e+37 }
 0x265   :  { %v932_v19 = vor.u32 1.1754944e-38, %v931_v8  ;;  %vm930_vm15 = vcmp.eq.f32.partialorder %v929_v12, 8.507059e+37  ;;  %v6806_v12 = vld [vmem:[#allocation28_spill] sm:$0xff] }
 0x266   :  { %v3679_v23 = vpop.eup %3678 }
 0x267   :  { %v939_v26 = vadd.f32 1.0, %v3679_v23 }
 0x268   :  { %v3681_v28 = vpop.eup %3680 }
 0x269   :  { %v3683_v2 = vpop.eup %3682  ;;  %v902_v3 = vmul.f32 %v3681_v28, %v900_v20  ;;  %3684 = vrcp.f32 %v939_v26  ;;  %vm907_vm8 = vweird.f32 %v3681_v28  ;;  %v951_v7 = vand.u32 2147483648, %v939_v26 }
 0x26a   :  { %v921_v4 = vmul.f32 %v3683_v2, %v919_v21  ;;  %3686 = vtanh.f32 %v895_v29  ;;  %vm926_vm9 = vweird.f32 %v3683_v2  ;;  %vm908_vm12 = vmor %vm906_vm10, %vm907_vm8  ;;  %vm945_vm1 = vweird.f32 %v939_v26 }
 0x26b   :  { %v903_v5 = vsub.f32 1.0, %v902_v3  ;;  %vm927_vm13 = vmor %vm925_vm11, %vm926_vm9 }
 0x26c   :  { %v922_v6 = vsub.f32 1.0, %v921_v4 }
 0x26d   :  { %v904_v9 = vmul.f32 %v3681_v28, %v903_v5 }
 0x26e   :  { %v923_v11 = vmul.f32 %v3683_v2, %v922_v6 }
 0x26f   :  { %v3685_v13 = vpop.eup %3684  ;;  %v905_v15 = vadd.f32 %v3681_v28, %v904_v9  ;;  %v952_v9 = vor.u32 1.1754944e-38, %v951_v7  ;;  %v5081_v7 = vld [vmem:[#allocation12 + $0x40] sm:$0xff] }
 0x270   :  { %v924_v17 = vadd.f32 %v3683_v2, %v923_v11  ;;  %v941_v18 = vmul.f32 %v3685_v13, %v939_v26  ;;  %v3687_v23 = vpop.eup %3686  ;;  %vm946_vm0 = vweird.f32 %v3685_v13  ;;  %6823 = vst [vmem:[#allocation46_spill] sm:$0xff] %v5081_v7 }
 0x271   :  { %v909_v22 = vsel %vm908_vm12, %v3681_v28, %v905_v15  ;;  %v949_v28 = vand.u32 2147483647, %v939_v26  ;;  %vm947_vm2 = vmor %vm945_vm1, %vm946_vm0  ;;  %v6805_v26 = vld [vmem:[#allocation27_spill] sm:$0xff]  ;;  %v6808_v15 = vld [vmem:[#allocation29_spill] sm:$0xff] }
 0x272   :  { %v914_v24 = vsel %vm911_vm14, %v913_v16, %v909_v22  ;;  %v928_v25 = vsel %vm927_vm13, %v3683_v2, %v924_v17  ;;  %v942_v29 = vsub.f32 1.0, %v941_v18  ;;  %v5039_v16 = vld [vmem:[#allocation12 + $0xd0] sm:$0xff]  ;;  %v5042_v17 = vld [vmem:[#allocation12 + $0xd8] sm:$0xff]  ;;  %v5045_v18 = vld [vmem:[#allocation12 + $0xa0] sm:$0xff] }
 0x273   :  { %v933_v3 = vsel %vm930_vm15, %v932_v19, %v928_v25  ;;  %v956_v4 = vmul.f32 %v3687_v23, %v914_v24  ;;  %vm950_vm3 = vcmp.eq.f32.partialorder %v949_v28, 8.507059e+37  ;;  %6809 = vst [vmem:[#allocation32_spill] sm:$0xff] %v5039_v16  ;;  %v5048_v19 = vld [vmem:[#allocation12 + $0xa8] sm:$0xff]  ;;  %v5051_v22 = vld [vmem:[#allocation12 + $0xb0] sm:$0xff]  ;;  %v5054_v23 = vld [vmem:[#allocation12 + $0xb8] sm:$0xff] }
 0x274   :  { %v955_v5 = vmul.f32 %v933_v3, %v4834_v58  ;;  %v943_v6 = vmul.f32 %v3685_v13, %v942_v29  ;;  %v6804_v58 = vld [vmem:[#allocation25_spill] sm:$0xff]  ;;  %6810 = vst [vmem:[#allocation34_spill] sm:$0xff] %v5042_v17  ;;  %v5057_v24 = vld [vmem:[#allocation12 + $0x80] sm:$0xff]  ;;  %v5066_v3 = vld [vmem:[#allocation12 + $0x98] sm:$0xff] }
 0x275   :  { %6811 = vst [vmem:[#allocation33_spill] sm:$0xff] %v5045_v18  ;;  %v5060_v25 = vld [vmem:[#allocation12 + $0x88] sm:$0xff]  ;;  %v5063_v29 = vld [vmem:[#allocation12 + $0x90] sm:$0xff] }
 0x276   :  { %v4992_v20 = vadd.f32 %v956_v4, %v955_v5  ;;  %v944_v21 = vadd.f32 %v3685_v13, %v943_v6  ;;  %6812 = vst [vmem:[#allocation35_spill] sm:$0xff] %v5048_v19  ;;  %v5069_v4 = vld [vmem:[#allocation12 + $0x60] sm:$0xff]  ;;  %v5072_v5 = vld [vmem:[#allocation12 + $0x68] sm:$0xff]  ;;  %v5075_v6 = vld [vmem:[#allocation12 + $0x70] sm:$0xff] }
 0x277   :  { %6813 = vst [vmem:[#allocation36_spill] sm:$0xff] %v5051_v22  ;;  %v5084_v28 = vld [vmem:[#allocation12 + $0x48] sm:$0xff] }
 0x278   :  { %3688 = vtanh.f32 %v4992_v20  ;;  %v948_v8 = vsel %vm947_vm2, %v3685_v13, %v944_v21  ;;  %v6807_v13 = vld [vmem:[#allocation30_spill] sm:$0xff]  ;;  %6814 = vst [vmem:[#allocation38_spill] sm:$0xff] %v5054_v23 }
 0x279   :  { %v953_v10 = vsel %vm950_vm3, %v952_v9, %v948_v8  ;;  %6815 = vst [vmem:[#allocation37_spill] sm:$0xff] %v5057_v24  ;;  %v5078_v21 = vld [vmem:[#allocation12 + $0x78] sm:$0xff]  ;;  %v5087_v8 = vld [vmem:[#allocation12 + $0x50] sm:$0xff] }
 0x27a   :  { %6816 = vst [vmem:[#allocation39_spill] sm:$0xff] %v5060_v25  ;;  %v5090_v9 = vld [vmem:[#allocation12 + $0x58] sm:$0xff] }
 0x27b   :  { %6817 = vst [vmem:[#allocation40_spill] sm:$0xff] %v5063_v29 }
 0x27c   :  { %6818 = vst [vmem:[#allocation42_spill] sm:$0xff] %v5066_v3 }
 0x27d   :  { %6819 = vst [vmem:[#allocation41_spill] sm:$0xff] %v5069_v4 }
 0x27e   :  { %v3689_v2 = vpop.eup %3688  ;;  %6820 = vst [vmem:[#allocation43_spill] sm:$0xff] %v5072_v5 }
 0x27f   :  { %v4995_v11 = vmul.f32 %v3689_v2, %v953_v10  ;;  %6821 = vst [vmem:[#allocation44_spill] sm:$0xff] %v5075_v6  ;;  %v5093_v2 = vld [vmem:[#allocation12 + $0x20] sm:$0xff]  ;;  %v5096_v10 = vld [vmem:[#allocation12 + $0x28] sm:$0xff] }
 0x280   :  { %6822 = vst [vmem:[#allocation45_spill] sm:$0xff] %v5078_v21 }
 0x281   :  { %6803 = vst [vmem:[#allocation31_spill] sm:$0xff] %v4995_v11  ;;  %987 = vmatmul.f32.vlgmr.msra.gmra.mxu0 %v4995_v11  ;;  %1007 = vmatmul.f32.vlgmr.msra.gmra.mxu1 %v4995_v11 }
 0x282   :  { %1027 = vmatmul.f32.vlgmr.msra.gmra.mxu2 %v4995_v11  ;;  %1047 = vmatmul.f32.vlgmr.msra.gmra.mxu3 %v4995_v11  ;;  %6824 = vst [vmem:[#allocation47_spill] sm:$0xff] %v5084_v28  ;;  %v5099_v11 = vld [vmem:[#allocation12 + $0x30] sm:$0xff] }
 0x283   :  { %1287 = vmatpush.msra.mxu0 %v4843_v0  ;;  %1307 = vmatpush.msra.mxu1 %v4846_v53  ;;  %6825 = vst [vmem:[#allocation48_spill] sm:$0xff] %v5087_v8 }
 0x284   :  { %1327 = vmatpush.msra.mxu2 %v4849_v63  ;;  %1347 = vmatpush.msra.mxu3 %v4852_v52  ;;  %6826 = vst [vmem:[#allocation49_spill] sm:$0xff] %v5090_v9 }
 0x285   :  { %1288 = vmatpush.msra.mxu0 %v4855_v31  ;;  %1308 = vmatpush.msra.mxu1 %v4858_v32  ;;  %6827 = vst [vmem:[#allocation50_spill] sm:$0xff] %v5093_v2 }
 0x286   :  { %1328 = vmatpush.msra.mxu2 %v4861_v34  ;;  %1348 = vmatpush.msra.mxu3 %v4864_v35  ;;  %6828 = vst [vmem:[#allocation51_spill] sm:$0xff] %v5096_v10 }
 0x287   :  { %1289 = vmatpush.msra.mxu0 %v4867_v36  ;;  %1309 = vmatpush.msra.mxu1 %v4870_v37  ;;  %6829 = vst [vmem:[#allocation52_spill] sm:$0xff] %v5099_v11 }
 0x288   :  { %1329 = vmatpush.msra.mxu2 %v4873_v38  ;;  %1349 = vmatpush.msra.mxu3 %v4876_v39 }
 0x289   :  { %1290 = vmatpush.msra.mxu0 %v4879_v41  ;;  %1310 = vmatpush.msra.mxu1 %v4882_v42 }
 0x28a   :  { %1330 = vmatpush.msra.mxu2 %v4885_v44  ;;  %1350 = vmatpush.msra.mxu3 %v4888_v45 }
 0x28b   :  { %1291 = vmatpush.msra.mxu0 %v4891_v46  ;;  %1311 = vmatpush.msra.mxu1 %v4894_v48 }
 0x28c   :  { %1331 = vmatpush.msra.mxu2 %v4897_v56  ;;  %1351 = vmatpush.msra.mxu3 %v4900_v59 }
 0x28d   :  { %1292 = vmatpush.msra.mxu0 %v4903_v40  ;;  %1312 = vmatpush.msra.mxu1 %v4906_v51 }
 0x28e   :  { %1332 = vmatpush.msra.mxu2 %v4909_v57  ;;  %1352 = vmatpush.msra.mxu3 %v4912_v62 }
 0x28f   :  { %1293 = vmatpush.msra.mxu0 %v4915_v54  ;;  %1313 = vmatpush.msra.mxu1 %v4918_v50 }
 0x290   :  { %1333 = vmatpush.msra.mxu2 %v4921_v14  ;;  %1353 = vmatpush.msra.mxu3 %v6804_v58 }
 0x291   :  { %1294 = vmatpush.msra.mxu0 %v6805_v26  ;;  %1314 = vmatpush.msra.mxu1 %v6806_v12 }
 0x292   :  { %1334 = vmatpush.msra.mxu2 %v6807_v13  ;;  %1354 = vmatpush.msra.mxu3 %v6808_v15 }
 0x293   :  { %1295 = vmatpush.msra.mxu0 %v4939_v27  ;;  %1315 = vmatpush.msra.mxu1 %v4942_v47 }
 0x294   :  { %1335 = vmatpush.msra.mxu2 %v4945_v55  ;;  %1355 = vmatpush.msra.mxu3 %v4948_v49 }
 0x295   :  { %1296 = vmatpush.msra.mxu0 %v4951_v60  ;;  %1316 = vmatpush.msra.mxu1 %v4954_v61 }
 0x296   :  { %1336 = vmatpush.msra.mxu2 %v5039_v16  ;;  %1356 = vmatpush.msra.mxu3 %v5042_v17 }
 0x297   :  { %1297 = vmatpush.msra.mxu0 %v5045_v18  ;;  %1317 = vmatpush.msra.mxu1 %v5048_v19 }
 0x298   :  { %1337 = vmatpush.msra.mxu2 %v5051_v22  ;;  %1357 = vmatpush.msra.mxu3 %v5054_v23 }
 0x299   :  { %1298 = vmatpush.msra.mxu0 %v5057_v24  ;;  %1318 = vmatpush.msra.mxu1 %v5060_v25 }
 0x29a   :  { %1338 = vmatpush.msra.mxu2 %v5063_v29  ;;  %1358 = vmatpush.msra.mxu3 %v5066_v3  ;;  %v6837_v29 = vld [vmem:[#allocation62_spill] sm:$0xff] }
 0x29b   :  { %1299 = vmatpush.msra.mxu0 %v5069_v4  ;;  %1319 = vmatpush.msra.mxu1 %v5072_v5 }
 0x29c   :  { %1339 = vmatpush.msra.mxu2 %v5075_v6  ;;  %1359 = vmatpush.msra.mxu3 %v5078_v21 }
 0x29d   :  { %1300 = vmatpush.msra.mxu0 %v5081_v7  ;;  %1320 = vmatpush.msra.mxu1 %v5084_v28  ;;  %v5102_v28 = vld [vmem:[#allocation12 + $0x38] sm:$0xff] }
 0x29e   :  { %1340 = vmatpush.msra.mxu2 %v5087_v8  ;;  %1360 = vmatpush.msra.mxu3 %v5090_v9  ;;  %6830 = vst [vmem:[#allocation54_spill] sm:$0xff] %v5102_v28  ;;  %v5105_v8 = vld [vmem:[#allocation12] sm:$0xff]  ;;  %v5108_v9 = vld [vmem:[#allocation12 + $0x8] sm:$0xff] }
 0x29f   :  { %1301 = vmatpush.msra.mxu0 %v5093_v2  ;;  %1321 = vmatpush.msra.mxu1 %v5096_v10  ;;  %6831 = vst [vmem:[#allocation53_spill] sm:$0xff] %v5105_v8  ;;  %v5111_v2 = vld [vmem:[#allocation12 + $0x10] sm:$0xff]  ;;  %v5114_v10 = vld [vmem:[#allocation12 + $0x18] sm:$0xff] }
 0x2a0   :  { %1341 = vmatpush.msra.mxu2 %v5099_v11  ;;  %1361 = vmatpush.msra.mxu3 %v5102_v28  ;;  %6832 = vst [vmem:[#allocation55_spill] sm:$0xff] %v5108_v9  ;;  %v6835_v11 = vld [vmem:[#allocation59_spill] sm:$0xff]  ;;  %v6836_v28 = vld [vmem:[#allocation60_spill] sm:$0xff] }
 0x2a1   :  { %1302 = vmatpush.msra.mxu0 %v5105_v8  ;;  %1322 = vmatpush.msra.mxu1 %v5108_v9  ;;  %6833 = vst [vmem:[#allocation56_spill] sm:$0xff] %v5111_v2  ;;  %v321_v7 = vadd.f32 %v6835_v11, %v6785_v30  ;;  %v362_v21 = vadd.f32 %v6836_v28, %v6787_v33 }
 0x2a2   :  { %1342 = vmatpush.msra.mxu2 %v5111_v2  ;;  %6834 = vst [vmem:[#allocation58_spill] sm:$0xff] %v5114_v10  ;;  %1362 = vmatpush.msra.mxu3 %v5114_v10  ;;  %v444_v2 = vadd.f32 %v6837_v29, %v6789_v43 }
 0x2fe   :  { %v988_v6 = vpop.f32.mrf.mxu0  ;;  %v1008_v8 = vpop.f32.mrf.mxu1 }
 0x2ff   :  { %v1051_v5 = vadd.f32 %v988_v6, %v321_v7  ;;  %v1052_v4 = vadd.f32 %v1008_v8, %v362_v21 }
 0x301   :  { %v3583_v3 = vmul.f32 -1.442695, %v1051_v5  ;;  %v3584_v9 = vmul.f32 -1.442695, %v1052_v4  ;;  %v6838_v5 = vld [vmem:[#allocation61_spill] sm:$0xff] }
 0x302   :  { %v403_v4 = vadd.f32 %v6838_v5, %v6791_v1 }
 0x303   :  { %3690 = vpow2.f32 %v3583_v3 }
 0x304   :  { %3692 = vpow2.f32 %v3584_v9 }
 0x305   :  { %v1048_v25 = vpop.f32.mrf.mxu3  ;;  %v1028_v28 = vpop.f32.mrf.mxu2 }
 0x306   :  { %v1054_v24 = vadd.f32 %v1048_v25, %v444_v2  ;;  %v1053_v7 = vadd.f32 %v1028_v28, %v403_v4 }
 0x308   :  { %v3585_v10 = vmul.f32 -1.442695, %v1054_v24 }
 0x309   :  { %v3691_v23 = vpop.eup %3690 }
 0x30a   :  { %v3693_v22 = vpop.eup %3692  ;;  %v1058_v11 = vadd.f32 1.0, %v3691_v23  ;;  %3694 = vpow2.f32 %v3585_v10 }
 0x30b   :  { %v1077_v30 = vadd.f32 1.0, %v3693_v22 }
 0x30c   :  { %3696 = vrcp.f32 %v1058_v11  ;;  %v1070_v2 = vand.u32 2147483648, %v1058_v11  ;;  %v1068_v10 = vand.u32 2147483647, %v1058_v11  ;;  %vm1064_vm6 = vweird.f32 %v1058_v11 }
 0x30d   :  { %3698 = vrcp.f32 %v1077_v30  ;;  %v1089_v23 = vand.u32 2147483648, %v1077_v30  ;;  %v1087_v33 = vand.u32 2147483647, %v1077_v30  ;;  %vm1083_vm7 = vweird.f32 %v1077_v30 }
 0x30e   :  { %v1071_v28 = vor.u32 1.1754944e-38, %v1070_v2  ;;  %vm1069_vm10 = vcmp.eq.f32.partialorder %v1068_v10, 8.507059e+37 }
 0x30f   :  { %vm1088_vm11 = vcmp.eq.f32.partialorder %v1087_v33, 8.507059e+37 }
 0x310   :  { %v3695_v6 = vpop.eup %3694 }
 0x311   :  { %v1097_v3 = vadd.f32 1.0, %v3695_v6 }
 0x312   :  { %v3697_v21 = vpop.eup %3696 }
 0x313   :  { %v3699_v29 = vpop.eup %3698  ;;  %v1060_v8 = vmul.f32 %v3697_v21, %v1058_v11  ;;  %3700 = vrcp.f32 %v1097_v3  ;;  %vm1065_vm4 = vweird.f32 %v3697_v21  ;;  %vm1103_vm13 = vweird.f32 %v1097_v3 }
 0x314   :  { %v1079_v25 = vmul.f32 %v3699_v29, %v1077_v30  ;;  %3702 = vtanh.f32 %v1053_v7  ;;  %vm1084_vm5 = vweird.f32 %v3699_v29  ;;  %vm1066_vm8 = vmor %vm1064_vm6, %vm1065_vm4 }
 0x315   :  { %v1061_v24 = vsub.f32 1.0, %v1060_v8  ;;  %vm1085_vm9 = vmor %vm1083_vm7, %vm1084_vm5  ;;  %v1090_v8 = vor.u32 1.1754944e-38, %v1089_v23 }
 0x316   :  { %v1080_v9 = vsub.f32 1.0, %v1079_v25 }
 0x317   :  { %v1062_v22 = vmul.f32 %v3697_v21, %v1061_v24 }
 0x318   :  { %v1081_v43 = vmul.f32 %v3699_v29, %v1080_v9 }
 0x319   :  { %v3701_v19 = vpop.eup %3700  ;;  %v1063_v5 = vadd.f32 %v3697_v21, %v1062_v22 }
 0x31a   :  { %v1082_v6 = vadd.f32 %v3699_v29, %v1081_v43  ;;  %v1099_v4 = vmul.f32 %v3701_v19, %v1097_v3  ;;  %v3703_v7 = vpop.eup %3702  ;;  %vm1104_vm12 = vweird.f32 %v3701_v19  ;;  %v1109_v43 = vand.u32 2147483648, %v1097_v3 }
 0x31b   :  { %v1067_v25 = vsel %vm1066_vm8, %v3697_v21, %v1063_v5  ;;  %v1107_v21 = vand.u32 2147483647, %v1097_v3  ;;  %vm1105_vm14 = vmor %vm1103_vm13, %vm1104_vm12  ;;  %v6846_v3 = vld [vmem:[#allocation37_spill] sm:$0xff]  ;;  %v6847_v5 = vld [vmem:[#allocation39_spill] sm:$0xff] }
 0x31c   :  { %v1072_v1 = vsel %vm1069_vm10, %v1071_v28, %v1067_v25  ;;  %v1086_v24 = vsel %vm1085_vm9, %v3699_v29, %v1082_v6  ;;  %v1100_v18 = vsub.f32 1.0, %v1099_v4  ;;  %v1110_v23 = vor.u32 1.1754944e-38, %v1109_v43  ;;  %v6848_v28 = vld [vmem:[#allocation40_spill] sm:$0xff]  ;;  %v6849_v6 = vld [vmem:[#allocation42_spill] sm:$0xff]  ;;  %v6850_v4 = vld [vmem:[#allocation41_spill] sm:$0xff] }
 0x31d   :  { %v1091_v9 = vsel %vm1088_vm11, %v1090_v8, %v1086_v24  ;;  %v1114_v17 = vmul.f32 %v3703_v7, %v1072_v1  ;;  %vm1108_vm15 = vcmp.eq.f32.partialorder %v1107_v21, 8.507059e+37  ;;  %v6840_v1 = vld [vmem:[#allocation32_spill] sm:$0xff]  ;;  %v6851_v8 = vld [vmem:[#allocation43_spill] sm:$0xff]  ;;  %v6853_v7 = vld [vmem:[#allocation45_spill] sm:$0xff] }
 0x31e   :  { %v1113_v16 = vmul.f32 %v1091_v9, %v4992_v20  ;;  %v1101_v22 = vmul.f32 %v3701_v19, %v1100_v18  ;;  %v6841_v20 = vld [vmem:[#allocation34_spill] sm:$0xff]  ;;  %v6844_v18 = vld [vmem:[#allocation36_spill] sm:$0xff]  ;;  %v6855_v9 = vld [vmem:[#allocation47_spill] sm:$0xff] }
 0x31f   :  { %v6852_v25 = vld [vmem:[#allocation44_spill] sm:$0xff]  ;;  %v6854_v24 = vld [vmem:[#allocation46_spill] sm:$0xff]  ;;  %v6859_v21 = vld [vmem:[#allocation51_spill] sm:$0xff] }
 0x320   :  { %v5126_v11 = vadd.f32 %v1114_v17, %v1113_v16  ;;  %v1102_v30 = vadd.f32 %v3701_v19, %v1101_v22  ;;  %v6842_v16 = vld [vmem:[#allocation33_spill] sm:$0xff]  ;;  %v6843_v17 = vld [vmem:[#allocation35_spill] sm:$0xff]  ;;  %v6856_v22 = vld [vmem:[#allocation48_spill] sm:$0xff] }
 0x321   :  { %v6858_v43 = vld [vmem:[#allocation50_spill] sm:$0xff] }
 0x322   :  { %3704 = vtanh.f32 %v5126_v11  ;;  %v1106_v2 = vsel %vm1105_vm14, %v3701_v19, %v1102_v30  ;;  %v6845_v19 = vld [vmem:[#allocation38_spill] sm:$0xff]  ;;  %v6857_v30 = vld [vmem:[#allocation49_spill] sm:$0xff] }
 0x323   :  { %v1111_v29 = vsel %vm1108_vm15, %v1110_v23, %v1106_v2  ;;  %v6860_v2 = vld [vmem:[#allocation52_spill] sm:$0xff]  ;;  %v6861_v23 = vld [vmem:[#allocation54_spill] sm:$0xff] }
 0x328   :  { %v3705_v33 = vpop.eup %3704 }
 0x329   :  { %v5129_v10 = vmul.f32 %v3705_v33, %v1111_v29  ;;  %v6862_v33 = vld [vmem:[#allocation53_spill] sm:$0xff]  ;;  %v6863_v29 = vld [vmem:[#allocation55_spill] sm:$0xff] }
 0x32b   :  { %6839 = vst [vmem:[#allocation57_spill] sm:$0xff] %v5129_v10  ;;  %1145 = vmatmul.f32.vlgmr.msrb.gmra.mxu0 %v5129_v10  ;;  %1165 = vmatmul.f32.vlgmr.msrb.gmra.mxu1 %v5129_v10 }
 0x32c   :  { %1185 = vmatmul.f32.vlgmr.msrb.gmra.mxu2 %v5129_v10  ;;  %1205 = vmatmul.f32.vlgmr.msrb.gmra.mxu3 %v5129_v10  ;;  %v6864_v10 = vld [vmem:[#allocation56_spill] sm:$0xff] }
 0x32d   :  { %1445 = vmatpush.msrb.mxu0 %v4843_v0  ;;  %1465 = vmatpush.msrb.mxu1 %v4846_v53 }
 0x32e   :  { %1485 = vmatpush.msrb.mxu2 %v4849_v63  ;;  %1505 = vmatpush.msrb.mxu3 %v4852_v52 }
 0x32f   :  { %1446 = vmatpush.msrb.mxu0 %v4855_v31  ;;  %1466 = vmatpush.msrb.mxu1 %v4858_v32 }
 0x330   :  { %1486 = vmatpush.msrb.mxu2 %v4861_v34  ;;  %1506 = vmatpush.msrb.mxu3 %v4864_v35 }
 0x331   :  { %1447 = vmatpush.msrb.mxu0 %v4867_v36  ;;  %1467 = vmatpush.msrb.mxu1 %v4870_v37 }
 0x332   :  { %1487 = vmatpush.msrb.mxu2 %v4873_v38  ;;  %1507 = vmatpush.msrb.mxu3 %v4876_v39 }
 0x333   :  { %1448 = vmatpush.msrb.mxu0 %v4879_v41  ;;  %1468 = vmatpush.msrb.mxu1 %v4882_v42 }
 0x334   :  { %1488 = vmatpush.msrb.mxu2 %v4885_v44  ;;  %1508 = vmatpush.msrb.mxu3 %v4888_v45 }
 0x335   :  { %1449 = vmatpush.msrb.mxu0 %v4891_v46  ;;  %1469 = vmatpush.msrb.mxu1 %v4894_v48 }
 0x336   :  { %1489 = vmatpush.msrb.mxu2 %v4897_v56  ;;  %1509 = vmatpush.msrb.mxu3 %v4900_v59 }
 0x337   :  { %1450 = vmatpush.msrb.mxu0 %v4903_v40  ;;  %1470 = vmatpush.msrb.mxu1 %v4906_v51 }
 0x338   :  { %1490 = vmatpush.msrb.mxu2 %v4909_v57  ;;  %1510 = vmatpush.msrb.mxu3 %v4912_v62 }
 0x339   :  { %1451 = vmatpush.msrb.mxu0 %v4915_v54  ;;  %1471 = vmatpush.msrb.mxu1 %v4918_v50 }
 0x33a   :  { %1491 = vmatpush.msrb.mxu2 %v4921_v14  ;;  %1511 = vmatpush.msrb.mxu3 %v6804_v58 }
 0x33b   :  { %1452 = vmatpush.msrb.mxu0 %v6805_v26  ;;  %1472 = vmatpush.msrb.mxu1 %v6806_v12 }
 0x33c   :  { %1492 = vmatpush.msrb.mxu2 %v6807_v13  ;;  %1512 = vmatpush.msrb.mxu3 %v6808_v15 }
 0x33d   :  { %1453 = vmatpush.msrb.mxu0 %v4939_v27  ;;  %1473 = vmatpush.msrb.mxu1 %v4942_v47 }
 0x33e   :  { %1493 = vmatpush.msrb.mxu2 %v4945_v55  ;;  %1513 = vmatpush.msrb.mxu3 %v4948_v49 }
 0x33f   :  { %1454 = vmatpush.msrb.mxu0 %v4951_v60  ;;  %1474 = vmatpush.msrb.mxu1 %v4954_v61 }
 0x340   :  { %1494 = vmatpush.msrb.mxu2 %v6840_v1  ;;  %1514 = vmatpush.msrb.mxu3 %v6841_v20 }
 0x341   :  { %1455 = vmatpush.msrb.mxu0 %v6842_v16  ;;  %1475 = vmatpush.msrb.mxu1 %v6843_v17 }
 0x342   :  { %1495 = vmatpush.msrb.mxu2 %v6844_v18  ;;  %1515 = vmatpush.msrb.mxu3 %v6845_v19 }
 0x343   :  { %1456 = vmatpush.msrb.mxu0 %v6846_v3  ;;  %1476 = vmatpush.msrb.mxu1 %v6847_v5 }
 0x344   :  { %1496 = vmatpush.msrb.mxu2 %v6848_v28  ;;  %1516 = vmatpush.msrb.mxu3 %v6849_v6  ;;  %v6871_v28 = vld [vmem:[#allocation65_spill] sm:$0xff] }
 0x345   :  { %1457 = vmatpush.msrb.mxu0 %v6850_v4  ;;  %1477 = vmatpush.msrb.mxu1 %v6851_v8 }
 0x346   :  { %1497 = vmatpush.msrb.mxu2 %v6852_v25  ;;  %1517 = vmatpush.msrb.mxu3 %v6853_v7  ;;  %v6869_v25 = vld [vmem:[#allocation64_spill] sm:$0xff] }
 0x347   :  { %1458 = vmatpush.msrb.mxu0 %v6854_v24  ;;  %1478 = vmatpush.msrb.mxu1 %v6855_v9  ;;  %v6865_v24 = vld [vmem:[#allocation58_spill] sm:$0xff]  ;;  %v6866_v9 = vld [vmem:[#allocation76_spill] sm:$0xff] }
 0x348   :  { %1498 = vmatpush.msrb.mxu2 %v6856_v22  ;;  %1518 = vmatpush.msrb.mxu3 %v6857_v30  ;;  %v6867_v22 = vld [vmem:[#allocation63_spill] sm:$0xff]  ;;  %v6868_v30 = vld [vmem:[#allocation77_spill] sm:$0xff] }
 0x349   :  { %1459 = vmatpush.msrb.mxu0 %v6858_v43  ;;  %1479 = vmatpush.msrb.mxu1 %v6859_v21  ;;  %v324_v7 = vadd.f32 %v6867_v22, %v6866_v9  ;;  %v365_v43 = vadd.f32 %v6869_v25, %v6868_v30 }
 0x34a   :  { %1499 = vmatpush.msrb.mxu2 %v6860_v2  ;;  %1519 = vmatpush.msrb.mxu3 %v6861_v23 }
 0x34b   :  { %1460 = vmatpush.msrb.mxu0 %v6862_v33  ;;  %1480 = vmatpush.msrb.mxu1 %v6863_v29  ;;  %v6870_v33 = vld [vmem:[#allocation80_spill] sm:$0xff] }
 0x34c   :  { %1500 = vmatpush.msrb.mxu2 %v6864_v10  ;;  %1520 = vmatpush.msrb.mxu3 %v6865_v24  ;;  %v447_v29 = vadd.f32 %v6871_v28, %v6870_v33 }
 0x3a8   :  { %v1146_v8 = vpop.f32.mrf.mxu0  ;;  %v1166_v21 = vpop.f32.mrf.mxu1 }
 0x3a9   :  { %v1209_v4 = vadd.f32 %v1146_v8, %v324_v7  ;;  %v1210_v2 = vadd.f32 %v1166_v21, %v365_v43  ;;  %v6872_v7 = vld [vmem:[#allocation82_spill] sm:$0xff] }
 0x3ab   :  { %v3586_v6 = vmul.f32 -1.442695, %v1209_v4  ;;  %v3587_v23 = vmul.f32 -1.442695, %v1210_v2  ;;  %v6873_v4 = vld [vmem:[#allocation68_spill] sm:$0xff] }
 0x3ac   :  { %v406_v43 = vadd.f32 %v6873_v4, %v6872_v7 }
 0x3ad   :  { %3706 = vpow2.f32 %v3586_v6 }
 0x3ae   :  { %3708 = vpow2.f32 %v3587_v23 }
 0x3af   :  { %v1206_v10 = vpop.f32.mrf.mxu3  ;;  %v1186_v25 = vpop.f32.mrf.mxu2 }
 0x3b0   :  { %v1212_v5 = vadd.f32 %v1206_v10, %v447_v29  ;;  %v1211_v2 = vadd.f32 %v1186_v25, %v406_v43 }
 0x3b2   :  { %v3588_v24 = vmul.f32 -1.442695, %v1212_v5 }
 0x3b3   :  { %v3707_v3 = vpop.eup %3706 }
 0x3b4   :  { %v3709_v19 = vpop.eup %3708  ;;  %v1216_v22 = vadd.f32 1.0, %v3707_v3  ;;  %3710 = vpow2.f32 %v3588_v24 }
 0x3b5   :  { %v1235_v9 = vadd.f32 1.0, %v3709_v19 }
 0x3b6   :  { %3712 = vrcp.f32 %v1216_v22  ;;  %v1228_v33 = vand.u32 2147483648, %v1216_v22  ;;  %v1226_v24 = vand.u32 2147483647, %v1216_v22  ;;  %vm1222_vm2 = vweird.f32 %v1216_v22 }
 0x3b7   :  { %3714 = vrcp.f32 %v1235_v9  ;;  %v1247_v3 = vand.u32 2147483648, %v1235_v9  ;;  %v1245_v18 = vand.u32 2147483647, %v1235_v9  ;;  %vm1241_vm3 = vweird.f32 %v1235_v9 }
 0x3b8   :  { %v1229_v25 = vor.u32 1.1754944e-38, %v1228_v33  ;;  %vm1227_vm6 = vcmp.eq.f32.partialorder %v1226_v24, 8.507059e+37 }
 0x3b9   :  { %vm1246_vm7 = vcmp.eq.f32.partialorder %v1245_v18, 8.507059e+37 }
 0x3ba   :  { %v3711_v8 = vpop.eup %3710 }
 0x3bb   :  { %v1255_v6 = vadd.f32 1.0, %v3711_v8 }
 0x3bc   :  { %v3713_v21 = vpop.eup %3712 }
 0x3bd   :  { %v3715_v28 = vpop.eup %3714  ;;  %v1218_v23 = vmul.f32 %v3713_v21, %v1216_v22  ;;  %3716 = vrcp.f32 %v1255_v6  ;;  %vm1223_vm0 = vweird.f32 %v3713_v21  ;;  %vm1261_vm9 = vweird.f32 %v1255_v6 }
 0x3be   :  { %v1237_v10 = vmul.f32 %v3715_v28, %v1235_v9  ;;  %3718 = vtanh.f32 %v1211_v2  ;;  %vm1242_vm1 = vweird.f32 %v3715_v28  ;;  %vm1224_vm4 = vmor %vm1222_vm2, %vm1223_vm0  ;;  %v1265_v33 = vand.u32 2147483647, %v1255_v6 }
 0x3bf   :  { %v1219_v5 = vsub.f32 1.0, %v1218_v23  ;;  %vm1243_vm5 = vmor %vm1241_vm3, %vm1242_vm1  ;;  %v1248_v23 = vor.u32 1.1754944e-38, %v1247_v3 }
 0x3c0   :  { %v1238_v29 = vsub.f32 1.0, %v1237_v10  ;;  %vm1266_vm11 = vcmp.eq.f32.partialorder %v1265_v33, 8.507059e+37 }
 0x3c1   :  { %v1220_v19 = vmul.f32 %v3713_v21, %v1219_v5 }
 0x3c2   :  { %v1239_v30 = vmul.f32 %v3715_v28, %v1238_v29 }
 0x3c3   :  { %v3717_v17 = vpop.eup %3716  ;;  %v1221_v4 = vadd.f32 %v3713_v21, %v1220_v19 }
 0x3c4   :  { %v1240_v8 = vadd.f32 %v3715_v28, %v1239_v30  ;;  %v1257_v43 = vmul.f32 %v3717_v17, %v1255_v6  ;;  %v3719_v2 = vpop.eup %3718  ;;  %vm1262_vm8 = vweird.f32 %v3717_v17  ;;  %v1267_v30 = vand.u32 2147483648, %v1255_v6 }
 0x3c5   :  { %v1225_v10 = vsel %vm1224_vm4, %v3713_v21, %v1221_v4  ;;  %vm1263_vm10 = vmor %vm1261_vm9, %vm1262_vm8 }
 0x3c6   :  { %v1230_v7 = vsel %vm1227_vm6, %v1229_v25, %v1225_v10  ;;  %v1244_v5 = vsel %vm1243_vm5, %v3715_v28, %v1240_v8  ;;  %v1258_v16 = vsub.f32 1.0, %v1257_v43  ;;  %v1268_v3 = vor.u32 1.1754944e-38, %v1267_v30  ;;  %v6906_v10 = vld [vmem:[#allocation82_spill] sm:$0xff] }
 0x3c7   :  { %v1249_v29 = vsel %vm1246_vm7, %v1248_v23, %v1244_v5  ;;  %v1272_v20 = vmul.f32 %v3719_v2, %v1230_v7  ;;  %v6907_v2 = vld [vmem:[#allocation72_spill] sm:$0xff] }
 0x3c8   :  { %v1271_v1 = vmul.f32 %v1249_v29, %v5126_v11  ;;  %v1259_v19 = vmul.f32 %v3717_v17, %v1258_v16  ;;  %v6904_v11 = vld [vmem:[#allocation80_spill] sm:$0xff]  ;;  %v409_v5 = vadd.f32 %v6907_v2, %v6906_v10  ;;  %v6908_v2 = vld [vmem:[#allocation70_spill] sm:$0xff] }
 0x3ca   :  { %v5208_v22 = vadd.f32 %v1272_v20, %v1271_v1  ;;  %v1260_v9 = vadd.f32 %v3717_v17, %v1259_v19  ;;  %v6905_v1 = vld [vmem:[#allocation69_spill] sm:$0xff] }
 0x3cb   :  { %v450_v20 = vadd.f32 %v6905_v1, %v6904_v11  ;;  %v1806_v1 = vld [vmem:[#allocation13 + $0x1a0] sm:$0xff] }
 0x3cc   :  { %3720 = vtanh.f32 %v5208_v22  ;;  %v1264_v21 = vsel %vm1263_vm10, %v3717_v17, %v1260_v9 }
 0x3cd   :  { %v1269_v28 = vsel %vm1266_vm11, %v1268_v3, %v1264_v21 }
 0x3d2   :  { %v3721_v18 = vpop.eup %3720 }
 0x3d3   :  { %v5211_v24 = vmul.f32 %v3721_v18, %v1269_v28 }
 0x3d5   :  { %1303 = vmatmul.f32.vlgmr.msra.gmra.mxu0 %v5211_v24  ;;  %1323 = vmatmul.f32.vlgmr.msra.gmra.mxu1 %v5211_v24 }
 0x3d6   :  { %1343 = vmatmul.f32.vlgmr.msra.gmra.mxu2 %v5211_v24  ;;  %1363 = vmatmul.f32.vlgmr.msra.gmra.mxu3 %v5211_v24 }
 0x3d7   :  { %1603 = vmatpush.msra.mxu0 %v4843_v0  ;;  %1623 = vmatpush.msra.mxu1 %v4846_v53  ;;  %v6874_v0 = vld [vmem:[#allocation32_spill] sm:$0xff]  ;;  %v6875_v53 = vld [vmem:[#allocation34_spill] sm:$0xff] }
 0x3d8   :  { %1643 = vmatpush.msra.mxu2 %v4849_v63  ;;  %1663 = vmatpush.msra.mxu3 %v4852_v52  ;;  %v6876_v63 = vld [vmem:[#allocation33_spill] sm:$0xff]  ;;  %v6877_v52 = vld [vmem:[#allocation35_spill] sm:$0xff] }
 0x3d9   :  { %1604 = vmatpush.msra.mxu0 %v4855_v31  ;;  %1624 = vmatpush.msra.mxu1 %v4858_v32  ;;  %v6878_v31 = vld [vmem:[#allocation36_spill] sm:$0xff]  ;;  %v6880_v32 = vld [vmem:[#allocation37_spill] sm:$0xff] }
 0x3da   :  { %1644 = vmatpush.msra.mxu2 %v4861_v34  ;;  %1664 = vmatpush.msra.mxu3 %v4864_v35  ;;  %v6881_v34 = vld [vmem:[#allocation39_spill] sm:$0xff]  ;;  %v6882_v35 = vld [vmem:[#allocation40_spill] sm:$0xff] }
 0x3db   :  { %1605 = vmatpush.msra.mxu0 %v4867_v36  ;;  %1625 = vmatpush.msra.mxu1 %v4870_v37  ;;  %v6883_v36 = vld [vmem:[#allocation42_spill] sm:$0xff]  ;;  %v6885_v37 = vld [vmem:[#allocation43_spill] sm:$0xff] }
 0x3dc   :  { %1645 = vmatpush.msra.mxu2 %v4873_v38  ;;  %1665 = vmatpush.msra.mxu3 %v4876_v39  ;;  %v6886_v38 = vld [vmem:[#allocation44_spill] sm:$0xff]  ;;  %v6887_v39 = vld [vmem:[#allocation45_spill] sm:$0xff] }
 0x3dd   :  { %1606 = vmatpush.msra.mxu0 %v4879_v41  ;;  %1626 = vmatpush.msra.mxu1 %v4882_v42  ;;  %v6888_v41 = vld [vmem:[#allocation46_spill] sm:$0xff]  ;;  %v6889_v42 = vld [vmem:[#allocation47_spill] sm:$0xff] }
 0x3de   :  { %1646 = vmatpush.msra.mxu2 %v4885_v44  ;;  %1666 = vmatpush.msra.mxu3 %v4888_v45  ;;  %v6890_v44 = vld [vmem:[#allocation48_spill] sm:$0xff]  ;;  %v6891_v45 = vld [vmem:[#allocation49_spill] sm:$0xff] }
 0x3df   :  { %1607 = vmatpush.msra.mxu0 %v4891_v46  ;;  %1627 = vmatpush.msra.mxu1 %v4894_v48  ;;  %v6892_v46 = vld [vmem:[#allocation50_spill] sm:$0xff]  ;;  %v6893_v48 = vld [vmem:[#allocation51_spill] sm:$0xff] }
 0x3e0   :  { %1647 = vmatpush.msra.mxu2 %v4897_v56  ;;  %1667 = vmatpush.msra.mxu3 %v4900_v59  ;;  %v6894_v56 = vld [vmem:[#allocation52_spill] sm:$0xff]  ;;  %v6895_v59 = vld [vmem:[#allocation54_spill] sm:$0xff] }
 0x3e1   :  { %1608 = vmatpush.msra.mxu0 %v4903_v40  ;;  %1628 = vmatpush.msra.mxu1 %v4906_v51  ;;  %v6896_v40 = vld [vmem:[#allocation53_spill] sm:$0xff]  ;;  %v6897_v51 = vld [vmem:[#allocation55_spill] sm:$0xff] }
 0x3e2   :  { %1648 = vmatpush.msra.mxu2 %v4909_v57  ;;  %1668 = vmatpush.msra.mxu3 %v4912_v62  ;;  %v6898_v57 = vld [vmem:[#allocation56_spill] sm:$0xff]  ;;  %v6899_v62 = vld [vmem:[#allocation58_spill] sm:$0xff] }
 0x3e3   :  { %1609 = vmatpush.msra.mxu0 %v4915_v54  ;;  %1629 = vmatpush.msra.mxu1 %v4918_v50  ;;  %v6900_v54 = vld [vmem:[#allocation76_spill] sm:$0xff]  ;;  %v6901_v50 = vld [vmem:[#allocation66_spill] sm:$0xff] }
 0x3e4   :  { %1649 = vmatpush.msra.mxu2 %v4921_v14  ;;  %1669 = vmatpush.msra.mxu3 %v6804_v58  ;;  %v327_v14 = vadd.f32 %v6901_v50, %v6900_v54 }
 0x3e5   :  { %1610 = vmatpush.msra.mxu0 %v6805_v26  ;;  %1630 = vmatpush.msra.mxu1 %v6806_v12 }
 0x3e6   :  { %1650 = vmatpush.msra.mxu2 %v6807_v13  ;;  %1670 = vmatpush.msra.mxu3 %v6808_v15 }
 0x3e7   :  { %1611 = vmatpush.msra.mxu0 %v4939_v27  ;;  %1631 = vmatpush.msra.mxu1 %v4942_v47  ;;  %v6879_v27 = vld [vmem:[#allocation38_spill] sm:$0xff]  ;;  %v6902_v47 = vld [vmem:[#allocation77_spill] sm:$0xff] }
 0x3e8   :  { %1651 = vmatpush.msra.mxu2 %v4945_v55  ;;  %1671 = vmatpush.msra.mxu3 %v4948_v49  ;;  %v6903_v55 = vld [vmem:[#allocation67_spill] sm:$0xff] }
 0x3e9   :  { %1612 = vmatpush.msra.mxu0 %v4951_v60  ;;  %1632 = vmatpush.msra.mxu1 %v4954_v61  ;;  %v6884_v61 = vld [vmem:[#allocation41_spill] sm:$0xff]  ;;  %v368_v49 = vadd.f32 %v6903_v55, %v6902_v47 }
 0x3ea   :  { %1652 = vmatpush.msra.mxu2 %v6874_v0  ;;  %1672 = vmatpush.msra.mxu3 %v6875_v53 }
 0x3eb   :  { %1613 = vmatpush.msra.mxu0 %v6876_v63  ;;  %1633 = vmatpush.msra.mxu1 %v6877_v52 }
 0x3ec   :  { %1653 = vmatpush.msra.mxu2 %v6878_v31  ;;  %1673 = vmatpush.msra.mxu3 %v6879_v27 }
 0x3ed   :  { %1614 = vmatpush.msra.mxu0 %v6880_v32  ;;  %1634 = vmatpush.msra.mxu1 %v6881_v34 }
 0x3ee   :  { %1654 = vmatpush.msra.mxu2 %v6882_v35  ;;  %1674 = vmatpush.msra.mxu3 %v6883_v36 }
 0x3ef   :  { %1615 = vmatpush.msra.mxu0 %v6884_v61  ;;  %1635 = vmatpush.msra.mxu1 %v6885_v37 }
 0x3f0   :  { %1655 = vmatpush.msra.mxu2 %v6886_v38  ;;  %1675 = vmatpush.msra.mxu3 %v6887_v39 }
 0x3f1   :  { %1616 = vmatpush.msra.mxu0 %v6888_v41  ;;  %1636 = vmatpush.msra.mxu1 %v6889_v42 }
 0x3f2   :  { %1656 = vmatpush.msra.mxu2 %v6890_v44  ;;  %1676 = vmatpush.msra.mxu3 %v6891_v45 }
 0x3f3   :  { %1617 = vmatpush.msra.mxu0 %v6892_v46  ;;  %1637 = vmatpush.msra.mxu1 %v6893_v48 }
 0x3f4   :  { %1657 = vmatpush.msra.mxu2 %v6894_v56  ;;  %1677 = vmatpush.msra.mxu3 %v6895_v59 }
 0x3f5   :  { %1618 = vmatpush.msra.mxu0 %v6896_v40  ;;  %1638 = vmatpush.msra.mxu1 %v6897_v51 }
 0x3f6   :  { %1658 = vmatpush.msra.mxu2 %v6898_v57  ;;  %1678 = vmatpush.msra.mxu3 %v6899_v62 }
 0x452   :  { %v1304_v60 = vpop.f32.mrf.mxu0  ;;  %v1324_v58 = vpop.f32.mrf.mxu1 }
 0x453   :  { %v1367_v26 = vadd.f32 %v1304_v60, %v327_v14  ;;  %v1368_v12 = vadd.f32 %v1324_v58, %v368_v49  ;;  %v1815_v49 = vld [vmem:[#allocation13 + $0x1e8] sm:$0xff]  ;;  %v1816_v60 = vld [vmem:[#allocation13 + $0x1f0] sm:$0xff]  ;;  %v1817_v58 = vld [vmem:[#allocation13 + $0x1f8] sm:$0xff] }
 0x455   :  { %v3589_v13 = vmul.f32 -1.442695, %v1367_v26  ;;  %v3590_v15 = vmul.f32 -1.442695, %v1368_v12  ;;  %v1810_v26 = vld [vmem:[#allocation13 + $0x1c0] sm:$0xff]  ;;  %v1811_v12 = vld [vmem:[#allocation13 + $0x1c8] sm:$0xff] }
 0x457   :  { %3722 = vpow2.f32 %v3589_v13  ;;  %v1812_v13 = vld [vmem:[#allocation13 + $0x1d0] sm:$0xff] }
 0x458   :  { %3724 = vpow2.f32 %v3590_v15  ;;  %v1813_v15 = vld [vmem:[#allocation13 + $0x1d8] sm:$0xff] }
 0x459   :  { %v1364_v16 = vpop.f32.mrf.mxu3  ;;  %v1344_v43 = vpop.f32.mrf.mxu2 }
 0x45a   :  { %v1370_v17 = vadd.f32 %v1364_v16, %v450_v20  ;;  %v1369_v9 = vadd.f32 %v1344_v43, %v409_v5  ;;  %v1807_v20 = vld [vmem:[#allocation13 + $0x1a8] sm:$0xff]  ;;  %v1808_v16 = vld [vmem:[#allocation13 + $0x1b0] sm:$0xff]  ;;  %v330_v5 = vadd.f32 %v6908_v2, %v6900_v54 }
 0x45b   :  { %v1799_v43 = vld [vmem:[#allocation13 + $0x168] sm:$0xff] }
 0x45c   :  { %v3591_v7 = vmul.f32 -1.442695, %v1370_v17  ;;  %v1809_v17 = vld [vmem:[#allocation13 + $0x1b8] sm:$0xff] }
 0x45d   :  { %v3723_v6 = vpop.eup %3722 }
 0x45e   :  { %v3725_v4 = vpop.eup %3724  ;;  %v1374_v25 = vadd.f32 1.0, %v3723_v6  ;;  %3726 = vpow2.f32 %v3591_v7  ;;  %v1802_v7 = vld [vmem:[#allocation13 + $0x180] sm:$0xff]  ;;  %v1803_v6 = vld [vmem:[#allocation13 + $0x188] sm:$0xff] }
 0x45f   :  { %v1393_v8 = vadd.f32 1.0, %v3725_v4  ;;  %v1804_v4 = vld [vmem:[#allocation13 + $0x190] sm:$0xff] }
 0x460   :  { %3728 = vrcp.f32 %v1374_v25  ;;  %v1386_v28 = vand.u32 2147483648, %v1374_v25  ;;  %v1384_v63 = vand.u32 2147483647, %v1374_v25  ;;  %vm1380_vm14 = vweird.f32 %v1374_v25 }
 0x461   :  { %3730 = vrcp.f32 %v1393_v8  ;;  %v1405_v0 = vand.u32 2147483648, %v1393_v8  ;;  %v1403_v31 = vand.u32 2147483647, %v1393_v8  ;;  %vm1399_vm15 = vweird.f32 %v1393_v8 }
 0x462   :  { %v1387_v34 = vor.u32 1.1754944e-38, %v1386_v28  ;;  %vm1385_vm2 = vcmp.eq.f32.partialorder %v1384_v63, 8.507059e+37  ;;  %v1790_v63 = vld [vmem:[#allocation13 + $0x120] sm:$0xff] }
 0x463   :  { %v1406_v61 = vor.u32 1.1754944e-38, %v1405_v0  ;;  %vm1404_vm3 = vcmp.eq.f32.partialorder %v1403_v31, 8.507059e+37  ;;  %v1792_v31 = vld [vmem:[#allocation13 + $0x130] sm:$0xff] }
 0x464   :  { %v3727_v23 = vpop.eup %3726 }
 0x465   :  { %v1413_v29 = vadd.f32 1.0, %v3727_v23  ;;  %v1800_v23 = vld [vmem:[#allocation13 + $0x170] sm:$0xff] }
 0x466   :  { %v3729_v19 = vpop.eup %3728 }
 0x467   :  { %v3731_v30 = vpop.eup %3730  ;;  %v1376_v33 = vmul.f32 %v3729_v19, %v1374_v25  ;;  %3732 = vrcp.f32 %v1413_v29  ;;  %vm1381_vm12 = vweird.f32 %v3729_v19  ;;  %v1425_v40 = vand.u32 2147483648, %v1413_v29  ;;  %v1805_v25 = vld [vmem:[#allocation13 + $0x198] sm:$0xff] }
 0x468   :  { %v1395_v21 = vmul.f32 %v3731_v30, %v1393_v8  ;;  %3734 = vtanh.f32 %v1369_v9  ;;  %vm1400_vm13 = vweird.f32 %v3731_v30  ;;  %vm1382_vm0 = vmor %vm1380_vm14, %vm1381_vm12  ;;  %vm1419_vm5 = vweird.f32 %v1413_v29  ;;  %v1798_v8 = vld [vmem:[#allocation13 + $0x160] sm:$0xff]  ;;  %v1801_v9 = vld [vmem:[#allocation13 + $0x178] sm:$0xff] }
 0x469   :  { %v1377_v3 = vsub.f32 1.0, %v1376_v33  ;;  %vm1401_vm1 = vmor %vm1399_vm15, %vm1400_vm13  ;;  %v1423_v51 = vand.u32 2147483647, %v1413_v29  ;;  %v1426_v62 = vor.u32 1.1754944e-38, %v1425_v40  ;;  %v1779_v40 = vld [vmem:[#allocation13 + $0xc8] sm:$0xff] }
 0x46a   :  { %v1396_v18 = vsub.f32 1.0, %v1395_v21  ;;  %v1794_v21 = vld [vmem:[#allocation13 + $0x140] sm:$0xff] }
 0x46b   :  { %v1378_v53 = vmul.f32 %v3729_v19, %v1377_v3  ;;  %vm1424_vm7 = vcmp.eq.f32.partialorder %v1423_v51, 8.507059e+37  ;;  %v1795_v3 = vld [vmem:[#allocation13 + $0x148] sm:$0xff]  ;;  %v1780_v51 = vld [vmem:[#allocation13 + $0xd0] sm:$0xff] }
 0x46c   :  { %v1397_v52 = vmul.f32 %v3731_v30, %v1396_v18  ;;  %v1796_v18 = vld [vmem:[#allocation13 + $0x150] sm:$0xff] }
 0x46d   :  { %v3733_v27 = vpop.eup %3732  ;;  %v1379_v32 = vadd.f32 %v3729_v19, %v1378_v53  ;;  %v1797_v53 = vld [vmem:[#allocation13 + $0x158] sm:$0xff] }
 0x46e   :  { %v1398_v35 = vadd.f32 %v3731_v30, %v1397_v52  ;;  %v1415_v36 = vmul.f32 %v3733_v27, %v1413_v29  ;;  %v3735_v38 = vpop.eup %3734  ;;  %vm1420_vm4 = vweird.f32 %v3733_v27  ;;  %v6909_v29 = vld [vmem:[#allocation71_spill] sm:$0xff]  ;;  %v1791_v52 = vld [vmem:[#allocation13 + $0x128] sm:$0xff] }
 0x46f   :  { %v1383_v37 = vsel %vm1382_vm0, %v3729_v19, %v1379_v32  ;;  %vm1421_vm6 = vmor %vm1419_vm5, %vm1420_vm4  ;;  %v371_v19 = vadd.f32 %v6909_v29, %v6902_v47  ;;  %v1760_v29 = vld [vmem:[#allocation13 + $0x30] sm:$0xff] }
 0x470   :  { %v1388_v39 = vsel %vm1385_vm2, %v1387_v34, %v1383_v37  ;;  %v1402_v41 = vsel %vm1401_vm1, %v3731_v30, %v1398_v35  ;;  %v1416_v42 = vsub.f32 1.0, %v1415_v36  ;;  %v1793_v34 = vld [vmem:[#allocation13 + $0x138] sm:$0xff]  ;;  %v1786_v35 = vld [vmem:[#allocation13 + $0x100] sm:$0xff]  ;;  %v1787_v36 = vld [vmem:[#allocation13 + $0x108] sm:$0xff] }
 0x471   :  { %v1407_v44 = vsel %vm1404_vm3, %v1406_v61, %v1402_v41  ;;  %v1430_v45 = vmul.f32 %v3735_v38, %v1388_v39  ;;  %v1788_v61 = vld [vmem:[#allocation13 + $0x110] sm:$0xff]  ;;  %v1789_v37 = vld [vmem:[#allocation13 + $0x118] sm:$0xff]  ;;  %v1782_v41 = vld [vmem:[#allocation13 + $0xe0] sm:$0xff] }
 0x472   :  { %v1429_v46 = vmul.f32 %v1407_v44, %v5208_v22  ;;  %v1417_v48 = vmul.f32 %v3733_v27, %v1416_v42  ;;  %v1814_v22 = vld [vmem:[#allocation13 + $0x1e0] sm:$0xff]  ;;  %v6910_v38 = vld [vmem:[#allocation73_spill] sm:$0xff] }
 0x473   :  { %v453_v39 = vadd.f32 %v6910_v38, %v6904_v11  ;;  %v1783_v42 = vld [vmem:[#allocation13 + $0xe8] sm:$0xff]  ;;  %v1784_v44 = vld [vmem:[#allocation13 + $0xf0] sm:$0xff] }
 0x474   :  { %v5290_v56 = vadd.f32 %v1430_v45, %v1429_v46  ;;  %v1418_v59 = vadd.f32 %v3733_v27, %v1417_v48  ;;  %v1785_v46 = vld [vmem:[#allocation13 + $0xf8] sm:$0xff] }
 0x476   :  { %3736 = vtanh.f32 %v5290_v56  ;;  %v1422_v57 = vsel %vm1421_vm6, %v3733_v27, %v1418_v59  ;;  %v1778_v59 = vld [vmem:[#allocation13 + $0xc0] sm:$0xff] }
 0x477   :  { %v1427_v14 = vsel %vm1424_vm7, %v1426_v62, %v1422_v57  ;;  %v1781_v57 = vld [vmem:[#allocation13 + $0xd8] sm:$0xff] }
 0x47c   :  { %v3737_v50 = vpop.eup %3736 }
 0x47d   :  { %v5293_v55 = vmul.f32 %v3737_v50, %v1427_v14  ;;  %v1774_v50 = vld [vmem:[#allocation13 + $0xa0] sm:$0xff]  ;;  %v1775_v14 = vld [vmem:[#allocation13 + $0xa8] sm:$0xff] }
 0x47f   :  { %1461 = vmatmul.f32.vlgmr.msrb.gmra.mxu0 %v5293_v55  ;;  %1481 = vmatmul.f32.vlgmr.msrb.gmra.mxu1 %v5293_v55 }
 0x480   :  { %1501 = vmatmul.f32.vlgmr.msrb.gmra.mxu2 %v5293_v55  ;;  %1521 = vmatmul.f32.vlgmr.msrb.gmra.mxu3 %v5293_v55 }
 0x481   :  { %1900 = vmatpush.msrb.mxu0 %v1814_v22  ;;  %1941 = vmatpush.msrb.mxu1 %v1815_v49  ;;  %v1776_v22 = vld [vmem:[#allocation13 + $0xb0] sm:$0xff] }
 0x482   :  { %1982 = vmatpush.msrb.mxu2 %v1816_v60  ;;  %2023 = vmatpush.msrb.mxu3 %v1817_v58  ;;  %v1777_v60 = vld [vmem:[#allocation13 + $0xb8] sm:$0xff]  ;;  %v1770_v58 = vld [vmem:[#allocation13 + $0x80] sm:$0xff] }
 0x483   :  { %1901 = vmatpush.msrb.mxu0 %v1810_v26  ;;  %1942 = vmatpush.msrb.mxu1 %v1811_v12  ;;  %v1771_v26 = vld [vmem:[#allocation13 + $0x88] sm:$0xff] }
 0x484   :  { %1983 = vmatpush.msrb.mxu2 %v1812_v13  ;;  %2024 = vmatpush.msrb.mxu3 %v1813_v15  ;;  %v1772_v15 = vld [vmem:[#allocation13 + $0x90] sm:$0xff] }
 0x485   :  { %1902 = vmatpush.msrb.mxu0 %v1806_v1  ;;  %1943 = vmatpush.msrb.mxu1 %v1807_v20  ;;  %v1773_v1 = vld [vmem:[#allocation13 + $0x98] sm:$0xff] }
 0x486   :  { %1984 = vmatpush.msrb.mxu2 %v1808_v16  ;;  %2025 = vmatpush.msrb.mxu3 %v1809_v17  ;;  %v1766_v16 = vld [vmem:[#allocation13 + $0x60] sm:$0xff]  ;;  %v1767_v17 = vld [vmem:[#allocation13 + $0x68] sm:$0xff] }
 0x487   :  { %1903 = vmatpush.msrb.mxu0 %v1802_v7  ;;  %1944 = vmatpush.msrb.mxu1 %v1803_v6  ;;  %v1768_v7 = vld [vmem:[#allocation13 + $0x70] sm:$0xff]  ;;  %v1769_v6 = vld [vmem:[#allocation13 + $0x78] sm:$0xff] }
 0x488   :  { %1985 = vmatpush.msrb.mxu2 %v1804_v4  ;;  %2026 = vmatpush.msrb.mxu3 %v1805_v25  ;;  %v1762_v4 = vld [vmem:[#allocation13 + $0x40] sm:$0xff]  ;;  %v1763_v25 = vld [vmem:[#allocation13 + $0x48] sm:$0xff] }
 0x489   :  { %1904 = vmatpush.msrb.mxu0 %v1798_v8  ;;  %1945 = vmatpush.msrb.mxu1 %v1799_v43  ;;  %v1764_v8 = vld [vmem:[#allocation13 + $0x50] sm:$0xff]  ;;  %v1765_v43 = vld [vmem:[#allocation13 + $0x58] sm:$0xff] }
 0x48a   :  { %1986 = vmatpush.msrb.mxu2 %v1800_v23  ;;  %2027 = vmatpush.msrb.mxu3 %v1801_v9  ;;  %v1758_v23 = vld [vmem:[#allocation13 + $0x20] sm:$0xff] }
 0x48b   :  { %1905 = vmatpush.msrb.mxu0 %v1794_v21  ;;  %1946 = vmatpush.msrb.mxu1 %v1795_v3  ;;  %v1754_v21 = vld [vmem:[#allocation13] sm:$0xff]  ;;  %v1755_v3 = vld [vmem:[#allocation13 + $0x8] sm:$0xff] }
 0x48c   :  { %1987 = vmatpush.msrb.mxu2 %v1796_v18  ;;  %2028 = vmatpush.msrb.mxu3 %v1797_v53 }
 0x48d   :  { %1906 = vmatpush.msrb.mxu0 %v1790_v63  ;;  %1947 = vmatpush.msrb.mxu1 %v1791_v52 }
 0x48e   :  { %1988 = vmatpush.msrb.mxu2 %v1792_v31  ;;  %2029 = vmatpush.msrb.mxu3 %v1793_v34 }
 0x48f   :  { %1907 = vmatpush.msrb.mxu0 %v1786_v35  ;;  %1948 = vmatpush.msrb.mxu1 %v1787_v36 }
 0x490   :  { %1989 = vmatpush.msrb.mxu2 %v1788_v61  ;;  %2030 = vmatpush.msrb.mxu3 %v1789_v37 }
 0x491   :  { %1908 = vmatpush.msrb.mxu0 %v1782_v41  ;;  %1949 = vmatpush.msrb.mxu1 %v1783_v42 }
 0x492   :  { %1990 = vmatpush.msrb.mxu2 %v1784_v44  ;;  %2031 = vmatpush.msrb.mxu3 %v1785_v46 }
 0x493   :  { %1909 = vmatpush.msrb.mxu0 %v1778_v59  ;;  %1950 = vmatpush.msrb.mxu1 %v1779_v40 }
 0x494   :  { %1991 = vmatpush.msrb.mxu2 %v1780_v51  ;;  %2032 = vmatpush.msrb.mxu3 %v1781_v57 }
 0x495   :  { %1910 = vmatpush.msrb.mxu0 %v1774_v50  ;;  %1951 = vmatpush.msrb.mxu1 %v1775_v14 }
 0x496   :  { %1992 = vmatpush.msrb.mxu2 %v1776_v22  ;;  %2033 = vmatpush.msrb.mxu3 %v1777_v60 }
 0x497   :  { %1911 = vmatpush.msrb.mxu0 %v1770_v58  ;;  %1952 = vmatpush.msrb.mxu1 %v1771_v26 }
 0x498   :  { %1993 = vmatpush.msrb.mxu2 %v1772_v15  ;;  %2034 = vmatpush.msrb.mxu3 %v1773_v1 }
 0x499   :  { %1912 = vmatpush.msrb.mxu0 %v1766_v16  ;;  %1953 = vmatpush.msrb.mxu1 %v1767_v17  ;;  %v6913_v17 = vld [vmem:[#allocation26_spill] sm:$0xff] }
 0x49a   :  { %1994 = vmatpush.msrb.mxu2 %v1768_v7  ;;  %2035 = vmatpush.msrb.mxu3 %v1769_v6  ;;  %v6914_v7 = vld [vmem:[#allocation31_spill] sm:$0xff] }
 0x49b   :  { %1913 = vmatpush.msrb.mxu0 %v1762_v4  ;;  %1954 = vmatpush.msrb.mxu1 %v1763_v25  ;;  %v5337_v6 = vld [vmem:[#allocation15 + $0x1e0] sm:$0xff]  ;;  %v5339_v4 = vld [vmem:[#allocation15 + $0x1e8] sm:$0xff] }
 0x49c   :  { %1995 = vmatpush.msrb.mxu2 %v1764_v8  ;;  %2036 = vmatpush.msrb.mxu3 %v1765_v43  ;;  %6915 = vst [vmem:[#allocation25_spill] sm:$0xff] %v5337_v6  ;;  %v5341_v25 = vld [vmem:[#allocation15 + $0x1c0] sm:$0xff]  ;;  %v5345_v8 = vld [vmem:[#allocation15 + $0x1c8] sm:$0xff]  ;;  %v5347_v43 = vld [vmem:[#allocation15 + $0x1f8] sm:$0xff] }
 0x49d   :  { %1914 = vmatpush.msrb.mxu0 %v1758_v23  ;;  %6916 = vst [vmem:[#allocation27_spill] sm:$0xff] %v5345_v8  ;;  %v5350_v23 = vld [vmem:[#allocation15 + $0x1a0] sm:$0xff] }
 0x49e   :  { %1996 = vmatpush.msrb.mxu2 %v1760_v29  ;;  %v6919_v29 = vld [vmem:[#allocation57_spill] sm:$0xff] }
 0x49f   :  { %1915 = vmatpush.msrb.mxu0 %v1754_v21  ;;  %v5385_v21 = vld [vmem:[#allocation15 + $0x188] sm:$0xff] }
 0x4fc   :  { %v1462_v30 = vpop.f32.mrf.mxu0  ;;  %v1482_v33 = vpop.f32.mrf.mxu1 }
 0x4fd   :  { %v1525_v28 = vadd.f32 %v1462_v30, %v330_v5  ;;  %v1526_v0 = vadd.f32 %v1482_v33, %v371_v19  ;;  %v1759_v5 = vld [vmem:[#allocation13 + $0x28] sm:$0xff]  ;;  %v1761_v19 = vld [vmem:[#allocation13 + $0x38] sm:$0xff] }
 0x4fe   :  { %v6911_v30 = vld [vmem:[#allocation78_spill] sm:$0xff]  ;;  %1955 = vmatpush.msrb.mxu1 %v1759_v5  ;;  %2037 = vmatpush.msrb.mxu3 %v1761_v19 }
 0x4ff   :  { %v3592_v27 = vmul.f32 -1.442695, %v1525_v28  ;;  %v3593_v32 = vmul.f32 -1.442695, %v1526_v0  ;;  %v412_v33 = vadd.f32 %v6911_v30, %v6906_v10  ;;  %v1756_v28 = vld [vmem:[#allocation13 + $0x10] sm:$0xff]  ;;  %v1757_v0 = vld [vmem:[#allocation13 + $0x18] sm:$0xff] }
 0x500   :  { %1956 = vmatpush.msrb.mxu1 %v1755_v3  ;;  %1997 = vmatpush.msrb.mxu2 %v1756_v28  ;;  %v5354_v5 = vld [vmem:[#allocation15 + $0x1d8] sm:$0xff]  ;;  %v5373_v19 = vld [vmem:[#allocation15 + $0x1f0] sm:$0xff]  ;;  %v5393_v3 = vld [vmem:[#allocation15 + $0x168] sm:$0xff] }
 0x501   :  { %3738 = vpow2.f32 %v3592_v27  ;;  %2038 = vmatpush.msrb.mxu3 %v1757_v0  ;;  %6918 = vst [vmem:[#allocation30_spill] sm:$0xff] %v5354_v5  ;;  %v5381_v30 = vld [vmem:[#allocation15 + $0x1b0] sm:$0xff]  ;;  %v5403_v0 = vld [vmem:[#allocation15 + $0x178] sm:$0xff] }
 0x502   :  { %3740 = vpow2.f32 %v3593_v32  ;;  %v5397_v28 = vld [vmem:[#allocation15 + $0x190] sm:$0xff] }
 0x503   :  { %v1522_v45 = vpop.f32.mrf.mxu3  ;;  %v1502_v2 = vpop.f32.mrf.mxu2 }
 0x504   :  { %v1528_v48 = vadd.f32 %v1522_v45, %v453_v39  ;;  %v1527_v63 = vadd.f32 %v1502_v2, %v412_v33  ;;  %v5352_v2 = vld [vmem:[#allocation15 + $0x1a8] sm:$0xff]  ;;  %v5383_v33 = vld [vmem:[#allocation15 + $0x180] sm:$0xff] }
 0x505   :  { %6917 = vst [vmem:[#allocation28_spill] sm:$0xff] %v5352_v2 }
 0x506   :  { %v3594_v62 = vmul.f32 -1.442695, %v1528_v48  ;;  %6921 = vst [vmem:[#allocation59_spill] sm:$0xff] %v5383_v33 }
 0x507   :  { %v3739_v49 = vpop.eup %3738 }
 0x508   :  { %v3741_v12 = vpop.eup %3740  ;;  %v5305_v13 = vadd.f32 1.0, %v3739_v49  ;;  %3742 = vpow2.f32 %v3594_v62 }
 0x509   :  { %v5307_v20 = vadd.f32 1.0, %v3741_v12 }
 0x50a   :  { %3744 = vrcp.f32 %v5305_v13  ;;  %v1544_v35 = vand.u32 2147483648, %v5305_v13  ;;  %v1542_v37 = vand.u32 2147483647, %v5305_v13  ;;  %vm1538_vm10 = vweird.f32 %v5305_v13 }
 0x50b   :  { %3746 = vrcp.f32 %v5307_v20  ;;  %v1563_v36 = vand.u32 2147483648, %v5307_v20  ;;  %v1561_v39 = vand.u32 2147483647, %v5307_v20  ;;  %vm1557_vm11 = vweird.f32 %v5307_v20 }
 0x50c   :  { %v1545_v44 = vor.u32 1.1754944e-38, %v1544_v35  ;;  %vm1543_vm14 = vcmp.eq.f32.partialorder %v1542_v37, 8.507059e+37  ;;  %v5417_v35 = vld [vmem:[#allocation15 + $0x158] sm:$0xff]  ;;  %v5421_v37 = vld [vmem:[#allocation15 + $0x150] sm:$0xff] }
 0x50d   :  { %v1564_v48 = vor.u32 1.1754944e-38, %v1563_v36  ;;  %vm1562_vm15 = vcmp.eq.f32.partialorder %v1561_v39, 8.507059e+37 }
 0x50e   :  { %v3743_v9 = vpop.eup %3742 }
 0x50f   :  { %v1571_v18 = vadd.f32 1.0, %v3743_v9  ;;  %v5376_v9 = vld [vmem:[#allocation15 + $0x1d0] sm:$0xff] }
 0x510   :  { %v3745_v53 = vpop.eup %3744 }
 0x511   :  { %v3747_v52 = vpop.eup %3746  ;;  %v1534_v31 = vmul.f32 %v3745_v53, %v5305_v13  ;;  %3748 = vrcp.f32 %v1571_v18  ;;  %vm1539_vm8 = vweird.f32 %v3745_v53  ;;  %v1583_v26 = vand.u32 2147483648, %v1571_v18 }
 0x512   :  { %v1553_v27 = vmul.f32 %v3747_v52, %v5307_v20  ;;  %3750 = vtanh.f32 %v1527_v63  ;;  %vm1558_vm9 = vweird.f32 %v3747_v52  ;;  %vm1540_vm12 = vmor %vm1538_vm10, %vm1539_vm8  ;;  %vm1577_vm1 = vweird.f32 %v1571_v18  ;;  %v6922_v63 = vld [vmem:[#allocation74_spill] sm:$0xff] }
 0x513   :  { %v1535_v32 = vsub.f32 1.0, %v1534_v31  ;;  %vm1559_vm13 = vmor %vm1557_vm11, %vm1558_vm9  ;;  %v1581_v12 = vand.u32 2147483647, %v1571_v18  ;;  %v1584_v15 = vor.u32 1.1754944e-38, %v1583_v26  ;;  %v6923_v31 = vld [vmem:[#allocation75_spill] sm:$0xff] }
 0x514   :  { %v1554_v34 = vsub.f32 1.0, %v1553_v27  ;;  %v374_v27 = vadd.f32 %v6923_v31, %v6902_v47  ;;  %v5428_v47 = vld [vmem:[#allocation15 + $0x138] sm:$0xff]  ;;  %v5463_v26 = vld [vmem:[#allocation15 + $0xa0] sm:$0xff] }
 0x515   :  { %v1536_v61 = vmul.f32 %v3745_v53, %v1535_v32  ;;  %vm1582_vm3 = vcmp.eq.f32.partialorder %v1581_v12, 8.507059e+37  ;;  %v5413_v32 = vld [vmem:[#allocation15 + $0x140] sm:$0xff]  ;;  %6926 = vst [vmem:[#allocation62_spill] sm:$0xff] %v5463_v26  ;;  %v5465_v12 = vld [vmem:[#allocation15 + $0xa8] sm:$0xff] }
 0x516   :  { %v1555_v38 = vmul.f32 %v3747_v52, %v1554_v34  ;;  %v5415_v34 = vld [vmem:[#allocation15 + $0x148] sm:$0xff]  ;;  %6927 = vst [vmem:[#allocation61_spill] sm:$0xff] %v5465_v12 }
 0x517   :  { %v3749_v41 = vpop.eup %3748  ;;  %v1537_v42 = vadd.f32 %v3745_v53, %v1536_v61 }
 0x518   :  { %v1556_v45 = vadd.f32 %v3747_v52, %v1555_v38  ;;  %v1573_v46 = vmul.f32 %v3749_v41, %v1571_v18  ;;  %v3751_v40 = vpop.eup %3750  ;;  %vm1578_vm0 = vweird.f32 %v3749_v41  ;;  %v5395_v18 = vld [vmem:[#allocation15 + $0x198] sm:$0xff] }
 0x519   :  { %v1541_v59 = vsel %vm1540_vm12, %v3745_v53, %v1537_v42  ;;  %vm1579_vm2 = vmor %vm1577_vm1, %vm1578_vm0  ;;  %v5405_v53 = vld [vmem:[#allocation15 + $0x170] sm:$0xff] }
 0x51a   :  { %v1546_v51 = vsel %vm1543_vm14, %v1545_v44, %v1541_v59  ;;  %v1560_v57 = vsel %vm1559_vm13, %v3747_v52, %v1556_v45  ;;  %v1574_v62 = vsub.f32 1.0, %v1573_v46  ;;  %v333_v52 = vadd.f32 %v6922_v63, %v6900_v54  ;;  %v5423_v54 = vld [vmem:[#allocation15 + $0x120] sm:$0xff]  ;;  %v5433_v42 = vld [vmem:[#allocation15 + $0x130] sm:$0xff] }
 0x51b   :  { %v1565_v50 = vsel %vm1562_vm15, %v1564_v48, %v1560_v57  ;;  %v1588_v14 = vmul.f32 %v3751_v40, %v1546_v51  ;;  %v5435_v46 = vld [vmem:[#allocation15 + $0x100] sm:$0xff]  ;;  %v5437_v48 = vld [vmem:[#allocation15 + $0x108] sm:$0xff]  ;;  %v5447_v51 = vld [vmem:[#allocation15 + $0x118] sm:$0xff] }
 0x51c   :  { %v1587_v22 = vmul.f32 %v1565_v50, %v5290_v56  ;;  %v1575_v49 = vmul.f32 %v3749_v41, %v1574_v62  ;;  %v6912_v56 = vld [vmem:[#allocation83_spill] sm:$0xff]  ;;  %v5445_v40 = vld [vmem:[#allocation15 + $0xe8] sm:$0xff] }
 0x51d   :  { %v5443_v59 = vld [vmem:[#allocation15 + $0xe0] sm:$0xff]  ;;  %v5452_v62 = vld [vmem:[#allocation15 + $0xc8] sm:$0xff]  ;;  %v5454_v50 = vld [vmem:[#allocation15 + $0xf8] sm:$0xff] }
 0x51e   :  { %v5322_v60 = vadd.f32 %v1588_v14, %v1587_v22  ;;  %v1576_v58 = vadd.f32 %v3749_v41, %v1575_v49  ;;  %v5450_v57 = vld [vmem:[#allocation15 + $0xc0] sm:$0xff]  ;;  %v5460_v49 = vld [vmem:[#allocation15 + $0xd8] sm:$0xff] }
 0x51f   :  { %v6924_v14 = vld [vmem:[#allocation79_spill] sm:$0xff]  ;;  %6925 = vst [vmem:[#allocation60_spill] sm:$0xff] %v5460_v49 }
 0x520   :  { %3752 = vtanh.f32 %v5322_v60  ;;  %v1580_v13 = vsel %vm1579_vm2, %v3749_v41, %v1576_v58  ;;  %v5425_v41 = vld [vmem:[#allocation15 + $0x128] sm:$0xff]  ;;  %v456_v22 = vadd.f32 %v6924_v14, %v6904_v11  ;;  %v5471_v11 = vld [vmem:[#allocation15 + $0xb8] sm:$0xff]  ;;  %v5489_v63 = vld [vmem:[#allocation15 + $0x60] sm:$0xff] }
 0x521   :  { %v1585_v20 = vsel %vm1582_vm3, %v1584_v15, %v1580_v13  ;;  %v5467_v13 = vld [vmem:[#allocation15 + $0x110] sm:$0xff]  ;;  %6928 = vst [vmem:[#allocation63_spill] sm:$0xff] %v5471_v11  ;;  %v5517_v14 = vld [vmem:[#allocation15 + $0x20] sm:$0xff] }
 0x522   :  { %6933 = vst [vmem:[#allocation34_spill] sm:$0xff] %v5489_v63 }
 0x523   :  { %6940 = vst [vmem:[#allocation40_spill] sm:$0xff] %v5517_v14 }
 0x526   :  { %v3753_v1 = vpop.eup %3752 }
 0x527   :  { %v1591_v16 = vmul.f32 %v3753_v1, %v1585_v20  ;;  %v5473_v1 = vld [vmem:[#allocation15 + $0xf0] sm:$0xff]  ;;  %v5477_v20 = vld [vmem:[#allocation15 + $0x80] sm:$0xff] }
 0x528   :  { %6929 = vst [vmem:[#allocation64_spill] sm:$0xff] %v5477_v20 }
 0x529   :  { %1619 = vmatmul.f32.vlgmr.msra.gmra.mxu0 %v1591_v16  ;;  %1639 = vmatmul.f32.vlgmr.msra.gmra.mxu1 %v1591_v16 }
 0x52a   :  { %1659 = vmatmul.f32.vlgmr.msra.gmra.mxu2 %v1591_v16  ;;  %1679 = vmatmul.f32.vlgmr.msra.gmra.mxu3 %v1591_v16 }
 0x52b   :  { %2104 = vmatpush.msra.mxu0 %v5337_v6  ;;  %2124 = vmatpush.msra.mxu1 %v5339_v4 }
 0x52c   :  { %2164 = vmatpush.msra.mxu3 %v5347_v43  ;;  %2144 = vmatpush.msra.mxu2 %v5373_v19 }
 0x52d   :  { %2105 = vmatpush.msra.mxu0 %v5341_v25  ;;  %2125 = vmatpush.msra.mxu1 %v5345_v8 }
 0x52e   :  { %2165 = vmatpush.msra.mxu3 %v5354_v5  ;;  %2145 = vmatpush.msra.mxu2 %v5376_v9 }
 0x52f   :  { %2106 = vmatpush.msra.mxu0 %v5350_v23  ;;  %2126 = vmatpush.msra.mxu1 %v5352_v2 }
 0x530   :  { %2146 = vmatpush.msra.mxu2 %v5381_v30 }
 0x531   :  { %1916 = vmatmul.f32.vlgmr.msrb.gmra.mxu0 %v6912_v56  ;;  %1957 = vmatmul.f32.vlgmr.msrb.gmra.mxu1 %v6912_v56 }
 0x532   :  { %1998 = vmatmul.f32.vlgmr.msrb.gmra.mxu2 %v6912_v56  ;;  %2039 = vmatmul.f32.vlgmr.msrb.gmra.mxu3 %v6912_v56 }
 0x533   :  { %2107 = vmatpush.msra.mxu0 %v5383_v33  ;;  %2127 = vmatpush.msra.mxu1 %v5385_v21 }
 0x534   :  { %2147 = vmatpush.msra.mxu2 %v5397_v28 }
 0x535   :  { %2128 = vmatpush.msra.mxu1 %v5393_v3 }
 0x536   :  { %2148 = vmatpush.msra.mxu2 %v5405_v53 }
 0x537   :  { %2129 = vmatpush.msra.mxu1 %v5415_v34 }
 0x538   :  { %2149 = vmatpush.msra.mxu2 %v5421_v37 }
 0x539   :  { %1919 = vmatmul.f32.gmra.mxu0 %v6913_v17  ;;  %1960 = vmatmul.f32.gmra.mxu1 %v6913_v17 }
 0x53a   :  { %2001 = vmatmul.f32.gmra.mxu2 %v6913_v17  ;;  %2042 = vmatmul.f32.gmra.mxu3 %v6913_v17  ;;  %v5483_v17 = vld [vmem:[#allocation15 + $0x98] sm:$0xff] }
 0x53b   :  { %2130 = vmatpush.msra.mxu1 %v5425_v41  ;;  %2150 = vmatpush.msra.mxu2 %v5433_v42  ;;  %6931 = vst [vmem:[#allocation68_spill] sm:$0xff] %v5483_v17 }
 0x53d   :  { %2131 = vmatpush.msra.mxu1 %v5437_v48  ;;  %2151 = vmatpush.msra.mxu2 %v5467_v13 }
 0x53f   :  { %2132 = vmatpush.msra.mxu1 %v5445_v40  ;;  %2152 = vmatpush.msra.mxu2 %v5473_v1 }
 0x541   :  { %1922 = vmatmul.f32.gmra.mxu0 %v6914_v7  ;;  %1963 = vmatmul.f32.gmra.mxu1 %v6914_v7 }
 0x542   :  { %2004 = vmatmul.f32.gmra.mxu2 %v6914_v7  ;;  %2045 = vmatmul.f32.gmra.mxu3 %v6914_v7  ;;  %v5485_v7 = vld [vmem:[#allocation15 + $0xd0] sm:$0xff] }
 0x543   :  { %2133 = vmatpush.msra.mxu1 %v5452_v62  ;;  %6932 = vst [vmem:[#allocation32_spill] sm:$0xff] %v5485_v7  ;;  %2153 = vmatpush.msra.mxu2 %v5485_v7 }
 0x545   :  { %2134 = vmatpush.msra.mxu1 %v5465_v12 }
 0x549   :  { %1925 = vmatmul.f32.gmra.mxu0 %v6919_v29  ;;  %1966 = vmatmul.f32.gmra.mxu1 %v6919_v29 }
 0x54a   :  { %2007 = vmatmul.f32.gmra.mxu2 %v6919_v29  ;;  %2048 = vmatmul.f32.gmra.mxu3 %v6919_v29 }
 0x551   :  { %1928 = vmatmul.f32.gmra.mxu0 %v5211_v24  ;;  %1969 = vmatmul.f32.gmra.mxu1 %v5211_v24 }
 0x552   :  { %2010 = vmatmul.f32.gmra.mxu2 %v5211_v24  ;;  %2051 = vmatmul.f32.gmra.mxu3 %v5211_v24  ;;  %v5379_v24 = vld [vmem:[#allocation15 + $0x1b8] sm:$0xff] }
 0x553   :  { %6920 = vst [vmem:[#allocation29_spill] sm:$0xff] %v5379_v24  ;;  %2166 = vmatpush.msra.mxu3 %v5379_v24 }
 0x555   :  { %2167 = vmatpush.msra.mxu3 %v5395_v18 }
 0x557   :  { %2168 = vmatpush.msra.mxu3 %v5403_v0 }
 0x559   :  { %1931 = vmatmul.f32.gmra.mxu0 %v5293_v55  ;;  %1972 = vmatmul.f32.gmra.mxu1 %v5293_v55 }
 0x55a   :  { %2013 = vmatmul.f32.gmra.mxu2 %v5293_v55  ;;  %2054 = vmatmul.f32.gmra.mxu3 %v5293_v55  ;;  %v5388_v55 = vld [vmem:[#allocation15 + $0x160] sm:$0xff] }
 0x55b   :  { %2108 = vmatpush.msra.mxu0 %v5388_v55  ;;  %2169 = vmatpush.msra.mxu3 %v5417_v35 }
 0x55d   :  { %2109 = vmatpush.msra.mxu0 %v5413_v32  ;;  %2170 = vmatpush.msra.mxu3 %v5428_v47 }
 0x55f   :  { %2110 = vmatpush.msra.mxu0 %v5423_v54  ;;  %2171 = vmatpush.msra.mxu3 %v5447_v51 }
 0x561   :  { %1934 = vmatmul.f32.gmra.mxu0 %v1591_v16  ;;  %1975 = vmatmul.f32.gmra.mxu1 %v1591_v16 }
 0x562   :  { %2016 = vmatmul.f32.gmra.mxu2 %v1591_v16  ;;  %2057 = vmatmul.f32.gmra.mxu3 %v1591_v16  ;;  %v5479_v16 = vld [vmem:[#allocation15 + $0x88] sm:$0xff] }
 0x563   :  { %2111 = vmatpush.msra.mxu0 %v5435_v46  ;;  %2172 = vmatpush.msra.mxu3 %v5454_v50  ;;  %6930 = vst [vmem:[#allocation65_spill] sm:$0xff] %v5479_v16 }
 0x564   :  { %2135 = vmatpush.msra.mxu1 %v5479_v16 }
 0x565   :  { %2112 = vmatpush.msra.mxu0 %v5443_v59  ;;  %2173 = vmatpush.msra.mxu3 %v5460_v49 }
 0x567   :  { %2113 = vmatpush.msra.mxu0 %v5450_v57  ;;  %2174 = vmatpush.msra.mxu3 %v5471_v11 }
 0x569   :  { %2114 = vmatpush.msra.mxu0 %v5463_v26  ;;  %2175 = vmatpush.msra.mxu3 %v5483_v17  ;;  %v5541_v17 = vld [vmem:[#allocation15 + $0x18] sm:$0xff] }
 0x56a   :  { %6949 = vst [vmem:[#allocation48_spill] sm:$0xff] %v5541_v17 }
 0x56b   :  { %2115 = vmatpush.msra.mxu0 %v5477_v20 }
 0x56d   :  { %2116 = vmatpush.msra.mxu0 %v5489_v63 }
 0x5a6   :  { %v1620_v36 = vpop.f32.mrf.mxu0  ;;  %v1640_v61 = vpop.f32.mrf.mxu1 }
 0x5a7   :  { %v1683_v38 = vadd.f32 %v1620_v36, %v333_v52  ;;  %v1684_v39 = vadd.f32 %v1640_v61, %v374_v27  ;;  %v5491_v52 = vld [vmem:[#allocation15 + $0x68] sm:$0xff]  ;;  %v5497_v36 = vld [vmem:[#allocation15 + $0xb0] sm:$0xff]  ;;  %v5499_v61 = vld [vmem:[#allocation15 + $0x78] sm:$0xff] }
 0x5a8   :  { %6934 = vst [vmem:[#allocation33_spill] sm:$0xff] %v5491_v52  ;;  %2136 = vmatpush.msra.mxu1 %v5491_v52  ;;  %2154 = vmatpush.msra.mxu2 %v5497_v36  ;;  %v6946_v52 = vld [vmem:[#allocation81_spill] sm:$0xff] }
 0x5a9   :  { %v3595_v44 = vmul.f32 -1.442695, %v1683_v38  ;;  %v3596_v45 = vmul.f32 -1.442695, %v1684_v39  ;;  %6935 = vst [vmem:[#allocation35_spill] sm:$0xff] %v5497_v36  ;;  %v5505_v39 = vld [vmem:[#allocation15 + $0x40] sm:$0xff]  ;;  %2176 = vmatpush.msra.mxu3 %v5499_v61  ;;  %v415_v63 = vadd.f32 %v6946_v52, %v6906_v10 }
 0x5aa   :  { %6936 = vst [vmem:[#allocation36_spill] sm:$0xff] %v5499_v61  ;;  %2117 = vmatpush.msra.mxu0 %v5505_v39  ;;  %v5549_v10 = vld [vmem:[#allocation15 + $0x30] sm:$0xff] }
 0x5ab   :  { %3754 = vpow2.f32 %v3595_v44  ;;  %6937 = vst [vmem:[#allocation38_spill] sm:$0xff] %v5505_v39  ;;  %v5507_v44 = vld [vmem:[#allocation15 + $0x48] sm:$0xff]  ;;  %v5539_v39 = vld [vmem:[#allocation15 + $0x38] sm:$0xff] }
 0x5ac   :  { %3756 = vpow2.f32 %v3596_v45  ;;  %6938 = vst [vmem:[#allocation37_spill] sm:$0xff] %v5507_v44  ;;  %v5512_v45 = vld [vmem:[#allocation15 + $0x90] sm:$0xff]  ;;  %2137 = vmatpush.msra.mxu1 %v5507_v44  ;;  %2118 = vmatpush.msra.mxu0 %v5517_v14 }
 0x5ad   :  { %v1680_v58 = vpop.f32.mrf.mxu3  ;;  %6939 = vst [vmem:[#allocation39_spill] sm:$0xff] %v5512_v45  ;;  %2155 = vmatpush.msra.mxu2 %v5512_v45  ;;  %v5537_v44 = vld [vmem:[#allocation15 + $0x50] sm:$0xff] }
 0x5ae   :  { %v1686_v15 = vadd.f32 %v1680_v58, %v456_v22  ;;  %v5519_v22 = vld [vmem:[#allocation15 + $0x28] sm:$0xff]  ;;  %v5521_v58 = vld [vmem:[#allocation15 + $0x58] sm:$0xff]  ;;  %6947 = vst [vmem:[#allocation46_spill] sm:$0xff] %v5537_v44 }
 0x5af   :  { %6941 = vst [vmem:[#allocation42_spill] sm:$0xff] %v5519_v22  ;;  %2177 = vmatpush.msra.mxu3 %v5521_v58  ;;  %2138 = vmatpush.msra.mxu1 %v5519_v22 }
 0x5b0   :  { %v3597_v56 = vmul.f32 -1.442695, %v1686_v15  ;;  %6942 = vst [vmem:[#allocation41_spill] sm:$0xff] %v5521_v58  ;;  %v5525_v15 = vld [vmem:[#allocation15 + $0x70] sm:$0xff] }
 0x5b1   :  { %v3755_v29 = vpop.eup %3754  ;;  %6943 = vst [vmem:[#allocation43_spill] sm:$0xff] %v5525_v15  ;;  %2156 = vmatpush.msra.mxu2 %v5525_v15  ;;  %2178 = vmatpush.msra.mxu3 %v5539_v39 }
 0x5b2   :  { %v3757_v31 = vpop.eup %3756  ;;  %v5493_v27 = vadd.f32 1.0, %v3755_v29  ;;  %3758 = vpow2.f32 %v3597_v56  ;;  %v1660_v56 = vpop.f32.mrf.mxu2  ;;  %v5529_v29 = vld [vmem:[#allocation15] sm:$0xff]  ;;  %6948 = vst [vmem:[#allocation47_spill] sm:$0xff] %v5539_v39  ;;  %v5556_v39 = vld [vmem:[#allocation15 + $0x10] sm:$0xff] }
 0x5b3   :  { %v5501_v38 = vadd.f32 1.0, %v3757_v31  ;;  %6944 = vst [vmem:[#allocation44_spill] sm:$0xff] %v5529_v29  ;;  %v5531_v31 = vld [vmem:[#allocation15 + $0x8] sm:$0xff]  ;;  %v1685_v16 = vadd.f32 %v1660_v56, %v415_v63  ;;  %2119 = vmatpush.msra.mxu0 %v5529_v29  ;;  %2157 = vmatpush.msra.mxu2 %v5537_v44 }
 0x5b4   :  { %3760 = vrcp.f32 %v5493_v27  ;;  %6945 = vst [vmem:[#allocation45_spill] sm:$0xff] %v5531_v31  ;;  %2139 = vmatpush.msra.mxu1 %v5531_v31  ;;  %2179 = vmatpush.msra.mxu3 %v5541_v17  ;;  %v1702_v31 = vand.u32 2147483648, %v5493_v27  ;;  %vm1696_vm6 = vweird.f32 %v5493_v27 }
 0x5b5   :  { %3762 = vrcp.f32 %v5501_v38  ;;  %6950 = vst [vmem:[#allocation49_spill] sm:$0xff] %v5549_v10  ;;  %2260 = vmatpush.msrb.mxu0 %v5337_v6  ;;  %2158 = vmatpush.msra.mxu2 %v5549_v10  ;;  %v1721_v17 = vand.u32 2147483648, %v5501_v38  ;;  %v1700_v6 = vand.u32 2147483647, %v5493_v27  ;;  %vm1715_vm7 = vweird.f32 %v5501_v38 }
 0x5b6   :  { %6951 = vst [vmem:[#allocation50_spill] sm:$0xff] %v5556_v39  ;;  %2280 = vmatpush.msrb.mxu1 %v5339_v4  ;;  %2320 = vmatpush.msrb.mxu3 %v5347_v43 }
 0x5b7   :  { %2261 = vmatpush.msrb.mxu0 %v5341_v25  ;;  %2159 = vmatpush.msra.mxu2 %v5556_v39  ;;  %vm1701_vm10 = vcmp.eq.f32.partialorder %v1700_v6, 8.507059e+37 }
 0x5b8   :  { %v3759_v61 = vpop.eup %3758  ;;  %2281 = vmatpush.msrb.mxu1 %v5345_v8  ;;  %2321 = vmatpush.msrb.mxu3 %v5354_v5 }
 0x5b9   :  { %v5543_v45 = vadd.f32 1.0, %v3759_v61  ;;  %2300 = vmatpush.msrb.mxu2 %v5373_v19  ;;  %2262 = vmatpush.msrb.mxu0 %v5350_v23 }
 0x5ba   :  { %v3761_v58 = vpop.eup %3760  ;;  %2282 = vmatpush.msrb.mxu1 %v5352_v2  ;;  %2322 = vmatpush.msrb.mxu3 %v5379_v24 }
 0x5bb   :  { %v3763_v52 = vpop.eup %3762  ;;  %v1692_v22 = vmul.f32 %v3761_v58, %v5493_v27  ;;  %3764 = vrcp.f32 %v5543_v45  ;;  %vm1697_vm4 = vweird.f32 %v3761_v58  ;;  %2301 = vmatpush.msrb.mxu2 %v5376_v9  ;;  %2263 = vmatpush.msrb.mxu0 %v5383_v33  ;;  %v1722_v27 = vor.u32 1.1754944e-38, %v1721_v17 }
 0x5bc   :  { %v1711_v61 = vmul.f32 %v3763_v52, %v5501_v38  ;;  %3766 = vtanh.f32 %v1685_v16  ;;  %vm1716_vm5 = vweird.f32 %v3763_v52  ;;  %vm1698_vm8 = vmor %vm1696_vm6, %vm1697_vm4  ;;  %2283 = vmatpush.msrb.mxu1 %v5385_v21  ;;  %2323 = vmatpush.msrb.mxu3 %v5395_v18  ;;  %vm1735_vm13 = vweird.f32 %v5543_v45 }
 0x5bd   :  { %v1693_v63 = vsub.f32 1.0, %v1692_v22  ;;  %vm1717_vm9 = vmor %vm1715_vm7, %vm1716_vm5  ;;  %2302 = vmatpush.msrb.mxu2 %v5381_v30  ;;  %2264 = vmatpush.msrb.mxu0 %v5388_v55 }
 0x5be   :  { %v1712_v56 = vsub.f32 1.0, %v1711_v61  ;;  %v1719_v61 = vand.u32 2147483647, %v5501_v38  ;;  %2284 = vmatpush.msrb.mxu1 %v5393_v3  ;;  %2324 = vmatpush.msrb.mxu3 %v5403_v0 }
 0x5bf   :  { %v1694_v29 = vmul.f32 %v3761_v58, %v1693_v63  ;;  %v1703_v63 = vor.u32 1.1754944e-38, %v1702_v31  ;;  %2303 = vmatpush.msrb.mxu2 %v5397_v28  ;;  %2265 = vmatpush.msrb.mxu0 %v5413_v32 }
 0x5c0   :  { %v1713_v22 = vmul.f32 %v3763_v52, %v1712_v56  ;;  %vm1720_vm11 = vcmp.eq.f32.partialorder %v1719_v61, 8.507059e+37  ;;  %2285 = vmatpush.msrb.mxu1 %v5415_v34  ;;  %2325 = vmatpush.msrb.mxu3 %v5417_v35  ;;  %v6952_v61 = vld [vmem:[#allocation65_spill] sm:$0xff] }
 0x5c1   :  { %v5572_v16 = vpop.eup %3764  ;;  %v1695_v8 = vadd.f32 %v3761_v58, %v1694_v29  ;;  %2304 = vmatpush.msrb.mxu2 %v5405_v53  ;;  %2266 = vmatpush.msrb.mxu0 %v5423_v54 }
 0x5c2   :  { %v1714_v56 = vadd.f32 %v3763_v52, %v1713_v22  ;;  %v1731_v5 = vmul.f32 %v5572_v16, %v5543_v45  ;;  %v3767_v38 = vpop.eup %3766  ;;  %vm1736_vm12 = vweird.f32 %v5572_v16  ;;  %2286 = vmatpush.msrb.mxu1 %v5425_v41  ;;  %2326 = vmatpush.msrb.mxu3 %v5428_v47 }
 0x5c3   :  { %v1699_v29 = vsel %vm1698_vm8, %v3761_v58, %v1695_v8  ;;  %2305 = vmatpush.msrb.mxu2 %v5421_v37  ;;  %2267 = vmatpush.msrb.mxu0 %v5435_v46  ;;  %vm1737_vm14 = vmor %vm1735_vm13, %vm1736_vm12 }
 0x5c4   :  { %v1704_v24 = vsel %vm1701_vm10, %v1703_v63, %v1699_v29  ;;  %v1718_v31 = vsel %vm1717_vm9, %v3763_v52, %v1714_v56  ;;  %v1732_v22 = vsub.f32 1.0, %v1731_v5  ;;  %2287 = vmatpush.msrb.mxu1 %v5437_v48  ;;  %2327 = vmatpush.msrb.mxu3 %v5447_v51  ;;  %v6954_v63 = vld [vmem:[#allocation39_spill] sm:$0xff]  ;;  %v6955_v56 = vld [vmem:[#allocation34_spill] sm:$0xff]  ;;  %v6957_v29 = vld [vmem:[#allocation36_spill] sm:$0xff] }
 0x5c5   :  { %v1723_v2 = vsel %vm1720_vm11, %v1722_v27, %v1718_v31  ;;  %v1746_v33 = vmul.f32 %v3767_v38, %v1704_v24  ;;  %2306 = vmatpush.msrb.mxu2 %v5433_v42  ;;  %2268 = vmatpush.msrb.mxu0 %v5443_v59  ;;  %v6956_v27 = vld [vmem:[#allocation33_spill] sm:$0xff]  ;;  %v6958_v38 = vld [vmem:[#allocation38_spill] sm:$0xff] }
 0x5c6   :  { %v1745_v6 = vmul.f32 %v1723_v2, %v5322_v60  ;;  %v1733_v8 = vmul.f32 %v5572_v16, %v1732_v22  ;;  %v1741_v60 = vand.u32 2147483648, %v5543_v45  ;;  %v1739_v2 = vand.u32 2147483647, %v5543_v45  ;;  %2288 = vmatpush.msrb.mxu1 %v5445_v40  ;;  %2328 = vmatpush.msrb.mxu3 %v5454_v50  ;;  %v6959_v31 = vld [vmem:[#allocation37_spill] sm:$0xff] }
 0x5c7   :  { %2307 = vmatpush.msrb.mxu2 %v5467_v13  ;;  %2269 = vmatpush.msrb.mxu0 %v5450_v57  ;;  %v6960_v22 = vld [vmem:[#allocation41_spill] sm:$0xff] }
 0x5c8   :  { %v1747_v5 = vadd.f32 %v1746_v33, %v1745_v6  ;;  %v1734_v24 = vadd.f32 %v5572_v16, %v1733_v8  ;;  %v1742_v17 = vor.u32 1.1754944e-38, %v1741_v60  ;;  %vm1740_vm15 = vcmp.eq.f32.partialorder %v1739_v2, 8.507059e+37  ;;  %2289 = vmatpush.msrb.mxu1 %v5452_v62  ;;  %2329 = vmatpush.msrb.mxu3 %v5460_v49  ;;  %v6962_v8 = vld [vmem:[#allocation42_spill] sm:$0xff]  ;;  %v6965_v60 = vld [vmem:[#allocation45_spill] sm:$0xff]  ;;  %v6966_v2 = vld [vmem:[#allocation48_spill] sm:$0xff] }
 0x5c9   :  { %2308 = vmatpush.msrb.mxu2 %v5473_v1  ;;  %2270 = vmatpush.msrb.mxu0 %v5463_v26  ;;  %v6961_v6 = vmov 0.0  }
 0x5ca   :  { %3768 = vtanh.f32 %v1747_v5  ;;  %v1738_v33 = vsel %vm1737_vm14, %v5572_v16, %v1734_v24  ;;  %2290 = vmatpush.msrb.mxu1 %v5465_v12  ;;  %2330 = vmatpush.msrb.mxu3 %v5471_v11  ;;  %v6953_v16 = vld [vmem:[#allocation68_spill] sm:$0xff]  ;;  %v6963_v5 = vld [vmem:[#allocation47_spill] sm:$0xff] }
 0x5cb   :  { %v1743_v58 = vsel %vm1740_vm15, %v1742_v17, %v1738_v33  ;;  %2309 = vmatpush.msrb.mxu2 %v5485_v7  ;;  %2271 = vmatpush.msrb.mxu0 %v5477_v20  ;;  %v6964_v24 = vld [vmem:[#allocation44_spill] sm:$0xff]  ;;  %v6967_v33 = vld [vmem:[#allocation25_spill] sm:$0xff]  ;;  %v6968_v17 = vld [vmem:[#allocation27_spill] sm:$0xff] }
 0x5cc   :  { %2291 = vmatpush.msrb.mxu1 %v6952_v61  ;;  %2331 = vmatpush.msrb.mxu3 %v6953_v16 }
 0x5cd   :  { %2310 = vmatpush.msrb.mxu2 %v5497_v36  ;;  %2272 = vmatpush.msrb.mxu0 %v6955_v56 }
 0x5ce   :  { %2292 = vmatpush.msrb.mxu1 %v6956_v27  ;;  %2332 = vmatpush.msrb.mxu3 %v6957_v29 }
 0x5cf   :  { %2311 = vmatpush.msrb.mxu2 %v6954_v63  ;;  %2273 = vmatpush.msrb.mxu0 %v6958_v38 }
 0x5d0   :  { %v3769_v45 = vpop.eup %3768  ;;  %2293 = vmatpush.msrb.mxu1 %v6959_v31  ;;  %2333 = vmatpush.msrb.mxu3 %v6960_v22 }
 0x5d1   :  { %v1749_v52 = vmul.f32 %v3769_v45, %v1743_v58  ;;  %2312 = vmatpush.msrb.mxu2 %v5525_v15  ;;  %2274 = vmatpush.msrb.mxu0 %v5517_v14  ;;  %v6969_v45 = vld [vmem:[#allocation30_spill] sm:$0xff]  ;;  %v6970_v58 = vld [vmem:[#allocation28_spill] sm:$0xff] }
 0x5d2   :  { %2294 = vmatpush.msrb.mxu1 %v6962_v8  ;;  %2334 = vmatpush.msrb.mxu3 %v6963_v5 }
 0x5d3   :  { %1937 = vmatmul.f32.gmra.mxu0 %v1749_v52  ;;  %1978 = vmatmul.f32.gmra.mxu1 %v1749_v52 }
 0x5d4   :  { %2019 = vmatmul.f32.gmra.mxu2 %v1749_v52  ;;  %2060 = vmatmul.f32.gmra.mxu3 %v1749_v52  ;;  %v6971_v52 = vld [vmem:[#allocation29_spill] sm:$0xff] }
 0x5d5   :  { %2313 = vmatpush.msrb.mxu2 %v5537_v44  ;;  %2275 = vmatpush.msrb.mxu0 %v6964_v24 }
 0x5d6   :  { %2295 = vmatpush.msrb.mxu1 %v6965_v60  ;;  %2335 = vmatpush.msrb.mxu3 %v6966_v2 }
 0x5d7   :  { %2314 = vmatpush.msrb.mxu2 %v5549_v10 }
 0x5d9   :  { %2315 = vmatpush.msrb.mxu2 %v5556_v39 }
 0x5db   :  { %2120 = vmatmul.f32.vlgmr.msra.gmra.mxu0 %v6961_v6  ;;  %2140 = vmatmul.f32.vlgmr.msra.gmra.mxu1 %v6961_v6 }
 0x5dc   :  { %2160 = vmatmul.f32.vlgmr.msra.gmra.mxu2 %v6961_v6  ;;  %2180 = vmatmul.f32.vlgmr.msra.gmra.mxu3 %v6961_v6  ;;  %v6972_v6 = vld [vmem:[#allocation59_spill] sm:$0xff] }
 0x5dd   :  { %2416 = vmatpush.msra.mxu0 %v6967_v33  ;;  %2436 = vmatpush.msra.mxu1 %v5339_v4 }
 0x5de   :  { %2456 = vmatpush.msra.mxu2 %v5373_v19  ;;  %2476 = vmatpush.msra.mxu3 %v5347_v43 }
 0x5df   :  { %2417 = vmatpush.msra.mxu0 %v5341_v25  ;;  %2437 = vmatpush.msra.mxu1 %v6968_v17 }
 0x5e0   :  { %2457 = vmatpush.msra.mxu2 %v5376_v9  ;;  %2477 = vmatpush.msra.mxu3 %v6969_v45 }
 0x5e1   :  { %2418 = vmatpush.msra.mxu0 %v5350_v23  ;;  %2438 = vmatpush.msra.mxu1 %v6970_v58 }
 0x5e2   :  { %2458 = vmatpush.msra.mxu2 %v5381_v30  ;;  %2478 = vmatpush.msra.mxu3 %v6971_v52 }
 0x5e3   :  { %2419 = vmatpush.msra.mxu0 %v6972_v6  ;;  %2439 = vmatpush.msra.mxu1 %v5385_v21 }
 0x5e4   :  { %2459 = vmatpush.msra.mxu2 %v5397_v28  ;;  %2479 = vmatpush.msra.mxu3 %v5395_v18 }
 0x5e5   :  { %2420 = vmatpush.msra.mxu0 %v5388_v55  ;;  %2440 = vmatpush.msra.mxu1 %v5393_v3 }
 0x5e6   :  { %2460 = vmatpush.msra.mxu2 %v5405_v53  ;;  %2480 = vmatpush.msra.mxu3 %v5403_v0 }
 0x5e7   :  { %2421 = vmatpush.msra.mxu0 %v5413_v32  ;;  %2441 = vmatpush.msra.mxu1 %v5415_v34 }
 0x5e8   :  { %2461 = vmatpush.msra.mxu2 %v5421_v37  ;;  %2481 = vmatpush.msra.mxu3 %v5417_v35 }
 0x5e9   :  { %2422 = vmatpush.msra.mxu0 %v5423_v54  ;;  %2442 = vmatpush.msra.mxu1 %v5425_v41 }
 0x5ea   :  { %2462 = vmatpush.msra.mxu2 %v5433_v42  ;;  %2482 = vmatpush.msra.mxu3 %v5428_v47 }
 0x5eb   :  { %2423 = vmatpush.msra.mxu0 %v5435_v46  ;;  %2443 = vmatpush.msra.mxu1 %v5437_v48 }
 0x5ec   :  { %2463 = vmatpush.msra.mxu2 %v5467_v13  ;;  %2483 = vmatpush.msra.mxu3 %v5447_v51 }
 0x5ed   :  { %2424 = vmatpush.msra.mxu0 %v5443_v59  ;;  %2444 = vmatpush.msra.mxu1 %v5445_v40 }
 0x5ee   :  { %2464 = vmatpush.msra.mxu2 %v5473_v1  ;;  %2484 = vmatpush.msra.mxu3 %v5454_v50 }
 0x5ef   :  { %2425 = vmatpush.msra.mxu0 %v5450_v57  ;;  %2445 = vmatpush.msra.mxu1 %v5452_v62 }
 0x5f0   :  { %2465 = vmatpush.msra.mxu2 %v5485_v7  ;;  %2485 = vmatpush.msra.mxu3 %v5460_v49 }
 0x5f1   :  { %2426 = vmatpush.msra.mxu0 %v5463_v26  ;;  %2446 = vmatpush.msra.mxu1 %v5465_v12 }
 0x5f2   :  { %2466 = vmatpush.msra.mxu2 %v5497_v36  ;;  %2486 = vmatpush.msra.mxu3 %v5471_v11 }
 0x5f3   :  { %2427 = vmatpush.msra.mxu0 %v5477_v20  ;;  %2447 = vmatpush.msra.mxu1 %v6952_v61 }
 0x5f4   :  { %2467 = vmatpush.msra.mxu2 %v6954_v63  ;;  %2487 = vmatpush.msra.mxu3 %v6953_v16 }
 0x5f5   :  { %2428 = vmatpush.msra.mxu0 %v6955_v56  ;;  %2448 = vmatpush.msra.mxu1 %v6956_v27 }
 0x5f6   :  { %2468 = vmatpush.msra.mxu2 %v5525_v15  ;;  %2488 = vmatpush.msra.mxu3 %v6957_v29 }
 0x5f7   :  { %2429 = vmatpush.msra.mxu0 %v6958_v38  ;;  %2449 = vmatpush.msra.mxu1 %v6959_v31  ;;  %v1917_v31 = vpop.f32.mrf.mxu0  ;;  %v2040_v38 = vpop.f32.mrf.mxu3 }
 0x5f8   :  { %2469 = vmatpush.msra.mxu2 %v5537_v44  ;;  %2489 = vmatpush.msra.mxu3 %v6960_v22  ;;  %v1958_v44 = vpop.f32.mrf.mxu1 }
 0x5f9   :  { %2430 = vmatpush.msra.mxu0 %v5517_v14  ;;  %2450 = vmatpush.msra.mxu1 %v6962_v8  ;;  %v1999_v8 = vpop.f32.mrf.mxu2 }
 0x5fa   :  { %2470 = vmatpush.msra.mxu2 %v5549_v10  ;;  %2490 = vmatpush.msra.mxu3 %v6963_v5 }
 0x5fb   :  { %2431 = vmatpush.msra.mxu0 %v6964_v24  ;;  %2451 = vmatpush.msra.mxu1 %v6965_v60 }
 0x5fc   :  { %2471 = vmatpush.msra.mxu2 %v5556_v39  ;;  %2491 = vmatpush.msra.mxu3 %v6966_v2 }
 0x5ff   :  { %v5712_v22 = vpop.f32.mrf.mxu0  ;;  %v5716_v29 = vpop.f32.mrf.mxu3 }
 0x600   :  { %6973 = vst [vmem:[#allocation51_spill] sm:$0xff] %v5712_v22  ;;  %v5714_v14 = vpop.f32.mrf.mxu1 }
 0x601   :  { %6974 = vst [vmem:[#allocation52_spill] sm:$0xff] %v5714_v14  ;;  %v5722_v24 = vpop.f32.mrf.mxu2 }
 0x602   :  { %6975 = vst [vmem:[#allocation54_spill] sm:$0xff] %v5716_v29 }
 0x603   :  { %6978 = vst [vmem:[#allocation56_spill] sm:$0xff] %v5722_v24 }
 0x607   :  { %v5718_v10 = vpop.f32.mrf.mxu0  ;;  %v5724_v60 = vpop.f32.mrf.mxu3 }
 0x608   :  { %6976 = vst [vmem:[#allocation53_spill] sm:$0xff] %v5718_v10  ;;  %v5720_v5 = vpop.f32.mrf.mxu1 }
 0x609   :  { %6977 = vst [vmem:[#allocation55_spill] sm:$0xff] %v5720_v5  ;;  %v5730_v15 = vpop.f32.mrf.mxu2 }
 0x60a   :  { %6979 = vst [vmem:[#allocation58_spill] sm:$0xff] %v5724_v60 }
 0x60b   :  { %6982 = vst [vmem:[#allocation77_spill] sm:$0xff] %v5730_v15 }
 0x60f   :  { %v5726_v39 = vpop.f32.mrf.mxu0  ;;  %v5732_v22 = vpop.f32.mrf.mxu3 }
 0x610   :  { %6980 = vst [vmem:[#allocation76_spill] sm:$0xff] %v5726_v39  ;;  %v5728_v2 = vpop.f32.mrf.mxu1 }
 0x611   :  { %6981 = vst [vmem:[#allocation66_spill] sm:$0xff] %v5728_v2  ;;  %v5738_v29 = vpop.f32.mrf.mxu2 }
 0x612   :  { %6983 = vst [vmem:[#allocation67_spill] sm:$0xff] %v5732_v22 }
 0x613   :  { %6986 = vst [vmem:[#allocation82_spill] sm:$0xff] %v5738_v29 }
 0x617   :  { %v5734_v14 = vpop.f32.mrf.mxu0  ;;  %v5740_v10 = vpop.f32.mrf.mxu3 }
 0x618   :  { %6984 = vst [vmem:[#allocation80_spill] sm:$0xff] %v5734_v14  ;;  %v5736_v27 = vpop.f32.mrf.mxu1 }
 0x619   :  { %6985 = vst [vmem:[#allocation69_spill] sm:$0xff] %v5736_v27  ;;  %v5746_v60 = vpop.f32.mrf.mxu2  ;;  %v1882_v27 = vld [vmem:[#allocation16] sm:$0xf] }
 0x61a   :  { %6987 = vst [vmem:[#allocation72_spill] sm:$0xff] %v5740_v10  ;;  %v5772_v63 = vperm.slane %v1882_v27, 3 }
 0x61b   :  { %6990 = vst [vmem:[#allocation73_spill] sm:$0xff] %v5746_v60 }
 0x61c   :  { %7002 = vst [vmem:[#allocation30_spill] sm:$0xff] %v5772_v63  ;;  %v2041_v61 = vadd.f32 %v2040_v38, %v5772_v63 }
 0x61f   :  { %v5742_v5 = vpop.f32.mrf.mxu0  ;;  %v5748_v39 = vpop.f32.mrf.mxu3 }
 0x620   :  { %6988 = vst [vmem:[#allocation70_spill] sm:$0xff] %v5742_v5  ;;  %v5744_v24 = vpop.f32.mrf.mxu1  ;;  %v5762_v5 = vperm.slane %v1882_v27, 0 }
 0x621   :  { %6989 = vst [vmem:[#allocation71_spill] sm:$0xff] %v5744_v24  ;;  %v5754_v22 = vpop.f32.mrf.mxu2  ;;  %v5764_v24 = vperm.slane %v1882_v27, 1 }
 0x622   :  { %6991 = vst [vmem:[#allocation78_spill] sm:$0xff] %v5748_v39  ;;  %v1918_v60 = vadd.f32 %v1917_v31, %v5762_v5 }
 0x623   :  { %6994 = vst [vmem:[#allocation31_spill] sm:$0xff] %v5754_v22  ;;  %v1959_v39 = vadd.f32 %v1958_v44, %v5764_v24 }
 0x624   :  { %6998 = vst [vmem:[#allocation79_spill] sm:$0xff] %v5762_v5 }
 0x625   :  { %6999 = vst [vmem:[#allocation81_spill] sm:$0xff] %v5764_v24 }
 0x627   :  { %v5750_v2 = vpop.f32.mrf.mxu0  ;;  %v5756_v14 = vpop.f32.mrf.mxu3 }
 0x628   :  { %6992 = vst [vmem:[#allocation83_spill] sm:$0xff] %v5750_v2  ;;  %v5752_v15 = vpop.f32.mrf.mxu1 }
 0x629   :  { %6993 = vst [vmem:[#allocation26_spill] sm:$0xff] %v5752_v15  ;;  %v5768_v2 = vpop.f32.mrf.mxu2 }
 0x62a   :  { %6995 = vst [vmem:[#allocation57_spill] sm:$0xff] %v5756_v14 }
 0x62b   :  { %7000 = vst [vmem:[#allocation25_spill] sm:$0xff] %v5768_v2 }
 0x650   :  { %v5758_v29 = vpop.f32.mrf.mxu0  ;;  %v5760_v10 = vpop.f32.mrf.mxu1 }
 0x651   :  { %6996 = vst [vmem:[#allocation74_spill] sm:$0xff] %v5758_v29 }
 0x652   :  { %6997 = vst [vmem:[#allocation75_spill] sm:$0xff] %v5760_v10 }
 0x657   :  { %v5770_v15 = vpop.f32.mrf.mxu3  ;;  %v5775_v20 = vpop.f32.mrf.mxu2 }
 0x658   :  { %7001 = vst [vmem:[#allocation27_spill] sm:$0xff] %v5770_v15  ;;  %v2121_v22 = vpop.f32.mrf.mxu0  ;;  %v2141_v56 = vpop.f32.mrf.mxu1 }
 0x659   :  { %v2184_v14 = vadd.f32 %v2121_v22, %v1918_v60  ;;  %v2185_v16 = vadd.f32 %v2141_v56, %v1959_v39  ;;  %7003 = vst [vmem:[#allocation28_spill] sm:$0xff] %v5775_v20  ;;  %v5777_v22 = vperm.slane %v1882_v27, 2 }
 0x65b   :  { %v3598_v29 = vmul.f32 -1.442695, %v2184_v14  ;;  %v3599_v10 = vmul.f32 -1.442695, %v2185_v16  ;;  %7004 = vst [vmem:[#allocation29_spill] sm:$0xff] %v5777_v22  ;;  %v2000_v16 = vadd.f32 %v1999_v8, %v5777_v22 }
 0x65d   :  { %3770 = vpow2.f32 %v3598_v29 }
 0x65e   :  { %3772 = vpow2.f32 %v3599_v10 }
 0x65f   :  { %v2181_v31 = vpop.f32.mrf.mxu3  ;;  %v2161_v39 = vpop.f32.mrf.mxu2 }
 0x660   :  { %v2187_v44 = vadd.f32 %v2181_v31, %v2041_v61  ;;  %v2186_v29 = vadd.f32 %v2161_v39, %v2000_v16 }
 0x662   :  { %v3600_v24 = vmul.f32 -1.442695, %v2187_v44 }
 0x663   :  { %v3771_v2 = vpop.eup %3770 }
 0x664   :  { %v3773_v5 = vpop.eup %3772  ;;  %v2191_v15 = vadd.f32 1.0, %v3771_v2  ;;  %3774 = vpow2.f32 %v3600_v24 }
 0x665   :  { %v2210_v11 = vadd.f32 1.0, %v3773_v5 }
 0x666   :  { %3776 = vrcp.f32 %v2191_v15  ;;  %v2203_v2 = vand.u32 2147483648, %v2191_v15  ;;  %v2201_v24 = vand.u32 2147483647, %v2191_v15  ;;  %vm2197_vm2 = vweird.f32 %v2191_v15 }
 0x667   :  { %3778 = vrcp.f32 %v2210_v11  ;;  %v2222_v5 = vand.u32 2147483648, %v2210_v11  ;;  %v2220_v63 = vand.u32 2147483647, %v2210_v11  ;;  %vm2216_vm3 = vweird.f32 %v2210_v11 }
 0x668   :  { %v2204_v39 = vor.u32 1.1754944e-38, %v2203_v2  ;;  %vm2202_vm5 = vcmp.eq.f32.partialorder %v2201_v24, 8.507059e+37 }
 0x669   :  { %v2223_v22 = vor.u32 1.1754944e-38, %v2222_v5  ;;  %vm2221_vm7 = vcmp.eq.f32.partialorder %v2220_v63, 8.507059e+37  ;;  %v5786_v63 = vld [vmem:[%s6419_s7] ss:$0 sm:$0xff] }
 0x66a   :  { %v3775_v14 = vpop.eup %3774 }
 0x66b   :  { %v2230_v56 = vadd.f32 1.0, %v3775_v14 }
 0x66c   :  { %v3777_v10 = vpop.eup %3776 }
 0x66d   :  { %v3779_v38 = vpop.eup %3778  ;;  %v2193_v60 = vmul.f32 %v3777_v10, %v2191_v15  ;;  %3780 = vrcp.f32 %v2230_v56  ;;  %vm2198_vm0 = vweird.f32 %v3777_v10  ;;  %vm2236_vm9 = vweird.f32 %v2230_v56 }
 0x66e   :  { %v2212_v61 = vmul.f32 %v3779_v38, %v2210_v11  ;;  %3782 = vtanh.f32 %v2186_v29  ;;  %vm2217_vm1 = vweird.f32 %v3779_v38  ;;  %vm2199_vm4 = vmor %vm2197_vm2, %vm2198_vm0  ;;  %v2240_v15 = vand.u32 2147483647, %v2230_v56 }
 0x66f   :  { %v2194_v31 = vsub.f32 1.0, %v2193_v60  ;;  %vm2218_vm6 = vmor %vm2216_vm3, %vm2217_vm1 }
 0x670   :  { %v2213_v44 = vsub.f32 1.0, %v2212_v61  ;;  %vm2241_vm11 = vcmp.eq.f32.partialorder %v2240_v15, 8.507059e+37 }
 0x671   :  { %v2195_v27 = vmul.f32 %v3777_v10, %v2194_v31 }
 0x672   :  { %v2214_v20 = vmul.f32 %v3779_v38, %v2213_v44 }
 0x673   :  { %v3781_v36 = vpop.eup %3780  ;;  %v2196_v8 = vadd.f32 %v3777_v10, %v2195_v27 }
 0x674   :  { %v2215_v14 = vadd.f32 %v3779_v38, %v2214_v20  ;;  %v2232_v16 = vmul.f32 %v3781_v36, %v2230_v56  ;;  %v3783_v29 = vpop.eup %3782  ;;  %vm2237_vm8 = vweird.f32 %v3781_v36  ;;  %v2242_v20 = vand.u32 2147483648, %v2230_v56 }
 0x675   :  { %v2200_v60 = vsel %vm2199_vm4, %v3777_v10, %v2196_v8  ;;  %vm2238_vm10 = vmor %vm2236_vm9, %vm2237_vm8 }
 0x676   :  { %v2205_v61 = vsel %vm2202_vm5, %v2204_v39, %v2200_v60  ;;  %v2219_v31 = vsel %vm2218_vm6, %v3779_v38, %v2215_v14  ;;  %v2233_v12 = vsub.f32 1.0, %v2232_v16  ;;  %v2243_v2 = vor.u32 1.1754944e-38, %v2242_v20 }
 0x677   :  { %v2224_v44 = vsel %vm2221_vm7, %v2223_v22, %v2219_v31  ;;  %v2247_v26 = vmul.f32 %v3783_v29, %v2205_v61  ;;  %v7038_v61 = vld [vmem:[#allocation29_spill] sm:$0xff]  ;;  %v7039_v31 = vld [vmem:[#allocation56_spill] sm:$0xff] }
 0x678   :  { %v2246_v49 = vmul.f32 0.0, %v2224_v44  ;;  %v2234_v7 = vmul.f32 %v3781_v36, %v2233_v12  ;;  %v2003_v44 = vadd.f32 %v7039_v31, %v7038_v61  ;;  %v5931_v31 = vld [vmem:[#allocation15 + $0x168] sm:$0xff] }
 0x67a   :  { %v5780_v27 = vadd.f32 %v2247_v26, %v2246_v49  ;;  %v2235_v11 = vadd.f32 %v3781_v36, %v2234_v7 }
 0x67c   :  { %3784 = vtanh.f32 %v5780_v27  ;;  %v2239_v10 = vsel %vm2238_vm10, %v3781_v36, %v2235_v11 }
 0x67d   :  { %v2244_v12 = vsel %vm2241_vm11, %v2243_v2, %v2239_v10 }
 0x682   :  { %v3785_v22 = vpop.eup %3784 }
 0x683   :  { %v5788_v49 = vmul.f32 %v3785_v22, %v2244_v12 }
 0x685   :  { %7005 = vst [vmem:[#allocation59_spill] sm:$0xff] %v5788_v49  ;;  %2276 = vmatmul.f32.vlgmr.msrb.gmra.mxu0 %v5788_v49  ;;  %2296 = vmatmul.f32.vlgmr.msrb.gmra.mxu1 %v5788_v49  ;;  %v3358_v26 = vmul.f32 %v5786_v63, %v5788_v49 }
 0x686   :  { %2316 = vmatmul.f32.vlgmr.msrb.gmra.mxu2 %v5788_v49  ;;  %2336 = vmatmul.f32.vlgmr.msrb.gmra.mxu3 %v5788_v49  ;;  %v6051_v49 = vld [vmem:[#allocation15 + $0x28] sm:$0xff] }
 0x687   :  { %3366 = vadd.xlane.f32.xlu0 %v3358_v26  ;;  %2572 = vmatpush.msrb.mxu0 %v6967_v33 }
 0x688   :  { %2592 = vmatpush.msrb.mxu1 %v5339_v4  ;;  %2612 = vmatpush.msrb.mxu2 %v5373_v19  ;;  %v7006_v4 = vld [vmem:[#allocation32_spill] sm:$0xff]  ;;  %v7010_v19 = vld [vmem:[#allocation35_spill] sm:$0xff] }
 0x689   :  { %2632 = vmatpush.msrb.mxu3 %v5347_v43  ;;  %2573 = vmatpush.msrb.mxu0 %v5341_v25  ;;  %v7007_v25 = vld [vmem:[#allocation60_spill] sm:$0xff]  ;;  %v7008_v43 = vld [vmem:[#allocation62_spill] sm:$0xff] }
 0x68a   :  { %2593 = vmatpush.msrb.mxu1 %v6968_v17  ;;  %2613 = vmatpush.msrb.mxu2 %v5376_v9  ;;  %v7011_v9 = vld [vmem:[#allocation63_spill] sm:$0xff] }
 0x68b   :  { %2633 = vmatpush.msrb.mxu3 %v6969_v45  ;;  %2574 = vmatpush.msrb.mxu0 %v5350_v23  ;;  %v7009_v23 = vld [vmem:[#allocation61_spill] sm:$0xff] }
 0x68c   :  { %2594 = vmatpush.msrb.mxu1 %v6970_v58  ;;  %2614 = vmatpush.msrb.mxu2 %v5381_v30  ;;  %v7012_v30 = vld [vmem:[#allocation64_spill] sm:$0xff] }
 0x68d   :  { %2634 = vmatpush.msrb.mxu3 %v6971_v52  ;;  %2575 = vmatpush.msrb.mxu0 %v6972_v6  ;;  %v7036_v52 = vld [vmem:[#allocation30_spill] sm:$0xff] }
 0x68e   :  { %2595 = vmatpush.msrb.mxu1 %v5385_v21  ;;  %2615 = vmatpush.msrb.mxu2 %v5397_v28  ;;  %v7013_v21 = vld [vmem:[#allocation65_spill] sm:$0xff]  ;;  %v7037_v6 = vld [vmem:[#allocation54_spill] sm:$0xff] }
 0x68f   :  { %2635 = vmatpush.msrb.mxu3 %v5395_v18  ;;  %2576 = vmatpush.msrb.mxu0 %v5388_v55  ;;  %v7014_v55 = vld [vmem:[#allocation39_spill] sm:$0xff]  ;;  %v7016_v18 = vld [vmem:[#allocation34_spill] sm:$0xff]  ;;  %v7017_v28 = vld [vmem:[#allocation33_spill] sm:$0xff]  ;;  %v2044_v56 = vadd.f32 %v7037_v6, %v7036_v52 }
 0x690   :  { %2596 = vmatpush.msrb.mxu1 %v5393_v3  ;;  %2616 = vmatpush.msrb.mxu2 %v5405_v53  ;;  %v7015_v3 = vld [vmem:[#allocation68_spill] sm:$0xff]  ;;  %v5898_v6 = vld [vmem:[#allocation15 + $0x1d0] sm:$0xff] }
 0x691   :  { %2636 = vmatpush.msrb.mxu3 %v5403_v0  ;;  %2577 = vmatpush.msrb.mxu0 %v5413_v32  ;;  %v7018_v0 = vld [vmem:[#allocation43_spill] sm:$0xff]  ;;  %v7019_v53 = vld [vmem:[#allocation36_spill] sm:$0xff]  ;;  %v7020_v32 = vld [vmem:[#allocation38_spill] sm:$0xff] }
 0x692   :  { %2597 = vmatpush.msrb.mxu1 %v5415_v34  ;;  %2617 = vmatpush.msrb.mxu2 %v5421_v37  ;;  %v7021_v34 = vld [vmem:[#allocation37_spill] sm:$0xff] }
 0x693   :  { %2637 = vmatpush.msrb.mxu3 %v5417_v35  ;;  %2578 = vmatpush.msrb.mxu0 %v5423_v54  ;;  %v7022_v35 = vld [vmem:[#allocation46_spill] sm:$0xff]  ;;  %v7023_v37 = vld [vmem:[#allocation41_spill] sm:$0xff]  ;;  %v7024_v54 = vld [vmem:[#allocation40_spill] sm:$0xff] }
 0x694   :  { %2598 = vmatpush.msrb.mxu1 %v5425_v41  ;;  %2618 = vmatpush.msrb.mxu2 %v5433_v42  ;;  %v7025_v41 = vld [vmem:[#allocation42_spill] sm:$0xff]  ;;  %v7027_v42 = vld [vmem:[#allocation47_spill] sm:$0xff] }
 0x695   :  { %2638 = vmatpush.msrb.mxu3 %v5428_v47  ;;  %2579 = vmatpush.msrb.mxu0 %v5435_v46  ;;  %v7026_v47 = vld [vmem:[#allocation49_spill] sm:$0xff]  ;;  %v7028_v46 = vld [vmem:[#allocation44_spill] sm:$0xff]  ;;  %7061 = vst [vmem:[#allocation47_spill] sm:$0xff] %v6051_v49 }
 0x696   :  { %2599 = vmatpush.msrb.mxu1 %v5437_v48  ;;  %2619 = vmatpush.msrb.mxu2 %v5467_v13  ;;  %v7029_v48 = vld [vmem:[#allocation45_spill] sm:$0xff]  ;;  %v7035_v13 = vld [vmem:[#allocation52_spill] sm:$0xff] }
 0x697   :  { %2639 = vmatpush.msrb.mxu3 %v5447_v51  ;;  %2580 = vmatpush.msrb.mxu0 %v5443_v59  ;;  %v7030_v59 = vld [vmem:[#allocation50_spill] sm:$0xff]  ;;  %v7032_v51 = vld [vmem:[#allocation79_spill] sm:$0xff] }
 0x698   :  { %2600 = vmatpush.msrb.mxu1 %v5445_v40  ;;  %2620 = vmatpush.msrb.mxu2 %v5473_v1  ;;  %v7031_v40 = vld [vmem:[#allocation48_spill] sm:$0xff] }
 0x699   :  { %2640 = vmatpush.msrb.mxu3 %v5454_v50  ;;  %2581 = vmatpush.msrb.mxu0 %v5450_v57  ;;  %v7033_v57 = vld [vmem:[#allocation51_spill] sm:$0xff]  ;;  %v7034_v50 = vld [vmem:[#allocation81_spill] sm:$0xff] }
 0x69a   :  { %2601 = vmatpush.msrb.mxu1 %v5452_v62  ;;  %2621 = vmatpush.msrb.mxu2 %v7006_v4  ;;  %v1921_v62 = vadd.f32 %v7033_v57, %v7032_v51  ;;  %v1962_v1 = vadd.f32 %v7035_v13, %v7034_v50 }
 0x69b   :  { %2641 = vmatpush.msrb.mxu3 %v7007_v25  ;;  %2582 = vmatpush.msrb.mxu0 %v7008_v43 }
 0x69c   :  { %2602 = vmatpush.msrb.mxu1 %v7009_v23  ;;  %2622 = vmatpush.msrb.mxu2 %v7010_v19 }
 0x69d   :  { %2642 = vmatpush.msrb.mxu3 %v7011_v9  ;;  %2583 = vmatpush.msrb.mxu0 %v7012_v30 }
 0x69e   :  { %2603 = vmatpush.msrb.mxu1 %v7013_v21  ;;  %2623 = vmatpush.msrb.mxu2 %v7014_v55 }
 0x69f   :  { %2643 = vmatpush.msrb.mxu3 %v7015_v3  ;;  %2584 = vmatpush.msrb.mxu0 %v7016_v18 }
 0x6a0   :  { %2604 = vmatpush.msrb.mxu1 %v7017_v28  ;;  %2624 = vmatpush.msrb.mxu2 %v7018_v0 }
 0x6a1   :  { %2644 = vmatpush.msrb.mxu3 %v7019_v53  ;;  %2585 = vmatpush.msrb.mxu0 %v7020_v32 }
 0x6a2   :  { %2605 = vmatpush.msrb.mxu1 %v7021_v34  ;;  %2625 = vmatpush.msrb.mxu2 %v7022_v35 }
 0x6a3   :  { %2645 = vmatpush.msrb.mxu3 %v7023_v37  ;;  %2586 = vmatpush.msrb.mxu0 %v7024_v54 }
 0x6a4   :  { %2606 = vmatpush.msrb.mxu1 %v7025_v41  ;;  %2626 = vmatpush.msrb.mxu2 %v7026_v47 }
 0x6a5   :  { %2646 = vmatpush.msrb.mxu3 %v7027_v42  ;;  %2587 = vmatpush.msrb.mxu0 %v7028_v46 }
 0x6a6   :  { %2607 = vmatpush.msrb.mxu1 %v7029_v48  ;;  %2627 = vmatpush.msrb.mxu2 %v7030_v59 }
 0x6a7   :  { %2647 = vmatpush.msrb.mxu3 %v7031_v40 }
 0x702   :  { %v2277_v7 = vpop.f32.mrf.mxu0  ;;  %v2297_v36 = vpop.f32.mrf.mxu1 }
 0x703   :  { %v2340_v33 = vadd.f32 %v2277_v7, %v1921_v62  ;;  %v2341_v17 = vadd.f32 %v2297_v36, %v1962_v1  ;;  %v5880_v7 = vld [vmem:[#allocation15 + $0x1e0] sm:$0xff]  ;;  %v5883_v36 = vld [vmem:[#allocation15 + $0x1e8] sm:$0xff] }
 0x705   :  { %v3601_v45 = vmul.f32 -1.442695, %v2340_v33  ;;  %v3602_v58 = vmul.f32 -1.442695, %v2341_v17  ;;  %v5886_v33 = vld [vmem:[#allocation15 + $0x1f0] sm:$0xff]  ;;  %v5889_v17 = vld [vmem:[#allocation15 + $0x1f8] sm:$0xff] }
 0x707   :  { %3786 = vpow2.f32 %v3601_v45  ;;  %v5892_v45 = vld [vmem:[#allocation15 + $0x1c0] sm:$0xff] }
 0x708   :  { %3788 = vpow2.f32 %v3602_v58  ;;  %v5895_v58 = vld [vmem:[#allocation15 + $0x1c8] sm:$0xff] }
 0x709   :  { %v2337_v38 = vpop.f32.mrf.mxu3  ;;  %v2317_v60 = vpop.f32.mrf.mxu2 }
 0x70a   :  { %v2343_v5 = vadd.f32 %v2337_v38, %v2044_v56  ;;  %v2342_v15 = vadd.f32 %v2317_v60, %v2003_v44  ;;  %v5901_v56 = vld [vmem:[#allocation15 + $0x1d8] sm:$0xff]  ;;  %v5904_v38 = vld [vmem:[#allocation15 + $0x1a0] sm:$0xff]  ;;  %v5934_v44 = vld [vmem:[#allocation15 + $0x170] sm:$0xff] }
 0x70b   :  { %v5925_v60 = vld [vmem:[#allocation15 + $0x198] sm:$0xff] }
 0x70c   :  { %v3603_v24 = vmul.f32 -1.442695, %v2343_v5  ;;  %v5907_v5 = vld [vmem:[#allocation15 + $0x1a8] sm:$0xff] }
 0x70d   :  { %v3787_v8 = vpop.eup %3786 }
 0x70e   :  { %v3789_v39 = vpop.eup %3788  ;;  %v2347_v14 = vadd.f32 1.0, %v3787_v8  ;;  %3790 = vpow2.f32 %v3603_v24  ;;  %v5910_v24 = vld [vmem:[#allocation15 + $0x1b0] sm:$0xff]  ;;  %v5913_v8 = vld [vmem:[#allocation15 + $0x1b8] sm:$0xff] }
 0x70f   :  { %v2366_v16 = vadd.f32 1.0, %v3789_v39  ;;  %v5916_v39 = vld [vmem:[#allocation15 + $0x180] sm:$0xff] }
 0x710   :  { %3792 = vrcp.f32 %v2347_v14  ;;  %v2359_v4 = vand.u32 2147483648, %v2347_v14  ;;  %v2357_v23 = vand.u32 2147483647, %v2347_v14  ;;  %vm2353_vm14 = vweird.f32 %v2347_v14 }
 0x711   :  { %3794 = vrcp.f32 %v2366_v16  ;;  %v2378_v25 = vand.u32 2147483648, %v2366_v16  ;;  %v2376_v9 = vand.u32 2147483647, %v2366_v16  ;;  %vm2372_vm15 = vweird.f32 %v2366_v16 }
 0x712   :  { %v2360_v55 = vor.u32 1.1754944e-38, %v2359_v4  ;;  %vm2358_vm2 = vcmp.eq.f32.partialorder %v2357_v23, 8.507059e+37  ;;  %v5961_v4 = vld [vmem:[#allocation15 + $0x138] sm:$0xff]  ;;  %v5970_v23 = vld [vmem:[#allocation15 + $0x110] sm:$0xff] }
 0x713   :  { %v2379_v28 = vor.u32 1.1754944e-38, %v2378_v25  ;;  %vm2377_vm3 = vcmp.eq.f32.partialorder %v2376_v9, 8.507059e+37  ;;  %v5964_v25 = vld [vmem:[#allocation15 + $0x100] sm:$0xff] }
 0x714   :  { %v3791_v29 = vpop.eup %3790  ;;  %v5976_v9 = vld [vmem:[#allocation15 + $0xe0] sm:$0xff] }
 0x715   :  { %v2386_v11 = vadd.f32 1.0, %v3791_v29  ;;  %v5928_v29 = vld [vmem:[#allocation15 + $0x160] sm:$0xff] }
 0x716   :  { %v3793_v20 = vpop.eup %3792 }
 0x717   :  { %v3795_v10 = vpop.eup %3794  ;;  %v2349_v2 = vmul.f32 %v3793_v20, %v2347_v14  ;;  %3796 = vrcp.f32 %v2386_v11  ;;  %vm2354_vm12 = vweird.f32 %v3793_v20  ;;  %v2398_v48 = vand.u32 2147483648, %v2386_v11  ;;  %v5919_v14 = vld [vmem:[#allocation15 + $0x188] sm:$0xff] }
 0x718   :  { %v2368_v22 = vmul.f32 %v3795_v10, %v2366_v16  ;;  %3798 = vtanh.f32 %v2342_v15  ;;  %vm2373_vm13 = vweird.f32 %v3795_v10  ;;  %vm2355_vm0 = vmor %vm2353_vm14, %vm2354_vm12  ;;  %vm2392_vm5 = vweird.f32 %v2386_v11  ;;  %v5922_v16 = vld [vmem:[#allocation15 + $0x190] sm:$0xff]  ;;  %v5943_v15 = vld [vmem:[#allocation15 + $0x148] sm:$0xff] }
 0x719   :  { %v2350_v12 = vsub.f32 1.0, %v2349_v2  ;;  %vm2374_vm1 = vmor %vm2372_vm15, %vm2373_vm13  ;;  %v2396_v59 = vand.u32 2147483647, %v2386_v11  ;;  %v2399_v57 = vor.u32 1.1754944e-38, %v2398_v48  ;;  %v5949_v2 = vld [vmem:[#allocation15 + $0x158] sm:$0xff]  ;;  %v6027_v48 = vld [vmem:[#allocation15 + $0x68] sm:$0xff] }
 0x71a   :  { %v2369_v26 = vsub.f32 1.0, %v2368_v22  ;;  %v5952_v22 = vld [vmem:[#allocation15 + $0x120] sm:$0xff]  ;;  %7053 = vst [vmem:[#allocation36_spill] sm:$0xff] %v6027_v48 }
 0x71b   :  { %v2351_v43 = vmul.f32 %v3793_v20, %v2350_v12  ;;  %vm2397_vm7 = vcmp.eq.f32.partialorder %v2396_v59, 8.507059e+37  ;;  %v5955_v12 = vld [vmem:[#allocation15 + $0x128] sm:$0xff]  ;;  %v6030_v59 = vld [vmem:[#allocation15 + $0x70] sm:$0xff] }
 0x71c   :  { %v2370_v19 = vmul.f32 %v3795_v10, %v2369_v26  ;;  %v5958_v26 = vld [vmem:[#allocation15 + $0x130] sm:$0xff]  ;;  %7054 = vst [vmem:[#allocation38_spill] sm:$0xff] %v6030_v59 }
 0x71d   :  { %v3797_v30 = vpop.eup %3796  ;;  %v2352_v21 = vadd.f32 %v3793_v20, %v2351_v43  ;;  %v5967_v43 = vld [vmem:[#allocation15 + $0x108] sm:$0xff] }
 0x71e   :  { %v2371_v3 = vadd.f32 %v3795_v10, %v2370_v19  ;;  %v2388_v18 = vmul.f32 %v3797_v30, %v2386_v11  ;;  %v3799_v53 = vpop.eup %3798  ;;  %vm2393_vm4 = vweird.f32 %v3797_v30  ;;  %v5937_v11 = vld [vmem:[#allocation15 + $0x178] sm:$0xff] }
 0x71f   :  { %v2356_v0 = vsel %vm2355_vm0, %v3793_v20, %v2352_v21  ;;  %vm2394_vm6 = vmor %vm2392_vm5, %vm2393_vm4  ;;  %v5940_v20 = vld [vmem:[#allocation15 + $0x140] sm:$0xff]  ;;  %v5973_v19 = vld [vmem:[#allocation15 + $0x118] sm:$0xff] }
 0x720   :  { %v2361_v32 = vsel %vm2358_vm2, %v2360_v55, %v2356_v0  ;;  %v2375_v34 = vsel %vm2374_vm1, %v3795_v10, %v2371_v3  ;;  %v2389_v35 = vsub.f32 1.0, %v2388_v18  ;;  %v5946_v10 = vld [vmem:[#allocation15 + $0x150] sm:$0xff]  ;;  %v5985_v55 = vld [vmem:[#allocation15 + $0xf8] sm:$0xff]  ;;  %v5988_v3 = vld [vmem:[#allocation15 + $0xc0] sm:$0xff] }
 0x721   :  { %v2380_v37 = vsel %vm2377_vm3, %v2379_v28, %v2375_v34  ;;  %v2403_v54 = vmul.f32 %v3799_v53, %v2361_v32  ;;  %v5982_v21 = vld [vmem:[#allocation15 + $0xf0] sm:$0xff]  ;;  %v5991_v18 = vld [vmem:[#allocation15 + $0xc8] sm:$0xff]  ;;  %v5997_v0 = vld [vmem:[#allocation15 + $0xd8] sm:$0xff] }
 0x722   :  { %v2402_v41 = vmul.f32 %v2380_v37, %v5780_v27  ;;  %v2390_v47 = vmul.f32 %v3797_v30, %v2389_v35  ;;  %7041 = vst [vmem:[#allocation60_spill] sm:$0xff] %v5991_v18  ;;  %v5994_v28 = vld [vmem:[#allocation15 + $0xd0] sm:$0xff]  ;;  %v6000_v53 = vld [vmem:[#allocation15 + $0xa0] sm:$0xff]  ;;  %v6003_v32 = vld [vmem:[#allocation15 + $0xa8] sm:$0xff] }
 0x723   :  { %7042 = vst [vmem:[#allocation62_spill] sm:$0xff] %v5994_v28  ;;  %v6006_v34 = vld [vmem:[#allocation15 + $0xb0] sm:$0xff]  ;;  %v6009_v35 = vld [vmem:[#allocation15 + $0xb8] sm:$0xff]  ;;  %v6012_v37 = vld [vmem:[#allocation15 + $0x80] sm:$0xff] }
 0x724   :  { %v5869_v42 = vadd.f32 %v2403_v54, %v2402_v41  ;;  %v2391_v46 = vadd.f32 %v3797_v30, %v2390_v47  ;;  %7043 = vst [vmem:[#allocation61_spill] sm:$0xff] %v5997_v0  ;;  %v6015_v54 = vld [vmem:[#allocation15 + $0x88] sm:$0xff]  ;;  %v6018_v41 = vld [vmem:[#allocation15 + $0x90] sm:$0xff]  ;;  %v6021_v47 = vld [vmem:[#allocation15 + $0x98] sm:$0xff] }
 0x725   :  { %7044 = vst [vmem:[#allocation35_spill] sm:$0xff] %v6000_v53 }
 0x726   :  { %3800 = vtanh.f32 %v5869_v42  ;;  %v2395_v40 = vsel %vm2394_vm6, %v3797_v30, %v2391_v46  ;;  %v5979_v30 = vld [vmem:[#allocation15 + $0xe8] sm:$0xff]  ;;  %7045 = vst [vmem:[#allocation63_spill] sm:$0xff] %v6003_v32  ;;  %v6024_v46 = vld [vmem:[#allocation15 + $0x60] sm:$0xff] }
 0x727   :  { %v2400_v13 = vsel %vm2397_vm7, %v2399_v57, %v2395_v40  ;;  %7046 = vst [vmem:[#allocation64_spill] sm:$0xff] %v6006_v34  ;;  %v6033_v40 = vld [vmem:[#allocation15 + $0x78] sm:$0xff]  ;;  %v6036_v57 = vld [vmem:[#allocation15 + $0x40] sm:$0xff] }
 0x728   :  { %7047 = vst [vmem:[#allocation65_spill] sm:$0xff] %v6009_v35 }
 0x729   :  { %7048 = vst [vmem:[#allocation39_spill] sm:$0xff] %v6012_v37 }
 0x72a   :  { %7049 = vst [vmem:[#allocation68_spill] sm:$0xff] %v6015_v54 }
 0x72b   :  { %7050 = vst [vmem:[#allocation34_spill] sm:$0xff] %v6018_v41 }
 0x72c   :  { %v3801_v62 = vpop.eup %3800  ;;  %7051 = vst [vmem:[#allocation33_spill] sm:$0xff] %v6021_v47 }
 0x72d   :  { %v5872_v1 = vmul.f32 %v3801_v62, %v2400_v13  ;;  %7052 = vst [vmem:[#allocation43_spill] sm:$0xff] %v6024_v46  ;;  %v6039_v62 = vld [vmem:[#allocation15 + $0x48] sm:$0xff]  ;;  %v6042_v13 = vld [vmem:[#allocation15 + $0x50] sm:$0xff] }
 0x72e   :  { %7055 = vst [vmem:[#allocation37_spill] sm:$0xff] %v6033_v40 }
 0x72f   :  { %7040 = vst [vmem:[#allocation32_spill] sm:$0xff] %v5872_v1  ;;  %2432 = vmatmul.f32.vlgmr.msra.gmra.mxu0 %v5872_v1  ;;  %2452 = vmatmul.f32.vlgmr.msra.gmra.mxu1 %v5872_v1  ;;  %v3359_v27 = vmul.f32 %v5786_v63, %v5872_v1 }
 0x730   :  { %2472 = vmatmul.f32.vlgmr.msra.gmra.mxu2 %v5872_v1  ;;  %2492 = vmatmul.f32.vlgmr.msra.gmra.mxu3 %v5872_v1  ;;  %7056 = vst [vmem:[#allocation46_spill] sm:$0xff] %v6036_v57  ;;  %v6048_v1 = vld [vmem:[#allocation15 + $0x20] sm:$0xff] }
 0x731   :  { %3368 = vadd.xlane.f32.xlu0 %v3359_v27  ;;  %2728 = vmatpush.msra.mxu0 %v5880_v7  ;;  %7057 = vst [vmem:[#allocation41_spill] sm:$0xff] %v6039_v62  ;;  %v6045_v27 = vld [vmem:[#allocation15 + $0x58] sm:$0xff] }
 0x732   :  { %2748 = vmatpush.msra.mxu1 %v5883_v36  ;;  %2768 = vmatpush.msra.mxu2 %v5886_v33  ;;  %7058 = vst [vmem:[#allocation40_spill] sm:$0xff] %v6042_v13 }
 0x733   :  { %2788 = vmatpush.msra.mxu3 %v5889_v17  ;;  %2729 = vmatpush.msra.mxu0 %v5892_v45  ;;  %7059 = vst [vmem:[#allocation42_spill] sm:$0xff] %v6045_v27 }
 0x734   :  { %2749 = vmatpush.msra.mxu1 %v5895_v58  ;;  %2769 = vmatpush.msra.mxu2 %v5898_v6  ;;  %7060 = vst [vmem:[#allocation49_spill] sm:$0xff] %v6048_v1 }
 0x735   :  { %2789 = vmatpush.msra.mxu3 %v5901_v56  ;;  %2730 = vmatpush.msra.mxu0 %v5904_v38 }
 0x736   :  { %2750 = vmatpush.msra.mxu1 %v5907_v5  ;;  %2770 = vmatpush.msra.mxu2 %v5910_v24 }
 0x737   :  { %2790 = vmatpush.msra.mxu3 %v5913_v8  ;;  %2731 = vmatpush.msra.mxu0 %v5916_v39 }
 0x738   :  { %2751 = vmatpush.msra.mxu1 %v5919_v14  ;;  %2771 = vmatpush.msra.mxu2 %v5922_v16 }
 0x739   :  { %2791 = vmatpush.msra.mxu3 %v5925_v60  ;;  %2732 = vmatpush.msra.mxu0 %v5928_v29 }
 0x73a   :  { %2752 = vmatpush.msra.mxu1 %v5931_v31  ;;  %2772 = vmatpush.msra.mxu2 %v5934_v44 }
 0x73b   :  { %2792 = vmatpush.msra.mxu3 %v5937_v11  ;;  %2733 = vmatpush.msra.mxu0 %v5940_v20 }
 0x73c   :  { %2753 = vmatpush.msra.mxu1 %v5943_v15  ;;  %2773 = vmatpush.msra.mxu2 %v5946_v10 }
 0x73d   :  { %2793 = vmatpush.msra.mxu3 %v5949_v2  ;;  %2734 = vmatpush.msra.mxu0 %v5952_v22 }
 0x73e   :  { %2754 = vmatpush.msra.mxu1 %v5955_v12  ;;  %2774 = vmatpush.msra.mxu2 %v5958_v26 }
 0x73f   :  { %2794 = vmatpush.msra.mxu3 %v5961_v4  ;;  %2735 = vmatpush.msra.mxu0 %v5964_v25 }
 0x740   :  { %2755 = vmatpush.msra.mxu1 %v5967_v43  ;;  %2775 = vmatpush.msra.mxu2 %v5970_v23 }
 0x741   :  { %2795 = vmatpush.msra.mxu3 %v5973_v19  ;;  %2736 = vmatpush.msra.mxu0 %v5976_v9 }
 0x742   :  { %2756 = vmatpush.msra.mxu1 %v5979_v30  ;;  %2776 = vmatpush.msra.mxu2 %v5982_v21 }
 0x743   :  { %2796 = vmatpush.msra.mxu3 %v5985_v55  ;;  %2737 = vmatpush.msra.mxu0 %v5988_v3 }
 0x744   :  { %2757 = vmatpush.msra.mxu1 %v5991_v18  ;;  %2777 = vmatpush.msra.mxu2 %v5994_v28 }
 0x745   :  { %2797 = vmatpush.msra.mxu3 %v5997_v0  ;;  %2738 = vmatpush.msra.mxu0 %v6000_v53 }
 0x746   :  { %2758 = vmatpush.msra.mxu1 %v6003_v32  ;;  %2778 = vmatpush.msra.mxu2 %v6006_v34 }
 0x747   :  { %2798 = vmatpush.msra.mxu3 %v6009_v35  ;;  %2739 = vmatpush.msra.mxu0 %v6012_v37 }
 0x748   :  { %2759 = vmatpush.msra.mxu1 %v6015_v54  ;;  %2779 = vmatpush.msra.mxu2 %v6018_v41  ;;  %v7070_v54 = vld [vmem:[#allocation58_spill] sm:$0xff] }
 0x749   :  { %2799 = vmatpush.msra.mxu3 %v6021_v47  ;;  %2740 = vmatpush.msra.mxu0 %v6024_v46 }
 0x74a   :  { %2760 = vmatpush.msra.mxu1 %v6027_v48  ;;  %2780 = vmatpush.msra.mxu2 %v6030_v59 }
 0x74b   :  { %2800 = vmatpush.msra.mxu3 %v6033_v40  ;;  %2741 = vmatpush.msra.mxu0 %v6036_v57  ;;  %v6054_v57 = vld [vmem:[#allocation15 + $0x30] sm:$0xff] }
 0x74c   :  { %2761 = vmatpush.msra.mxu1 %v6039_v62  ;;  %2781 = vmatpush.msra.mxu2 %v6042_v13  ;;  %7062 = vst [vmem:[#allocation44_spill] sm:$0xff] %v6054_v57  ;;  %v6057_v62 = vld [vmem:[#allocation15 + $0x38] sm:$0xff]  ;;  %v6060_v13 = vld [vmem:[#allocation15] sm:$0xff] }
 0x74d   :  { %2801 = vmatpush.msra.mxu3 %v6045_v27  ;;  %2742 = vmatpush.msra.mxu0 %v6048_v1  ;;  %7063 = vst [vmem:[#allocation45_spill] sm:$0xff] %v6057_v62  ;;  %v6063_v27 = vld [vmem:[#allocation15 + $0x8] sm:$0xff]  ;;  %v6066_v1 = vld [vmem:[#allocation15 + $0x10] sm:$0xff] }
 0x74e   :  { %2762 = vmatpush.msra.mxu1 %v6051_v49  ;;  %2782 = vmatpush.msra.mxu2 %v6054_v57  ;;  %7064 = vst [vmem:[#allocation50_spill] sm:$0xff] %v6060_v13  ;;  %v6069_v49 = vld [vmem:[#allocation15 + $0x18] sm:$0xff]  ;;  %v7068_v57 = vld [vmem:[#allocation53_spill] sm:$0xff] }
 0x74f   :  { %2802 = vmatpush.msra.mxu3 %v6057_v62  ;;  %2743 = vmatpush.msra.mxu0 %v6060_v13  ;;  %7065 = vst [vmem:[#allocation48_spill] sm:$0xff] %v6063_v27  ;;  %v1924_v40 = vadd.f32 %v7068_v57, %v7032_v51  ;;  %v7069_v62 = vld [vmem:[#allocation55_spill] sm:$0xff] }
 0x750   :  { %2763 = vmatpush.msra.mxu1 %v6063_v27  ;;  %7066 = vst [vmem:[#allocation51_spill] sm:$0xff] %v6066_v1  ;;  %2783 = vmatpush.msra.mxu2 %v6066_v1  ;;  %v1965_v59 = vadd.f32 %v7069_v62, %v7034_v50  ;;  %v2047_v1 = vadd.f32 %v7070_v54, %v7036_v52 }
 0x751   :  { %7067 = vst [vmem:[#allocation52_spill] sm:$0xff] %v6069_v49  ;;  %2803 = vmatpush.msra.mxu3 %v6069_v49 }
 0x7ac   :  { %v2433_v48 = vpop.f32.mrf.mxu0  ;;  %v2453_v13 = vpop.f32.mrf.mxu1 }
 0x7ad   :  { %v2496_v46 = vadd.f32 %v2433_v48, %v1924_v40  ;;  %v2497_v47 = vadd.f32 %v2453_v13, %v1965_v59 }
 0x7af   :  { %v3604_v41 = vmul.f32 -1.442695, %v2496_v46  ;;  %v3605_v27 = vmul.f32 -1.442695, %v2497_v47  ;;  %v7071_v46 = vld [vmem:[#allocation77_spill] sm:$0xff] }
 0x7b0   :  { %v2006_v47 = vadd.f32 %v7071_v46, %v7038_v61 }
 0x7b1   :  { %3802 = vpow2.f32 %v3604_v41 }
 0x7b2   :  { %3804 = vpow2.f32 %v3605_v27 }
 0x7b3   :  { %v2493_v37 = vpop.f32.mrf.mxu3  ;;  %v2473_v62 = vpop.f32.mrf.mxu2 }
 0x7b4   :  { %v2499_v35 = vadd.f32 %v2493_v37, %v2047_v1  ;;  %v2498_v40 = vadd.f32 %v2473_v62, %v2006_v47 }
 0x7b6   :  { %v3606_v49 = vmul.f32 -1.442695, %v2499_v35 }
 0x7b7   :  { %v3803_v34 = vpop.eup %3802 }
 0x7b8   :  { %v3805_v32 = vpop.eup %3804  ;;  %v2503_v57 = vadd.f32 1.0, %v3803_v34  ;;  %3806 = vpow2.f32 %v3606_v49 }
 0x7b9   :  { %v2522_v51 = vadd.f32 1.0, %v3805_v32 }
 0x7ba   :  { %3808 = vrcp.f32 %v2503_v57  ;;  %v2515_v27 = vand.u32 2147483648, %v2503_v57  ;;  %v2513_v34 = vand.u32 2147483647, %v2503_v57  ;;  %vm2509_vm10 = vweird.f32 %v2503_v57 }
 0x7bb   :  { %3810 = vrcp.f32 %v2522_v51  ;;  %v2534_v49 = vand.u32 2147483648, %v2522_v51  ;;  %v2532_v50 = vand.u32 2147483647, %v2522_v51  ;;  %vm2528_vm11 = vweird.f32 %v2522_v51 }
 0x7bc   :  { %v2516_v62 = vor.u32 1.1754944e-38, %v2515_v27  ;;  %vm2514_vm14 = vcmp.eq.f32.partialorder %v2513_v34, 8.507059e+37 }
 0x7bd   :  { %vm2533_vm15 = vcmp.eq.f32.partialorder %v2532_v50, 8.507059e+37 }
 0x7be   :  { %v3807_v48 = vpop.eup %3806 }
 0x7bf   :  { %v2542_v41 = vadd.f32 1.0, %v3807_v48 }
 0x7c0   :  { %v3809_v59 = vpop.eup %3808 }
 0x7c1   :  { %v3811_v54 = vpop.eup %3810  ;;  %v2505_v13 = vmul.f32 %v3809_v59, %v2503_v57  ;;  %3812 = vrcp.f32 %v2542_v41  ;;  %vm2510_vm8 = vweird.f32 %v3809_v59  ;;  %vm2548_vm1 = vweird.f32 %v2542_v41 }
 0x7c2   :  { %v2524_v1 = vmul.f32 %v3811_v54, %v2522_v51  ;;  %3814 = vtanh.f32 %v2498_v40  ;;  %vm2529_vm9 = vweird.f32 %v3811_v54  ;;  %vm2511_vm12 = vmor %vm2509_vm10, %vm2510_vm8 }
 0x7c3   :  { %v2506_v35 = vsub.f32 1.0, %v2505_v13  ;;  %vm2530_vm13 = vmor %vm2528_vm11, %vm2529_vm9  ;;  %v2535_v13 = vor.u32 1.1754944e-38, %v2534_v49 }
 0x7c4   :  { %v2525_v37 = vsub.f32 1.0, %v2524_v1 }
 0x7c5   :  { %v2507_v32 = vmul.f32 %v3809_v59, %v2506_v35 }
 0x7c6   :  { %v2526_v52 = vmul.f32 %v3811_v54, %v2525_v37 }
 0x7c7   :  { %v3813_v53 = vpop.eup %3812  ;;  %v2508_v46 = vadd.f32 %v3809_v59, %v2507_v32 }
 0x7c8   :  { %v2527_v48 = vadd.f32 %v3811_v54, %v2526_v52  ;;  %v2544_v47 = vmul.f32 %v3813_v53, %v2542_v41  ;;  %v3815_v40 = vpop.eup %3814  ;;  %vm2549_vm0 = vweird.f32 %v3813_v53  ;;  %v2554_v52 = vand.u32 2147483648, %v2542_v41 }
 0x7c9   :  { %v2512_v1 = vsel %vm2511_vm12, %v3809_v59, %v2508_v46  ;;  %v2552_v59 = vand.u32 2147483647, %v2542_v41  ;;  %vm2550_vm2 = vmor %vm2548_vm1, %vm2549_vm0  ;;  %v7078_v41 = vld [vmem:[#allocation64_spill] sm:$0xff]  ;;  %v7079_v46 = vld [vmem:[#allocation65_spill] sm:$0xff] }
 0x7ca   :  { %v2517_v61 = vsel %vm2514_vm14, %v2516_v62, %v2512_v1  ;;  %v2531_v35 = vsel %vm2530_vm13, %v3811_v54, %v2527_v48  ;;  %v2545_v0 = vsub.f32 1.0, %v2544_v47  ;;  %v2555_v49 = vor.u32 1.1754944e-38, %v2554_v52  ;;  %v7080_v62 = vld [vmem:[#allocation39_spill] sm:$0xff]  ;;  %v7081_v48 = vld [vmem:[#allocation68_spill] sm:$0xff]  ;;  %v7082_v47 = vld [vmem:[#allocation34_spill] sm:$0xff] }
 0x7cb   :  { %v2536_v37 = vsel %vm2533_vm15, %v2535_v13, %v2531_v35  ;;  %v2559_v28 = vmul.f32 %v3815_v40, %v2517_v61  ;;  %vm2553_vm3 = vcmp.eq.f32.partialorder %v2552_v59, 8.507059e+37  ;;  %v7083_v13 = vld [vmem:[#allocation33_spill] sm:$0xff]  ;;  %v7084_v1 = vld [vmem:[#allocation43_spill] sm:$0xff]  ;;  %v7085_v40 = vld [vmem:[#allocation36_spill] sm:$0xff] }
 0x7cc   :  { %v2558_v18 = vmul.f32 %v2536_v37, %v5869_v42  ;;  %v2546_v32 = vmul.f32 %v3813_v53, %v2545_v0  ;;  %v7073_v42 = vld [vmem:[#allocation60_spill] sm:$0xff]  ;;  %v7076_v0 = vld [vmem:[#allocation35_spill] sm:$0xff]  ;;  %v7086_v35 = vld [vmem:[#allocation38_spill] sm:$0xff] }
 0x7cd   :  { %v7087_v37 = vld [vmem:[#allocation37_spill] sm:$0xff]  ;;  %v7090_v52 = vld [vmem:[#allocation40_spill] sm:$0xff]  ;;  %v7091_v59 = vld [vmem:[#allocation42_spill] sm:$0xff] }
 0x7ce   :  { %v6081_v57 = vadd.f32 %v2559_v28, %v2558_v18  ;;  %v2547_v51 = vadd.f32 %v3813_v53, %v2546_v32  ;;  %v7074_v18 = vld [vmem:[#allocation62_spill] sm:$0xff]  ;;  %v7075_v28 = vld [vmem:[#allocation61_spill] sm:$0xff] }
 0x7cf   :  { %v7088_v32 = vld [vmem:[#allocation46_spill] sm:$0xff] }
 0x7d0   :  { %3816 = vtanh.f32 %v6081_v57  ;;  %v2551_v27 = vsel %vm2550_vm2, %v3813_v53, %v2547_v51  ;;  %v7077_v53 = vld [vmem:[#allocation63_spill] sm:$0xff]  ;;  %v7089_v51 = vld [vmem:[#allocation41_spill] sm:$0xff] }
 0x7d1   :  { %v2556_v54 = vsel %vm2553_vm3, %v2555_v49, %v2551_v27  ;;  %v7092_v27 = vld [vmem:[#allocation49_spill] sm:$0xff]  ;;  %v7093_v49 = vld [vmem:[#allocation47_spill] sm:$0xff] }
 0x7d6   :  { %v3817_v50 = vpop.eup %3816 }
 0x7d7   :  { %v6084_v34 = vmul.f32 %v3817_v50, %v2556_v54  ;;  %v7094_v50 = vld [vmem:[#allocation44_spill] sm:$0xff]  ;;  %v7095_v54 = vld [vmem:[#allocation45_spill] sm:$0xff] }
 0x7d9   :  { %7072 = vst [vmem:[#allocation54_spill] sm:$0xff] %v6084_v34  ;;  %2588 = vmatmul.f32.vlgmr.msrb.gmra.mxu0 %v6084_v34  ;;  %2608 = vmatmul.f32.vlgmr.msrb.gmra.mxu1 %v6084_v34  ;;  %v3360_v61 = vmul.f32 %v5786_v63, %v6084_v34 }
 0x7da   :  { %2628 = vmatmul.f32.vlgmr.msrb.gmra.mxu2 %v6084_v34  ;;  %2648 = vmatmul.f32.vlgmr.msrb.gmra.mxu3 %v6084_v34  ;;  %v7097_v34 = vld [vmem:[#allocation48_spill] sm:$0xff] }
 0x7db   :  { %3370 = vadd.xlane.f32.xlu1 %v3360_v61  ;;  %2884 = vmatpush.msrb.mxu0 %v5880_v7  ;;  %v7096_v61 = vld [vmem:[#allocation50_spill] sm:$0xff] }
 0x7dc   :  { %2904 = vmatpush.msrb.mxu1 %v5883_v36  ;;  %2924 = vmatpush.msrb.mxu2 %v5886_v33 }
 0x7dd   :  { %2944 = vmatpush.msrb.mxu3 %v5889_v17  ;;  %2885 = vmatpush.msrb.mxu0 %v5892_v45 }
 0x7de   :  { %2905 = vmatpush.msrb.mxu1 %v5895_v58  ;;  %2925 = vmatpush.msrb.mxu2 %v5898_v6 }
 0x7df   :  { %2945 = vmatpush.msrb.mxu3 %v5901_v56  ;;  %2886 = vmatpush.msrb.mxu0 %v5904_v38 }
 0x7e0   :  { %2906 = vmatpush.msrb.mxu1 %v5907_v5  ;;  %2926 = vmatpush.msrb.mxu2 %v5910_v24 }
 0x7e1   :  { %2946 = vmatpush.msrb.mxu3 %v5913_v8  ;;  %2887 = vmatpush.msrb.mxu0 %v5916_v39 }
 0x7e2   :  { %2907 = vmatpush.msrb.mxu1 %v5919_v14  ;;  %2927 = vmatpush.msrb.mxu2 %v5922_v16 }
 0x7e3   :  { %2947 = vmatpush.msrb.mxu3 %v5925_v60  ;;  %2888 = vmatpush.msrb.mxu0 %v5928_v29 }
 0x7e4   :  { %2908 = vmatpush.msrb.mxu1 %v5931_v31  ;;  %2928 = vmatpush.msrb.mxu2 %v5934_v44 }
 0x7e5   :  { %2948 = vmatpush.msrb.mxu3 %v5937_v11  ;;  %2889 = vmatpush.msrb.mxu0 %v5940_v20 }
 0x7e6   :  { %2909 = vmatpush.msrb.mxu1 %v5943_v15  ;;  %2929 = vmatpush.msrb.mxu2 %v5946_v10 }
 0x7e7   :  { %2949 = vmatpush.msrb.mxu3 %v5949_v2  ;;  %2890 = vmatpush.msrb.mxu0 %v5952_v22 }
 0x7e8   :  { %2910 = vmatpush.msrb.mxu1 %v5955_v12  ;;  %2930 = vmatpush.msrb.mxu2 %v5958_v26 }
 0x7e9   :  { %2950 = vmatpush.msrb.mxu3 %v5961_v4  ;;  %2891 = vmatpush.msrb.mxu0 %v5964_v25 }
 0x7ea   :  { %2911 = vmatpush.msrb.mxu1 %v5967_v43  ;;  %2931 = vmatpush.msrb.mxu2 %v5970_v23 }
 0x7eb   :  { %2951 = vmatpush.msrb.mxu3 %v5973_v19  ;;  %2892 = vmatpush.msrb.mxu0 %v5976_v9 }
 0x7ec   :  { %2912 = vmatpush.msrb.mxu1 %v5979_v30  ;;  %2932 = vmatpush.msrb.mxu2 %v5982_v21 }
 0x7ed   :  { %2952 = vmatpush.msrb.mxu3 %v5985_v55  ;;  %2893 = vmatpush.msrb.mxu0 %v5988_v3 }
 0x7ee   :  { %2913 = vmatpush.msrb.mxu1 %v7073_v42  ;;  %2933 = vmatpush.msrb.mxu2 %v7074_v18 }
 0x7ef   :  { %2953 = vmatpush.msrb.mxu3 %v7075_v28  ;;  %2894 = vmatpush.msrb.mxu0 %v7076_v0 }
 0x7f0   :  { %2914 = vmatpush.msrb.mxu1 %v7077_v53  ;;  %2934 = vmatpush.msrb.mxu2 %v7078_v41 }
 0x7f1   :  { %2954 = vmatpush.msrb.mxu3 %v7079_v46  ;;  %2895 = vmatpush.msrb.mxu0 %v7080_v62 }
 0x7f2   :  { %2915 = vmatpush.msrb.mxu1 %v7081_v48  ;;  %2935 = vmatpush.msrb.mxu2 %v7082_v47  ;;  %v7105_v48 = vld [vmem:[#allocation67_spill] sm:$0xff] }
 0x7f3   :  { %2955 = vmatpush.msrb.mxu3 %v7083_v13  ;;  %2896 = vmatpush.msrb.mxu0 %v7084_v1 }
 0x7f4   :  { %2916 = vmatpush.msrb.mxu1 %v7085_v40  ;;  %2936 = vmatpush.msrb.mxu2 %v7086_v35  ;;  %v7103_v40 = vld [vmem:[#allocation66_spill] sm:$0xff] }
 0x7f5   :  { %2956 = vmatpush.msrb.mxu3 %v7087_v37  ;;  %2897 = vmatpush.msrb.mxu0 %v7088_v32  ;;  %v7098_v37 = vld [vmem:[#allocation51_spill] sm:$0xff]  ;;  %v7099_v32 = vld [vmem:[#allocation52_spill] sm:$0xff] }
 0x7f6   :  { %2917 = vmatpush.msrb.mxu1 %v7089_v51  ;;  %2937 = vmatpush.msrb.mxu2 %v7090_v52  ;;  %v7100_v51 = vld [vmem:[#allocation79_spill] sm:$0xff]  ;;  %v7101_v52 = vld [vmem:[#allocation76_spill] sm:$0xff] }
 0x7f7   :  { %2957 = vmatpush.msrb.mxu3 %v7091_v59  ;;  %2898 = vmatpush.msrb.mxu0 %v7092_v27  ;;  %v1927_v35 = vadd.f32 %v7101_v52, %v7100_v51  ;;  %v7102_v59 = vld [vmem:[#allocation81_spill] sm:$0xff] }
 0x7f8   :  { %2918 = vmatpush.msrb.mxu1 %v7093_v49  ;;  %2938 = vmatpush.msrb.mxu2 %v7094_v50  ;;  %v1968_v27 = vadd.f32 %v7103_v40, %v7102_v59 }
 0x7f9   :  { %2958 = vmatpush.msrb.mxu3 %v7095_v54  ;;  %2899 = vmatpush.msrb.mxu0 %v7096_v61  ;;  %v7104_v61 = vld [vmem:[#allocation30_spill] sm:$0xff] }
 0x7fa   :  { %2919 = vmatpush.msrb.mxu1 %v7097_v34  ;;  %2939 = vmatpush.msrb.mxu2 %v7098_v37  ;;  %v2050_v34 = vadd.f32 %v7105_v48, %v7104_v61 }
 0x7fb   :  { %2959 = vmatpush.msrb.mxu3 %v7099_v32 }
 0x856   :  { %v2589_v1 = vpop.f32.mrf.mxu0  ;;  %v2609_v49 = vpop.f32.mrf.mxu1 }
 0x857   :  { %v2652_v13 = vadd.f32 %v2589_v1, %v1927_v35  ;;  %v2653_v50 = vadd.f32 %v2609_v49, %v1968_v27  ;;  %v7106_v35 = vld [vmem:[#allocation29_spill] sm:$0xff] }
 0x859   :  { %v3607_v47 = vmul.f32 -1.442695, %v2652_v13  ;;  %v3608_v54 = vmul.f32 -1.442695, %v2653_v50  ;;  %v7107_v13 = vld [vmem:[#allocation82_spill] sm:$0xff] }
 0x85a   :  { %v2009_v27 = vadd.f32 %v7107_v13, %v7106_v35 }
 0x85b   :  { %3818 = vpow2.f32 %v3607_v47 }
 0x85c   :  { %3820 = vpow2.f32 %v3608_v54 }
 0x85d   :  { %v2649_v37 = vpop.f32.mrf.mxu3  ;;  %v2629_v40 = vpop.f32.mrf.mxu2 }
 0x85e   :  { %v2655_v62 = vadd.f32 %v2649_v37, %v2050_v34  ;;  %v2654_v50 = vadd.f32 %v2629_v40, %v2009_v27 }
 0x860   :  { %v3609_v32 = vmul.f32 -1.442695, %v2655_v62 }
 0x861   :  { %v3819_v46 = vpop.eup %3818 }
 0x862   :  { %v3821_v41 = vpop.eup %3820  ;;  %v2659_v52 = vadd.f32 1.0, %v3819_v46  ;;  %3822 = vpow2.f32 %v3609_v32 }
 0x863   :  { %v2678_v51 = vadd.f32 1.0, %v3821_v41 }
 0x864   :  { %3824 = vrcp.f32 %v2659_v52  ;;  %v2671_v61 = vand.u32 2147483648, %v2659_v52  ;;  %v2669_v32 = vand.u32 2147483647, %v2659_v52  ;;  %vm2665_vm6 = vweird.f32 %v2659_v52 }
 0x865   :  { %3826 = vrcp.f32 %v2678_v51  ;;  %v2690_v46 = vand.u32 2147483648, %v2678_v51  ;;  %v2688_v53 = vand.u32 2147483647, %v2678_v51  ;;  %vm2684_vm7 = vweird.f32 %v2678_v51 }
 0x866   :  { %v2672_v40 = vor.u32 1.1754944e-38, %v2671_v61  ;;  %vm2670_vm10 = vcmp.eq.f32.partialorder %v2669_v32, 8.507059e+37 }
 0x867   :  { %vm2689_vm11 = vcmp.eq.f32.partialorder %v2688_v53, 8.507059e+37 }
 0x868   :  { %v3823_v1 = vpop.eup %3822 }
 0x869   :  { %v2698_v47 = vadd.f32 1.0, %v3823_v1 }
 0x86a   :  { %v3825_v49 = vpop.eup %3824 }
 0x86b   :  { %v3827_v48 = vpop.eup %3826  ;;  %v2661_v54 = vmul.f32 %v3825_v49, %v2659_v52  ;;  %3828 = vrcp.f32 %v2698_v47  ;;  %vm2666_vm4 = vweird.f32 %v3825_v49  ;;  %vm2704_vm13 = vweird.f32 %v2698_v47 }
 0x86c   :  { %v2680_v34 = vmul.f32 %v3827_v48, %v2678_v51  ;;  %3830 = vtanh.f32 %v2654_v50  ;;  %vm2685_vm5 = vweird.f32 %v3827_v48  ;;  %vm2667_vm8 = vmor %vm2665_vm6, %vm2666_vm4  ;;  %v2708_v61 = vand.u32 2147483647, %v2698_v47 }
 0x86d   :  { %v2662_v62 = vsub.f32 1.0, %v2661_v54  ;;  %vm2686_vm9 = vmor %vm2684_vm7, %vm2685_vm5  ;;  %v2691_v54 = vor.u32 1.1754944e-38, %v2690_v46 }
 0x86e   :  { %v2681_v37 = vsub.f32 1.0, %v2680_v34  ;;  %vm2709_vm15 = vcmp.eq.f32.partialorder %v2708_v61, 8.507059e+37  ;;  %v7128_v61 = vld [vmem:[#allocation49_spill] sm:$0xff] }
 0x86f   :  { %v2663_v41 = vmul.f32 %v3825_v49, %v2662_v62 }
 0x870   :  { %v2682_v59 = vmul.f32 %v3827_v48, %v2681_v37 }
 0x871   :  { %v3829_v0 = vpop.eup %3828  ;;  %v2664_v13 = vadd.f32 %v3825_v49, %v2663_v41 }
 0x872   :  { %v2683_v1 = vadd.f32 %v3827_v48, %v2682_v59  ;;  %v2700_v27 = vmul.f32 %v3829_v0, %v2698_v47  ;;  %v3831_v50 = vpop.eup %3830  ;;  %vm2705_vm12 = vweird.f32 %v3829_v0  ;;  %v2710_v59 = vand.u32 2147483648, %v2698_v47  ;;  %v7115_v47 = vld [vmem:[#allocation65_spill] sm:$0xff] }
 0x873   :  { %v2668_v34 = vsel %vm2667_vm8, %v3825_v49, %v2664_v13  ;;  %vm2706_vm14 = vmor %vm2704_vm13, %vm2705_vm12  ;;  %v7116_v13 = vld [vmem:[#allocation39_spill] sm:$0xff] }
 0x874   :  { %v2673_v35 = vsel %vm2670_vm10, %v2672_v40, %v2668_v34  ;;  %v2687_v62 = vsel %vm2686_vm9, %v3827_v48, %v2683_v1  ;;  %v2701_v28 = vsub.f32 1.0, %v2700_v27  ;;  %v2711_v46 = vor.u32 1.1754944e-38, %v2710_v59  ;;  %v7117_v40 = vld [vmem:[#allocation68_spill] sm:$0xff]  ;;  %v7118_v1 = vld [vmem:[#allocation34_spill] sm:$0xff]  ;;  %v7119_v27 = vld [vmem:[#allocation33_spill] sm:$0xff] }
 0x875   :  { %v2692_v37 = vsel %vm2689_vm11, %v2691_v54, %v2687_v62  ;;  %v2715_v18 = vmul.f32 %v3831_v50, %v2673_v35  ;;  %v7114_v35 = vld [vmem:[#allocation64_spill] sm:$0xff]  ;;  %v7120_v54 = vld [vmem:[#allocation43_spill] sm:$0xff]  ;;  %v7122_v50 = vld [vmem:[#allocation38_spill] sm:$0xff] }
 0x876   :  { %v2714_v42 = vmul.f32 %v2692_v37, %v6081_v57  ;;  %v2702_v41 = vmul.f32 %v3829_v0, %v2701_v28  ;;  %v7112_v28 = vld [vmem:[#allocation35_spill] sm:$0xff]  ;;  %v7121_v34 = vld [vmem:[#allocation36_spill] sm:$0xff]  ;;  %v7123_v62 = vld [vmem:[#allocation37_spill] sm:$0xff] }
 0x877   :  { %v7124_v37 = vld [vmem:[#allocation46_spill] sm:$0xff] }
 0x878   :  { %v6165_v52 = vadd.f32 %v2715_v18, %v2714_v42  ;;  %v2703_v51 = vadd.f32 %v3829_v0, %v2702_v41  ;;  %v7110_v42 = vld [vmem:[#allocation62_spill] sm:$0xff]  ;;  %v7111_v18 = vld [vmem:[#allocation61_spill] sm:$0xff] }
 0x879   :  { %v7125_v41 = vld [vmem:[#allocation41_spill] sm:$0xff]  ;;  %v7127_v59 = vld [vmem:[#allocation42_spill] sm:$0xff] }
 0x87a   :  { %3832 = vtanh.f32 %v6165_v52  ;;  %v2707_v49 = vsel %vm2706_vm14, %v3829_v0, %v2703_v51  ;;  %v7113_v0 = vld [vmem:[#allocation63_spill] sm:$0xff]  ;;  %v7126_v51 = vld [vmem:[#allocation40_spill] sm:$0xff] }
 0x87b   :  { %v2712_v48 = vsel %vm2709_vm15, %v2711_v46, %v2707_v49  ;;  %v7129_v49 = vld [vmem:[#allocation47_spill] sm:$0xff]  ;;  %v7130_v46 = vld [vmem:[#allocation44_spill] sm:$0xff] }
 0x880   :  { %v3833_v53 = vpop.eup %3832 }
 0x881   :  { %v6168_v32 = vmul.f32 %v3833_v53, %v2712_v48  ;;  %v7131_v53 = vld [vmem:[#allocation45_spill] sm:$0xff]  ;;  %v7132_v48 = vld [vmem:[#allocation50_spill] sm:$0xff] }
 0x883   :  { %7108 = vst [vmem:[#allocation56_spill] sm:$0xff] %v6168_v32  ;;  %2744 = vmatmul.f32.vlgmr.msra.gmra.mxu0 %v6168_v32  ;;  %2764 = vmatmul.f32.vlgmr.msra.gmra.mxu1 %v6168_v32  ;;  %v3361_v57 = vmul.f32 %v5786_v63, %v6168_v32  ;;  %v7109_v63 = vld [vmem:[#allocation60_spill] sm:$0xff] }
 0x884   :  { %2784 = vmatmul.f32.vlgmr.msra.gmra.mxu2 %v6168_v32  ;;  %2804 = vmatmul.f32.vlgmr.msra.gmra.mxu3 %v6168_v32  ;;  %v7134_v32 = vld [vmem:[#allocation51_spill] sm:$0xff] }
 0x885   :  { %3372 = vadd.xlane.f32.xlu1 %v3361_v57  ;;  %3040 = vmatpush.msra.mxu0 %v5880_v7  ;;  %v7133_v57 = vld [vmem:[#allocation48_spill] sm:$0xff] }
 0x886   :  { %3060 = vmatpush.msra.mxu1 %v5883_v36  ;;  %3080 = vmatpush.msra.mxu2 %v5886_v33 }
 0x887   :  { %3100 = vmatpush.msra.mxu3 %v5889_v17  ;;  %3041 = vmatpush.msra.mxu0 %v5892_v45 }
 0x888   :  { %3061 = vmatpush.msra.mxu1 %v5895_v58  ;;  %3081 = vmatpush.msra.mxu2 %v5898_v6 }
 0x889   :  { %3101 = vmatpush.msra.mxu3 %v5901_v56  ;;  %3042 = vmatpush.msra.mxu0 %v5904_v38 }
 0x88a   :  { %3062 = vmatpush.msra.mxu1 %v5907_v5  ;;  %3082 = vmatpush.msra.mxu2 %v5910_v24 }
 0x88b   :  { %3102 = vmatpush.msra.mxu3 %v5913_v8  ;;  %3043 = vmatpush.msra.mxu0 %v5916_v39 }
 0x88c   :  { %3063 = vmatpush.msra.mxu1 %v5919_v14  ;;  %3083 = vmatpush.msra.mxu2 %v5922_v16 }
 0x88d   :  { %3103 = vmatpush.msra.mxu3 %v5925_v60  ;;  %3044 = vmatpush.msra.mxu0 %v5928_v29 }
 0x88e   :  { %3064 = vmatpush.msra.mxu1 %v5931_v31  ;;  %3084 = vmatpush.msra.mxu2 %v5934_v44 }
 0x88f   :  { %3104 = vmatpush.msra.mxu3 %v5937_v11  ;;  %3045 = vmatpush.msra.mxu0 %v5940_v20 }
 0x890   :  { %3065 = vmatpush.msra.mxu1 %v5943_v15  ;;  %3085 = vmatpush.msra.mxu2 %v5946_v10 }
 0x891   :  { %3105 = vmatpush.msra.mxu3 %v5949_v2  ;;  %3046 = vmatpush.msra.mxu0 %v5952_v22 }
 0x892   :  { %3066 = vmatpush.msra.mxu1 %v5955_v12  ;;  %3086 = vmatpush.msra.mxu2 %v5958_v26 }
 0x893   :  { %3106 = vmatpush.msra.mxu3 %v5961_v4  ;;  %3047 = vmatpush.msra.mxu0 %v5964_v25 }
 0x894   :  { %3067 = vmatpush.msra.mxu1 %v5967_v43  ;;  %3087 = vmatpush.msra.mxu2 %v5970_v23 }
 0x895   :  { %3107 = vmatpush.msra.mxu3 %v5973_v19  ;;  %3048 = vmatpush.msra.mxu0 %v5976_v9 }
 0x896   :  { %3068 = vmatpush.msra.mxu1 %v5979_v30  ;;  %3088 = vmatpush.msra.mxu2 %v5982_v21 }
 0x897   :  { %3108 = vmatpush.msra.mxu3 %v5985_v55  ;;  %3049 = vmatpush.msra.mxu0 %v5988_v3 }
 0x898   :  { %3069 = vmatpush.msra.mxu1 %v7109_v63  ;;  %3089 = vmatpush.msra.mxu2 %v7110_v42 }
 0x899   :  { %3109 = vmatpush.msra.mxu3 %v7111_v18  ;;  %3050 = vmatpush.msra.mxu0 %v7112_v28 }
 0x89a   :  { %3070 = vmatpush.msra.mxu1 %v7113_v0  ;;  %3090 = vmatpush.msra.mxu2 %v7114_v35 }
 0x89b   :  { %3110 = vmatpush.msra.mxu3 %v7115_v47  ;;  %3051 = vmatpush.msra.mxu0 %v7116_v13 }
 0x89c   :  { %3071 = vmatpush.msra.mxu1 %v7117_v40  ;;  %3091 = vmatpush.msra.mxu2 %v7118_v1  ;;  %v7141_v1 = vld [vmem:[#allocation72_spill] sm:$0xff] }
 0x89d   :  { %3111 = vmatpush.msra.mxu3 %v7119_v27  ;;  %3052 = vmatpush.msra.mxu0 %v7120_v54 }
 0x89e   :  { %3072 = vmatpush.msra.mxu1 %v7121_v34  ;;  %3092 = vmatpush.msra.mxu2 %v7122_v50  ;;  %v7139_v50 = vld [vmem:[#allocation69_spill] sm:$0xff] }
 0x89f   :  { %3112 = vmatpush.msra.mxu3 %v7123_v62  ;;  %3053 = vmatpush.msra.mxu0 %v7124_v37  ;;  %v7135_v37 = vld [vmem:[#allocation52_spill] sm:$0xff] }
 0x8a0   :  { %3073 = vmatpush.msra.mxu1 %v7125_v41  ;;  %3093 = vmatpush.msra.mxu2 %v7126_v51  ;;  %v7136_v41 = vld [vmem:[#allocation79_spill] sm:$0xff]  ;;  %v7137_v51 = vld [vmem:[#allocation80_spill] sm:$0xff] }
 0x8a1   :  { %3113 = vmatpush.msra.mxu3 %v7127_v59  ;;  %3054 = vmatpush.msra.mxu0 %v7128_v61  ;;  %v1930_v62 = vadd.f32 %v7137_v51, %v7136_v41  ;;  %v7138_v59 = vld [vmem:[#allocation81_spill] sm:$0xff] }
 0x8a2   :  { %3074 = vmatpush.msra.mxu1 %v7129_v49  ;;  %3094 = vmatpush.msra.mxu2 %v7130_v46  ;;  %v1971_v61 = vadd.f32 %v7139_v50, %v7138_v59 }
 0x8a3   :  { %3114 = vmatpush.msra.mxu3 %v7131_v53  ;;  %3055 = vmatpush.msra.mxu0 %v7132_v48  ;;  %v7140_v48 = vld [vmem:[#allocation30_spill] sm:$0xff] }
 0x8a4   :  { %3075 = vmatpush.msra.mxu1 %v7133_v57  ;;  %3095 = vmatpush.msra.mxu2 %v7134_v32  ;;  %v2053_v57 = vadd.f32 %v7141_v1, %v7140_v48 }
 0x8a5   :  { %3115 = vmatpush.msra.mxu3 %v7135_v37 }
 0x900   :  { %v2745_v34 = vpop.f32.mrf.mxu0  ;;  %v2765_v49 = vpop.f32.mrf.mxu1 }
 0x901   :  { %v2808_v54 = vadd.f32 %v2745_v34, %v1930_v62  ;;  %v2809_v46 = vadd.f32 %v2765_v49, %v1971_v61  ;;  %v7142_v62 = vld [vmem:[#allocation29_spill] sm:$0xff] }
 0x903   :  { %v3610_v27 = vmul.f32 -1.442695, %v2808_v54  ;;  %v3611_v53 = vmul.f32 -1.442695, %v2809_v46  ;;  %v7143_v54 = vld [vmem:[#allocation73_spill] sm:$0xff] }
 0x904   :  { %v2012_v61 = vadd.f32 %v7143_v54, %v7142_v62 }
 0x905   :  { %3834 = vpow2.f32 %v3610_v27 }
 0x906   :  { %3836 = vpow2.f32 %v3611_v53 }
 0x907   :  { %v2805_v32 = vpop.f32.mrf.mxu3  ;;  %v2785_v50 = vpop.f32.mrf.mxu2 }
 0x908   :  { %v2811_v40 = vadd.f32 %v2805_v32, %v2053_v57  ;;  %v2810_v46 = vadd.f32 %v2785_v50, %v2012_v61 }
 0x90a   :  { %v3612_v37 = vmul.f32 -1.442695, %v2811_v40 }
 0x90b   :  { %v3835_v13 = vpop.eup %3834 }
 0x90c   :  { %v3837_v47 = vpop.eup %3836  ;;  %v2815_v51 = vadd.f32 1.0, %v3835_v13  ;;  %3838 = vpow2.f32 %v3612_v37 }
 0x90d   :  { %v2834_v41 = vadd.f32 1.0, %v3837_v47 }
 0x90e   :  { %3840 = vrcp.f32 %v2815_v51  ;;  %v2827_v48 = vand.u32 2147483648, %v2815_v51  ;;  %v2825_v37 = vand.u32 2147483647, %v2815_v51  ;;  %vm2821_vm2 = vweird.f32 %v2815_v51 }
 0x90f   :  { %3842 = vrcp.f32 %v2834_v41  ;;  %v2846_v13 = vand.u32 2147483648, %v2834_v41  ;;  %v2844_v35 = vand.u32 2147483647, %v2834_v41  ;;  %vm2840_vm3 = vweird.f32 %v2834_v41 }
 0x910   :  { %v2828_v50 = vor.u32 1.1754944e-38, %v2827_v48  ;;  %vm2826_vm6 = vcmp.eq.f32.partialorder %v2825_v37, 8.507059e+37 }
 0x911   :  { %vm2845_vm7 = vcmp.eq.f32.partialorder %v2844_v35, 8.507059e+37 }
 0x912   :  { %v3839_v34 = vpop.eup %3838 }
 0x913   :  { %v2854_v27 = vadd.f32 1.0, %v3839_v34 }
 0x914   :  { %v3841_v49 = vpop.eup %3840 }
 0x915   :  { %v3843_v1 = vpop.eup %3842  ;;  %v2817_v53 = vmul.f32 %v3841_v49, %v2815_v51  ;;  %3844 = vrcp.f32 %v2854_v27  ;;  %vm2822_vm0 = vweird.f32 %v3841_v49  ;;  %vm2860_vm9 = vweird.f32 %v2854_v27 }
 0x916   :  { %v2836_v32 = vmul.f32 %v3843_v1, %v2834_v41  ;;  %3846 = vtanh.f32 %v2810_v46  ;;  %vm2841_vm1 = vweird.f32 %v3843_v1  ;;  %vm2823_vm4 = vmor %vm2821_vm2, %vm2822_vm0  ;;  %v2864_v48 = vand.u32 2147483647, %v2854_v27 }
 0x917   :  { %v2818_v40 = vsub.f32 1.0, %v2817_v53  ;;  %vm2842_vm5 = vmor %vm2840_vm3, %vm2841_vm1  ;;  %v2847_v53 = vor.u32 1.1754944e-38, %v2846_v13 }
 0x918   :  { %v2837_v57 = vsub.f32 1.0, %v2836_v32  ;;  %vm2865_vm11 = vcmp.eq.f32.partialorder %v2864_v48, 8.507059e+37 }
 0x919   :  { %v2819_v47 = vmul.f32 %v3841_v49, %v2818_v40 }
 0x91a   :  { %v2838_v59 = vmul.f32 %v3843_v1, %v2837_v57 }
 0x91b   :  { %v3845_v0 = vpop.eup %3844  ;;  %v2820_v54 = vadd.f32 %v3841_v49, %v2819_v47 }
 0x91c   :  { %v2839_v34 = vadd.f32 %v3843_v1, %v2838_v59  ;;  %v2856_v61 = vmul.f32 %v3845_v0, %v2854_v27  ;;  %v3847_v46 = vpop.eup %3846  ;;  %vm2861_vm8 = vweird.f32 %v3845_v0  ;;  %v2866_v59 = vand.u32 2147483648, %v2854_v27 }
 0x91d   :  { %v2824_v32 = vsel %vm2823_vm4, %v3841_v49, %v2820_v54  ;;  %vm2862_vm10 = vmor %vm2860_vm9, %vm2861_vm8 }
 0x91e   :  { %v2829_v62 = vsel %vm2826_vm6, %v2828_v50, %v2824_v32  ;;  %v2843_v40 = vsel %vm2842_vm5, %v3843_v1, %v2839_v34  ;;  %v2857_v28 = vsub.f32 1.0, %v2856_v61  ;;  %v2867_v13 = vor.u32 1.1754944e-38, %v2866_v59 }
 0x91f   :  { %v2848_v57 = vsel %vm2845_vm7, %v2847_v53, %v2843_v40  ;;  %v2871_v18 = vmul.f32 %v3847_v46, %v2829_v62  ;;  %v7176_v40 = vld [vmem:[#allocation29_spill] sm:$0xff] }
 0x920   :  { %v2870_v42 = vmul.f32 %v2848_v57, %v6165_v52  ;;  %v2858_v47 = vmul.f32 %v3845_v0, %v2857_v28  ;;  %v6259_v52 = vld [vmem:[%s6419_s7] ss:$0 sm:$0xff]  ;;  %v7175_v28 = vld [vmem:[#allocation78_spill] sm:$0xff] }
 0x921   :  { %v7177_v57 = vld [vmem:[#allocation31_spill] sm:$0xff] }
 0x922   :  { %v6249_v51 = vadd.f32 %v2871_v18, %v2870_v42  ;;  %v2859_v41 = vadd.f32 %v3845_v0, %v2858_v47  ;;  %v7174_v18 = vld [vmem:[#allocation30_spill] sm:$0xff]  ;;  %v2015_v47 = vadd.f32 %v7177_v57, %v7176_v40 }
 0x924   :  { %3848 = vtanh.f32 %v6249_v51  ;;  %v2863_v49 = vsel %vm2862_vm10, %v3845_v0, %v2859_v41  ;;  %v2056_v0 = vadd.f32 %v7175_v28, %v7174_v18 }
 0x925   :  { %v2868_v1 = vsel %vm2865_vm11, %v2867_v13, %v2863_v49 }
 0x92a   :  { %v3849_v35 = vpop.eup %3848 }
 0x92b   :  { %v6252_v37 = vmul.f32 %v3849_v35, %v2868_v1 }
 0x92d   :  { %2900 = vmatmul.f32.vlgmr.msrb.gmra.mxu0 %v6252_v37  ;;  %2920 = vmatmul.f32.vlgmr.msrb.gmra.mxu1 %v6252_v37  ;;  %v3362_v42 = vmul.f32 %v6259_v52, %v6252_v37 }
 0x92e   :  { %2940 = vmatmul.f32.vlgmr.msrb.gmra.mxu2 %v6252_v37  ;;  %2960 = vmatmul.f32.vlgmr.msrb.gmra.mxu3 %v6252_v37 }
 0x92f   :  { %3374 = vadd.xlane.f32.xlu2 %v3362_v42  ;;  %3196 = vmatpush.msrb.mxu0 %v5880_v7  ;;  %v7144_v7 = vld [vmem:[#allocation62_spill] sm:$0xff] }
 0x930   :  { %3216 = vmatpush.msrb.mxu1 %v5883_v36  ;;  %3236 = vmatpush.msrb.mxu2 %v5886_v33  ;;  %v7145_v36 = vld [vmem:[#allocation61_spill] sm:$0xff]  ;;  %v7146_v33 = vld [vmem:[#allocation35_spill] sm:$0xff] }
 0x931   :  { %3256 = vmatpush.msrb.mxu3 %v5889_v17  ;;  %3197 = vmatpush.msrb.mxu0 %v5892_v45  ;;  %v7147_v17 = vld [vmem:[#allocation63_spill] sm:$0xff]  ;;  %v7148_v45 = vld [vmem:[#allocation64_spill] sm:$0xff] }
 0x932   :  { %3217 = vmatpush.msrb.mxu1 %v5895_v58  ;;  %3237 = vmatpush.msrb.mxu2 %v5898_v6  ;;  %v7149_v58 = vld [vmem:[#allocation65_spill] sm:$0xff]  ;;  %v7150_v6 = vld [vmem:[#allocation39_spill] sm:$0xff] }
 0x933   :  { %3257 = vmatpush.msrb.mxu3 %v5901_v56  ;;  %3198 = vmatpush.msrb.mxu0 %v5904_v38  ;;  %v7151_v56 = vld [vmem:[#allocation68_spill] sm:$0xff]  ;;  %v7152_v38 = vld [vmem:[#allocation34_spill] sm:$0xff] }
 0x934   :  { %3218 = vmatpush.msrb.mxu1 %v5907_v5  ;;  %3238 = vmatpush.msrb.mxu2 %v5910_v24  ;;  %v7153_v5 = vld [vmem:[#allocation33_spill] sm:$0xff]  ;;  %v7154_v24 = vld [vmem:[#allocation43_spill] sm:$0xff] }
 0x935   :  { %3258 = vmatpush.msrb.mxu3 %v5913_v8  ;;  %3199 = vmatpush.msrb.mxu0 %v5916_v39  ;;  %v7155_v8 = vld [vmem:[#allocation36_spill] sm:$0xff]  ;;  %v7156_v39 = vld [vmem:[#allocation38_spill] sm:$0xff] }
 0x936   :  { %3219 = vmatpush.msrb.mxu1 %v5919_v14  ;;  %3239 = vmatpush.msrb.mxu2 %v5922_v16  ;;  %v7157_v14 = vld [vmem:[#allocation37_spill] sm:$0xff]  ;;  %v7158_v16 = vld [vmem:[#allocation46_spill] sm:$0xff] }
 0x937   :  { %3259 = vmatpush.msrb.mxu3 %v5925_v60  ;;  %3200 = vmatpush.msrb.mxu0 %v5928_v29  ;;  %v7159_v60 = vld [vmem:[#allocation41_spill] sm:$0xff]  ;;  %v7160_v29 = vld [vmem:[#allocation40_spill] sm:$0xff] }
 0x938   :  { %3220 = vmatpush.msrb.mxu1 %v5931_v31  ;;  %3240 = vmatpush.msrb.mxu2 %v5934_v44  ;;  %v7161_v31 = vld [vmem:[#allocation42_spill] sm:$0xff]  ;;  %v7162_v44 = vld [vmem:[#allocation49_spill] sm:$0xff] }
 0x939   :  { %3260 = vmatpush.msrb.mxu3 %v5937_v11  ;;  %3201 = vmatpush.msrb.mxu0 %v5940_v20  ;;  %v7163_v11 = vld [vmem:[#allocation47_spill] sm:$0xff]  ;;  %v7164_v20 = vld [vmem:[#allocation44_spill] sm:$0xff] }
 0x93a   :  { %3221 = vmatpush.msrb.mxu1 %v5943_v15  ;;  %3241 = vmatpush.msrb.mxu2 %v5946_v10  ;;  %v7165_v15 = vld [vmem:[#allocation45_spill] sm:$0xff]  ;;  %v7166_v10 = vld [vmem:[#allocation50_spill] sm:$0xff] }
 0x93b   :  { %3261 = vmatpush.msrb.mxu3 %v5949_v2  ;;  %3202 = vmatpush.msrb.mxu0 %v5952_v22  ;;  %v7167_v2 = vld [vmem:[#allocation48_spill] sm:$0xff]  ;;  %v7168_v22 = vld [vmem:[#allocation51_spill] sm:$0xff] }
 0x93c   :  { %3222 = vmatpush.msrb.mxu1 %v5955_v12  ;;  %3242 = vmatpush.msrb.mxu2 %v5958_v26  ;;  %v7169_v12 = vld [vmem:[#allocation52_spill] sm:$0xff]  ;;  %v7170_v26 = vld [vmem:[#allocation79_spill] sm:$0xff] }
 0x93d   :  { %3262 = vmatpush.msrb.mxu3 %v5961_v4  ;;  %3203 = vmatpush.msrb.mxu0 %v5964_v25  ;;  %v7171_v4 = vld [vmem:[#allocation70_spill] sm:$0xff] }
 0x93e   :  { %3223 = vmatpush.msrb.mxu1 %v5967_v43  ;;  %3243 = vmatpush.msrb.mxu2 %v5970_v23  ;;  %v1933_v25 = vadd.f32 %v7171_v4, %v7170_v26  ;;  %v7172_v43 = vld [vmem:[#allocation81_spill] sm:$0xff]  ;;  %v7173_v23 = vld [vmem:[#allocation71_spill] sm:$0xff] }
 0x93f   :  { %3263 = vmatpush.msrb.mxu3 %v5973_v19  ;;  %3204 = vmatpush.msrb.mxu0 %v5976_v9  ;;  %v1974_v19 = vadd.f32 %v7173_v23, %v7172_v43 }
 0x940   :  { %3224 = vmatpush.msrb.mxu1 %v5979_v30  ;;  %3244 = vmatpush.msrb.mxu2 %v5982_v21 }
 0x941   :  { %3264 = vmatpush.msrb.mxu3 %v5985_v55  ;;  %3205 = vmatpush.msrb.mxu0 %v5988_v3 }
 0x942   :  { %3225 = vmatpush.msrb.mxu1 %v7109_v63  ;;  %3245 = vmatpush.msrb.mxu2 %v7144_v7 }
 0x943   :  { %3265 = vmatpush.msrb.mxu3 %v7145_v36  ;;  %3206 = vmatpush.msrb.mxu0 %v7146_v33 }
 0x944   :  { %3226 = vmatpush.msrb.mxu1 %v7147_v17  ;;  %3246 = vmatpush.msrb.mxu2 %v7148_v45 }
 0x945   :  { %3266 = vmatpush.msrb.mxu3 %v7149_v58  ;;  %3207 = vmatpush.msrb.mxu0 %v7150_v6 }
 0x946   :  { %3227 = vmatpush.msrb.mxu1 %v7151_v56  ;;  %3247 = vmatpush.msrb.mxu2 %v7152_v38 }
 0x947   :  { %3267 = vmatpush.msrb.mxu3 %v7153_v5  ;;  %3208 = vmatpush.msrb.mxu0 %v7154_v24 }
 0x948   :  { %3228 = vmatpush.msrb.mxu1 %v7155_v8  ;;  %3248 = vmatpush.msrb.mxu2 %v7156_v39 }
 0x949   :  { %3268 = vmatpush.msrb.mxu3 %v7157_v14  ;;  %3209 = vmatpush.msrb.mxu0 %v7158_v16 }
 0x94a   :  { %3229 = vmatpush.msrb.mxu1 %v7159_v60  ;;  %3249 = vmatpush.msrb.mxu2 %v7160_v29 }
 0x94b   :  { %3269 = vmatpush.msrb.mxu3 %v7161_v31  ;;  %3210 = vmatpush.msrb.mxu0 %v7162_v44 }
 0x94c   :  { %3230 = vmatpush.msrb.mxu1 %v7163_v11  ;;  %3250 = vmatpush.msrb.mxu2 %v7164_v20 }
 0x94d   :  { %3270 = vmatpush.msrb.mxu3 %v7165_v15  ;;  %3211 = vmatpush.msrb.mxu0 %v7166_v10 }
 0x94e   :  { %3231 = vmatpush.msrb.mxu1 %v7167_v2  ;;  %3251 = vmatpush.msrb.mxu2 %v7168_v22 }
 0x94f   :  { %3271 = vmatpush.msrb.mxu3 %v7169_v12 }
 0x9aa   :  { %v2901_v9 = vpop.f32.mrf.mxu0  ;;  %v2921_v30 = vpop.f32.mrf.mxu1 }
 0x9ab   :  { %v2964_v21 = vadd.f32 %v2901_v9, %v1933_v25  ;;  %v2965_v55 = vadd.f32 %v2921_v30, %v1974_v19  ;;  %v7178_v9 = vld [vmem:[#allocation83_spill] sm:$0xff] }
 0x9ac   :  { %v1936_v30 = vadd.f32 %v7178_v9, %v7170_v26 }
 0x9ad   :  { %v3613_v3 = vmul.f32 -1.442695, %v2964_v21  ;;  %v3614_v63 = vmul.f32 -1.442695, %v2965_v55  ;;  %v7179_v21 = vld [vmem:[#allocation26_spill] sm:$0xff] }
 0x9ae   :  { %v1977_v55 = vadd.f32 %v7179_v21, %v7172_v43 }
 0x9af   :  { %3850 = vpow2.f32 %v3613_v3 }
 0x9b0   :  { %3852 = vpow2.f32 %v3614_v63 }
 0x9b1   :  { %v2961_v62 = vpop.f32.mrf.mxu3  ;;  %v2941_v32 = vpop.f32.mrf.mxu2 }
 0x9b2   :  { %v2967_v27 = vadd.f32 %v2961_v62, %v2056_v0  ;;  %v2966_v48 = vadd.f32 %v2941_v32, %v2015_v47 }
 0x9b4   :  { %v3615_v54 = vmul.f32 -1.442695, %v2967_v27 }
 0x9b5   :  { %v3851_v50 = vpop.eup %3850 }
 0x9b6   :  { %v3853_v34 = vpop.eup %3852  ;;  %v2971_v61 = vadd.f32 1.0, %v3851_v50  ;;  %3854 = vpow2.f32 %v3615_v54  ;;  %v7180_v54 = vld [vmem:[#allocation57_spill] sm:$0xff] }
 0x9b7   :  { %v2990_v53 = vadd.f32 1.0, %v3853_v34  ;;  %v2059_v50 = vadd.f32 %v7180_v54, %v7174_v18 }
 0x9b8   :  { %3856 = vrcp.f32 %v2971_v61  ;;  %v2983_v7 = vand.u32 2147483648, %v2971_v61  ;;  %v2981_v17 = vand.u32 2147483647, %v2971_v61  ;;  %vm2977_vm14 = vweird.f32 %v2971_v61 }
 0x9b9   :  { %3858 = vrcp.f32 %v2990_v53  ;;  %v3002_v36 = vand.u32 2147483648, %v2990_v53  ;;  %v3000_v58 = vand.u32 2147483647, %v2990_v53  ;;  %vm2996_vm15 = vweird.f32 %v2990_v53 }
 0x9ba   :  { %v2984_v38 = vor.u32 1.1754944e-38, %v2983_v7  ;;  %vm2982_vm2 = vcmp.eq.f32.partialorder %v2981_v17, 8.507059e+37 }
 0x9bb   :  { %v3003_v8 = vor.u32 1.1754944e-38, %v3002_v36  ;;  %vm3001_vm3 = vcmp.eq.f32.partialorder %v3000_v58, 8.507059e+37 }
 0x9bc   :  { %v3855_v46 = vpop.eup %3854 }
 0x9bd   :  { %v3010_v41 = vadd.f32 1.0, %v3855_v46 }
 0x9be   :  { %v3857_v59 = vpop.eup %3856 }
 0x9bf   :  { %v3859_v49 = vpop.eup %3858  ;;  %v2973_v13 = vmul.f32 %v3857_v59, %v2971_v61  ;;  %3860 = vrcp.f32 %v3010_v41  ;;  %vm2978_vm12 = vweird.f32 %v3857_v59  ;;  %v3022_v2 = vand.u32 2147483648, %v3010_v41 }
 0x9c0   :  { %v2992_v35 = vmul.f32 %v3859_v49, %v2990_v53  ;;  %3862 = vtanh.f32 %v2966_v48  ;;  %vm2997_vm13 = vweird.f32 %v3859_v49  ;;  %vm2979_vm0 = vmor %vm2977_vm14, %vm2978_vm12  ;;  %vm3016_vm5 = vweird.f32 %v3010_v41  ;;  %v7181_v48 = vld [vmem:[#allocation25_spill] sm:$0xff] }
 0x9c1   :  { %v2974_v1 = vsub.f32 1.0, %v2973_v13  ;;  %vm2998_vm1 = vmor %vm2996_vm15, %vm2997_vm13  ;;  %v3020_v22 = vand.u32 2147483647, %v3010_v41  ;;  %v3023_v4 = vor.u32 1.1754944e-38, %v3022_v2 }
 0x9c2   :  { %v2993_v42 = vsub.f32 1.0, %v2992_v35 }
 0x9c3   :  { %v2975_v33 = vmul.f32 %v3857_v59, %v2974_v1  ;;  %vm3021_vm7 = vcmp.eq.f32.partialorder %v3020_v22, 8.507059e+37 }
 0x9c4   :  { %v2994_v45 = vmul.f32 %v3859_v49, %v2993_v42 }
 0x9c5   :  { %v3861_v6 = vpop.eup %3860  ;;  %v2976_v56 = vadd.f32 %v3857_v59, %v2975_v33 }
 0x9c6   :  { %v2995_v5 = vadd.f32 %v3859_v49, %v2994_v45  ;;  %v3012_v24 = vmul.f32 %v3861_v6, %v3010_v41  ;;  %v3863_v14 = vpop.eup %3862  ;;  %vm3017_vm4 = vweird.f32 %v3861_v6 }
 0x9c7   :  { %v2980_v39 = vsel %vm2979_vm0, %v3857_v59, %v2976_v56  ;;  %vm3018_vm6 = vmor %vm3016_vm5, %vm3017_vm4 }
 0x9c8   :  { %v2985_v16 = vsel %vm2982_vm2, %v2984_v38, %v2980_v39  ;;  %v2999_v60 = vsel %vm2998_vm1, %v3859_v49, %v2995_v5  ;;  %v3013_v29 = vsub.f32 1.0, %v3012_v24  ;;  %v2018_v49 = vadd.f32 %v7181_v48, %v7176_v40 }
 0x9c9   :  { %v3004_v31 = vsel %vm3001_vm3, %v3003_v8, %v2999_v60  ;;  %v3027_v44 = vmul.f32 %v3863_v14, %v2985_v16 }
 0x9ca   :  { %v3026_v11 = vmul.f32 %v3004_v31, %v6249_v51  ;;  %v3014_v20 = vmul.f32 %v3861_v6, %v3013_v29 }
 0x9cc   :  { %v6338_v15 = vadd.f32 %v3027_v44, %v3026_v11  ;;  %v3015_v10 = vadd.f32 %v3861_v6, %v3014_v20 }
 0x9ce   :  { %3864 = vtanh.f32 %v6338_v15  ;;  %v3019_v12 = vsel %vm3018_vm6, %v3861_v6, %v3015_v10 }
 0x9cf   :  { %v3024_v23 = vsel %vm3021_vm7, %v3023_v4, %v3019_v12 }
 0x9d4   :  { %v3865_v25 = vpop.eup %3864 }
 0x9d5   :  { %v6341_v19 = vmul.f32 %v3865_v25, %v3024_v23 }
 0x9d7   :  { %3056 = vmatmul.f32.vlgmr.msra.gmra.mxu0 %v6341_v19  ;;  %3076 = vmatmul.f32.vlgmr.msra.gmra.mxu1 %v6341_v19  ;;  %v3363_v51 = vmul.f32 %v6259_v52, %v6341_v19 }
 0x9d8   :  { %3096 = vmatmul.f32.vlgmr.msra.gmra.mxu2 %v6341_v19  ;;  %3116 = vmatmul.f32.vlgmr.msra.gmra.mxu3 %v6341_v19 }
 0x9d9   :  { %3376 = vadd.xlane.f32.xlu2 %v3363_v51 }
 0xa54   :  { %v3057_v3 = vpop.f32.mrf.mxu0  ;;  %v3077_v63 = vpop.f32.mrf.mxu1 }
 0xa55   :  { %v3120_v28 = vadd.f32 %v3057_v3, %v1936_v30  ;;  %v3121_v0 = vadd.f32 %v3077_v63, %v1977_v55  ;;  %v7182_v63 = vld [vmem:[#allocation74_spill] sm:$0xff] }
 0xa57   :  { %v3616_v62 = vmul.f32 -1.442695, %v3120_v28  ;;  %v3617_v27 = vmul.f32 -1.442695, %v3121_v0  ;;  %v1939_v28 = vadd.f32 %v7182_v63, %v7170_v26  ;;  %v7183_v0 = vld [vmem:[#allocation75_spill] sm:$0xff] }
 0xa59   :  { %3866 = vpow2.f32 %v3616_v62  ;;  %v1980_v62 = vadd.f32 %v7183_v0, %v7172_v43 }
 0xa5a   :  { %3868 = vpow2.f32 %v3617_v27 }
 0xa5b   :  { %v3117_v34 = vpop.f32.mrf.mxu3  ;;  %v3097_v41 = vpop.f32.mrf.mxu2 }
 0xa5c   :  { %v3123_v61 = vadd.f32 %v3117_v34, %v2059_v50  ;;  %v3122_v1 = vadd.f32 %v3097_v41, %v2018_v49 }
 0xa5e   :  { %v3618_v53 = vmul.f32 -1.442695, %v3123_v61 }
 0xa5f   :  { %v3867_v32 = vpop.eup %3866 }
 0xa60   :  { %v3869_v46 = vpop.eup %3868  ;;  %v3127_v57 = vadd.f32 1.0, %v3867_v32  ;;  %3870 = vpow2.f32 %v3618_v53  ;;  %v7184_v32 = vld [vmem:[#allocation27_spill] sm:$0xff] }
 0xa61   :  { %v3146_v47 = vadd.f32 1.0, %v3869_v46  ;;  %v2062_v46 = vadd.f32 %v7184_v32, %v7174_v18 }
 0xa62   :  { %3872 = vrcp.f32 %v3127_v57  ;;  %v3139_v45 = vand.u32 2147483648, %v3127_v57  ;;  %v3137_v56 = vand.u32 2147483647, %v3127_v57  ;;  %vm3133_vm10 = vweird.f32 %v3127_v57 }
 0xa63   :  { %3874 = vrcp.f32 %v3146_v47  ;;  %v3158_v58 = vand.u32 2147483648, %v3146_v47  ;;  %v3156_v5 = vand.u32 2147483647, %v3146_v47  ;;  %vm3152_vm11 = vweird.f32 %v3146_v47 }
 0xa64   :  { %v3140_v39 = vor.u32 1.1754944e-38, %v3139_v45  ;;  %vm3138_vm14 = vcmp.eq.f32.partialorder %v3137_v56, 8.507059e+37 }
 0xa65   :  { %v3159_v60 = vor.u32 1.1754944e-38, %v3158_v58  ;;  %vm3157_vm15 = vcmp.eq.f32.partialorder %v3156_v5, 8.507059e+37 }
 0xa66   :  { %v3871_v59 = vpop.eup %3870 }
 0xa67   :  { %v3166_v13 = vadd.f32 1.0, %v3871_v59 }
 0xa68   :  { %v3873_v35 = vpop.eup %3872 }
 0xa69   :  { %v3875_v42 = vpop.eup %3874  ;;  %v3129_v7 = vmul.f32 %v3873_v35, %v3127_v57  ;;  %3876 = vrcp.f32 %v3166_v13  ;;  %vm3134_vm8 = vweird.f32 %v3873_v35  ;;  %v3178_v23 = vand.u32 2147483648, %v3166_v13 }
 0xa6a   :  { %v3148_v36 = vmul.f32 %v3875_v42, %v3146_v47  ;;  %3878 = vtanh.f32 %v3122_v1  ;;  %vm3153_vm9 = vweird.f32 %v3875_v42  ;;  %vm3135_vm12 = vmor %vm3133_vm10, %vm3134_vm8  ;;  %vm3172_vm1 = vweird.f32 %v3166_v13 }
 0xa6b   :  { %v3130_v33 = vsub.f32 1.0, %v3129_v7  ;;  %vm3154_vm13 = vmor %vm3152_vm11, %vm3153_vm9  ;;  %v3176_v51 = vand.u32 2147483647, %v3166_v13  ;;  %v3179_v30 = vor.u32 1.1754944e-38, %v3178_v23 }
 0xa6c   :  { %v3149_v17 = vsub.f32 1.0, %v3148_v36 }
 0xa6d   :  { %v3131_v6 = vmul.f32 %v3873_v35, %v3130_v33  ;;  %vm3177_vm3 = vcmp.eq.f32.partialorder %v3176_v51, 8.507059e+37 }
 0xa6e   :  { %v3150_v38 = vmul.f32 %v3875_v42, %v3149_v17 }
 0xa6f   :  { %v3877_v24 = vpop.eup %3876  ;;  %v3132_v8 = vadd.f32 %v3873_v35, %v3131_v6 }
 0xa70   :  { %v3151_v14 = vadd.f32 %v3875_v42, %v3150_v38  ;;  %v3168_v16 = vmul.f32 %v3877_v24, %v3166_v13  ;;  %v3879_v31 = vpop.eup %3878  ;;  %vm3173_vm0 = vweird.f32 %v3877_v24 }
 0xa71   :  { %v3136_v29 = vsel %vm3135_vm12, %v3873_v35, %v3132_v8  ;;  %vm3174_vm2 = vmor %vm3172_vm1, %vm3173_vm0  ;;  %v7185_v35 = vld [vmem:[#allocation28_spill] sm:$0xff]  ;;  %vm3394_vm0 = vcmask 7168  }
 0xa72   :  { %v3141_v44 = vsel %vm3138_vm14, %v3140_v39, %v3136_v29  ;;  %v3155_v11 = vsel %vm3154_vm13, %v3875_v42, %v3151_v14  ;;  %v3169_v20 = vsub.f32 1.0, %v3168_v16  ;;  %v2021_v1 = vadd.f32 %v7185_v35, %v7176_v40 }
 0xa73   :  { %v3160_v10 = vsel %vm3157_vm15, %v3159_v60, %v3155_v11  ;;  %v3183_v2 = vmul.f32 %v3879_v31, %v3141_v44 }
 0xa74   :  { %v3182_v22 = vmul.f32 %v3160_v10, %v6338_v15  ;;  %v3170_v12 = vmul.f32 %v3877_v24, %v3169_v20 }
 0xa76   :  { %v6358_v4 = vadd.f32 %v3183_v2, %v3182_v22  ;;  %v3171_v25 = vadd.f32 %v3877_v24, %v3170_v12 }
 0xa78   :  { %3880 = vtanh.f32 %v6358_v4  ;;  %v3175_v9 = vsel %vm3174_vm2, %v3877_v24, %v3171_v25 }
 0xa79   :  { %v3180_v55 = vsel %vm3177_vm3, %v3179_v30, %v3175_v9 }
 0xa7e   :  { %v3881_v21 = vpop.eup %3880 }
 0xa7f   :  { %v6361_v3 = vmul.f32 %v3881_v21, %v3180_v55 }
 0xa81   :  { %3212 = vmatmul.f32.vlgmr.msrb.gmra.mxu0 %v6361_v3  ;;  %3232 = vmatmul.f32.vlgmr.msrb.gmra.mxu1 %v6361_v3  ;;  %v3364_v15 = vmul.f32 %v6259_v52, %v6361_v3 }
 0xa82   :  { %3252 = vmatmul.f32.vlgmr.msrb.gmra.mxu2 %v6361_v3  ;;  %3272 = vmatmul.f32.vlgmr.msrb.gmra.mxu3 %v6361_v3 }
 0xa83   :  { %3378 = vadd.xlane.f32.xlu0 %v3364_v15 }
 0xafe   :  { %v3213_v27 = vpop.f32.mrf.mxu0  ;;  %v3233_v54 = vpop.f32.mrf.mxu1 }
 0xaff   :  { %v3276_v50 = vadd.f32 %v3213_v27, %v1939_v28  ;;  %v3277_v34 = vadd.f32 %v3233_v54, %v1980_v62  ;;  %v3371_v62 = vpop.xlane.xlu1 %3370  ;;  %v3375_v27 = vpop.xlane.xlu2 %3374 }
 0xb01   :  { %v3619_v61 = vmul.f32 -1.442695, %v3276_v50  ;;  %v3620_v53 = vmul.f32 -1.442695, %v3277_v34  ;;  %v4259_v50 = vmov 0  }
 0xb02   :  { %3638 = vset.pattern.permute.xlu1 %v4259_v50  ;;  %3637 = vset.pattern.permute.xlu0 %v4259_v50 }
 0xb03   :  { %3882 = vpow2.f32 %v3619_v61  ;;  %3636 = vset.pattern.permute.xlu2 %v4259_v50 }
 0xb04   :  { %3884 = vpow2.f32 %v3620_v53  ;;  %v3640_v53 = vld [vmem:[#allocation6] ss:$0 sm:$0xff] }
 0xb05   :  { %v3273_v57 = vpop.f32.mrf.mxu3  ;;  %v3253_v43 = vpop.f32.mrf.mxu2 }
 0xb06   :  { %v3279_v47 = vadd.f32 %v3273_v57, %v2062_v46  ;;  %v3278_v36 = vadd.f32 %v3253_v43, %v2021_v1 }
 0xb07   :  { %v3373_v34 = vpop.xlane.xlu1 %3372  ;;  %v3377_v61 = vpop.xlane.xlu2 %3376 }
 0xb08   :  { %v3621_v41 = vmul.f32 -1.442695, %v3279_v47  ;;  %v3391_v46 = vadd.f32 %v3640_v53, %v3377_v61  ;;  %v3390_v47 = vadd.f32 %v3640_v53, %v3375_v27 }
 0xb09   :  { %v3883_v59 = vpop.eup %3882 }
 0xb0a   :  { %v3885_v48 = vpop.eup %3884  ;;  %v3283_v26 = vadd.f32 1.0, %v3883_v59  ;;  %3886 = vpow2.f32 %v3621_v41 }
 0xb0b   :  { %v3302_v49 = vadd.f32 1.0, %v3885_v48  ;;  %v3389_v48 = vadd.f32 %v3640_v53, %v3373_v34 }
 0xb0c   :  { %3888 = vrcp.f32 %v3283_v26  ;;  %v3295_v6 = vand.u32 2147483648, %v3283_v26  ;;  %v3293_v5 = vand.u32 2147483647, %v3283_v26  ;;  %vm3289_vm6 = vweird.f32 %v3283_v26 }
 0xb0d   :  { %3890 = vrcp.f32 %v3302_v49  ;;  %v3314_v56 = vand.u32 2147483648, %v3302_v49  ;;  %v3312_v8 = vand.u32 2147483647, %v3302_v49  ;;  %vm3308_vm7 = vweird.f32 %v3302_v49 }
 0xb0e   :  { %v3296_v14 = vor.u32 1.1754944e-38, %v3295_v6  ;;  %vm3294_vm10 = vcmp.eq.f32.partialorder %v3293_v5, 8.507059e+37 }
 0xb0f   :  { %v3315_v29 = vor.u32 1.1754944e-38, %v3314_v56  ;;  %vm3313_vm11 = vcmp.eq.f32.partialorder %v3312_v8, 8.507059e+37 }
 0xb10   :  { %v3887_v13 = vpop.eup %3886 }
 0xb11   :  { %v3322_v42 = vadd.f32 1.0, %v3887_v13  ;;  %v3399_v13 = vsel %vm3394_vm0, %v3390_v47, -inf }
 0xb12   :  { %v3889_v7 = vpop.eup %3888 }
 0xb13   :  { %v3891_v18 = vpop.eup %3890  ;;  %v3285_v33 = vmul.f32 %v3889_v7, %v3283_v26  ;;  %3892 = vrcp.f32 %v3322_v42  ;;  %vm3290_vm4 = vweird.f32 %v3889_v7  ;;  %v3334_v9 = vand.u32 2147483648, %v3322_v42 }
 0xb14   :  { %v3304_v17 = vmul.f32 %v3891_v18, %v3302_v49  ;;  %3894 = vtanh.f32 %v3278_v36  ;;  %vm3309_vm5 = vweird.f32 %v3891_v18  ;;  %vm3291_vm8 = vmor %vm3289_vm6, %vm3290_vm4  ;;  %vm3328_vm13 = vweird.f32 %v3322_v42 }
 0xb15   :  { %v3286_v45 = vsub.f32 1.0, %v3285_v33  ;;  %vm3310_vm9 = vmor %vm3308_vm7, %vm3309_vm5  ;;  %v3332_v30 = vand.u32 2147483647, %v3322_v42  ;;  %v3335_v55 = vor.u32 1.1754944e-38, %v3334_v9  ;;  %v3401_v26 = vsel %vm3394_vm0, %v3391_v46, -inf }
 0xb16   :  { %v3305_v58 = vsub.f32 1.0, %v3304_v17 }
 0xb17   :  { %v3287_v38 = vmul.f32 %v3889_v7, %v3286_v45  ;;  %vm3333_vm15 = vcmp.eq.f32.partialorder %v3332_v30, 8.507059e+37 }
 0xb18   :  { %v3306_v24 = vmul.f32 %v3891_v18, %v3305_v58 }
 0xb19   :  { %v3893_v39 = vpop.eup %3892  ;;  %v3288_v40 = vadd.f32 %v3889_v7, %v3287_v38 }
 0xb1a   :  { %v3307_v16 = vadd.f32 %v3891_v18, %v3306_v24  ;;  %v3324_v60 = vmul.f32 %v3893_v39, %v3322_v42  ;;  %v3895_v44 = vpop.eup %3894  ;;  %vm3329_vm12 = vweird.f32 %v3893_v39 }
 0xb1b   :  { %v3292_v31 = vsel %vm3291_vm8, %v3889_v7, %v3288_v40  ;;  %vm3330_vm14 = vmor %vm3328_vm13, %vm3329_vm12 }
 0xb1c   :  { %v3297_v11 = vsel %vm3294_vm10, %v3296_v14, %v3292_v31  ;;  %v3311_v20 = vsel %vm3310_vm9, %v3891_v18, %v3307_v16  ;;  %v3325_v10 = vsub.f32 1.0, %v3324_v60  ;;  %v3398_v18 = vsel %vm3394_vm0, %v3389_v48, -inf }
 0xb1d   :  { %v3316_v2 = vsel %vm3313_vm11, %v3315_v29, %v3311_v20  ;;  %v3339_v22 = vmul.f32 %v3895_v44, %v3297_v11 }
 0xb1e   :  { %v3338_v12 = vmul.f32 %v3316_v2, %v6358_v4  ;;  %v3326_v25 = vmul.f32 %v3893_v39, %v3325_v10  ;;  %v3367_v4 = vpop.xlane.xlu0 %3366 }
 0xb1f   :  { %v3386_v59 = vadd.f32 %v3640_v53, %v3367_v4 }
 0xb20   :  { %v3340_v23 = vadd.f32 %v3339_v22, %v3338_v12  ;;  %v3327_v51 = vadd.f32 %v3893_v39, %v3326_v25 }
 0xb21   :  { %v3395_v7 = vsel %vm3394_vm0, %v3386_v59, -inf }
 0xb22   :  { %3896 = vtanh.f32 %v3340_v23  ;;  %v3331_v21 = vsel %vm3330_vm14, %v3893_v39, %v3327_v51  ;;  %v3400_v17 = vmax.f32 %v3395_v7, %v3399_v13  ;;  %v3526_v7 = vld [vmem:[#allocation18 + $0x68] sm:$0xff] }
 0xb23   :  { %v3336_v63 = vsel %vm3333_vm15, %v3335_v55, %v3331_v21 }
 0xb26   :  { %v3369_v54 = vpop.xlane.xlu0 %3368 }
 0xb27   :  { %v3387_v57 = vadd.f32 %v3640_v53, %v3369_v54 }
 0xb28   :  { %v3897_v15 = vpop.eup %3896 }
 0xb29   :  { %v6378_v28 = vmul.f32 %v3897_v15, %v3336_v63  ;;  %v3396_v43 = vsel %vm3394_vm0, %v3387_v57, -inf }
 0xb2a   :  { %v3402_v42 = vmax.f32 %v3396_v43, %v3401_v26 }
 0xb2b   :  { %v3365_v0 = vmul.f32 %v6259_v52, %v6378_v28  ;;  %v3388_v52 = vadd.f32 %v3640_v53, %v3371_v62 }
 0xb2c   :  { %v3407_v6 = vmax.f32 %v3400_v17, %v3402_v42  ;;  %v3527_v42 = vld [vmem:[#allocation18 + $0x70] sm:$0xff]  ;;  %v3522_v17 = vld [vmem:[#allocation18 + $0x48] sm:$0xff] }
 0xb2d   :  { %3380 = vadd.xlane.f32.xlu1 %v3365_v0  ;;  %v3397_v36 = vsel %vm3394_vm0, %v3388_v52, -inf }
 0xb2e   :  { %v3379_v32 = vpop.xlane.xlu0 %3378 }
 0xb2f   :  { %v3392_v41 = vadd.f32 %v3640_v53, %v3379_v32 }
 0xb31   :  { %v3403_v35 = vsel %vm3394_vm0, %v3392_v41, -inf }
 0xb32   :  { %v3404_v45 = vmax.f32 %v3397_v36, %v3403_v35  ;;  %v3525_v36 = vld [vmem:[#allocation18 + $0x60] sm:$0xff] }
 0xba0   :  { %v3381_v49 = vpop.xlane.xlu1 %3380 }
 0xba1   :  { %v3393_v1 = vadd.f32 %v3640_v53, %v3381_v49 }
 0xba3   :  { %v3405_v33 = vsel %vm3394_vm0, %v3393_v1, -inf }
 0xba4   :  { %v3406_v58 = vmax.f32 %v3398_v18, %v3405_v33  ;;  %v3524_v18 = vld [vmem:[#allocation18 + $0x58] sm:$0xff]  ;;  %v3523_v33 = vld [vmem:[#allocation18 + $0x50] sm:$0xff] }
 0xba6   :  { %v3408_v56 = vmax.f32 %v3404_v45, %v3406_v58  ;;  %v3521_v45 = vld [vmem:[#allocation18 + $0x40] sm:$0xff]  ;;  %v3520_v58 = vld [vmem:[#allocation18 + $0x38] sm:$0xff] }
 0xba8   :  { %v3409_v38 = vmax.f32 %v3407_v6, %v3408_v56  ;;  %v3519_v6 = vld [vmem:[#allocation18 + $0x30] sm:$0xff]  ;;  %v3518_v56 = vld [vmem:[#allocation18 + $0x28] sm:$0xff] }
 0xbaa   :  { %v3410_v5 = vsub.f32 %v3386_v59, %v3409_v38  ;;  %v3411_v24 = vsub.f32 %v3387_v57, %v3409_v38  ;;  %v3412_v8 = vsub.f32 %v3388_v52, %v3409_v38  ;;  %v3413_v39 = vsub.f32 %v3389_v48, %v3409_v38 }
 0xbab   :  { %v3414_v40 = vsub.f32 %v3390_v47, %v3409_v38  ;;  %v3415_v29 = vsub.f32 %v3391_v46, %v3409_v38  ;;  %v3416_v44 = vsub.f32 %v3392_v41, %v3409_v38  ;;  %v3417_v20 = vsub.f32 %v3393_v1, %v3409_v38  ;;  %v3528_v1 = vld [vmem:[#allocation18 + $0x78] sm:$0xff]  ;;  %v3517_v38 = vld [vmem:[#allocation18 + $0x20] sm:$0xff] }
 0xbac   :  { %v3418_v14 = vmul.f32 1.442695, %v3410_v5  ;;  %v3420_v16 = vmul.f32 1.442695, %v3411_v24  ;;  %v3422_v60 = vmul.f32 1.442695, %v3412_v8  ;;  %3533 = vmatpush.msra.mxu0 %v3528_v1 }
 0xbad   :  { %v3424_v31 = vmul.f32 1.442695, %v3413_v39  ;;  %v3426_v11 = vmul.f32 1.442695, %v3414_v40  ;;  %v3428_v10 = vmul.f32 1.442695, %v3415_v29 }
 0xbae   :  { %3898 = vpow2.f32 %v3418_v14  ;;  %v3430_v2 = vmul.f32 1.442695, %v3416_v44  ;;  %v3432_v25 = vmul.f32 1.442695, %v3417_v20  ;;  %3534 = vmatpush.msra.mxu0 %v3527_v42  ;;  %v3516_v24 = vld [vmem:[#allocation18 + $0x18] sm:$0xff]  ;;  %v3515_v8 = vld [vmem:[#allocation18 + $0x10] sm:$0xff] }
 0xbaf   :  { %3900 = vpow2.f32 %v3420_v16  ;;  %v3514_v39 = vld [vmem:[#allocation18 + $0x8] sm:$0xff]  ;;  %v3513_v40 = vld [vmem:[#allocation18] sm:$0xff]  ;;  %v7186_v29 = vld [vmem:[#allocation59_spill] sm:$0xff] }
 0xbb0   :  { %3902 = vpow2.f32 %v3422_v60  ;;  %3535 = vmatpush.msra.mxu0 %v3526_v7  ;;  %v7187_v44 = vld [vmem:[#allocation32_spill] sm:$0xff] }
 0xbb1   :  { %3904 = vpow2.f32 %v3424_v31 }
 0xbb2   :  { %3906 = vpow2.f32 %v3426_v11  ;;  %3536 = vmatpush.msra.mxu0 %v3525_v36 }
 0xbb3   :  { %3908 = vpow2.f32 %v3428_v10  ;;  %v7188_v10 = vld [vmem:[#allocation54_spill] sm:$0xff] }
 0xbb4   :  { %v3899_v22 = vpop.eup %3898  ;;  %3910 = vpow2.f32 %v3430_v2  ;;  %3537 = vmatpush.msra.mxu0 %v3524_v18 }
 0xbb5   :  { %v3901_v12 = vpop.eup %3900  ;;  %v3434_v23 = vsel %vm3394_vm0, %v3899_v22, 0.0  ;;  %3912 = vpow2.f32 %v3432_v25 }
 0xbb6   :  { %v3903_v51 = vpop.eup %3902  ;;  %v3435_v9 = vsel %vm3394_vm0, %v3901_v12, 0.0  ;;  %3538 = vmatpush.msra.mxu0 %v3523_v33 }
 0xbb7   :  { %v3905_v30 = vpop.eup %3904  ;;  %v3436_v21 = vadd.f32 %v3435_v9, %v3434_v23  ;;  %v3437_v55 = vsel %vm3394_vm0, %v3903_v51, 0.0 }
 0xbb8   :  { %v3907_v15 = vpop.eup %3906  ;;  %v3439_v0 = vsel %vm3394_vm0, %v3905_v30, 0.0  ;;  %3539 = vmatpush.msra.mxu0 %v3522_v17 }
 0xbb9   :  { %v3438_v63 = vadd.f32 %v3437_v55, %v3436_v21  ;;  %v3909_v4 = vpop.eup %3908  ;;  %v3441_v27 = vsel %vm3394_vm0, %v3907_v15, 0.0 }
 0xbba   :  { %v3911_v54 = vpop.eup %3910  ;;  %v3443_v34 = vsel %vm3394_vm0, %v3909_v4, 0.0  ;;  %3540 = vmatpush.msra.mxu0 %v3521_v45 }
 0xbbb   :  { %v3440_v62 = vadd.f32 %v3439_v0, %v3438_v63  ;;  %v3913_v61 = vpop.eup %3912  ;;  %v3445_v32 = vsel %vm3394_vm0, %v3911_v54, 0.0 }
 0xbbc   :  { %v3447_v57 = vsel %vm3394_vm0, %v3913_v61, 0.0  ;;  %3541 = vmatpush.msra.mxu0 %v3520_v58 }
 0xbbd   :  { %v3442_v50 = vadd.f32 %v3441_v27, %v3440_v62 }
 0xbbe   :  { %3542 = vmatpush.msra.mxu0 %v3519_v6 }
 0xbbf   :  { %v3444_v53 = vadd.f32 %v3443_v34, %v3442_v50  ;;  %v3641_v50 = vld [vmem:[%s6422_s10] ss:$0 sm:$0xff] }
 0xbc0   :  { %3543 = vmatpush.msra.mxu0 %v3518_v56 }
 0xbc1   :  { %v3446_v46 = vadd.f32 %v3445_v32, %v3444_v53 }
 0xbc2   :  { %3544 = vmatpush.msra.mxu0 %v3517_v38 }
 0xbc3   :  { %v3448_v47 = vadd.f32 %v3447_v57, %v3446_v46 }
 0xbc4   :  { %3545 = vmatpush.msra.mxu0 %v3516_v24 }
 0xbc5   :  { %3914 = vrcp.f32 %v3448_v47 }
 0xbc6   :  { %3546 = vmatpush.msra.mxu0 %v3515_v8 }
 0xbc8   :  { %3547 = vmatpush.msra.mxu0 %v3514_v39 }
 0xbca   :  { %3548 = vmatpush.msra.mxu0 %v3513_v40 }
 0xbcb   :  { %v3915_v41 = vpop.eup %3914 }
 0xbcc   :  { %v3452_v59 = vmul.f32 %v3915_v41, %v3903_v51  ;;  %v3451_v52 = vmul.f32 %v3915_v41, %v3901_v12  ;;  %v3450_v48 = vmul.f32 %v3915_v41, %v3899_v22  ;;  %v3455_v26 = vmul.f32 %v3915_v41, %v3909_v4  ;;  %v7189_v12 = vld [vmem:[#allocation56_spill] sm:$0xff] }
 0xbcd   :  { %v3453_v49 = vmul.f32 %v3915_v41, %v3905_v30  ;;  %v3457_v43 = vmul.f32 %v3915_v41, %v3913_v61  ;;  %v3454_v13 = vmul.f32 %v3915_v41, %v3907_v15  ;;  %v3456_v35 = vmul.f32 %v3915_v41, %v3911_v54 }
 0xbce   :  { %3470 = vperm.xlu1 %3638, %v3452_v59   ;;  %3465 = vperm.xlu0 %3637, %v3451_v52  }
 0xbcf   :  { %3460 = vperm.xlu2 %3636, %v3450_v48  }
 0xbd6   :  { %3485 = vperm.xlu1 %3638, %v3455_v26  }
 0xbd7   :  { %3475 = vperm.xlu2 %3636, %v3453_v49  }
 0xbde   :  { %3495 = vperm.xlu1 %3638, %v3457_v43  }
 0xbdf   :  { %3480 = vperm.xlu2 %3636, %v3454_v13  }
 0xbe7   :  { %3490 = vperm.xlu2 %3636, %v3456_v35  }
 0xc29   :  { %v3461_v5 = vpop.permute.xlu2 %3460 }
 0xc2a   :  { %v3498_v31 = vmul.f32 %v3461_v5, %v7186_v29 }
 0xc31   :  { %v3476_v14 = vpop.permute.xlu2 %3475 }
 0xc32   :  { %v3501_v25 = vmul.f32 %v3476_v14, %v7189_v12 }
 0xc39   :  { %v3481_v20 = vpop.permute.xlu2 %3480 }
 0xc3a   :  { %v3502_v51 = vmul.f32 %v3481_v20, %v6252_v37 }
 0xc40   :  { %v3471_v16 = vpop.permute.xlu1 %3470  ;;  %v3466_v60 = vpop.permute.xlu0 %3465 }
 0xc41   :  { %v3499_v11 = vmul.f32 %v3466_v60, %v7187_v44  ;;  %v3500_v2 = vmul.f32 %v3471_v16, %v7188_v10  ;;  %v3491_v15 = vpop.permute.xlu2 %3490 }
 0xc42   :  { %v3504_v0 = vmul.f32 %v3491_v15, %v6361_v3 }
 0xc43   :  { %v3506_v22 = vadd.f32 %v3499_v11, %v3498_v31 }
 0xc45   :  { %v3507_v23 = vadd.f32 %v3506_v22, %v3500_v2 }
 0xc47   :  { %v3508_v9 = vadd.f32 %v3507_v23, %v3501_v25 }
 0xc48   :  { %v3486_v30 = vpop.permute.xlu1 %3485 }
 0xc49   :  { %v3503_v21 = vmul.f32 %v3486_v30, %v6341_v19  ;;  %v3509_v55 = vadd.f32 %v3508_v9, %v3502_v51 }
 0xc4b   :  { %v3510_v63 = vadd.f32 %v3509_v55, %v3503_v21 }
 0xc4d   :  { %v3511_v27 = vadd.f32 %v3510_v63, %v3504_v0 }
 0xc50   :  { %v3496_v4 = vpop.permute.xlu1 %3495 }
 0xc51   :  { %v3505_v62 = vmul.f32 %v3496_v4, %v6378_v28 }
 0xc53   :  { %v3512_v54 = vadd.f32 %v3511_v27, %v3505_v62 }
 0xc55   :  { %3549 = vmatmul.f32.vlgmr.msra.gmra.mxu0 %v3512_v54 }
 0xcd2   :  { %v3550_v37 = vpop.f32.mrf.mxu0 }
 0xcd3   :  { %v3551_v19 = vadd.f32 %v3641_v50, %v3550_v37 }
 0xcd5   :  { %3553 = vst [vmem:[#allocation19] sm:$0xff] %v3551_v19 }
 0xcd6   :  { %3564 = dma.vmem_to_hbm [thread:$0]  %s3560_s16, 128, %s3562_s19, [#allocation9]  }
 0xcd7   :  { %4245 = dma.done.wait [#allocation9], 128  }
 0xcd8   :  { %4246 = vsyncadd [#allocation9], 4294967168 }
 0xcd9   :  { %3569 = vsyncpa [#allocation8], 1 }
 0xcda   :  { %3570 = vsyncpa [#allocation11], 1 }
 0xcdb   :  { %3571 = vsyncpa [#allocation14], 1 }
 0xcdc   :  { %3572 = vsyncpa [#allocation17], 1 }
 0xcdd   :  { %3573 = vsyncpa [#allocation9], 1 }

</bundles_post_ra>
